<compile_context>
chip_gen: v6e
topology: v6e:2x2x1
jax: 0.10.0
libtpu: 0.0.40
codegen_flags: <defaults>
</compile_context>

<pallas_src>
import functools

import jax
import jax.numpy as jnp
from jax import lax
from jax.experimental import pallas as pl
from jax.experimental.pallas import tpu as pltpu

_BN_EPS = 1e-5
_VMEM_LIMIT = 32 * 1024 * 1024


# ----------------------------------------------------------------------------
# glue: SNGP-style soft spectral normalization of conv weights
# ----------------------------------------------------------------------------
def _spectral_normalize(w, norm_bound, n_power_iterations, key):
    cout = w.shape[0]
    w_mat = w.reshape(cout, -1)
    u = jax.random.normal(key, (cout,), jnp.float32)
    u = u / (jnp.linalg.norm(u) + 1e-12)
    v = w_mat.T @ u
    v = v / (jnp.linalg.norm(v) + 1e-12)
    for _ in range(n_power_iterations):
        v = w_mat.T @ u
        v = v / (jnp.linalg.norm(v) + 1e-12)
        u = w_mat @ v
        u = u / (jnp.linalg.norm(u) + 1e-12)
    sigma = u @ (w_mat @ v)
    return w / jnp.maximum(1.0, sigma / norm_bound)


# ----------------------------------------------------------------------------
# kernel 1: conv1 (3x3, pad=1) + optional 1x1 shortcut conv, + BN statistics
# ----------------------------------------------------------------------------
def _conv1_kernel(*refs, H, W, Cin, C, has_projection):
    if has_projection:
        (x_ref, w1_ref, ws_ref,
         y1_ref, s1_ref, sc_ref, ss_ref,
         xpad, pat) = refs
    else:
        (x_ref, w1_ref, y1_ref, s1_ref, xpad, pat) = refs

    x_img = x_ref[0]                                       # (H, W, Cin) f32

    # 1-px halo in a per-image VMEM scratch: zero ONLY the 4 halo strips,
    # the interior is fully overwritten every grid step (megacore-safe).
    xpad[0:1, :, :] = jnp.zeros((1, W + 2, Cin), jnp.float32)
    xpad[H + 1:H + 2, :, :] = jnp.zeros((1, W + 2, Cin), jnp.float32)
    xpad[:, 0:1, :] = jnp.zeros((H + 2, 1, Cin), jnp.float32)
    xpad[:, W + 1:W + 2, :] = jnp.zeros((H + 2, 1, Cin), jnp.float32)
    xpad[1:H + 1, 1:W + 1, :] = x_img

    # im2col: fuse the 9 taps into one (H*W, 9*Cin) bf16 patch matrix.
    for k in range(9):
        dh, dw = k // 3, k % 3
        pat[:, :, k * Cin:(k + 1) * Cin] = (
            xpad[dh:dh + H, dw:dw + W, :].astype(jnp.bfloat16))
    p = pat[...].reshape(H * W, 9 * Cin)

    # conv1 as a single MXU matmul (bf16 operands, f32 accumulation).
    y1 = lax.dot_general(p, w1_ref[...], (((1,), (1,)), ((), ())),
                         preferred_element_type=jnp.float32)   # (H*W, C)
    y1_ref[0] = y1
    # single-pass BN statistics for bn1 (sum, sum of squares).
    s1_ref[0, 0:1, :] = jnp.sum(y1, axis=0, keepdims=True)
    s1_ref[0, 1:2, :] = jnp.sum(y1 * y1, axis=0, keepdims=True)

    if has_projection:
        xb = x_img.reshape(H * W, Cin).astype(jnp.bfloat16)
        # channel-major output (C, H*W): lane-dense stores.
        sc = lax.dot_general(ws_ref[...], xb, (((1,), (1,)), ((), ())),
                             preferred_element_type=jnp.float32)
        sc_ref[0] = sc
        ss_ref[0, :, 0:1] = jnp.sum(sc, axis=1, keepdims=True)
        ss_ref[0, :, 1:2] = jnp.sum(sc * sc, axis=1, keepdims=True)


# ----------------------------------------------------------------------------
# kernel 2: fused bn1 scale/shift + relu, conv2 (3x3, pad=1), + BN statistics
# ----------------------------------------------------------------------------
def _bn1_conv2_kernel(y1_ref, a1_ref, b1_ref, w2_ref, y2_ref, s2_ref,
                      zpad, pat, *, H, W, C):
    # bn1 folded into one per-channel scale/shift, then relu (f32).
    z = jnp.maximum(y1_ref[0] * a1_ref[...] + b1_ref[...], 0.0)   # (H*W, C)
    zsp = z.reshape(H, W, C)

    zpad[0:1, :, :] = jnp.zeros((1, W + 2, C), jnp.float32)
    zpad[H + 1:H + 2, :, :] = jnp.zeros((1, W + 2, C), jnp.float32)
    zpad[:, 0:1, :] = jnp.zeros((H + 2, 1, C), jnp.float32)
    zpad[:, W + 1:W + 2, :] = jnp.zeros((H + 2, 1, C), jnp.float32)
    zpad[1:H + 1, 1:W + 1, :] = zsp

    for k in range(9):
        dh, dw = k // 3, k % 3
        pat[:, :, k * C:(k + 1) * C] = (
            zpad[dh:dh + H, dw:dw + W, :].astype(jnp.bfloat16))
    p = pat[...].reshape(H * W, 9 * C)

    # conv2 as a single MXU matmul, channel-major (C, H*W) output.
    y2 = lax.dot_general(w2_ref[...], p, (((1,), (1,)), ((), ())),
                         preferred_element_type=jnp.float32)
    y2_ref[0] = y2
    s2_ref[0, :, 0:1] = jnp.sum(y2, axis=1, keepdims=True)
    s2_ref[0, :, 1:2] = jnp.sum(y2 * y2, axis=1, keepdims=True)


# ----------------------------------------------------------------------------
# kernel 3: bn2 (+ shortcut bn) + residual add + relu, channel-major, elementwise
# ----------------------------------------------------------------------------
def _finalize_kernel(*refs, has_projection):
    if has_projection:
        (y2_ref, sc_ref, a2_ref, b2_ref, as_ref, bs_ref, o_ref) = refs
        shortcut = sc_ref[0] * as_ref[...] + bs_ref[...]
    else:
        (y2_ref, sc_ref, a2_ref, b2_ref, o_ref) = refs
        shortcut = sc_ref[0]
    o_ref[0] = jnp.maximum(y2_ref[0] * a2_ref[...] + b2_ref[...] + shortcut,
                           0.0)


# ----------------------------------------------------------------------------
# parameter init (torch layout, f32, spectrally normalized)
# ----------------------------------------------------------------------------
def init_params(key, in_planes, planes, stride=1, norm_bound=1.0,
                n_power_iterations=1):
    if stride != 1:
        # TODO(synk): stride > 1 not implemented in the kernel.
        raise NotImplementedError("stride > 1 not implemented")
    ks = jax.random.split(key, 12)
    w1 = 0.1 * jax.random.normal(ks[0], (planes, in_planes, 3, 3), jnp.float32)
    w2 = 0.1 * jax.random.normal(ks[1], (planes, planes, 3, 3), jnp.float32)
    p = {
        "w1": _spectral_normalize(w1, norm_bound, n_power_iterations, ks[2]),
        "w2": _spectral_normalize(w2, norm_bound, n_power_iterations, ks[3]),
        "g1": 1.0 + 0.1 * jax.random.normal(ks[4], (planes,), jnp.float32),
        "b1": 0.1 * jax.random.normal(ks[5], (planes,), jnp.float32),
        "g2": 1.0 + 0.1 * jax.random.normal(ks[6], (planes,), jnp.float32),
        "b2": 0.1 * jax.random.normal(ks[7], (planes,), jnp.float32),
    }
    if stride != 1 or in_planes != planes:
        ws = 0.1 * jax.random.normal(ks[8], (planes, in_planes, 1, 1),
                                     jnp.float32)
        p["ws"] = _spectral_normalize(ws, norm_bound, n_power_iterations, ks[9])
        p["gs"] = 1.0 + 0.1 * jax.random.normal(ks[10], (planes,), jnp.float32)
        p["bs"] = 0.1 * jax.random.normal(ks[11], (planes,), jnp.float32)
    return p


def _bn_affine(total_sum, total_sumsq, gamma, beta, count):
    mean = total_sum / count
    var = total_sumsq / count - mean * mean        # biased (training-mode) var
    scale = gamma * lax.rsqrt(var + _BN_EPS)
    shift = beta - mean * scale
    return scale, shift


# ----------------------------------------------------------------------------
# wrapper
# ----------------------------------------------------------------------------
@functools.partial(jax.jit, static_argnames=("in_planes", "planes", "stride"))
def spectral_basic_block(x_nchw, params, *, in_planes, planes, stride=1):
    assert stride == 1, "kernel implements stride=1"
    has_projection = (stride != 1) or (in_planes != planes)

    N, Cin, H, W = x_nchw.shape
    assert Cin == in_planes
    HW = H * W
    C = planes

    x_nhwc = jnp.transpose(x_nchw, (0, 2, 3, 1)).astype(jnp.float32)

    # weight prep (glue): im2col layout (Cout, 9*Cin), bf16 for the MXU.
    w1t = jnp.transpose(params["w1"], (0, 2, 3, 1)).reshape(C, 9 * Cin)
    w1t = w1t.astype(jnp.bfloat16)
    w2t = jnp.transpose(params["w2"], (0, 2, 3, 1)).reshape(C, 9 * C)
    w2t = w2t.astype(jnp.bfloat16)

    cparams = pltpu.CompilerParams(
        dimension_semantics=("parallel",), vmem_limit_bytes=_VMEM_LIMIT)

    # ---------------- call 1: conv1 (+ shortcut conv) + statistics ----------
    in_specs1 = [
        pl.BlockSpec((1, H, W, Cin), lambda n: (n, 0, 0, 0)),
        pl.BlockSpec((C, 9 * Cin), lambda n: (0, 0)),
    ]
    args1 = [x_nhwc, w1t]
    out_shape1 = [
        jax.ShapeDtypeStruct((N, HW, C), jnp.float32),     # conv1 raw (rows)
        jax.ShapeDtypeStruct((N, 2, C), jnp.float32),      # bn1 partial stats
    ]
    out_specs1 = [
        pl.BlockSpec((1, HW, C), lambda n: (n, 0, 0)),
        pl.BlockSpec((1, 2, C), lambda n: (n, 0, 0)),
    ]
    flops1 = 2 * N * HW * (9 * Cin) * C
    bytes1 = 4 * (N * HW * Cin + N * HW * C + N * 2 * C) + 2 * C * 9 * Cin
    if has_projection:
        wst = params["ws"][:, :, 0, 0].astype(jnp.bfloat16)        # (C, Cin)
        in_specs1.append(pl.BlockSpec((C, Cin), lambda n: (0, 0)))
        args1.append(wst)
        out_shape1 += [
            jax.ShapeDtypeStruct((N, C, HW), jnp.float32),  # shortcut raw (CM)
            jax.ShapeDtypeStruct((N, C, 2), jnp.float32),   # shortcut bn stats
        ]
        out_specs1 += [
            pl.BlockSpec((1, C, HW), lambda n: (n, 0, 0)),
            pl.BlockSpec((1, C, 2), lambda n: (n, 0, 0)),
        ]
        flops1 += 2 * N * HW * Cin * C
        bytes1 += 4 * (N * HW * C + N * 2 * C) + 2 * C * Cin

    res1 = pl.pallas_call(
        functools.partial(_conv1_kernel, H=H, W=W, Cin=Cin, C=C,
                          has_projection=has_projection),
        grid=(N,),
        in_specs=in_specs1,
        out_shape=tuple(out_shape1),
        out_specs=tuple(out_specs1),
        scratch_shapes=[pltpu.VMEM((H + 2, W + 2, Cin), jnp.float32),
                        pltpu.VMEM((H, W, 9 * Cin), jnp.bfloat16)],
        compiler_params=cparams,
        cost_estimate=pl.CostEstimate(flops=int(flops1), transcendentals=0,
                                      bytes_accessed=int(bytes1)),
    )(*args1)
    if has_projection:
        y1_raw, stats1, sc_raw, stats_sc = res1
    else:
        y1_raw, stats1 = res1

    # glue: reduce per-image partial stats -> fused bn1 scale/shift (tiny).
    count = float(N * HW)
    scale1, shift1 = _bn_affine(jnp.sum(stats1[:, 0, :], axis=0),
                                jnp.sum(stats1[:, 1, :], axis=0),
                                params["g1"], params["b1"], count)
    scale1 = scale1.reshape(1, C)
    shift1 = shift1.reshape(1, C)

    # ---------------- call 2: bn1 + relu + conv2 + statistics ----------------
    flops2 = 2 * N * HW * (9 * C) * C + 4 * N * HW * C
    bytes2 = 4 * (2 * N * HW * C + N * 2 * C) + 2 * C * 9 * C
    y2_raw, stats2 = pl.pallas_call(
        functools.partial(_bn1_conv2_kernel, H=H, W=W, C=C),
        grid=(N,),
        in_specs=[
            pl.BlockSpec((1, HW, C), lambda n: (n, 0, 0)),
            pl.BlockSpec((1, C), lambda n: (0, 0)),
            pl.BlockSpec((1, C), lambda n: (0, 0)),
            pl.BlockSpec((C, 9 * C), lambda n: (0, 0)),
        ],
        out_shape=(jax.ShapeDtypeStruct((N, C, HW), jnp.float32),
                   jax.ShapeDtypeStruct((N, C, 2), jnp.float32)),
        out_specs=(pl.BlockSpec((1, C, HW), lambda n: (n, 0, 0)),
                   pl.BlockSpec((1, C, 2), lambda n: (n, 0, 0))),
        scratch_shapes=[pltpu.VMEM((H + 2, W + 2, C), jnp.float32),
                        pltpu.VMEM((H, W, 9 * C), jnp.bfloat16)],
        compiler_params=cparams,
        cost_estimate=pl.CostEstimate(flops=int(flops2), transcendentals=0,
                                      bytes_accessed=int(bytes2)),
    )(y1_raw, scale1, shift1, w2t)

    # glue: bn2 (and shortcut-bn) fused scale/shift.
    scale2, shift2 = _bn_affine(jnp.sum(stats2[:, :, 0], axis=0),
                                jnp.sum(stats2[:, :, 1], axis=0),
                                params["g2"], params["b2"], count)
    scale2 = scale2.reshape(C, 1)
    shift2 = shift2.reshape(C, 1)

    if has_projection:
        scale_s, shift_s = _bn_affine(jnp.sum(stats_sc[:, :, 0], axis=0),
                                      jnp.sum(stats_sc[:, :, 1], axis=0),
                                      params["gs"], params["bs"], count)
        sc_in = sc_raw
        extra_in = [scale_s.reshape(C, 1), shift_s.reshape(C, 1)]
        extra_specs = [pl.BlockSpec((C, 1), lambda n: (0, 0)),
                       pl.BlockSpec((C, 1), lambda n: (0, 0))]
    else:
        # identity shortcut: the NCHW input is already channel-major (free).
        sc_in = x_nchw.reshape(N, Cin, HW).astype(jnp.float32)
        extra_in, extra_specs = [], []

    # ---------------- call 3: bn2 + shortcut + add + relu --------------------
    flops3 = 8 * N * HW * C
    bytes3 = 4 * 3 * N * HW * C
    out_cm = pl.pallas_call(
        functools.partial(_finalize_kernel, has_projection=has_projection),
        grid=(N,),
        in_specs=[
            pl.BlockSpec((1, C, HW), lambda n: (n, 0, 0)),
            pl.BlockSpec((1, C, HW), lambda n: (n, 0, 0)),
            pl.BlockSpec((C, 1), lambda n: (0, 0)),
            pl.BlockSpec((C, 1), lambda n: (0, 0)),
        ] + extra_specs,
        out_shape=jax.ShapeDtypeStruct((N, C, HW), jnp.float32),
        out_specs=pl.BlockSpec((1, C, HW), lambda n: (n, 0, 0)),
        compiler_params=cparams,
        cost_estimate=pl.CostEstimate(flops=int(flops3), transcendentals=0,
                                      bytes_accessed=int(bytes3)),
    )(y2_raw, sc_in, scale2, shift2, *extra_in)

    # channel-major output reshapes straight to NCHW (no transpose needed).
    return out_cm.reshape(N, C, H, W)


# ----------------------------------------------------------------------------
# pure-JAX reference (f32) for a loose numerical check
# ----------------------------------------------------------------------------
def _reference_forward(x, p):
    def conv(x, w, pad):
        return lax.conv_general_dilated(
            x, w, window_strides=(1, 1), padding=[(pad, pad), (pad, pad)],
            dimension_numbers=("NCHW", "OIHW", "NCHW"))

    def bn(x, g, b):
        mean = jnp.mean(x, axis=(0, 2, 3), keepdims=True)
        var = jnp.mean((x - mean) ** 2, axis=(0, 2, 3), keepdims=True)
        return ((x - mean) * lax.rsqrt(var + _BN_EPS)
                * g.reshape(1, -1, 1, 1) + b.reshape(1, -1, 1, 1))

    out = jax.nn.relu(bn(conv(x, p["w1"], 1), p["g1"], p["b1"]))
    out = bn(conv(out, p["w2"], 1), p["g2"], p["b2"])
    sc = bn(conv(x, p["ws"], 0), p["gs"], p["bs"]) if "ws" in p else x
    return jax.nn.relu(out + sc)


# ----------------------------------------------------------------------------
if __name__ == "__main__":
    key = jax.random.PRNGKey(0)
    kx, kp = jax.random.split(key)

    N, Cin, H, W = 2, 4, 16, 16
    planes = 8          # in_planes != planes -> projection shortcut (1x1 conv+BN)
    stride = 1

    x = jax.random.normal(kx, (N, Cin, H, W), jnp.float32)
    params = init_params(kp, Cin, planes, stride=stride)

    out = spectral_basic_block(x, params, in_planes=Cin, planes=planes,
                               stride=stride)
    out = jax.block_until_ready(out)

    assert out.shape == (N, planes, H, W), out.shape
    assert bool(jnp.all(jnp.isfinite(out))) and bool(jnp.all(out >= 0.0))

    # Loose check vs an f32 XLA reference (kernel uses bf16 MXU operands, so a
    # ~1e-2-level difference is expected; real bugs are O(1)).
    ref = _reference_forward(x, params)
    err = float(jnp.max(jnp.abs(out - ref)))
    assert err < 0.2, f"max abs err {err}"

    print("KERNEL_OK")
</pallas_src>

<mosaic_0001>
module attributes {stable_mosaic.version = 11 : i64} {
  func.func @_conv1_kernel(%arg0: i32, %arg1: memref<1x16x16x4xf32, #tpu.memory_space<vmem>>, %arg2: memref<8x36xbf16, #tpu.memory_space<vmem>>, %arg3: memref<8x4xbf16, #tpu.memory_space<vmem>>, %arg4: memref<1x256x8xf32, #tpu.memory_space<vmem>>, %arg5: memref<1x2x8xf32, #tpu.memory_space<vmem>>, %arg6: memref<1x8x256xf32, #tpu.memory_space<vmem>>, %arg7: memref<1x8x2xf32, #tpu.memory_space<vmem>>, %arg8: memref<18x18x4xf32, #tpu.memory_space<vmem>>, %arg9: memref<16x16x36xbf16, #tpu.memory_space<vmem>>) attributes {dimension_semantics = [#tpu.dimension_semantics<parallel>], iteration_bounds = array<i64: 2>, scalar_prefetch = 0 : i64, scratch_operands = 2 : i64, tpu.core_type = #tpu.core_type<tc>, window_params = [{transform_indices = @transform_0, window_bounds = array<i64: 1, 16, 16, 4>}, {pipeline_mode = #tpu.pipeline_mode<synchronous>, transform_indices = @transform_1, window_bounds = array<i64: 8, 36>}, {pipeline_mode = #tpu.pipeline_mode<synchronous>, transform_indices = @transform_2, window_bounds = array<i64: 8, 4>}, {transform_indices = @transform_3, window_bounds = array<i64: 1, 256, 8>}, {transform_indices = @transform_4, window_bounds = array<i64: 1, 2, 8>}, {transform_indices = @transform_5, window_bounds = array<i64: 1, 8, 256>}, {transform_indices = @transform_6, window_bounds = array<i64: 1, 8, 2>}]} {
    %c0 = arith.constant 0 : index
    %c0_0 = arith.constant 0 : index
    %c0_1 = arith.constant 0 : index
    %c0_2 = arith.constant 0 : index
    %0 = vector.load %arg1[%c0, %c0_0, %c0_1, %c0_2] : memref<1x16x16x4xf32, #tpu.memory_space<vmem>>, vector<1x16x16x4xf32>
    %1 = vector.shape_cast %0 : vector<1x16x16x4xf32> to vector<16x16x4xf32>
    %cst = arith.constant 0.000000e+00 : f32
    %2 = vector.broadcast %cst : f32 to vector<1x18x4xf32>
    %c0_3 = arith.constant 0 : index
    %c0_4 = arith.constant 0 : index
    %c0_5 = arith.constant 0 : index
    %3 = vector.load %arg8[%c0_3, %c0_4, %c0_5] : memref<18x18x4xf32, #tpu.memory_space<vmem>>, vector<1x18x4xf32>
    tpu.vector_store %arg8[%c0_3, %c0_4, %c0_5], %2 {strides = array<i32>} : memref<18x18x4xf32, #tpu.memory_space<vmem>>, vector<1x18x4xf32>,
    %cst_6 = arith.constant 0.000000e+00 : f32
    %4 = vector.broadcast %cst_6 : f32 to vector<1x18x4xf32>
    %c17 = arith.constant 17 : index
    %c0_7 = arith.constant 0 : index
    %c0_8 = arith.constant 0 : index
    %5 = vector.load %arg8[%c17, %c0_7, %c0_8] : memref<18x18x4xf32, #tpu.memory_space<vmem>>, vector<1x18x4xf32>
    tpu.vector_store %arg8[%c17, %c0_7, %c0_8], %4 {strides = array<i32>} : memref<18x18x4xf32, #tpu.memory_space<vmem>>, vector<1x18x4xf32>,
    %cst_9 = arith.constant 0.000000e+00 : f32
    %6 = vector.broadcast %cst_9 : f32 to vector<18x1x4xf32>
    %c0_10 = arith.constant 0 : index
    %c0_11 = arith.constant 0 : index
    %c0_12 = arith.constant 0 : index
    %7 = vector.load %arg8[%c0_10, %c0_11, %c0_12] : memref<18x18x4xf32, #tpu.memory_space<vmem>>, vector<18x1x4xf32>
    tpu.vector_store %arg8[%c0_10, %c0_11, %c0_12], %6 {strides = array<i32>} : memref<18x18x4xf32, #tpu.memory_space<vmem>>, vector<18x1x4xf32>,
    %cst_13 = arith.constant 0.000000e+00 : f32
    %8 = vector.broadcast %cst_13 : f32 to vector<18x1x4xf32>
    %c0_14 = arith.constant 0 : index
    %c17_15 = arith.constant 17 : index
    %c0_16 = arith.constant 0 : index
    %9 = vector.load %arg8[%c0_14, %c17_15, %c0_16] : memref<18x18x4xf32, #tpu.memory_space<vmem>>, vector<18x1x4xf32>
    tpu.vector_store %arg8[%c0_14, %c17_15, %c0_16], %8 {strides = array<i32>} : memref<18x18x4xf32, #tpu.memory_space<vmem>>, vector<18x1x4xf32>,
    %c1 = arith.constant 1 : index
    %c1_17 = arith.constant 1 : index
    %c0_18 = arith.constant 0 : index
    %10 = vector.load %arg8[%c1, %c1_17, %c0_18] : memref<18x18x4xf32, #tpu.memory_space<vmem>>, vector<16x16x4xf32>
    tpu.vector_store %arg8[%c1, %c1_17, %c0_18], %1 {strides = array<i32>} : memref<18x18x4xf32, #tpu.memory_space<vmem>>, vector<16x16x4xf32>,
    %c0_19 = arith.constant 0 : index
    %c0_20 = arith.constant 0 : index
    %c0_21 = arith.constant 0 : index
    %11 = vector.load %arg8[%c0_19, %c0_20, %c0_21] : memref<18x18x4xf32, #tpu.memory_space<vmem>>, vector<16x16x4xf32>
    %12 = arith.truncf %11 : vector<16x16x4xf32> to vector<16x16x4xbf16>
    %c0_22 = arith.constant 0 : index
    %c0_23 = arith.constant 0 : index
    %c0_24 = arith.constant 0 : index
    %13 = vector.load %arg9[%c0_22, %c0_23, %c0_24] : memref<16x16x36xbf16, #tpu.memory_space<vmem>>, vector<16x16x4xbf16>
    tpu.vector_store %arg9[%c0_22, %c0_23, %c0_24], %12 {strides = array<i32>} : memref<16x16x36xbf16, #tpu.memory_space<vmem>>, vector<16x16x4xbf16>,
    %c0_25 = arith.constant 0 : index
    %c1_26 = arith.constant 1 : index
    %c0_27 = arith.constant 0 : index
    %14 = vector.load %arg8[%c0_25, %c1_26, %c0_27] : memref<18x18x4xf32, #tpu.memory_space<vmem>>, vector<16x16x4xf32>
    %15 = arith.truncf %14 : vector<16x16x4xf32> to vector<16x16x4xbf16>
    %c0_28 = arith.constant 0 : index
    %c0_29 = arith.constant 0 : index
    %c4 = arith.constant 4 : index
    %16 = vector.load %arg9[%c0_28, %c0_29, %c4] : memref<16x16x36xbf16, #tpu.memory_space<vmem>>, vector<16x16x4xbf16>
    tpu.vector_store %arg9[%c0_28, %c0_29, %c4], %15 {strides = array<i32>} : memref<16x16x36xbf16, #tpu.memory_space<vmem>>, vector<16x16x4xbf16>,
    %c0_30 = arith.constant 0 : index
    %c2 = arith.constant 2 : index
    %c0_31 = arith.constant 0 : index
    %17 = vector.load %arg8[%c0_30, %c2, %c0_31] : memref<18x18x4xf32, #tpu.memory_space<vmem>>, vector<16x16x4xf32>
    %18 = arith.truncf %17 : vector<16x16x4xf32> to vector<16x16x4xbf16>
    %c0_32 = arith.constant 0 : index
    %c0_33 = arith.constant 0 : index
    %c8 = arith.constant 8 : index
    %19 = vector.load %arg9[%c0_32, %c0_33, %c8] : memref<16x16x36xbf16, #tpu.memory_space<vmem>>, vector<16x16x4xbf16>
    tpu.vector_store %arg9[%c0_32, %c0_33, %c8], %18 {strides = array<i32>} : memref<16x16x36xbf16, #tpu.memory_space<vmem>>, vector<16x16x4xbf16>,
    %c1_34 = arith.constant 1 : index
    %c0_35 = arith.constant 0 : index
    %c0_36 = arith.constant 0 : index
    %20 = vector.load %arg8[%c1_34, %c0_35, %c0_36] : memref<18x18x4xf32, #tpu.memory_space<vmem>>, vector<16x16x4xf32>
    %21 = arith.truncf %20 : vector<16x16x4xf32> to vector<16x16x4xbf16>
    %c0_37 = arith.constant 0 : index
    %c0_38 = arith.constant 0 : index
    %c12 = arith.constant 12 : index
    %22 = vector.load %arg9[%c0_37, %c0_38, %c12] : memref<16x16x36xbf16, #tpu.memory_space<vmem>>, vector<16x16x4xbf16>
    tpu.vector_store %arg9[%c0_37, %c0_38, %c12], %21 {strides = array<i32>} : memref<16x16x36xbf16, #tpu.memory_space<vmem>>, vector<16x16x4xbf16>,
    %c1_39 = arith.constant 1 : index
    %c1_40 = arith.constant 1 : index
    %c0_41 = arith.constant 0 : index
    %23 = vector.load %arg8[%c1_39, %c1_40, %c0_41] : memref<18x18x4xf32, #tpu.memory_space<vmem>>, vector<16x16x4xf32>
    %24 = arith.truncf %23 : vector<16x16x4xf32> to vector<16x16x4xbf16>
    %c0_42 = arith.constant 0 : index
    %c0_43 = arith.constant 0 : index
    %c16 = arith.constant 16 : index
    %25 = vector.load %arg9[%c0_42, %c0_43, %c16] : memref<16x16x36xbf16, #tpu.memory_space<vmem>>, vector<16x16x4xbf16>
    tpu.vector_store %arg9[%c0_42, %c0_43, %c16], %24 {strides = array<i32>} : memref<16x16x36xbf16, #tpu.memory_space<vmem>>, vector<16x16x4xbf16>,
    %c1_44 = arith.constant 1 : index
    %c2_45 = arith.constant 2 : index
    %c0_46 = arith.constant 0 : index
    %26 = vector.load %arg8[%c1_44, %c2_45, %c0_46] : memref<18x18x4xf32, #tpu.memory_space<vmem>>, vector<16x16x4xf32>
    %27 = arith.truncf %26 : vector<16x16x4xf32> to vector<16x16x4xbf16>
    %c0_47 = arith.constant 0 : index
    %c0_48 = arith.constant 0 : index
    %c20 = arith.constant 20 : index
    %28 = vector.load %arg9[%c0_47, %c0_48, %c20] : memref<16x16x36xbf16, #tpu.memory_space<vmem>>, vector<16x16x4xbf16>
    tpu.vector_store %arg9[%c0_47, %c0_48, %c20], %27 {strides = array<i32>} : memref<16x16x36xbf16, #tpu.memory_space<vmem>>, vector<16x16x4xbf16>,
    %c2_49 = arith.constant 2 : index
    %c0_50 = arith.constant 0 : index
    %c0_51 = arith.constant 0 : index
    %29 = vector.load %arg8[%c2_49, %c0_50, %c0_51] : memref<18x18x4xf32, #tpu.memory_space<vmem>>, vector<16x16x4xf32>
    %30 = arith.truncf %29 : vector<16x16x4xf32> to vector<16x16x4xbf16>
    %c0_52 = arith.constant 0 : index
    %c0_53 = arith.constant 0 : index
    %c24 = arith.constant 24 : index
    %31 = vector.load %arg9[%c0_52, %c0_53, %c24] : memref<16x16x36xbf16, #tpu.memory_space<vmem>>, vector<16x16x4xbf16>
    tpu.vector_store %arg9[%c0_52, %c0_53, %c24], %30 {strides = array<i32>} : memref<16x16x36xbf16, #tpu.memory_space<vmem>>, vector<16x16x4xbf16>,
    %c2_54 = arith.constant 2 : index
    %c1_55 = arith.constant 1 : index
    %c0_56 = arith.constant 0 : index
    %32 = vector.load %arg8[%c2_54, %c1_55, %c0_56] : memref<18x18x4xf32, #tpu.memory_space<vmem>>, vector<16x16x4xf32>
    %33 = arith.truncf %32 : vector<16x16x4xf32> to vector<16x16x4xbf16>
    %c0_57 = arith.constant 0 : index
    %c0_58 = arith.constant 0 : index
    %c28 = arith.constant 28 : index
    %34 = vector.load %arg9[%c0_57, %c0_58, %c28] : memref<16x16x36xbf16, #tpu.memory_space<vmem>>, vector<16x16x4xbf16>
    tpu.vector_store %arg9[%c0_57, %c0_58, %c28], %33 {strides = array<i32>} : memref<16x16x36xbf16, #tpu.memory_space<vmem>>, vector<16x16x4xbf16>,
    %c2_59 = arith.constant 2 : index
    %c2_60 = arith.constant 2 : index
    %c0_61 = arith.constant 0 : index
    %35 = vector.load %arg8[%c2_59, %c2_60, %c0_61] : memref<18x18x4xf32, #tpu.memory_space<vmem>>, vector<16x16x4xf32>
    %36 = arith.truncf %35 : vector<16x16x4xf32> to vector<16x16x4xbf16>
    %c0_62 = arith.constant 0 : index
    %c0_63 = arith.constant 0 : index
    %c32 = arith.constant 32 : index
    %37 = vector.load %arg9[%c0_62, %c0_63, %c32] : memref<16x16x36xbf16, #tpu.memory_space<vmem>>, vector<16x16x4xbf16>
    tpu.vector_store %arg9[%c0_62, %c0_63, %c32], %36 {strides = array<i32>} : memref<16x16x36xbf16, #tpu.memory_space<vmem>>, vector<16x16x4xbf16>,
    %c0_64 = arith.constant 0 : index
    %c0_65 = arith.constant 0 : index
    %c0_66 = arith.constant 0 : index
    %38 = vector.load %arg9[%c0_64, %c0_65, %c0_66] : memref<16x16x36xbf16, #tpu.memory_space<vmem>>, vector<16x16x36xbf16>
    %39 = vector.shape_cast %38 : vector<16x16x36xbf16> to vector<256x36xbf16>
    %c0_67 = arith.constant 0 : index
    %c0_68 = arith.constant 0 : index
    %40 = vector.load %arg2[%c0_67, %c0_68] : memref<8x36xbf16, #tpu.memory_space<vmem>>, vector<8x36xbf16>
    %cst_69 = arith.constant dense<0.000000e+00> : vector<256x8xf32>
    %41 = tpu.matmul %39, %40, %cst_69 {dimension_numbers = #tpu.dot_dimension_numbers<[1], [1], [0], [0], [0, 0, 1, 0], [], []>} : vector<256x36xbf16>, vector<8x36xbf16>, vector<256x8xf32> -> vector<256x8xf32>
    %c0_70 = arith.constant 0 : index
    %c0_71 = arith.constant 0 : index
    %c0_72 = arith.constant 0 : index
    %42 = vector.load %arg4[%c0_70, %c0_71, %c0_72] : memref<1x256x8xf32, #tpu.memory_space<vmem>>, vector<1x256x8xf32>
    %43 = vector.shape_cast %42 : vector<1x256x8xf32> to vector<256x8xf32>
    %44 = vector.shape_cast %41 : vector<256x8xf32> to vector<1x256x8xf32>
    tpu.vector_store %arg4[%c0_70, %c0_71, %c0_72], %44 {strides = array<i32>} : memref<1x256x8xf32, #tpu.memory_space<vmem>>, vector<1x256x8xf32>,
    %cst_73 = arith.constant dense<0.000000e+00> : vector<8xf32>
    %45 = vector.multi_reduction <add>, %41, %cst_73 [0] : vector<256x8xf32> to vector<8xf32>
    %46 = vector.shape_cast %45 : vector<8xf32> to vector<1x8xf32>
    %c0_74 = arith.constant 0 : index
    %c0_75 = arith.constant 0 : index
    %c0_76 = arith.constant 0 : index
    %47 = vector.load %arg5[%c0_74, %c0_75, %c0_76] : memref<1x2x8xf32, #tpu.memory_space<vmem>>, vector<1x1x8xf32>
    %48 = vector.shape_cast %47 : vector<1x1x8xf32> to vector<1x8xf32>
    %49 = vector.shape_cast %46 : vector<1x8xf32> to vector<1x1x8xf32>
    tpu.vector_store %arg5[%c0_74, %c0_75, %c0_76], %49 {strides = array<i32>} : memref<1x2x8xf32, #tpu.memory_space<vmem>>, vector<1x1x8xf32>,
    %50 = arith.mulf %41, %41 : vector<256x8xf32>
    %cst_77 = arith.constant dense<0.000000e+00> : vector<8xf32>
    %51 = vector.multi_reduction <add>, %50, %cst_77 [0] : vector<256x8xf32> to vector<8xf32>
    %52 = vector.shape_cast %51 : vector<8xf32> to vector<1x8xf32>
    %c0_78 = arith.constant 0 : index
    %c1_79 = arith.constant 1 : index
    %c0_80 = arith.constant 0 : index
    %53 = vector.load %arg5[%c0_78, %c1_79, %c0_80] : memref<1x2x8xf32, #tpu.memory_space<vmem>>, vector<1x1x8xf32>
    %54 = vector.shape_cast %53 : vector<1x1x8xf32> to vector<1x8xf32>
    %55 = vector.shape_cast %52 : vector<1x8xf32> to vector<1x1x8xf32>
    tpu.vector_store %arg5[%c0_78, %c1_79, %c0_80], %55 {strides = array<i32>} : memref<1x2x8xf32, #tpu.memory_space<vmem>>, vector<1x1x8xf32>,
    %56 = vector.shape_cast %1 : vector<16x16x4xf32> to vector<256x4xf32>
    %57 = arith.truncf %56 : vector<256x4xf32> to vector<256x4xbf16>
    %c0_81 = arith.constant 0 : index
    %c0_82 = arith.constant 0 : index
    %58 = vector.load %arg3[%c0_81, %c0_82] : memref<8x4xbf16, #tpu.memory_space<vmem>>, vector<8x4xbf16>
    %cst_83 = arith.constant dense<0.000000e+00> : vector<8x256xf32>
    %59 = tpu.matmul %58, %57, %cst_83 {dimension_numbers = #tpu.dot_dimension_numbers<[1], [1], [0], [0], [0, 0, 1, 0], [], []>} : vector<8x4xbf16>, vector<256x4xbf16>, vector<8x256xf32> -> vector<8x256xf32>
    %c0_84 = arith.constant 0 : index
    %c0_85 = arith.constant 0 : index
    %c0_86 = arith.constant 0 : index
    %60 = vector.load %arg6[%c0_84, %c0_85, %c0_86] : memref<1x8x256xf32, #tpu.memory_space<vmem>>, vector<1x8x256xf32>
    %61 = vector.shape_cast %60 : vector<1x8x256xf32> to vector<8x256xf32>
    %62 = vector.shape_cast %59 : vector<8x256xf32> to vector<1x8x256xf32>
    tpu.vector_store %arg6[%c0_84, %c0_85, %c0_86], %62 {strides = array<i32>} : memref<1x8x256xf32, #tpu.memory_space<vmem>>, vector<1x8x256xf32>,
    %cst_87 = arith.constant dense<0.000000e+00> : vector<8xf32>
    %63 = vector.multi_reduction <add>, %59, %cst_87 [1] : vector<8x256xf32> to vector<8xf32>
    %64 = vector.shape_cast %63 : vector<8xf32> to vector<8x1xf32>
    %c0_88 = arith.constant 0 : index
    %c0_89 = arith.constant 0 : index
    %c0_90 = arith.constant 0 : index
    %65 = vector.load %arg7[%c0_88, %c0_89, %c0_90] : memref<1x8x2xf32, #tpu.memory_space<vmem>>, vector<1x8x1xf32>
    %66 = vector.shape_cast %65 : vector<1x8x1xf32> to vector<8x1xf32>
    %67 = vector.shape_cast %64 : vector<8x1xf32> to vector<1x8x1xf32>
    tpu.vector_store %arg7[%c0_88, %c0_89, %c0_90], %67 {strides = array<i32>} : memref<1x8x2xf32, #tpu.memory_space<vmem>>, vector<1x8x1xf32>,
    %68 = arith.mulf %59, %59 : vector<8x256xf32>
    %cst_91 = arith.constant dense<0.000000e+00> : vector<8xf32>
    %69 = vector.multi_reduction <add>, %68, %cst_91 [1] : vector<8x256xf32> to vector<8xf32>
    %70 = vector.shape_cast %69 : vector<8xf32> to vector<8x1xf32>
    %c0_92 = arith.constant 0 : index
    %c0_93 = arith.constant 0 : index
    %c1_94 = arith.constant 1 : index
    %71 = vector.load %arg7[%c0_92, %c0_93, %c1_94] : memref<1x8x2xf32, #tpu.memory_space<vmem>>, vector<1x8x1xf32>
    %72 = vector.shape_cast %71 : vector<1x8x1xf32> to vector<8x1xf32>
    %73 = vector.shape_cast %70 : vector<8x1xf32> to vector<1x8x1xf32>
    tpu.vector_store %arg7[%c0_92, %c0_93, %c1_94], %73 {strides = array<i32>} : memref<1x8x2xf32, #tpu.memory_space<vmem>>, vector<1x8x1xf32>,
    return
  }
  func.func @transform_0(%arg0: i32) -> (i32, i32, i32, i32) {
    %c0_i32 = arith.constant 0 : i32
    %c0_i32_0 = arith.constant 0 : i32
    %c0_i32_1 = arith.constant 0 : i32
    %c0_i32_2 = arith.constant 0 : i32
    return %arg0, %c0_i32, %c0_i32_0, %c0_i32_1 : i32, i32, i32, i32
  }
  func.func @transform_1(%arg0: i32) -> (i32, i32) {
    %c0_i32 = arith.constant 0 : i32
    %c0_i32_0 = arith.constant 0 : i32
    %c0_i32_1 = arith.constant 0 : i32
    return %c0_i32, %c0_i32_0 : i32, i32
  }
  func.func @transform_2(%arg0: i32) -> (i32, i32) {
    %c0_i32 = arith.constant 0 : i32
    %c0_i32_0 = arith.constant 0 : i32
    %c0_i32_1 = arith.constant 0 : i32
    return %c0_i32, %c0_i32_0 : i32, i32
  }
  func.func @transform_3(%arg0: i32) -> (i32, i32, i32) {
    %c0_i32 = arith.constant 0 : i32
    %c0_i32_0 = arith.constant 0 : i32
    %c0_i32_1 = arith.constant 0 : i32
    return %arg0, %c0_i32, %c0_i32_0 : i32, i32, i32
  }
  func.func @transform_4(%arg0: i32) -> (i32, i32, i32) {
    %c0_i32 = arith.constant 0 : i32
    %c0_i32_0 = arith.constant 0 : i32
    %c0_i32_1 = arith.constant 0 : i32
    return %arg0, %c0_i32, %c0_i32_0 : i32, i32, i32
  }
  func.func @transform_5(%arg0: i32) -> (i32, i32, i32) {
    %c0_i32 = arith.constant 0 : i32
    %c0_i32_0 = arith.constant 0 : i32
    %c0_i32_1 = arith.constant 0 : i32
    return %arg0, %c0_i32, %c0_i32_0 : i32, i32, i32
  }
  func.func @transform_6(%arg0: i32) -> (i32, i32, i32) {
    %c0_i32 = arith.constant 0 : i32
    %c0_i32_0 = arith.constant 0 : i32
    %c0_i32_1 = arith.constant 0 : i32
    return %arg0, %c0_i32, %c0_i32_0 : i32, i32, i32
  }
}

module attributes {stable_mosaic.version = 11 : i64} {
  func.func @_bn1_conv2_kernel(%arg0: i32, %arg1: memref<1x256x8xf32, #tpu.memory_space<vmem>>, %arg2: memref<1x8xf32, #tpu.memory_space<vmem>>, %arg3: memref<1x8xf32, #tpu.memory_space<vmem>>, %arg4: memref<8x72xbf16, #tpu.memory_space<vmem>>, %arg5: memref<1x8x256xf32, #tpu.memory_space<vmem>>, %arg6: memref<1x8x2xf32, #tpu.memory_space<vmem>>, %arg7: memref<18x18x8xf32, #tpu.memory_space<vmem>>, %arg8: memref<16x16x72xbf16, #tpu.memory_space<vmem>>) attributes {dimension_semantics = [#tpu.dimension_semantics<parallel>], iteration_bounds = array<i64: 2>, scalar_prefetch = 0 : i64, scratch_operands = 2 : i64, tpu.core_type = #tpu.core_type<tc>, window_params = [{transform_indices = @transform_0, window_bounds = array<i64: 1, 256, 8>}, {pipeline_mode = #tpu.pipeline_mode<synchronous>, transform_indices = @transform_1, window_bounds = array<i64: 1, 8>}, {pipeline_mode = #tpu.pipeline_mode<synchronous>, transform_indices = @transform_2, window_bounds = array<i64: 1, 8>}, {pipeline_mode = #tpu.pipeline_mode<synchronous>, transform_indices = @transform_3, window_bounds = array<i64: 8, 72>}, {transform_indices = @transform_4, window_bounds = array<i64: 1, 8, 256>}, {transform_indices = @transform_5, window_bounds = array<i64: 1, 8, 2>}]} {
    %c0 = arith.constant 0 : index
    %c0_0 = arith.constant 0 : index
    %c0_1 = arith.constant 0 : index
    %0 = vector.load %arg1[%c0, %c0_0, %c0_1] : memref<1x256x8xf32, #tpu.memory_space<vmem>>, vector<1x256x8xf32>
    %1 = vector.shape_cast %0 : vector<1x256x8xf32> to vector<256x8xf32>
    %c0_2 = arith.constant 0 : index
    %c0_3 = arith.constant 0 : index
    %2 = vector.load %arg2[%c0_2, %c0_3] : memref<1x8xf32, #tpu.memory_space<vmem>>, vector<1x8xf32>
    %3 = vector.broadcast %2 : vector<1x8xf32> to vector<256x8xf32>
    %4 = arith.mulf %1, %3 : vector<256x8xf32>
    %c0_4 = arith.constant 0 : index
    %c0_5 = arith.constant 0 : index
    %5 = vector.load %arg3[%c0_4, %c0_5] : memref<1x8xf32, #tpu.memory_space<vmem>>, vector<1x8xf32>
    %6 = vector.broadcast %5 : vector<1x8xf32> to vector<256x8xf32>
    %7 = arith.addf %4, %6 : vector<256x8xf32>
    %cst = arith.constant 0.000000e+00 : f32
    %8 = vector.broadcast %cst : f32 to vector<256x8xf32>
    %9 = arith.maximumf %7, %8 : vector<256x8xf32>
    %10 = vector.shape_cast %9 : vector<256x8xf32> to vector<16x16x8xf32>
    %cst_6 = arith.constant 0.000000e+00 : f32
    %11 = vector.broadcast %cst_6 : f32 to vector<1x18x8xf32>
    %c0_7 = arith.constant 0 : index
    %c0_8 = arith.constant 0 : index
    %c0_9 = arith.constant 0 : index
    %12 = vector.load %arg7[%c0_7, %c0_8, %c0_9] : memref<18x18x8xf32, #tpu.memory_space<vmem>>, vector<1x18x8xf32>
    tpu.vector_store %arg7[%c0_7, %c0_8, %c0_9], %11 {strides = array<i32>} : memref<18x18x8xf32, #tpu.memory_space<vmem>>, vector<1x18x8xf32>,
    %cst_10 = arith.constant 0.000000e+00 : f32
    %13 = vector.broadcast %cst_10 : f32 to vector<1x18x8xf32>
    %c17 = arith.constant 17 : index
    %c0_11 = arith.constant 0 : index
    %c0_12 = arith.constant 0 : index
    %14 = vector.load %arg7[%c17, %c0_11, %c0_12] : memref<18x18x8xf32, #tpu.memory_space<vmem>>, vector<1x18x8xf32>
    tpu.vector_store %arg7[%c17, %c0_11, %c0_12], %13 {strides = array<i32>} : memref<18x18x8xf32, #tpu.memory_space<vmem>>, vector<1x18x8xf32>,
    %cst_13 = arith.constant 0.000000e+00 : f32
    %15 = vector.broadcast %cst_13 : f32 to vector<18x1x8xf32>
    %c0_14 = arith.constant 0 : index
    %c0_15 = arith.constant 0 : index
    %c0_16 = arith.constant 0 : index
    %16 = vector.load %arg7[%c0_14, %c0_15, %c0_16] : memref<18x18x8xf32, #tpu.memory_space<vmem>>, vector<18x1x8xf32>
    tpu.vector_store %arg7[%c0_14, %c0_15, %c0_16], %15 {strides = array<i32>} : memref<18x18x8xf32, #tpu.memory_space<vmem>>, vector<18x1x8xf32>,
    %cst_17 = arith.constant 0.000000e+00 : f32
    %17 = vector.broadcast %cst_17 : f32 to vector<18x1x8xf32>
    %c0_18 = arith.constant 0 : index
    %c17_19 = arith.constant 17 : index
    %c0_20 = arith.constant 0 : index
    %18 = vector.load %arg7[%c0_18, %c17_19, %c0_20] : memref<18x18x8xf32, #tpu.memory_space<vmem>>, vector<18x1x8xf32>
    tpu.vector_store %arg7[%c0_18, %c17_19, %c0_20], %17 {strides = array<i32>} : memref<18x18x8xf32, #tpu.memory_space<vmem>>, vector<18x1x8xf32>,
    %c1 = arith.constant 1 : index
    %c1_21 = arith.constant 1 : index
    %c0_22 = arith.constant 0 : index
    %19 = vector.load %arg7[%c1, %c1_21, %c0_22] : memref<18x18x8xf32, #tpu.memory_space<vmem>>, vector<16x16x8xf32>
    tpu.vector_store %arg7[%c1, %c1_21, %c0_22], %10 {strides = array<i32>} : memref<18x18x8xf32, #tpu.memory_space<vmem>>, vector<16x16x8xf32>,
    %c0_23 = arith.constant 0 : index
    %c0_24 = arith.constant 0 : index
    %c0_25 = arith.constant 0 : index
    %20 = vector.load %arg7[%c0_23, %c0_24, %c0_25] : memref<18x18x8xf32, #tpu.memory_space<vmem>>, vector<16x16x8xf32>
    %21 = arith.truncf %20 : vector<16x16x8xf32> to vector<16x16x8xbf16>
    %c0_26 = arith.constant 0 : index
    %c0_27 = arith.constant 0 : index
    %c0_28 = arith.constant 0 : index
    %22 = vector.load %arg8[%c0_26, %c0_27, %c0_28] : memref<16x16x72xbf16, #tpu.memory_space<vmem>>, vector<16x16x8xbf16>
    tpu.vector_store %arg8[%c0_26, %c0_27, %c0_28], %21 {strides = array<i32>} : memref<16x16x72xbf16, #tpu.memory_space<vmem>>, vector<16x16x8xbf16>,
    %c0_29 = arith.constant 0 : index
    %c1_30 = arith.constant 1 : index
    %c0_31 = arith.constant 0 : index
    %23 = vector.load %arg7[%c0_29, %c1_30, %c0_31] : memref<18x18x8xf32, #tpu.memory_space<vmem>>, vector<16x16x8xf32>
    %24 = arith.truncf %23 : vector<16x16x8xf32> to vector<16x16x8xbf16>
    %c0_32 = arith.constant 0 : index
    %c0_33 = arith.constant 0 : index
    %c8 = arith.constant 8 : index
    %25 = vector.load %arg8[%c0_32, %c0_33, %c8] : memref<16x16x72xbf16, #tpu.memory_space<vmem>>, vector<16x16x8xbf16>
    tpu.vector_store %arg8[%c0_32, %c0_33, %c8], %24 {strides = array<i32>} : memref<16x16x72xbf16, #tpu.memory_space<vmem>>, vector<16x16x8xbf16>,
    %c0_34 = arith.constant 0 : index
    %c2 = arith.constant 2 : index
    %c0_35 = arith.constant 0 : index
    %26 = vector.load %arg7[%c0_34, %c2, %c0_35] : memref<18x18x8xf32, #tpu.memory_space<vmem>>, vector<16x16x8xf32>
    %27 = arith.truncf %26 : vector<16x16x8xf32> to vector<16x16x8xbf16>
    %c0_36 = arith.constant 0 : index
    %c0_37 = arith.constant 0 : index
    %c16 = arith.constant 16 : index
    %28 = vector.load %arg8[%c0_36, %c0_37, %c16] : memref<16x16x72xbf16, #tpu.memory_space<vmem>>, vector<16x16x8xbf16>
    tpu.vector_store %arg8[%c0_36, %c0_37, %c16], %27 {strides = array<i32>} : memref<16x16x72xbf16, #tpu.memory_space<vmem>>, vector<16x16x8xbf16>,
    %c1_38 = arith.constant 1 : index
    %c0_39 = arith.constant 0 : index
    %c0_40 = arith.constant 0 : index
    %29 = vector.load %arg7[%c1_38, %c0_39, %c0_40] : memref<18x18x8xf32, #tpu.memory_space<vmem>>, vector<16x16x8xf32>
    %30 = arith.truncf %29 : vector<16x16x8xf32> to vector<16x16x8xbf16>
    %c0_41 = arith.constant 0 : index
    %c0_42 = arith.constant 0 : index
    %c24 = arith.constant 24 : index
    %31 = vector.load %arg8[%c0_41, %c0_42, %c24] : memref<16x16x72xbf16, #tpu.memory_space<vmem>>, vector<16x16x8xbf16>
    tpu.vector_store %arg8[%c0_41, %c0_42, %c24], %30 {strides = array<i32>} : memref<16x16x72xbf16, #tpu.memory_space<vmem>>, vector<16x16x8xbf16>,
    %c1_43 = arith.constant 1 : index
    %c1_44 = arith.constant 1 : index
    %c0_45 = arith.constant 0 : index
    %32 = vector.load %arg7[%c1_43, %c1_44, %c0_45] : memref<18x18x8xf32, #tpu.memory_space<vmem>>, vector<16x16x8xf32>
    %33 = arith.truncf %32 : vector<16x16x8xf32> to vector<16x16x8xbf16>
    %c0_46 = arith.constant 0 : index
    %c0_47 = arith.constant 0 : index
    %c32 = arith.constant 32 : index
    %34 = vector.load %arg8[%c0_46, %c0_47, %c32] : memref<16x16x72xbf16, #tpu.memory_space<vmem>>, vector<16x16x8xbf16>
    tpu.vector_store %arg8[%c0_46, %c0_47, %c32], %33 {strides = array<i32>} : memref<16x16x72xbf16, #tpu.memory_space<vmem>>, vector<16x16x8xbf16>,
    %c1_48 = arith.constant 1 : index
    %c2_49 = arith.constant 2 : index
    %c0_50 = arith.constant 0 : index
    %35 = vector.load %arg7[%c1_48, %c2_49, %c0_50] : memref<18x18x8xf32, #tpu.memory_space<vmem>>, vector<16x16x8xf32>
    %36 = arith.truncf %35 : vector<16x16x8xf32> to vector<16x16x8xbf16>
    %c0_51 = arith.constant 0 : index
    %c0_52 = arith.constant 0 : index
    %c40 = arith.constant 40 : index
    %37 = vector.load %arg8[%c0_51, %c0_52, %c40] : memref<16x16x72xbf16, #tpu.memory_space<vmem>>, vector<16x16x8xbf16>
    tpu.vector_store %arg8[%c0_51, %c0_52, %c40], %36 {strides = array<i32>} : memref<16x16x72xbf16, #tpu.memory_space<vmem>>, vector<16x16x8xbf16>,
    %c2_53 = arith.constant 2 : index
    %c0_54 = arith.constant 0 : index
    %c0_55 = arith.constant 0 : index
    %38 = vector.load %arg7[%c2_53, %c0_54, %c0_55] : memref<18x18x8xf32, #tpu.memory_space<vmem>>, vector<16x16x8xf32>
    %39 = arith.truncf %38 : vector<16x16x8xf32> to vector<16x16x8xbf16>
    %c0_56 = arith.constant 0 : index
    %c0_57 = arith.constant 0 : index
    %c48 = arith.constant 48 : index
    %40 = vector.load %arg8[%c0_56, %c0_57, %c48] : memref<16x16x72xbf16, #tpu.memory_space<vmem>>, vector<16x16x8xbf16>
    tpu.vector_store %arg8[%c0_56, %c0_57, %c48], %39 {strides = array<i32>} : memref<16x16x72xbf16, #tpu.memory_space<vmem>>, vector<16x16x8xbf16>,
    %c2_58 = arith.constant 2 : index
    %c1_59 = arith.constant 1 : index
    %c0_60 = arith.constant 0 : index
    %41 = vector.load %arg7[%c2_58, %c1_59, %c0_60] : memref<18x18x8xf32, #tpu.memory_space<vmem>>, vector<16x16x8xf32>
    %42 = arith.truncf %41 : vector<16x16x8xf32> to vector<16x16x8xbf16>
    %c0_61 = arith.constant 0 : index
    %c0_62 = arith.constant 0 : index
    %c56 = arith.constant 56 : index
    %43 = vector.load %arg8[%c0_61, %c0_62, %c56] : memref<16x16x72xbf16, #tpu.memory_space<vmem>>, vector<16x16x8xbf16>
    tpu.vector_store %arg8[%c0_61, %c0_62, %c56], %42 {strides = array<i32>} : memref<16x16x72xbf16, #tpu.memory_space<vmem>>, vector<16x16x8xbf16>,
    %c2_63 = arith.constant 2 : index
    %c2_64 = arith.constant 2 : index
    %c0_65 = arith.constant 0 : index
    %44 = vector.load %arg7[%c2_63, %c2_64, %c0_65] : memref<18x18x8xf32, #tpu.memory_space<vmem>>, vector<16x16x8xf32>
    %45 = arith.truncf %44 : vector<16x16x8xf32> to vector<16x16x8xbf16>
    %c0_66 = arith.constant 0 : index
    %c0_67 = arith.constant 0 : index
    %c64 = arith.constant 64 : index
    %46 = vector.load %arg8[%c0_66, %c0_67, %c64] : memref<16x16x72xbf16, #tpu.memory_space<vmem>>, vector<16x16x8xbf16>
    tpu.vector_store %arg8[%c0_66, %c0_67, %c64], %45 {strides = array<i32>} : memref<16x16x72xbf16, #tpu.memory_space<vmem>>, vector<16x16x8xbf16>,
    %c0_68 = arith.constant 0 : index
    %c0_69 = arith.constant 0 : index
    %c0_70 = arith.constant 0 : index
    %47 = vector.load %arg8[%c0_68, %c0_69, %c0_70] : memref<16x16x72xbf16, #tpu.memory_space<vmem>>, vector<16x16x72xbf16>
    %48 = vector.shape_cast %47 : vector<16x16x72xbf16> to vector<256x72xbf16>
    %c0_71 = arith.constant 0 : index
    %c0_72 = arith.constant 0 : index
    %49 = vector.load %arg4[%c0_71, %c0_72] : memref<8x72xbf16, #tpu.memory_space<vmem>>, vector<8x72xbf16>
    %cst_73 = arith.constant dense<0.000000e+00> : vector<8x256xf32>
    %50 = tpu.matmul %49, %48, %cst_73 {dimension_numbers = #tpu.dot_dimension_numbers<[1], [1], [0], [0], [0, 0, 1, 0], [], []>} : vector<8x72xbf16>, vector<256x72xbf16>, vector<8x256xf32> -> vector<8x256xf32>
    %c0_74 = arith.constant 0 : index
    %c0_75 = arith.constant 0 : index
    %c0_76 = arith.constant 0 : index
    %51 = vector.load %arg5[%c0_74, %c0_75, %c0_76] : memref<1x8x256xf32, #tpu.memory_space<vmem>>, vector<1x8x256xf32>
    %52 = vector.shape_cast %51 : vector<1x8x256xf32> to vector<8x256xf32>
    %53 = vector.shape_cast %50 : vector<8x256xf32> to vector<1x8x256xf32>
    tpu.vector_store %arg5[%c0_74, %c0_75, %c0_76], %53 {strides = array<i32>} : memref<1x8x256xf32, #tpu.memory_space<vmem>>, vector<1x8x256xf32>,
    %cst_77 = arith.constant dense<0.000000e+00> : vector<8xf32>
    %54 = vector.multi_reduction <add>, %50, %cst_77 [1] : vector<8x256xf32> to vector<8xf32>
    %55 = vector.shape_cast %54 : vector<8xf32> to vector<8x1xf32>
    %c0_78 = arith.constant 0 : index
    %c0_79 = arith.constant 0 : index
    %c0_80 = arith.constant 0 : index
    %56 = vector.load %arg6[%c0_78, %c0_79, %c0_80] : memref<1x8x2xf32, #tpu.memory_space<vmem>>, vector<1x8x1xf32>
    %57 = vector.shape_cast %56 : vector<1x8x1xf32> to vector<8x1xf32>
    %58 = vector.shape_cast %55 : vector<8x1xf32> to vector<1x8x1xf32>
    tpu.vector_store %arg6[%c0_78, %c0_79, %c0_80], %58 {strides = array<i32>} : memref<1x8x2xf32, #tpu.memory_space<vmem>>, vector<1x8x1xf32>,
    %59 = arith.mulf %50, %50 : vector<8x256xf32>
    %cst_81 = arith.constant dense<0.000000e+00> : vector<8xf32>
    %60 = vector.multi_reduction <add>, %59, %cst_81 [1] : vector<8x256xf32> to vector<8xf32>
    %61 = vector.shape_cast %60 : vector<8xf32> to vector<8x1xf32>
    %c0_82 = arith.constant 0 : index
    %c0_83 = arith.constant 0 : index
    %c1_84 = arith.constant 1 : index
    %62 = vector.load %arg6[%c0_82, %c0_83, %c1_84] : memref<1x8x2xf32, #tpu.memory_space<vmem>>, vector<1x8x1xf32>
    %63 = vector.shape_cast %62 : vector<1x8x1xf32> to vector<8x1xf32>
    %64 = vector.shape_cast %61 : vector<8x1xf32> to vector<1x8x1xf32>
    tpu.vector_store %arg6[%c0_82, %c0_83, %c1_84], %64 {strides = array<i32>} : memref<1x8x2xf32, #tpu.memory_space<vmem>>, vector<1x8x1xf32>,
    return
  }
  func.func @transform_0(%arg0: i32) -> (i32, i32, i32) {
    %c0_i32 = arith.constant 0 : i32
    %c0_i32_0 = arith.constant 0 : i32
    %c0_i32_1 = arith.constant 0 : i32
    return %arg0, %c0_i32, %c0_i32_0 : i32, i32, i32
  }
  func.func @transform_1(%arg0: i32) -> (i32, i32) {
    %c0_i32 = arith.constant 0 : i32
    %c0_i32_0 = arith.constant 0 : i32
    %c0_i32_1 = arith.constant 0 : i32
    return %c0_i32, %c0_i32_0 : i32, i32
  }
  func.func @transform_2(%arg0: i32) -> (i32, i32) {
    %c0_i32 = arith.constant 0 : i32
    %c0_i32_0 = arith.constant 0 : i32
    %c0_i32_1 = arith.constant 0 : i32
    return %c0_i32, %c0_i32_0 : i32, i32
  }
  func.func @transform_3(%arg0: i32) -> (i32, i32) {
    %c0_i32 = arith.constant 0 : i32
    %c0_i32_0 = arith.constant 0 : i32
    %c0_i32_1 = arith.constant 0 : i32
    return %c0_i32, %c0_i32_0 : i32, i32
  }
  func.func @transform_4(%arg0: i32) -> (i32, i32, i32) {
    %c0_i32 = arith.constant 0 : i32
    %c0_i32_0 = arith.constant 0 : i32
    %c0_i32_1 = arith.constant 0 : i32
    return %arg0, %c0_i32, %c0_i32_0 : i32, i32, i32
  }
  func.func @transform_5(%arg0: i32) -> (i32, i32, i32) {
    %c0_i32 = arith.constant 0 : i32
    %c0_i32_0 = arith.constant 0 : i32
    %c0_i32_1 = arith.constant 0 : i32
    return %arg0, %c0_i32, %c0_i32_0 : i32, i32, i32
  }
}

module attributes {stable_mosaic.version = 11 : i64} {
  func.func @_finalize_kernel(%arg0: i32, %arg1: memref<1x8x256xf32, #tpu.memory_space<vmem>>, %arg2: memref<1x8x256xf32, #tpu.memory_space<vmem>>, %arg3: memref<8x1xf32, #tpu.memory_space<vmem>>, %arg4: memref<8x1xf32, #tpu.memory_space<vmem>>, %arg5: memref<8x1xf32, #tpu.memory_space<vmem>>, %arg6: memref<8x1xf32, #tpu.memory_space<vmem>>, %arg7: memref<1x8x256xf32, #tpu.memory_space<vmem>>) attributes {dimension_semantics = [#tpu.dimension_semantics<parallel>], iteration_bounds = array<i64: 2>, scalar_prefetch = 0 : i64, scratch_operands = 0 : i64, tpu.core_type = #tpu.core_type<tc>, window_params = [{transform_indices = @transform_0, window_bounds = array<i64: 1, 8, 256>}, {transform_indices = @transform_1, window_bounds = array<i64: 1, 8, 256>}, {pipeline_mode = #tpu.pipeline_mode<synchronous>, transform_indices = @transform_2, window_bounds = array<i64: 8, 1>}, {pipeline_mode = #tpu.pipeline_mode<synchronous>, transform_indices = @transform_3, window_bounds = array<i64: 8, 1>}, {pipeline_mode = #tpu.pipeline_mode<synchronous>, transform_indices = @transform_4, window_bounds = array<i64: 8, 1>}, {pipeline_mode = #tpu.pipeline_mode<synchronous>, transform_indices = @transform_5, window_bounds = array<i64: 8, 1>}, {transform_indices = @transform_6, window_bounds = array<i64: 1, 8, 256>}]} {
    %c0 = arith.constant 0 : index
    %c0_0 = arith.constant 0 : index
    %c0_1 = arith.constant 0 : index
    %0 = vector.load %arg2[%c0, %c0_0, %c0_1] : memref<1x8x256xf32, #tpu.memory_space<vmem>>, vector<1x8x256xf32>
    %1 = vector.shape_cast %0 : vector<1x8x256xf32> to vector<8x256xf32>
    %c0_2 = arith.constant 0 : index
    %c0_3 = arith.constant 0 : index
    %2 = vector.load %arg5[%c0_2, %c0_3] : memref<8x1xf32, #tpu.memory_space<vmem>>, vector<8x1xf32>
    %3 = vector.broadcast %2 : vector<8x1xf32> to vector<8x256xf32>
    %4 = arith.mulf %1, %3 : vector<8x256xf32>
    %c0_4 = arith.constant 0 : index
    %c0_5 = arith.constant 0 : index
    %5 = vector.load %arg6[%c0_4, %c0_5] : memref<8x1xf32, #tpu.memory_space<vmem>>, vector<8x1xf32>
    %6 = vector.broadcast %5 : vector<8x1xf32> to vector<8x256xf32>
    %7 = arith.addf %4, %6 : vector<8x256xf32>
    %c0_6 = arith.constant 0 : index
    %c0_7 = arith.constant 0 : index
    %c0_8 = arith.constant 0 : index
    %8 = vector.load %arg1[%c0_6, %c0_7, %c0_8] : memref<1x8x256xf32, #tpu.memory_space<vmem>>, vector<1x8x256xf32>
    %9 = vector.shape_cast %8 : vector<1x8x256xf32> to vector<8x256xf32>
    %c0_9 = arith.constant 0 : index
    %c0_10 = arith.constant 0 : index
    %10 = vector.load %arg3[%c0_9, %c0_10] : memref<8x1xf32, #tpu.memory_space<vmem>>, vector<8x1xf32>
    %11 = vector.broadcast %10 : vector<8x1xf32> to vector<8x256xf32>
    %12 = arith.mulf %9, %11 : vector<8x256xf32>
    %c0_11 = arith.constant 0 : index
    %c0_12 = arith.constant 0 : index
    %13 = vector.load %arg4[%c0_11, %c0_12] : memref<8x1xf32, #tpu.memory_space<vmem>>, vector<8x1xf32>
    %14 = vector.broadcast %13 : vector<8x1xf32> to vector<8x256xf32>
    %15 = arith.addf %12, %14 : vector<8x256xf32>
    %16 = arith.addf %15, %7 : vector<8x256xf32>
    %cst = arith.constant 0.000000e+00 : f32
    %17 = vector.broadcast %cst : f32 to vector<8x256xf32>
    %18 = arith.maximumf %16, %17 : vector<8x256xf32>
    %c0_13 = arith.constant 0 : index
    %c0_14 = arith.constant 0 : index
    %c0_15 = arith.constant 0 : index
    %19 = vector.load %arg7[%c0_13, %c0_14, %c0_15] : memref<1x8x256xf32, #tpu.memory_space<vmem>>, vector<1x8x256xf32>
    %20 = vector.shape_cast %19 : vector<1x8x256xf32> to vector<8x256xf32>
    %21 = vector.shape_cast %18 : vector<8x256xf32> to vector<1x8x256xf32>
    tpu.vector_store %arg7[%c0_13, %c0_14, %c0_15], %21 {strides = array<i32>} : memref<1x8x256xf32, #tpu.memory_space<vmem>>, vector<1x8x256xf32>,
    return
  }
  func.func @transform_0(%arg0: i32) -> (i32, i32, i32) {
    %c0_i32 = arith.constant 0 : i32
    %c0_i32_0 = arith.constant 0 : i32
    %c0_i32_1 = arith.constant 0 : i32
    return %arg0, %c0_i32, %c0_i32_0 : i32, i32, i32
  }
  func.func @transform_1(%arg0: i32) -> (i32, i32, i32) {
    %c0_i32 = arith.constant 0 : i32
    %c0_i32_0 = arith.constant 0 : i32
    %c0_i32_1 = arith.constant 0 : i32
    return %arg0, %c0_i32, %c0_i32_0 : i32, i32, i32
  }
  func.func @transform_2(%arg0: i32) -> (i32, i32) {
    %c0_i32 = arith.constant 0 : i32
    %c0_i32_0 = arith.constant 0 : i32
    %c0_i32_1 = arith.constant 0 : i32
    return %c0_i32, %c0_i32_0 : i32, i32
  }
  func.func @transform_3(%arg0: i32) -> (i32, i32) {
    %c0_i32 = arith.constant 0 : i32
    %c0_i32_0 = arith.constant 0 : i32
    %c0_i32_1 = arith.constant 0 : i32
    return %c0_i32, %c0_i32_0 : i32, i32
  }
  func.func @transform_4(%arg0: i32) -> (i32, i32) {
    %c0_i32 = arith.constant 0 : i32
    %c0_i32_0 = arith.constant 0 : i32
    %c0_i32_1 = arith.constant 0 : i32
    return %c0_i32, %c0_i32_0 : i32, i32
  }
  func.func @transform_5(%arg0: i32) -> (i32, i32) {
    %c0_i32 = arith.constant 0 : i32
    %c0_i32_0 = arith.constant 0 : i32
    %c0_i32_1 = arith.constant 0 : i32
    return %c0_i32, %c0_i32_0 : i32, i32
  }
  func.func @transform_6(%arg0: i32) -> (i32, i32, i32) {
    %c0_i32 = arith.constant 0 : i32
    %c0_i32_0 = arith.constant 0 : i32
    %c0_i32_1 = arith.constant 0 : i32
    return %arg0, %c0_i32, %c0_i32_0 : i32, i32, i32
  }
}

</mosaic_0001>

<bundles_post_ra>
// kernel: spectral_basic_block.5
= control target key start
LH: loop header
LB: loop body
LE: loop exit
PB: predicated region body
PF: predicated region fallthrough
CT: control target
= control target key end

     0   :  { %s452_s21 = smov 0   ;;  %s484_s0 = inlined_call_operand.vmem [shape: f32[2,8,256], index: 0, kind: input, shape index: {}]   ;;  %s485_s1 = inlined_call_operand.vmem [shape: f32[2,8,256], index: 1, kind: input, shape index: {}]   ;;  %s486_s2 = inlined_call_operand.vmem [shape: f32[8,1], index: 2, kind: input, shape index: {}]   ;;  %s487_s3 = inlined_call_operand.vmem [shape: f32[8,1], index: 3, kind: input, shape index: {}]   ;;  %s488_s4 = inlined_call_operand.vmem [shape: f32[8,1], index: 4, kind: input, shape index: {}]   ;;  %s489_s5 = inlined_call_operand.vmem [shape: f32[8,1], index: 5, kind: input, shape index: {}]   ;;  %s490_s6 = inlined_call_operand.vmem [shape: f32[2,8,256], index: 6, kind: output, shape index: {}]  }
   0x1 LB: > { %s381_s22 = sadd.s32 4294967295, %s414_s21   ;;  %p385_p0 = scmp.ge.s32.totalorder %s414_s21, 1  ;;  %s414_s21 = sphi %s452_s21, %s16_s21  }
   0x2   : > { %p222_p1 = scmp.lt.s32.totalorder %s414_s21, 3 }
   0x4   : > { %p223_p2 = pnand %p385_p0, %p222_p1 }
   0x5   : > { %p257_p3 = scmp.lt.s32.totalorder (!%p223_p2), %s381_s22, 1 }
   0x6   : > { %226 = sbr.rel (%p223_p2) target bundleno = 150 (0x96), region = 44 }
   0xb   : > { %v282_v0 = vld [vmem:[%s489_s5] sm:$0xff]  ;;  %v416_v2 = vmov 0   ;;  %s492_s22 = smov (!%p257_p3, %s381_s22), 1 }
   0xc   : > { %v274_v1 = vld [vmem:[%s488_s4] sm:$0xff]  ;;  %407 = vset.pattern.permute.xlu1 %v416_v2  ;;  %406 = vset.pattern.permute.xlu0 %v416_v2  ;;  %s394_s7 = sshll.u32 %s492_s22, 4 }
   0xd   : > { %285 = vperm.xlu1 %407, %v282_v0   ;;  %277 = vperm.xlu0 %406, %v274_v1   ;;  %v300_v3 = vld [vmem:[%s487_s3] sm:$0xff]  ;;  %s266_s10 = scalar_lea.vmem %s485_s1, %s394_s7  ;;  %s261_s13 = scalar_lea.vmem %s484_s0, %s394_s7 }
   0xe   : > { %v292_v4 = vld [vmem:[%s486_s2] sm:$0xff]  ;;  %v273_v8 = vld [vmem:[%s266_s10 + $0x8] sm:$0xff]  ;;  %s271_s16 = scalar_lea.vmem %s490_s6, %s394_s7 }
   0xf   : > { %v272_v7 = vld [vmem:[%s266_s10] sm:$0xff]  ;;  %v291_v10 = vld [vmem:[%s261_s13 + $0x8] sm:$0xff] }
  0x10   : > { %v290_v9 = vld [vmem:[%s261_s13] sm:$0xff] }
  0x11   : > { %303 = vperm.xlu1 %407, %v300_v3   ;;  %295 = vperm.xlu0 %406, %v292_v4  }
  0x88   : > { %v286_v5 = vpop.permute.xlu1 %285  ;;  %v278_v6 = vpop.permute.xlu0 %277 }
  0x89   : > { %v280_v11 = vmul.f32 %v278_v6, %v272_v7  ;;  %v281_v12 = vmul.f32 %v278_v6, %v273_v8 }
  0x8b   : > { %v288_v17 = vadd.f32 %v286_v5, %v280_v11  ;;  %v289_v18 = vadd.f32 %v286_v5, %v281_v12 }
  0x8c   : > { %v296_v13 = vpop.permute.xlu0 %295  ;;  %v304_v16 = vpop.permute.xlu1 %303 }
  0x8d   : > { %v298_v14 = vmul.f32 %v296_v13, %v290_v9  ;;  %v299_v15 = vmul.f32 %v296_v13, %v291_v10 }
  0x8f   : > { %v306_v19 = vadd.f32 %v304_v16, %v298_v14  ;;  %v307_v20 = vadd.f32 %v304_v16, %v299_v15 }
  0x91   : > { %v308_v21 = vadd.f32 %v306_v19, %v288_v17  ;;  %v309_v22 = vadd.f32 %v307_v20, %v289_v18 }
  0x93   : > { %v310_v23 = vmax.f32 %v308_v21, 0.0  ;;  %v311_v24 = vmax.f32 %v309_v22, 0.0 }
  0x95   : > { %312 = vst [vmem:[%s271_s16] sm:$0xff] %v310_v23  ;;  %313 = vst [vmem:[%s271_s16 + $0x8] sm:$0xff] %v311_v24 }
  0x96 PF: > { %s16_s21 = sadd.s32 1, %s414_s21  }
  0x97   : > { %p13_p4 = scmp.ge.s32.totalorder %s16_s21, 4  }
  0x99   :  { %15 = sbr.rel (!%p13_p4) target bundleno = 1 (0x1), region = 77 }

// kernel: spectral_basic_block.4
= control target key start
LH: loop header
LB: loop body
LE: loop exit
PB: predicated region body
PF: predicated region fallthrough
CT: control target
= control target key end

     0   :  { %s3729_s18 = smov 0   ;;  %s4891_s0 = inlined_call_operand.vmem [shape: f32[2,256,8], index: 0, kind: input, shape index: {}]   ;;  %s4892_s1 = inlined_call_operand.vmem [shape: f32[1,8], index: 1, kind: input, shape index: {}]   ;;  %s4893_s2 = inlined_call_operand.vmem [shape: f32[1,8], index: 2, kind: input, shape index: {}]   ;;  %s4894_s3 = inlined_call_operand.vmem [shape: bf16[8,72], index: 3, kind: input, shape index: {}]   ;;  %s4895_s4 = inlined_call_operand.vmem [shape: f32[2,8,256], index: 4, kind: output, shape index: {0}]   ;;  %s4896_s5 = inlined_call_operand.vmem [shape: f32[2,8,2], index: 5, kind: output, shape index: {1}]  }
   0x1 LB: > { %s3014_s19 = sadd.s32 4294967295, %s3688_s18   ;;  %p3018_p0 = scmp.ge.s32.totalorder %s3688_s18, 1  ;;  %s3688_s18 = sphi %s3729_s18, %s16_s18  }
   0x2   : > { %p190_p1 = scmp.lt.s32.totalorder %s3688_s18, 3 }
   0x4   : > { %p191_p2 = pnand %p3018_p0, %p190_p1 }
   0x5   : > { %p3739_p3 = scmp.lt.s32.totalorder (!%p191_p2), %s3014_s19, 1  ;;  %s3691_s29 = smov (!%p191_p2), 8  }
   0x6   : > { %194 = sbr.rel (%p191_p2) target bundleno = 1020 (0x3fc), region = 36  ;;  %s3692_s30 = smov (!%p191_p2), 16  }
   0x7   : > { %s3693_s6 = smov (!%p191_p2), 24   ;;  %s3694_s7 = smov (!%p191_p2), 32  }
   0x8   : > { %s3695_s8 = smov (!%p191_p2), 40   ;;  %s3696_s9 = smov (!%p191_p2), 48  }
   0x9   : > { %s3697_s10 = smov (!%p191_p2), 56   ;;  %s3698_s11 = smov (!%p191_p2), 64  }
   0xb   : > { %vm379_vm0 = vcmask 64512   ;;  %vm388_vm1 = vcmask 57344   ;;  %vm382_vm2 = vcmask 58368   ;;  %v3690_v0 = vmov 0.0   ;;  %s4899_s19 = smov (!%p3739_p3, %s3014_s19), 1 }
   0xc   : > { %380 = vst.msk [vmem:[#allocation2] sm:$0xff] %vm379_vm0, %v3690_v0  ;;  %381 = vst.msk [vmem:[#allocation2 + $0x8] sm:$0xff] %vm379_vm0, %v3690_v0  ;;  %s3333_s21 = sshll.u32 %s4899_s19, 8  ;;  %v3795_v1 = vld [vmem:[%s4892_s1] ss:$0 sm:$0xff]  ;;  %vm618_vm3 = vcmask 60416  }
   0xd   : > { %385 = vst.msk [vmem:[#allocation2 + $0x198] sm:$0xff] %vm379_vm0, %v3690_v0  ;;  %386 = vst.msk [vmem:[#allocation2 + $0x1a0] sm:$0xff] %vm379_vm0, %v3690_v0  ;;  %s3800_s26 = scalar_lea.vmem %s4891_s0, %s3333_s21  ;;  %v3805_v2 = vld [vmem:[%s4893_s2] ss:$0 sm:$0xff]  ;;  %vm875_vm4 = vcmask 126016   ;;  %vm1132_vm5 = vcmask 191616  }
   0xe   : > { %390 = vst.msk [vmem:[#allocation2 + $0x18] sm:$0x1] %vm388_vm1, %v3690_v0  ;;  %391 = vst.msk [vmem:[#allocation2 + $0x30] sm:$0x1] %vm388_vm1, %v3690_v0  ;;  %v237_v3 = vld [vmem:[%s3800_s26] sm:$0xff]  ;;  %v238_v4 = vld [vmem:[%s3800_s26 + $0x8] sm:$0xff] }
   0xf   : > { %392 = vst.msk [vmem:[#allocation2 + $0x48] sm:$0x1] %vm388_vm1, %v3690_v0  ;;  %393 = vst.msk [vmem:[#allocation2 + $0x60] sm:$0x1] %vm388_vm1, %v3690_v0  ;;  %v239_v5 = vld [vmem:[%s3800_s26 + $0x10] sm:$0xff]  ;;  %v276_v6 = vmul.f32 %v3795_v1, %v237_v3  ;;  %v277_v7 = vmul.f32 %v3795_v1, %v238_v4  ;;  %v240_v9 = vld [vmem:[%s3800_s26 + $0x18] sm:$0xff] }
  0x10   : > { %394 = vst.msk [vmem:[#allocation2 + $0x78] sm:$0x1] %vm388_vm1, %v3690_v0  ;;  %395 = vst.msk [vmem:[#allocation2 + $0x90] sm:$0x1] %vm388_vm1, %v3690_v0  ;;  %v278_v8 = vmul.f32 %v3795_v1, %v239_v5  ;;  %v241_v10 = vld [vmem:[%s3800_s26 + $0x20] sm:$0xff]  ;;  %v242_v11 = vld [vmem:[%s3800_s26 + $0x28] sm:$0xff]  ;;  %v279_v14 = vmul.f32 %v3795_v1, %v240_v9 }
  0x11   : > { %396 = vst.msk [vmem:[#allocation2 + $0xa8] sm:$0x1] %vm388_vm1, %v3690_v0  ;;  %397 = vst.msk [vmem:[#allocation2 + $0xc0] sm:$0x1] %vm388_vm1, %v3690_v0  ;;  %v280_v15 = vmul.f32 %v3795_v1, %v241_v10  ;;  %v281_v16 = vmul.f32 %v3795_v1, %v242_v11  ;;  %v243_v17 = vld [vmem:[%s3800_s26 + $0x30] sm:$0xff]  ;;  %v315_v19 = vadd.f32 %v3805_v2, %v276_v6  ;;  %v244_v22 = vld [vmem:[%s3800_s26 + $0x38] sm:$0xff] }
  0x12   : > { %398 = vst.msk [vmem:[#allocation2 + $0xd8] sm:$0x1] %vm388_vm1, %v3690_v0  ;;  %399 = vst.msk [vmem:[#allocation2 + $0xf0] sm:$0x1] %vm388_vm1, %v3690_v0  ;;  %v316_v21 = vadd.f32 %v3805_v2, %v277_v7  ;;  %v317_v23 = vadd.f32 %v3805_v2, %v278_v8  ;;  %v318_v24 = vadd.f32 %v3805_v2, %v279_v14  ;;  %v245_v27 = vld [vmem:[%s3800_s26 + $0x40] sm:$0xff]  ;;  %v246_v28 = vld [vmem:[%s3800_s26 + $0x48] sm:$0xff] }
  0x13   : > { %400 = vst.msk [vmem:[#allocation2 + $0x108] sm:$0x1] %vm388_vm1, %v3690_v0  ;;  %401 = vst.msk [vmem:[#allocation2 + $0x120] sm:$0x1] %vm388_vm1, %v3690_v0  ;;  %v651_v12 = vld [vmem:[#allocation2 + $0x1] sm:$0xff]  ;;  %v319_v25 = vadd.f32 %v3805_v2, %v280_v15  ;;  %v320_v26 = vadd.f32 %v3805_v2, %v281_v16  ;;  %v247_v29 = vld [vmem:[%s3800_s26 + $0x50] sm:$0xff]  ;;  %v282_v32 = vmul.f32 %v3795_v1, %v243_v17 }
  0x14   : > { %402 = vst.msk [vmem:[#allocation2 + $0x138] sm:$0x1] %vm388_vm1, %v3690_v0  ;;  %403 = vst.msk [vmem:[#allocation2 + $0x150] sm:$0x1] %vm388_vm1, %v3690_v0  ;;  %v3367_v18 = vpack.c.bf16 %v651_v12, %v651_v12  ;;  %v347_v30 = vmax.f32 %v315_v19, 0.0  ;;  %v348_v31 = vmax.f32 %v316_v21, 0.0  ;;  %v283_v33 = vmul.f32 %v3795_v1, %v244_v22 }
  0x15   : > { %404 = vst.msk [vmem:[#allocation2 + $0x168] sm:$0x1] %vm388_vm1, %v3690_v0  ;;  %405 = vst.msk [vmem:[#allocation2 + $0x180] sm:$0x1] %vm388_vm1, %v3690_v0  ;;  %v248_v34 = vld [vmem:[%s3800_s26 + $0x58] sm:$0xff]  ;;  %v249_v35 = vld [vmem:[%s3800_s26 + $0x60] sm:$0xff]  ;;  %v321_v41 = vadd.f32 %v3805_v2, %v282_v32  ;;  %v284_v43 = vmul.f32 %v3795_v1, %v245_v27  ;;  %v285_v44 = vmul.f32 %v3795_v1, %v246_v28 }
  0x16   : > { %408 = vst.msk [vmem:[#allocation2 + $0x29] sm:$0x1] %vm388_vm1, %v3690_v0  ;;  %409 = vst.msk [vmem:[#allocation2 + $0x41] sm:$0x1] %vm388_vm1, %v3690_v0  ;;  %779 = vrot.lane.b32.xlu0 %v3367_v18, %s3691_s29  ;;  %v250_v36 = vld [vmem:[%s3800_s26 + $0x68] sm:$0xff]  ;;  %v349_v37 = vmax.f32 %v317_v23, 0.0  ;;  %v322_v42 = vadd.f32 %v3805_v2, %v283_v33  ;;  %v286_v45 = vmul.f32 %v3795_v1, %v247_v29 }
  0x17   : > { %410 = vst.msk [vmem:[#allocation2 + $0x59] sm:$0x1] %vm388_vm1, %v3690_v0  ;;  %411 = vst.msk [vmem:[#allocation2 + $0x71] sm:$0x1] %vm388_vm1, %v3690_v0  ;;  %v350_v38 = vmax.f32 %v318_v24, 0.0  ;;  %v351_v39 = vmax.f32 %v319_v25, 0.0  ;;  %v287_v46 = vmul.f32 %v3795_v1, %v248_v34  ;;  %v288_v47 = vmul.f32 %v3795_v1, %v249_v35 }
  0x18   : > { %412 = vst.msk [vmem:[#allocation2 + $0x89] sm:$0x1] %vm388_vm1, %v3690_v0  ;;  %413 = vst.msk [vmem:[#allocation2 + $0xa1] sm:$0x1] %vm388_vm1, %v3690_v0  ;;  %v352_v40 = vmax.f32 %v320_v26, 0.0  ;;  %v289_v48 = vmul.f32 %v3795_v1, %v250_v36  ;;  %v251_v49 = vld [vmem:[%s3800_s26 + $0x70] sm:$0xff]  ;;  %v323_v53 = vadd.f32 %v3805_v2, %v284_v43  ;;  %v324_v54 = vadd.f32 %v3805_v2, %v285_v44 }
  0x19   : > { %414 = vst.msk [vmem:[#allocation2 + $0xb9] sm:$0x1] %vm388_vm1, %v3690_v0  ;;  %415 = vst.msk [vmem:[#allocation2 + $0xd1] sm:$0x1] %vm388_vm1, %v3690_v0  ;;  %v252_v50 = vld [vmem:[%s3800_s26 + $0x78] sm:$0xff]  ;;  %v353_v51 = vmax.f32 %v321_v41, 0.0  ;;  %v325_v55 = vadd.f32 %v3805_v2, %v286_v45  ;;  %v326_v56 = vadd.f32 %v3805_v2, %v287_v46  ;;  %v327_v57 = vadd.f32 %v3805_v2, %v288_v47 }
  0x1a   : > { %416 = vst.msk [vmem:[#allocation2 + $0xe9] sm:$0x1] %vm388_vm1, %v3690_v0  ;;  %417 = vst.msk [vmem:[#allocation2 + $0x101] sm:$0x1] %vm388_vm1, %v3690_v0  ;;  %v354_v52 = vmax.f32 %v322_v42, 0.0  ;;  %v328_v58 = vadd.f32 %v3805_v2, %v289_v48  ;;  %v253_v59 = vld [vmem:[%s3800_s26 + $0x80] sm:$0xff]  ;;  %v291_v3 = vmul.f32 %v3795_v1, %v252_v50 }
  0x1b   : > { %418 = vst.msk [vmem:[#allocation2 + $0x119] sm:$0x1] %vm388_vm1, %v3690_v0  ;;  %419 = vst.msk [vmem:[#allocation2 + $0x131] sm:$0x1] %vm388_vm1, %v3690_v0  ;;  %v254_v60 = vld [vmem:[%s3800_s26 + $0x88] sm:$0xff]  ;;  %v255_v61 = vld [vmem:[%s3800_s26 + $0x90] sm:$0xff] }
  0x1c   : > { %420 = vst.msk [vmem:[#allocation2 + $0x149] sm:$0x1] %vm388_vm1, %v3690_v0  ;;  %421 = vst.msk [vmem:[#allocation2 + $0x161] sm:$0x1] %vm388_vm1, %v3690_v0  ;;  %v355_v62 = vmax.f32 %v323_v53, 0.0  ;;  %v356_v63 = vmax.f32 %v324_v54, 0.0  ;;  %v330_v12 = vadd.f32 %v3805_v2, %v291_v3  ;;  %v293_v14 = vmul.f32 %v3795_v1, %v254_v60 }
  0x1d   : > { %422 = vst.msk [vmem:[#allocation2 + $0x179] sm:$0x1] %vm388_vm1, %v3690_v0  ;;  %423 = vst.msk [vmem:[#allocation2 + $0x191] sm:$0x1] %vm388_vm1, %v3690_v0  ;;  %v256_v4 = vld [vmem:[%s3800_s26 + $0x98] sm:$0xff]  ;;  %v257_v5 = vld [vmem:[%s3800_s26 + $0xa0] sm:$0xff]  ;;  %v294_v17 = vmul.f32 %v3795_v1, %v255_v61 }
  0x1e   : > { %383 = vst.msk [vmem:[#allocation2 + $0x10] sm:$0x3] %vm382_vm2, %v3690_v0  ;;  %387 = vst.msk [vmem:[#allocation2 + $0x1a8] sm:$0x3] %vm382_vm2, %v3690_v0  ;;  %v258_v6 = vld [vmem:[%s3800_s26 + $0xa8] sm:$0xff]  ;;  %v357_v7 = vmax.f32 %v325_v55, 0.0  ;;  %v295_v18 = vmul.f32 %v3795_v1, %v256_v4  ;;  %v296_v19 = vmul.f32 %v3795_v1, %v257_v5 }
  0x1f   : > { %389 = vst.msk [vmem:[#allocation2] sm:$0x1] %vm388_vm1, %v3690_v0  ;;  %406 = vst.msk [vmem:[#allocation2 + $0x198] sm:$0x1] %vm388_vm1, %v3690_v0  ;;  %v358_v8 = vmax.f32 %v326_v56, 0.0  ;;  %v359_v9 = vmax.f32 %v327_v57, 0.0  ;;  %v333_v32 = vadd.f32 %v3805_v2, %v294_v17 }
  0x20   : > { %407 = vst.msk [vmem:[#allocation2 + $0x11] sm:$0x1] %vm388_vm1, %v3690_v0  ;;  %424 = vst.msk [vmem:[#allocation2 + $0x1a9] sm:$0x1] %vm388_vm1, %v3690_v0  ;;  %v290_v0 = vmul.f32 %v3795_v1, %v251_v49  ;;  %v360_v10 = vmax.f32 %v328_v58, 0.0  ;;  %v362_v25 = vmax.f32 %v330_v12, 0.0  ;;  %v334_v33 = vadd.f32 %v3805_v2, %v295_v18 }
  0x21   : > { %426 = vst.msk [vmem:[#allocation2 + $0x19] sm:$0xff] %vm379_vm0, %v347_v30  ;;  %427 = vst.msk [vmem:[#allocation2 + $0x21] sm:$0xff] %vm379_vm0, %v348_v31  ;;  %v259_v26 = vld [vmem:[%s3800_s26 + $0xb0] sm:$0xff]  ;;  %v332_v31 = vadd.f32 %v3805_v2, %v293_v14  ;;  %v335_v36 = vadd.f32 %v3805_v2, %v296_v19  ;;  %v365_v43 = vmax.f32 %v333_v32, 0.0  ;;  %v262_v48 = vld [vmem:[%s3800_s26 + $0xc8] sm:$0xff]  ;;  %vm1389_vm6 = vcmask 257216  }
  0x22   : > { %428 = vst.msk [vmem:[#allocation2 + $0x31] sm:$0xff] %vm379_vm0, %v349_v37  ;;  %429 = vst.msk [vmem:[#allocation2 + $0x39] sm:$0xff] %vm379_vm0, %v350_v38  ;;  %v329_v11 = vadd.f32 %v3805_v2, %v290_v0  ;;  %v298_v38 = vmul.f32 %v3795_v1, %v259_v26  ;;  %v366_v44 = vmax.f32 %v334_v33, 0.0  ;;  %v263_v49 = vld [vmem:[%s3800_s26 + $0xd0] sm:$0xff]  ;;  %v264_v53 = vld [vmem:[%s3800_s26 + $0xd8] sm:$0xff]  ;;  %vm1646_vm7 = vcmask 322816  }
  0x23   : > { %430 = vst.msk [vmem:[#allocation2 + $0x49] sm:$0xff] %vm379_vm0, %v351_v39  ;;  %431 = vst.msk [vmem:[#allocation2 + $0x51] sm:$0xff] %vm379_vm0, %v352_v40  ;;  %v260_v39 = vld [vmem:[%s3800_s26 + $0xb8] sm:$0xff]  ;;  %v261_v40 = vld [vmem:[%s3800_s26 + $0xc0] sm:$0xff]  ;;  %v364_v42 = vmax.f32 %v332_v31, 0.0  ;;  %v367_v45 = vmax.f32 %v335_v36, 0.0  ;;  %v303_v0 = vmul.f32 %v3795_v1, %v264_v53 }
  0x24   : > { %432 = vst.msk [vmem:[#allocation2 + $0x61] sm:$0xff] %vm379_vm0, %v353_v51  ;;  %433 = vst.msk [vmem:[#allocation2 + $0x69] sm:$0xff] %vm379_vm0, %v354_v52  ;;  %v361_v24 = vmax.f32 %v329_v11, 0.0  ;;  %v337_v47 = vadd.f32 %v3805_v2, %v298_v38  ;;  %v299_v51 = vmul.f32 %v3795_v1, %v260_v39  ;;  %v300_v52 = vmul.f32 %v3795_v1, %v261_v40  ;;  %v265_v54 = vld [vmem:[%s3800_s26 + $0xe0] sm:$0xff]  ;;  %v266_v55 = vld [vmem:[%s3800_s26 + $0xe8] sm:$0xff]  ;;  %s3334_s14 = sshll.u32 %s4899_s19, 4 }
  0x25   : > { %v652_v13 = vld [vmem:[#allocation2 + $0x9] sm:$0xff]  ;;  %434 = vst.msk [vmem:[#allocation2 + $0x79] sm:$0xff] %vm379_vm0, %v355_v62  ;;  %435 = vst.msk [vmem:[#allocation2 + $0x81] sm:$0xff] %vm379_vm0, %v356_v63  ;;  %v301_v62 = vmul.f32 %v3795_v1, %v262_v48  ;;  %v302_v63 = vmul.f32 %v3795_v1, %v263_v49  ;;  %v304_v3 = vmul.f32 %v3795_v1, %v265_v54  ;;  %v268_v48 = vld [vmem:[%s3800_s26 + $0xf8] sm:$0xff]  ;;  %vm1903_vm8 = vcmask 388416   ;;  %s231_s17 = scalar_lea.vmem %s4895_s4, %s3334_s14  ;;  %s3023_s20 = sshll.u32 %s4899_s19, 3 }
  0x26   : > { %v3368_v20 = vpack.c.bf16 %v652_v13, %v652_v13  ;;  %v292_v13 = vmul.f32 %v3795_v1, %v253_v59  ;;  %436 = vst.msk [vmem:[#allocation2 + $0x91] sm:$0xff] %vm379_vm0, %v357_v7  ;;  %437 = vst.msk [vmem:[#allocation2 + $0x99] sm:$0xff] %vm379_vm0, %v358_v8  ;;  %v369_v59 = vmax.f32 %v337_v47, 0.0  ;;  %v338_v60 = vadd.f32 %v3805_v2, %v299_v51  ;;  %v458_v26 = vld [vmem:[#allocation2] sm:$0xff]  ;;  %v267_v47 = vld [vmem:[%s3800_s26 + $0xf0] sm:$0xff]  ;;  %s235_s23 = scalar_lea.vmem %s4896_s5, %s3023_s20 }
  0x27   : > { %438 = vst.msk [vmem:[#allocation2 + $0xa9] sm:$0xff] %vm379_vm0, %v359_v9  ;;  %439 = vst.msk [vmem:[#allocation2 + $0xb1] sm:$0xff] %vm379_vm0, %v360_v10  ;;  %v339_v61 = vadd.f32 %v3805_v2, %v300_v52  ;;  %v305_v4 = vmul.f32 %v3795_v1, %v266_v55  ;;  %v340_v10 = vadd.f32 %v3805_v2, %v301_v62  ;;  %vm2161_vm9 = vcmask 454016  }
  0x28   : > { %781 = vrot.lane.b32.xlu0 %v3368_v20, %s3691_s29  ;;  %v653_v15 = vld [vmem:[#allocation2 + $0x19] sm:$0xff]  ;;  %v654_v16 = vld [vmem:[#allocation2 + $0x21] sm:$0xff]  ;;  %v297_v20 = vmul.f32 %v3795_v1, %v258_v6  ;;  %v331_v29 = vadd.f32 %v3805_v2, %v292_v13  ;;  %440 = vst.msk [vmem:[#allocation2 + $0xc1] sm:$0xff] %vm379_vm0, %v361_v24  ;;  %441 = vst.msk [vmem:[#allocation2 + $0xc9] sm:$0xff] %vm379_vm0, %v362_v25  ;;  %v370_v7 = vmax.f32 %v338_v60, 0.0  ;;  %vm2418_vm10 = vcmask 519616  }
  0x29   : > { %v3369_v21 = vpack.c.bf16 %v653_v15, %v653_v15  ;;  %v655_v22 = vld [vmem:[#allocation2 + $0x31] sm:$0xff]  ;;  %v3370_v27 = vpack.c.bf16 %v654_v16, %v654_v16  ;;  %v656_v34 = vld [vmem:[#allocation2 + $0x39] sm:$0xff]  ;;  %443 = vst.msk [vmem:[#allocation2 + $0xe1] sm:$0xff] %vm379_vm0, %v364_v42  ;;  %444 = vst.msk [vmem:[#allocation2 + $0xf1] sm:$0xff] %vm379_vm0, %v365_v43  ;;  %v371_v8 = vmax.f32 %v339_v61, 0.0  ;;  %v341_v11 = vadd.f32 %v3805_v2, %v302_v63 }
  0x2a   : > { %v657_v23 = vld [vmem:[#allocation2 + $0x49] sm:$0xff]  ;;  %v3371_v28 = vpack.c.bf16 %v655_v22, %v655_v22  ;;  %v363_v35 = vmax.f32 %v331_v29, 0.0  ;;  %v336_v37 = vadd.f32 %v3805_v2, %v297_v20  ;;  %v3372_v50 = vpack.c.bf16 %v656_v34, %v656_v34  ;;  %v658_v56 = vld [vmem:[#allocation2 + $0x51] sm:$0xff]  ;;  %445 = vst.msk [vmem:[#allocation2 + $0xf9] sm:$0xff] %vm379_vm0, %v366_v44  ;;  %446 = vst.msk [vmem:[#allocation2 + $0x109] sm:$0xff] %vm379_vm0, %v367_v45 }
  0x2b   : > { %783 = vrot.lane.b32.xlu1 %v3369_v21, %s3691_s29  ;;  %v3373_v30 = vpack.c.bf16 %v657_v23, %v657_v23  ;;  %v659_v41 = vld [vmem:[#allocation2 + $0x61] sm:$0xff]  ;;  %448 = vst.msk [vmem:[#allocation2 + $0x121] sm:$0xff] %vm379_vm0, %v369_v59  ;;  %v3374_v5 = vpack.c.bf16 %v658_v56, %v658_v56  ;;  %v660_v9 = vld [vmem:[#allocation2 + $0x69] sm:$0xff]  ;;  %v342_v12 = vadd.f32 %v3805_v2, %v303_v0  ;;  %449 = vst.msk [vmem:[#allocation2 + $0x129] sm:$0xff] %vm379_vm0, %v370_v7  ;;  %vm2675_vm11 = vcmask 585216  }
  0x2c   : > { %787 = vrot.lane.b32.xlu0 %v3371_v28, %s3691_s29  ;;  %442 = vst.msk [vmem:[#allocation2 + $0xd9] sm:$0xff] %vm379_vm0, %v363_v35  ;;  %v368_v46 = vmax.f32 %v336_v37, 0.0  ;;  %v3375_v57 = vpack.c.bf16 %v659_v41, %v659_v41  ;;  %v661_v58 = vld [vmem:[#allocation2 + $0x79] sm:$0xff]  ;;  %v343_v13 = vadd.f32 %v3805_v2, %v304_v3  ;;  %450 = vst.msk [vmem:[#allocation2 + $0x139] sm:$0xff] %vm379_vm0, %v371_v8  ;;  %v372_v16 = vmax.f32 %v340_v10, 0.0  ;;  %v662_v22 = vld [vmem:[#allocation2 + $0x81] sm:$0xff] }
  0x2d   : > { %v3377_v6 = vpack.c.bf16 %v661_v58, %v661_v58  ;;  %v663_v14 = vld [vmem:[#allocation2 + $0x91] sm:$0xff]  ;;  %v344_v15 = vadd.f32 %v3805_v2, %v305_v4  ;;  %v373_v17 = vmax.f32 %v341_v11, 0.0  ;;  %v374_v18 = vmax.f32 %v342_v12, 0.0  ;;  %v461_v32 = vld [vmem:[#allocation2 + $0x20] sm:$0xff]  ;;  %v464_v41 = vld [vmem:[#allocation2 + $0x48] sm:$0xff] }
  0x2e   : > { %447 = vst.msk [vmem:[#allocation2 + $0x111] sm:$0xff] %vm379_vm0, %v368_v46  ;;  %v3376_v19 = vpack.c.bf16 %v660_v9, %v660_v9  ;;  %v375_v20 = vmax.f32 %v343_v13, 0.0  ;;  %v3379_v23 = vpack.c.bf16 %v663_v14, %v663_v14  ;;  %451 = vst.msk [vmem:[#allocation2 + $0x141] sm:$0xff] %vm379_vm0, %v372_v16  ;;  %v665_v24 = vld [vmem:[#allocation2 + $0xa9] sm:$0xff]  ;;  %v3378_v25 = vpack.c.bf16 %v662_v22, %v662_v22  ;;  %v460_v29 = vld [vmem:[#allocation2 + $0x18] sm:$0xff] }
  0x2f   : > { %785 = vrot.lane.b32.xlu1 %v3370_v27, %s3691_s29  ;;  %v376_v21 = vmax.f32 %v344_v15, 0.0  ;;  %452 = vst.msk [vmem:[#allocation2 + $0x151] sm:$0xff] %vm379_vm0, %v373_v17  ;;  %453 = vst.msk [vmem:[#allocation2 + $0x159] sm:$0xff] %vm379_vm0, %v374_v18  ;;  %v664_v27 = vld [vmem:[#allocation2 + $0x99] sm:$0xff]  ;;  %v3939_v28 = vpack.c.bf16 %v665_v24, %v665_v24  ;;  %v667_v31 = vld [vmem:[#allocation2 + $0xc1] sm:$0xff]  ;;  %v3335_v37 = vpack.c.bf16 %v458_v26, %v458_v26  ;;  %vm2821_vm12 = vcmask 588800  }
  0x30   : > { %791 = vrot.lane.b32.xlu0 %v3373_v30, %s3691_s29  ;;  %454 = vst.msk [vmem:[#allocation2 + $0x169] sm:$0xff] %vm379_vm0, %v375_v20  ;;  %v459_v30 = vld [vmem:[#allocation2 + $0x8] sm:$0xff]  ;;  %v666_v33 = vld [vmem:[#allocation2 + $0xb1] sm:$0xff]  ;;  %v3380_v35 = vpack.c.bf16 %v664_v27, %v664_v27  ;;  %v3337_v38 = vpack.c.bf16 %v460_v29, %v460_v29  ;;  %v3944_v42 = vpack.c.bf16 %v667_v31, %v667_v31  ;;  %v1179_v46 = vld [vmem:[#allocation2 + $0xc0] sm:$0xff]  ;;  %vm2919_vm13 = vcmask 7168  }
  0x31   : > { %455 = vst.msk [vmem:[#allocation2 + $0x171] sm:$0xff] %vm379_vm0, %v376_v21  ;;  %v462_v34 = vld [vmem:[#allocation2 + $0x30] sm:$0xff]  ;;  %v3336_v39 = vpack.c.bf16 %v459_v30, %v459_v30  ;;  %v463_v40 = vld [vmem:[#allocation2 + $0x38] sm:$0xff]  ;;  %v3338_v44 = vpack.c.bf16 %v461_v32, %v461_v32  ;;  %v466_v51 = vld [vmem:[#allocation2 + $0x60] sm:$0xff]  ;;  %v3951_v53 = vpack.c.bf16 %v666_v33, %v666_v33  ;;  %v3341_v60 = vpack.c.bf16 %v464_v41, %v464_v41 }
  0x32   : > { %v668_v36 = vld [vmem:[#allocation2 + $0xc9] sm:$0xff]  ;;  %619 = vst.msk [vmem:[#allocation3] sm:$0xf] %vm618_vm3, %v3335_v37  ;;  %621 = vst.msk [vmem:[#allocation3 + $0x8] sm:$0xf] %vm618_vm3, %v3337_v38  ;;  %v3339_v49 = vpack.c.bf16 %v462_v34, %v462_v34  ;;  %v3340_v54 = vpack.c.bf16 %v463_v40, %v463_v40  ;;  %v468_v55 = vld [vmem:[#allocation2 + $0x78] sm:$0xff]  ;;  %v3963_v3 = vpack.c.bf16 %v1179_v46, %v1179_v46 }
  0x33   : > { %789 = vrot.lane.b32.xlu1 %v3372_v50, %s3691_s29  ;;  %v669_v43 = vld [vmem:[#allocation2 + $0xd9] sm:$0xff]  ;;  %v465_v45 = vld [vmem:[#allocation2 + $0x50] sm:$0xff]  ;;  %620 = vst.msk [vmem:[#allocation3 + $0x4] sm:$0xf] %vm618_vm3, %v3336_v39  ;;  %v1180_v50 = vld [vmem:[#allocation2 + $0xc8] sm:$0xff]  ;;  %v3955_v58 = vpack.c.bf16 %v668_v36, %v668_v36  ;;  %v306_v10 = vmul.f32 %v3795_v1, %v267_v47  ;;  %v307_v11 = vmul.f32 %v3795_v1, %v268_v48  ;;  %vm2926_vm14 = vcmask 15368  }
  0x34   : > { %795 = vrot.lane.b32.xlu0 %v3375_v57, %s3691_s29  ;;  %v467_v52 = vld [vmem:[#allocation2 + $0x68] sm:$0xff]  ;;  %622 = vst.msk [vmem:[#allocation3 + $0xc] sm:$0xf] %vm618_vm3, %v3338_v44  ;;  %v469_v56 = vld [vmem:[#allocation2 + $0x80] sm:$0xff]  ;;  %v470_v57 = vld [vmem:[#allocation2 + $0x90] sm:$0xff]  ;;  %v3957_v59 = vpack.c.bf16 %v669_v43, %v669_v43  ;;  %v3342_v61 = vpack.c.bf16 %v465_v45, %v465_v45  ;;  %v3965_v4 = vpack.c.bf16 %v1180_v50, %v1180_v50 }
  0x35   : > { %623 = vst.msk [vmem:[#allocation3 + $0x10] sm:$0xf] %vm618_vm3, %v3339_v49  ;;  %v471_v62 = vld [vmem:[#allocation2 + $0x98] sm:$0xff]  ;;  %v472_v63 = vld [vmem:[#allocation2 + $0xa8] sm:$0xff]  ;;  %v473_v0 = vld [vmem:[#allocation2 + $0xb0] sm:$0xff]  ;;  %v3971_v12 = vpack.c.bf16 %v468_v55, %v468_v55  ;;  %v3973_v13 = vpack.c.bf16 %v469_v56, %v469_v56  ;;  %v3977_v16 = vpack.c.bf16 %v470_v57, %v470_v57  ;;  %v345_v21 = vadd.f32 %v3805_v2, %v306_v10 }
  0x36   : > { %624 = vst.msk [vmem:[#allocation3 + $0x14] sm:$0xf] %vm618_vm3, %v3340_v54  ;;  %v476_v7 = vld [vmem:[#allocation2 + $0xd8] sm:$0xff]  ;;  %v477_v8 = vld [vmem:[#allocation2 + $0xe0] sm:$0xff]  ;;  %625 = vst.msk [vmem:[#allocation3 + $0x18] sm:$0xf] %vm618_vm3, %v3341_v60  ;;  %v3979_v17 = vpack.c.bf16 %v471_v62, %v471_v62  ;;  %v3981_v18 = vpack.c.bf16 %v472_v63, %v472_v63  ;;  %v346_v22 = vadd.f32 %v3805_v2, %v307_v11 }
  0x37   : > { %793 = vrot.lane.b32.xlu1 %v3374_v5, %s3691_s29  ;;  %v3343_v5 = vpack.c.bf16 %v466_v51, %v466_v51  ;;  %v671_v9 = vld [vmem:[#allocation2 + $0xf1] sm:$0xff]  ;;  %626 = vst.msk [vmem:[#allocation3 + $0x1c] sm:$0xf] %vm618_vm3, %v3342_v61  ;;  %635 = vst.msk [vmem:[#allocation3 + $0x40] sm:$0xf] %vm618_vm3, %v3963_v3  ;;  %v480_v1 = vld [vmem:[#allocation2 + $0x108] sm:$0xff]  ;;  %v3999_v24 = vpack.c.bf16 %v477_v8, %v477_v8 }
  0x38   : > { %799 = vrot.lane.b32.xlu0 %v3377_v6, %s3691_s29  ;;  %v3344_v6 = vpack.c.bf16 %v467_v52, %v467_v52  ;;  %v478_v14 = vld [vmem:[#allocation2 + $0xf0] sm:$0xff]  ;;  %v479_v15 = vld [vmem:[#allocation2 + $0xf8] sm:$0xff]  ;;  %636 = vst.msk [vmem:[#allocation3 + $0x44] sm:$0xf] %vm618_vm3, %v3965_v4  ;;  %629 = vst.msk [vmem:[#allocation3 + $0x28] sm:$0xf] %vm618_vm3, %v3971_v12  ;;  %v3387_v26 = vpack.c.bf16 %v671_v9, %v671_v9  ;;  %v3357_v32 = vpack.c.bf16 %v480_v1, %v480_v1 }
  0x39   : > { %627 = vst.msk [vmem:[#allocation3 + $0x20] sm:$0xf] %vm618_vm3, %v3343_v5  ;;  %v481_v20 = vld [vmem:[#allocation2 + $0x110] sm:$0xff]  ;;  %630 = vst.msk [vmem:[#allocation3 + $0x2c] sm:$0xf] %vm618_vm3, %v3973_v13  ;;  %v3355_v2 = vpack.c.bf16 %v478_v14, %v478_v14  ;;  %v3356_v27 = vpack.c.bf16 %v479_v15, %v479_v15  ;;  %v377_v30 = vmax.f32 %v345_v21, 0.0 }
  0x3a   : > { %628 = vst.msk [vmem:[#allocation3 + $0x24] sm:$0xf] %vm618_vm3, %v3344_v6  ;;  %631 = vst.msk [vmem:[#allocation3 + $0x30] sm:$0xf] %vm618_vm3, %v3977_v16  ;;  %v673_v29 = vld [vmem:[#allocation2 + $0x109] sm:$0xff]  ;;  %v378_v31 = vmax.f32 %v346_v22, 0.0  ;;  %v3358_v33 = vpack.c.bf16 %v481_v20, %v481_v20 }
  0x3b   : > { %797 = vrot.lane.b32.xlu1 %v3376_v19, %s3691_s29  ;;  %v3983_v19 = vpack.c.bf16 %v473_v0, %v473_v0  ;;  %632 = vst.msk [vmem:[#allocation3 + $0x34] sm:$0xf] %vm618_vm3, %v3979_v17  ;;  %633 = vst.msk [vmem:[#allocation3 + $0x38] sm:$0xf] %vm618_vm3, %v3981_v18  ;;  %v482_v34 = vld [vmem:[#allocation2 + $0x120] sm:$0xff]  ;;  %v3389_v40 = vpack.c.bf16 %v673_v29, %v673_v29  ;;  %v484_v43 = vld [vmem:[#allocation2 + $0x138] sm:$0xff] }
  0x3c   : > { %803 = vrot.lane.b32.xlu0 %v3379_v23, %s3691_s29  ;;  %v3997_v23 = vpack.c.bf16 %v476_v7, %v476_v7  ;;  %638 = vst.msk [vmem:[#allocation3 + $0x4c] sm:$0xf] %vm618_vm3, %v3999_v24  ;;  %639 = vst.msk [vmem:[#allocation3 + $0x50] sm:$0xf] %vm618_vm3, %v3355_v2  ;;  %v4025_v37 = vpack.c.bf16 %v482_v34, %v482_v34  ;;  %v672_v39 = vld [vmem:[#allocation2 + $0xf9] sm:$0xff]  ;;  %v675_v41 = vld [vmem:[#allocation2 + $0x121] sm:$0xff]  ;;  %v4036_v46 = vpack.c.bf16 %v484_v43, %v484_v43 }
  0x3d   : > { %634 = vst.msk [vmem:[#allocation3 + $0x3c] sm:$0xf] %vm618_vm3, %v3983_v19  ;;  %640 = vst.msk [vmem:[#allocation3 + $0x54] sm:$0xf] %vm618_vm3, %v3356_v27  ;;  %v485_v44 = vld [vmem:[#allocation2 + $0x140] sm:$0xff]  ;;  %v3388_v45 = vpack.c.bf16 %v672_v39, %v672_v39  ;;  %v674_v48 = vld [vmem:[#allocation2 + $0x111] sm:$0xff]  ;;  %v3391_v49 = vpack.c.bf16 %v675_v41, %v675_v41 }
  0x3e   : > { %637 = vst.msk [vmem:[#allocation3 + $0x48] sm:$0xf] %vm618_vm3, %v3997_v23  ;;  %641 = vst.msk [vmem:[#allocation3 + $0x58] sm:$0xf] %vm618_vm3, %v3357_v32  ;;  %v4038_v47 = vpack.c.bf16 %v485_v44, %v485_v44  ;;  %v677_v50 = vld [vmem:[#allocation2 + $0x139] sm:$0xff]  ;;  %v3390_v51 = vpack.c.bf16 %v674_v48, %v674_v48  ;;  %v676_v52 = vld [vmem:[#allocation2 + $0x129] sm:$0xff] }
  0x3f   : > { %801 = vrot.lane.b32.xlu1 %v3378_v25, %s3691_s29  ;;  %v670_v25 = vld [vmem:[#allocation2 + $0xe1] sm:$0xff]  ;;  %456 = vst.msk [vmem:[#allocation2 + $0x181] sm:$0xff] %vm379_vm0, %v377_v30  ;;  %457 = vst.msk [vmem:[#allocation2 + $0x189] sm:$0xff] %vm379_vm0, %v378_v31  ;;  %v3393_v54 = vpack.c.bf16 %v677_v50, %v677_v50  ;;  %v486_v55 = vld [vmem:[#allocation2 + $0x150] sm:$0xff]  ;;  %v3392_v0 = vpack.c.bf16 %v676_v52, %v676_v52 }
  0x40   : > { %807 = vrot.lane.b32.xlu0 %v3939_v28, %s3691_s29  ;;  %v4019_v36 = vpack.c.bf16 %v670_v25, %v670_v25  ;;  %642 = vst.msk [vmem:[#allocation3 + $0x5c] sm:$0xf] %vm618_vm3, %v3358_v33  ;;  %643 = vst.msk [vmem:[#allocation3 + $0x60] sm:$0xf] %vm618_vm3, %v4025_v37  ;;  %v487_v56 = vld [vmem:[#allocation2 + $0x158] sm:$0xff]  ;;  %v4047_v60 = vpack.c.bf16 %v486_v55, %v486_v55  ;;  %v488_v62 = vld [vmem:[#allocation2 + $0x168] sm:$0xff] }
  0x41   : > { %645 = vst.msk [vmem:[#allocation3 + $0x68] sm:$0xf] %vm618_vm3, %v4036_v46  ;;  %646 = vst.msk [vmem:[#allocation3 + $0x6c] sm:$0xf] %vm618_vm3, %v4038_v47  ;;  %v679_v57 = vld [vmem:[#allocation2 + $0x151] sm:$0xff]  ;;  %v4049_v61 = vpack.c.bf16 %v487_v56, %v487_v56  ;;  %v4056_v5 = vpack.c.bf16 %v488_v62, %v488_v62  ;;  %v678_v7 = vld [vmem:[#allocation2 + $0x141] sm:$0xff] }
  0x42   : > { %v489_v63 = vld [vmem:[#allocation2 + $0x170] sm:$0xff]  ;;  %647 = vst.msk [vmem:[#allocation3 + $0x70] sm:$0xf] %vm618_vm3, %v4047_v60  ;;  %v3395_v8 = vpack.c.bf16 %v679_v57, %v679_v57  ;;  %v3394_v10 = vpack.c.bf16 %v678_v7, %v678_v7  ;;  %v680_v11 = vld [vmem:[#allocation2 + $0x159] sm:$0xff]  ;;  %v908_v15 = vld [vmem:[#allocation2 + $0x2] sm:$0xff] }
  0x43   : > { %805 = vrot.lane.b32.xlu1 %v3380_v35, %s3691_s29  ;;  %v483_v35 = vld [vmem:[#allocation2 + $0x128] sm:$0xff]  ;;  %648 = vst.msk [vmem:[#allocation3 + $0x74] sm:$0xf] %vm618_vm3, %v4049_v61  ;;  %v4058_v6 = vpack.c.bf16 %v489_v63, %v489_v63  ;;  %649 = vst.msk [vmem:[#allocation3 + $0x78] sm:$0xf] %vm618_vm3, %v4056_v5  ;;  %v3396_v1 = vpack.c.bf16 %v680_v11, %v680_v11  ;;  %v682_v20 = vld [vmem:[#allocation2 + $0x171] sm:$0xff]  ;;  %v3399_v21 = vpack.c.bf16 %v908_v15, %v908_v15 }
  0x44   : > { %811 = vrot.lane.b32.xlu0 %v3944_v42, %s3691_s29  ;;  %v4027_v38 = vpack.c.bf16 %v483_v35, %v483_v35  ;;  %v681_v9 = vld [vmem:[#allocation2 + $0x169] sm:$0xff]  ;;  %v910_v22 = vld [vmem:[#allocation2 + $0x1a] sm:$0xff]  ;;  %v4073_v25 = vpack.c.bf16 %v682_v20, %v682_v20  ;;  %v912_v27 = vld [vmem:[#allocation2 + $0x32] sm:$0xff] }
  0x45   : > { %650 = vst.msk [vmem:[#allocation3 + $0x7c] sm:$0xf] %vm618_vm3, %v4058_v6  ;;  %v4067_v14 = vpack.c.bf16 %v681_v9, %v681_v9  ;;  %v3401_v2 = vpack.c.bf16 %v910_v22, %v910_v22  ;;  %v911_v30 = vld [vmem:[#allocation2 + $0x22] sm:$0xff]  ;;  %v3403_v31 = vpack.c.bf16 %v912_v27, %v912_v27  ;;  %v914_v32 = vld [vmem:[#allocation2 + $0x4a] sm:$0xff]  ;;  %v913_v34 = vld [vmem:[#allocation2 + $0x3a] sm:$0xff] }
  0x46   : > { %644 = vst.msk [vmem:[#allocation3 + $0x64] sm:$0xf] %vm618_vm3, %v4027_v38  ;;  %v3402_v33 = vpack.c.bf16 %v911_v30, %v911_v30  ;;  %v3405_v35 = vpack.c.bf16 %v914_v32, %v914_v32  ;;  %v916_v39 = vld [vmem:[#allocation2 + $0x62] sm:$0xff]  ;;  %v915_v41 = vld [vmem:[#allocation2 + $0x52] sm:$0xff]  ;;  %v918_v44 = vld [vmem:[#allocation2 + $0x7a] sm:$0xff] }
  0x47   : > { %809 = vrot.lane.b32.xlu1 %v3951_v53, %s3691_s29  ;;  %v3407_v43 = vpack.c.bf16 %v916_v39, %v916_v39  ;;  %v917_v48 = vld [vmem:[#allocation2 + $0x6a] sm:$0xff]  ;;  %v920_v50 = vld [vmem:[#allocation2 + $0x92] sm:$0xff]  ;;  %v919_v52 = vld [vmem:[#allocation2 + $0x82] sm:$0xff] }
  0x48   : > { %815 = vrot.lane.b32.xlu0 %v3957_v59, %s3691_s29  ;;  %v922_v55 = vld [vmem:[#allocation2 + $0xaa] sm:$0xff]  ;;  %v3410_v56 = vpack.c.bf16 %v919_v52, %v919_v52  ;;  %v921_v57 = vld [vmem:[#allocation2 + $0x9a] sm:$0xff]  ;;  %v924_v63 = vld [vmem:[#allocation2 + $0xc2] sm:$0xff] }
  0x49   : > { %v4092_v62 = vpack.c.bf16 %v922_v55, %v922_v55  ;;  %v923_v7 = vld [vmem:[#allocation2 + $0xb2] sm:$0xff]  ;;  %v926_v9 = vld [vmem:[#allocation2 + $0xda] sm:$0xff]  ;;  %v925_v11 = vld [vmem:[#allocation2 + $0xca] sm:$0xff] }
  0x4a   : > { %v4107_v15 = vpack.c.bf16 %v926_v9, %v926_v9  ;;  %v4111_v20 = vpack.c.bf16 %v925_v11, %v925_v11  ;;  %v929_v27 = vld [vmem:[#allocation2 + $0xfa] sm:$0xff]  ;;  %v932_v30 = vld [vmem:[#allocation2 + $0x122] sm:$0xff]  ;;  %v931_v32 = vld [vmem:[#allocation2 + $0x112] sm:$0xff] }
  0x4b   : > { %813 = vrot.lane.b32.xlu1 %v3955_v58, %s3691_s29  ;;  %v3422_v39 = vpack.c.bf16 %v931_v32, %v931_v32  ;;  %v937_v52 = vld [vmem:[#allocation2 + $0x15a] sm:$0xff] }
  0x4c   : > { %819 = vrot.lane.b32.xlu0 %v3387_v26, %s3691_s29  ;;  %v909_v26 = vld [vmem:[#allocation2 + $0xa] sm:$0xff]  ;;  %v1195_v11 = vld [vmem:[#allocation2 + $0x180] sm:$0xff] }
  0x4d   : > { %v3400_v29 = vpack.c.bf16 %v909_v26, %v909_v26  ;;  %v930_v26 = vld [vmem:[#allocation2 + $0x10a] sm:$0xff] }
  0x4f   : > { %817 = vrot.lane.b32.xlu1 %v4019_v36, %s3691_s29 }
  0x50   : > { %823 = vrot.lane.b32.xlu0 %v3389_v40, %s3691_s29  ;;  %v3404_v40 = vpack.c.bf16 %v913_v34, %v913_v34 }
  0x53   : > { %821 = vrot.lane.b32.xlu1 %v3388_v45, %s3691_s29  ;;  %v3406_v45 = vpack.c.bf16 %v915_v41, %v915_v41 }
  0x54   : > { %827 = vrot.lane.b32.xlu0 %v3391_v49, %s3691_s29  ;;  %v3409_v49 = vpack.c.bf16 %v918_v44, %v918_v44  ;;  %v936_v44 = vld [vmem:[#allocation2 + $0x152] sm:$0xff] }
  0x57   : > { %825 = vrot.lane.b32.xlu1 %v3390_v51, %s3691_s29  ;;  %v3408_v51 = vpack.c.bf16 %v917_v48, %v917_v48  ;;  %v935_v48 = vld [vmem:[#allocation2 + $0x142] sm:$0xff] }
  0x58   : > { %831 = vrot.lane.b32.xlu0 %v3393_v54, %s3691_s29  ;;  %v4087_v54 = vpack.c.bf16 %v920_v50, %v920_v50  ;;  %v938_v50 = vld [vmem:[#allocation2 + $0x16a] sm:$0xff] }
  0x59   : > { %v4134_v55 = vpack.c.bf16 %v938_v50, %v938_v50 }
  0x5b   : > { %829 = vrot.lane.b32.xlu1 %v3392_v0, %s3691_s29  ;;  %v4095_v0 = vpack.c.bf16 %v921_v57, %v921_v57 }
  0x5c   : > { %835 = vrot.lane.b32.xlu0 %v3395_v8, %s3691_s29  ;;  %v4099_v8 = vpack.c.bf16 %v924_v63, %v924_v63  ;;  %v4138_v63 = vpack.c.bf16 %v937_v52, %v937_v52  ;;  %v1967_v52 = vld [vmem:[#allocation2 + $0x198] sm:$0xff] }
  0x5f   : > { %833 = vrot.lane.b32.xlu1 %v3394_v10, %s3691_s29  ;;  %v4103_v10 = vpack.c.bf16 %v923_v7, %v923_v7  ;;  %v939_v7 = vld [vmem:[#allocation2 + $0x172] sm:$0xff] }
  0x60   : > { %839 = vrot.lane.b32.xlu0 %v4067_v14, %s3691_s29 }
  0x63   : > { %837 = vrot.lane.b32.xlu1 %v3396_v1, %s3691_s29  ;;  %v928_v1 = vld [vmem:[#allocation2 + $0xf2] sm:$0xff] }
  0x64   : > { %1036 = vrot.lane.b32.xlu0 %v3399_v21, %s3692_s30  ;;  %v927_v21 = vld [vmem:[#allocation2 + $0xe2] sm:$0xff]  ;;  %v3419_v22 = vpack.c.bf16 %v928_v1, %v928_v1 }
  0x67   : > { %841 = vrot.lane.b32.xlu1 %v4073_v25, %s3691_s29 }
  0x68   : > { %1040 = vrot.lane.b32.xlu0 %v3401_v2, %s3692_s30  ;;  %v4117_v2 = vpack.c.bf16 %v927_v21, %v927_v21  ;;  %v4146_v21 = vpack.c.bf16 %v939_v7, %v939_v7  ;;  %v3557_v7 = vpack.c.bf16 %v1967_v52, %v1967_v52 }
  0x6b   : > { %1038 = vrot.lane.b32.xlu1 %v3400_v29, %s3692_s30  ;;  %v3421_v29 = vpack.c.bf16 %v930_v26, %v930_v26 }
  0x6c   : > { %1044 = vrot.lane.b32.xlu0 %v3403_v31, %s3692_s30  ;;  %v3420_v31 = vpack.c.bf16 %v929_v27, %v929_v27 }
  0x6f   : > { %1042 = vrot.lane.b32.xlu1 %v3402_v33, %s3692_s30  ;;  %v3423_v33 = vpack.c.bf16 %v932_v30, %v932_v30 }
  0x70   : > { %1048 = vrot.lane.b32.xlu0 %v3405_v35, %s3692_s30  ;;  %v934_v35 = vld [vmem:[#allocation2 + $0x13a] sm:$0xff] }
  0x71   : > { %v3425_v41 = vpack.c.bf16 %v934_v35, %v934_v35 }
  0x73   : > { %1046 = vrot.lane.b32.xlu1 %v3404_v40, %s3692_s30  ;;  %v933_v40 = vld [vmem:[#allocation2 + $0x12a] sm:$0xff] }
  0x74   : > { %1052 = vrot.lane.b32.xlu0 %v3407_v43, %s3692_s30 }
  0x77   : > { %1050 = vrot.lane.b32.xlu1 %v3406_v45, %s3692_s30  ;;  %v3424_v45 = vpack.c.bf16 %v933_v40, %v933_v40  ;;  %v1453_v40 = vld [vmem:[#allocation2 + $0x189] sm:$0xff] }
  0x78   : > { %1056 = vrot.lane.b32.xlu0 %v3409_v49, %s3692_s30  ;;  %v4129_v49 = vpack.c.bf16 %v936_v44, %v936_v44  ;;  %v4178_v44 = vpack.c.bf16 %v1453_v40, %v1453_v40 }
  0x7b   : > { %1054 = vrot.lane.b32.xlu1 %v3408_v51, %s3692_s30  ;;  %v3426_v51 = vpack.c.bf16 %v935_v48, %v935_v48 }
  0x7c   : > { %1060 = vrot.lane.b32.xlu0 %v4087_v54, %s3692_s30 }
  0x7f   : > { %1058 = vrot.lane.b32.xlu1 %v3410_v56, %s3692_s30 }
  0x80   : > { %1064 = vrot.lane.b32.xlu0 %v4092_v62, %s3692_s30 }
  0x83   : > { %1062 = vrot.lane.b32.xlu1 %v4095_v0, %s3692_s30 }
  0x84   : > { %1068 = vrot.lane.b32.xlu0 %v4099_v8, %s3692_s30 }
  0x87   : > { %1066 = vrot.lane.b32.xlu1 %v4103_v10, %s3692_s30 }
  0x88   : > { %1072 = vrot.lane.b32.xlu0 %v4107_v15, %s3692_s30  ;;  %v780_v34 = vpop.permute.xlu0 %779 }
  0x89   : > { %876 = vst.msk [vmem:[#allocation3] sm:$0xf] %vm875_vm4, %v780_v34 }
  0x8b   : > { %1070 = vrot.lane.b32.xlu1 %v4111_v20, %s3692_s30 }
  0x8c   : > { %1076 = vrot.lane.b32.xlu0 %v3419_v22, %s3692_s30  ;;  %v4151_v22 = vpack.c.bf16 %v1195_v11, %v1195_v11 }
  0x8f   : > { %1074 = vrot.lane.b32.xlu1 %v4117_v2, %s3692_s30 }
  0x90   : > { %1080 = vrot.lane.b32.xlu0 %v3421_v29, %s3692_s30  ;;  %v1196_v29 = vld [vmem:[#allocation2 + $0x188] sm:$0xff] }
  0x93   : > { %1078 = vrot.lane.b32.xlu1 %v3420_v31, %s3692_s30  ;;  %v1452_v31 = vld [vmem:[#allocation2 + $0x181] sm:$0xff] }
  0x94   : > { %1084 = vrot.lane.b32.xlu0 %v3423_v33, %s3692_s30  ;;  %v4162_v33 = vpack.c.bf16 %v1196_v29, %v1196_v29  ;;  %v4167_v34 = vpack.c.bf16 %v1452_v31, %v1452_v31 }
  0x97   : > { %1082 = vrot.lane.b32.xlu1 %v3422_v39, %s3692_s30 }
  0x98   : > { %1088 = vrot.lane.b32.xlu0 %v3425_v41, %s3692_s30 }
  0x9a   : > { %v782_v43 = vpop.permute.xlu0 %781 }
  0x9b   : > { %877 = vst.msk [vmem:[#allocation3 + $0x4] sm:$0xf] %vm875_vm4, %v782_v43  ;;  %1086 = vrot.lane.b32.xlu1 %v3424_v45, %s3692_s30  ;;  %v1709_v43 = vld [vmem:[#allocation2 + $0x182] sm:$0xff] }
  0x9c   : > { %1092 = vrot.lane.b32.xlu0 %v4129_v49, %s3692_s30  ;;  %v4183_v45 = vpack.c.bf16 %v1709_v43, %v1709_v43 }
  0x9d   : > { %v784_v56 = vpop.permute.xlu1 %783 }
  0x9e   : > { %878 = vst.msk [vmem:[#allocation3 + $0x8] sm:$0xf] %vm875_vm4, %v784_v56  ;;  %v788_v57 = vpop.permute.xlu0 %787 }
  0x9f   : > { %1090 = vrot.lane.b32.xlu1 %v3426_v51, %s3692_s30  ;;  %880 = vst.msk [vmem:[#allocation3 + $0x10] sm:$0xf] %vm875_vm4, %v788_v57 }
  0xa0   : > { %1096 = vrot.lane.b32.xlu0 %v4134_v55, %s3692_s30 }
  0xa1   : > { %v786_v9 = vpop.permute.xlu1 %785 }
  0xa2   : > { %879 = vst.msk [vmem:[#allocation3 + $0xc] sm:$0xf] %vm875_vm4, %v786_v9  ;;  %v792_v1 = vpop.permute.xlu0 %791 }
  0xa3   : > { %1094 = vrot.lane.b32.xlu1 %v4138_v63, %s3692_s30  ;;  %882 = vst.msk [vmem:[#allocation3 + $0x18] sm:$0xf] %vm875_vm4, %v792_v1  ;;  %v1968_v1 = vld [vmem:[#allocation2 + $0x1a0] sm:$0xff] }
  0xa4   : > { %1321 = vrot.lane.b32.xlu0 %v3963_v3, %s3693_s6 }
  0xa5   : > { %v790_v26 = vpop.permute.xlu1 %789 }
  0xa6   : > { %881 = vst.msk [vmem:[#allocation3 + $0x14] sm:$0xf] %vm875_vm4, %v790_v26  ;;  %v796_v27 = vpop.permute.xlu0 %795 }
  0xa7   : > { %1098 = vrot.lane.b32.xlu1 %v4146_v21, %s3692_s30  ;;  %884 = vst.msk [vmem:[#allocation3 + $0x20] sm:$0xf] %vm875_vm4, %v796_v27  ;;  %v2224_v27 = vld [vmem:[#allocation2 + $0x199] sm:$0xff] }
  0xa8   : > { %1353 = vrot.lane.b32.xlu0 %v4151_v22, %s3693_s6 }
  0xa9   : > { %v794_v30 = vpop.permute.xlu1 %793 }
  0xaa   : > { %883 = vst.msk [vmem:[#allocation3 + $0x1c] sm:$0xf] %vm875_vm4, %v794_v30  ;;  %v800_v32 = vpop.permute.xlu0 %799  ;;  %v3589_v30 = vpack.c.bf16 %v2224_v27, %v2224_v27 }
  0xab   : > { %1323 = vrot.lane.b32.xlu1 %v3965_v4, %s3693_s6  ;;  %886 = vst.msk [vmem:[#allocation3 + $0x28] sm:$0xf] %vm875_vm4, %v800_v32 }
  0xac   : > { %1578 = vrot.lane.b32.xlu0 %v3944_v42, %s3694_s7 }
  0xad   : > { %v798_v35 = vpop.permute.xlu1 %797 }
  0xae   : > { %885 = vst.msk [vmem:[#allocation3 + $0x24] sm:$0xf] %vm875_vm4, %v798_v35  ;;  %v804_v39 = vpop.permute.xlu0 %803  ;;  %v2225_v35 = vld [vmem:[#allocation2 + $0x1a1] sm:$0xff] }
  0xaf   : > { %1355 = vrot.lane.b32.xlu1 %v4162_v33, %s3693_s6  ;;  %888 = vst.msk [vmem:[#allocation3 + $0x30] sm:$0xf] %vm875_vm4, %v804_v39  ;;  %v2481_v39 = vld [vmem:[#allocation2 + $0x19a] sm:$0xff] }
  0xb0   : > { %1610 = vrot.lane.b32.xlu0 %v4167_v34, %s3694_s7 }
  0xb1   : > { %v802_v41 = vpop.permute.xlu1 %801 }
  0xb2   : > { %887 = vst.msk [vmem:[#allocation3 + $0x2c] sm:$0xf] %vm875_vm4, %v802_v41  ;;  %v808_v42 = vpop.permute.xlu0 %807  ;;  %v3621_v41 = vpack.c.bf16 %v2481_v39, %v2481_v39  ;;  %v1448_v39 = vld [vmem:[#allocation2 + $0x151] sm:$0xff] }
  0xb3   : > { %1580 = vrot.lane.b32.xlu1 %v3955_v58, %s3694_s7  ;;  %890 = vst.msk [vmem:[#allocation3 + $0x38] sm:$0xf] %vm875_vm4, %v808_v42  ;;  %v1710_v58 = vld [vmem:[#allocation2 + $0x18a] sm:$0xff] }
  0xb4   : > { %1835 = vrot.lane.b32.xlu0 %v4099_v8, %s3695_s8  ;;  %v4194_v57 = vpack.c.bf16 %v1710_v58, %v1710_v58 }
  0xb5   : > { %v806_v48 = vpop.permute.xlu1 %805 }
  0xb6   : > { %889 = vst.msk [vmem:[#allocation3 + $0x34] sm:$0xf] %vm875_vm4, %v806_v48  ;;  %v812_v50 = vpop.permute.xlu0 %811  ;;  %v2482_v48 = vld [vmem:[#allocation2 + $0x1a2] sm:$0xff] }
  0xb7   : > { %1612 = vrot.lane.b32.xlu1 %v4178_v44, %s3694_s7  ;;  %892 = vst.msk [vmem:[#allocation3 + $0x40] sm:$0xf] %vm875_vm4, %v812_v50 }
  0xb8   : > { %1867 = vrot.lane.b32.xlu0 %v4183_v45, %s3695_s8 }
  0xb9   : > { %v810_v51 = vpop.permute.xlu1 %809 }
  0xba   : > { %891 = vst.msk [vmem:[#allocation3 + $0x3c] sm:$0xf] %vm875_vm4, %v810_v51  ;;  %v816_v56 = vpop.permute.xlu0 %815 }
  0xbb   : > { %1837 = vrot.lane.b32.xlu1 %v4111_v20, %s3695_s8  ;;  %894 = vst.msk [vmem:[#allocation3 + $0x48] sm:$0xf] %vm875_vm4, %v816_v56 }
  0xbc   : > { %2093 = vrot.lane.b32.xlu0 %v3997_v23, %s3696_s9  ;;  %v3558_v23 = vpack.c.bf16 %v1968_v1, %v1968_v1 }
  0xbd   : > { %v814_v9 = vpop.permute.xlu1 %813 }
  0xbe   : > { %893 = vst.msk [vmem:[#allocation3 + $0x44] sm:$0xf] %vm875_vm4, %v814_v9  ;;  %v820_v11 = vpop.permute.xlu0 %819 }
  0xbf   : > { %1869 = vrot.lane.b32.xlu1 %v4194_v57, %s3695_s8  ;;  %896 = vst.msk [vmem:[#allocation3 + $0x50] sm:$0xf] %vm875_vm4, %v820_v11 }
  0xc0   : > { %2125 = vrot.lane.b32.xlu0 %v3557_v7, %s3696_s9 }
  0xc1   : > { %v818_v26 = vpop.permute.xlu1 %817 }
  0xc2   : > { %895 = vst.msk [vmem:[#allocation3 + $0x4c] sm:$0xf] %vm875_vm4, %v818_v26  ;;  %v824_v29 = vpop.permute.xlu0 %823  ;;  %v2206_v26 = vld [vmem:[#allocation2 + $0xc1] sm:$0xff] }
  0xc3   : > { %2095 = vrot.lane.b32.xlu1 %v3999_v24, %s3696_s9  ;;  %898 = vst.msk [vmem:[#allocation3 + $0x58] sm:$0xf] %vm875_vm4, %v824_v29  ;;  %v3571_v27 = vpack.c.bf16 %v2206_v26, %v2206_v26 }
  0xc4   : > { %2350 = vrot.lane.b32.xlu0 %v3957_v59, %s3697_s10  ;;  %v3590_v59 = vpack.c.bf16 %v2225_v35, %v2225_v35 }
  0xc5   : > { %v822_v31 = vpop.permute.xlu1 %821 }
  0xc6   : > { %897 = vst.msk [vmem:[#allocation3 + $0x54] sm:$0xf] %vm875_vm4, %v822_v31  ;;  %v828_v32 = vpop.permute.xlu0 %827 }
  0xc7   : > { %2127 = vrot.lane.b32.xlu1 %v3558_v23, %s3696_s9  ;;  %900 = vst.msk [vmem:[#allocation3 + $0x60] sm:$0xf] %vm875_vm4, %v828_v32 }
  0xc8   : > { %2382 = vrot.lane.b32.xlu0 %v3589_v30, %s3697_s10 }
  0xc9   : > { %v826_v24 = vpop.permute.xlu1 %825 }
  0xca   : > { %899 = vst.msk [vmem:[#allocation3 + $0x5c] sm:$0xf] %vm875_vm4, %v826_v24  ;;  %v832_v40 = vpop.permute.xlu0 %831  ;;  %v1432_v24 = vld [vmem:[#allocation2 + $0x91] sm:$0xff] }
  0xcb   : > { %2352 = vrot.lane.b32.xlu1 %v4019_v36, %s3697_s10  ;;  %902 = vst.msk [vmem:[#allocation3 + $0x68] sm:$0xf] %vm875_vm4, %v832_v40 }
  0xcc   : > { %2607 = vrot.lane.b32.xlu0 %v4107_v15, %s3698_s11  ;;  %v3622_v15 = vpack.c.bf16 %v2482_v48, %v2482_v48  ;;  %v1449_v48 = vld [vmem:[#allocation2 + $0x159] sm:$0xff] }
  0xcd   : > { %v830_v43 = vpop.permute.xlu1 %829 }
  0xce   : > { %901 = vst.msk [vmem:[#allocation3 + $0x64] sm:$0xf] %vm875_vm4, %v830_v43  ;;  %v836_v42 = vpop.permute.xlu0 %835 }
  0xcf   : > { %2384 = vrot.lane.b32.xlu1 %v3590_v59, %s3697_s10  ;;  %904 = vst.msk [vmem:[#allocation3 + $0x70] sm:$0xf] %vm875_vm4, %v836_v42  ;;  %v4313_v59 = vpack.c.bf16 %v1448_v39, %v1448_v39  ;;  %v1703_v39 = vld [vmem:[#allocation2 + $0x13a] sm:$0xff] }
  0xd0   : > { %2639 = vrot.lane.b32.xlu0 %v3621_v41, %s3698_s11 }
  0xd1   : > { %v834_v36 = vpop.permute.xlu1 %833 }
  0xd2   : > { %903 = vst.msk [vmem:[#allocation3 + $0x6c] sm:$0xf] %vm875_vm4, %v834_v36  ;;  %v840_v50 = vpop.permute.xlu0 %839 }
  0xd3   : > { %2609 = vrot.lane.b32.xlu1 %v4117_v2, %s3698_s11  ;;  %906 = vst.msk [vmem:[#allocation3 + $0x78] sm:$0xf] %vm875_vm4, %v840_v50 }
  0xd4   : > { %1317 = vrot.lane.b32.xlu0 %v3981_v18, %s3693_s6 }
  0xd5   : > { %v838_v58 = vpop.permute.xlu1 %837 }
  0xd6   : > { %905 = vst.msk [vmem:[#allocation3 + $0x74] sm:$0xf] %vm875_vm4, %v838_v58  ;;  %v1037_v51 = vpop.permute.xlu0 %1036 }
  0xd7   : > { %2641 = vrot.lane.b32.xlu1 %v3622_v15, %s3698_s11  ;;  %1133 = vst.msk [vmem:[#allocation3] sm:$0xf] %vm1132_vm5, %v1037_v51  ;;  %v4326_v15 = vpack.c.bf16 %v1449_v48, %v1449_v48 }
  0xd8   : > { %1349 = vrot.lane.b32.xlu0 %v4056_v5, %s3693_s6 }
  0xd9   : > { %v842_v52 = vpop.permute.xlu1 %841 }
  0xda   : > { %907 = vst.msk [vmem:[#allocation3 + $0x7c] sm:$0xf] %vm875_vm4, %v842_v52  ;;  %v1041_v2 = vpop.permute.xlu0 %1040 }
  0xdb   : > { %1319 = vrot.lane.b32.xlu1 %v3983_v19, %s3693_s6  ;;  %1135 = vst.msk [vmem:[#allocation3 + $0x8] sm:$0xf] %vm1132_vm5, %v1041_v2 }
  0xdc   : > { %1574 = vrot.lane.b32.xlu0 %v3939_v28, %s3694_s7 }
  0xdd   : > { %v1039_v56 = vpop.permute.xlu1 %1038 }
  0xde   : > { %1134 = vst.msk [vmem:[#allocation3 + $0x4] sm:$0xf] %vm1132_vm5, %v1039_v56  ;;  %v1045_v7 = vpop.permute.xlu0 %1044  ;;  %v2204_v56 = vld [vmem:[#allocation2 + $0xa9] sm:$0xff] }
  0xdf   : > { %1351 = vrot.lane.b32.xlu1 %v4058_v6, %s3693_s6  ;;  %1137 = vst.msk [vmem:[#allocation3 + $0x10] sm:$0xf] %vm1132_vm5, %v1045_v7 }
  0xe0   : > { %1606 = vrot.lane.b32.xlu0 %v4067_v14, %s3694_s7 }
  0xe1   : > { %v1043_v9 = vpop.permute.xlu1 %1042 }
  0xe2   : > { %1136 = vst.msk [vmem:[#allocation3 + $0xc] sm:$0xf] %vm1132_vm5, %v1043_v9  ;;  %v1049_v11 = vpop.permute.xlu0 %1048  ;;  %v2220_v9 = vld [vmem:[#allocation2 + $0x169] sm:$0xff] }
  0xe3   : > { %1576 = vrot.lane.b32.xlu1 %v3951_v53, %s3694_s7  ;;  %1139 = vst.msk [vmem:[#allocation3 + $0x18] sm:$0xf] %vm1132_vm5, %v1049_v11  ;;  %v2205_v11 = vld [vmem:[#allocation2 + $0xb1] sm:$0xff] }
  0xe4   : > { %1831 = vrot.lane.b32.xlu0 %v4092_v62, %s3695_s8 }
  0xe5   : > { %v1047_v28 = vpop.permute.xlu1 %1046 }
  0xe6   : > { %1138 = vst.msk [vmem:[#allocation3 + $0x14] sm:$0xf] %vm1132_vm5, %v1047_v28  ;;  %v1053_v1 = vpop.permute.xlu0 %1052 }
  0xe7   : > { %1608 = vrot.lane.b32.xlu1 %v4073_v25, %s3694_s7  ;;  %1141 = vst.msk [vmem:[#allocation3 + $0x20] sm:$0xf] %vm1132_vm5, %v1053_v1  ;;  %v2461_v1 = vld [vmem:[#allocation2 + $0xaa] sm:$0xff] }
  0xe8   : > { %1863 = vrot.lane.b32.xlu0 %v4134_v55, %s3695_s8 }
  0xe9   : > { %v1051_v14 = vpop.permute.xlu1 %1050 }
  0xea   : > { %1140 = vst.msk [vmem:[#allocation3 + $0x1c] sm:$0xf] %vm1132_vm5, %v1051_v14  ;;  %v1057_v53 = vpop.permute.xlu0 %1056  ;;  %v3570_v14 = vpack.c.bf16 %v2205_v11, %v2205_v11 }
  0xeb   : > { %1833 = vrot.lane.b32.xlu1 %v4103_v10, %s3695_s8  ;;  %1143 = vst.msk [vmem:[#allocation3 + $0x28] sm:$0xf] %vm1132_vm5, %v1057_v53  ;;  %v3601_v53 = vpack.c.bf16 %v2461_v1, %v2461_v1 }
  0xec   : > { %2089 = vrot.lane.b32.xlu0 %v3963_v3, %s3696_s9  ;;  %v2207_v3 = vld [vmem:[#allocation2 + $0xc9] sm:$0xff] }
  0xed   : > { %v1055_v62 = vpop.permute.xlu1 %1054 }
  0xee   : > { %1142 = vst.msk [vmem:[#allocation3 + $0x24] sm:$0xf] %vm1132_vm5, %v1055_v62  ;;  %v1061_v25 = vpop.permute.xlu0 %1060 }
  0xef   : > { %1865 = vrot.lane.b32.xlu1 %v4146_v21, %s3695_s8  ;;  %1145 = vst.msk [vmem:[#allocation3 + $0x30] sm:$0xf] %vm1132_vm5, %v1061_v25 }
  0xf0   : > { %2121 = vrot.lane.b32.xlu0 %v4151_v22, %s3696_s9  ;;  %v3572_v22 = vpack.c.bf16 %v2207_v3, %v2207_v3 }
  0xf1   : > { %v1059_v10 = vpop.permute.xlu1 %1058 }
  0xf2   : > { %1144 = vst.msk [vmem:[#allocation3 + $0x2c] sm:$0xf] %vm1132_vm5, %v1059_v10  ;;  %v1065_v29 = vpop.permute.xlu0 %1064 }
  0xf3   : > { %2091 = vrot.lane.b32.xlu1 %v3965_v4, %s3696_s9  ;;  %1147 = vst.msk [vmem:[#allocation3 + $0x38] sm:$0xf] %vm1132_vm5, %v1065_v29 }
  0xf4   : > { %2346 = vrot.lane.b32.xlu0 %v3571_v27, %s3697_s10  ;;  %v2462_v27 = vld [vmem:[#allocation2 + $0xb2] sm:$0xff] }
  0xf5   : > { %v1063_v23 = vpop.permute.xlu1 %1062  ;;  %v3602_v29 = vpack.c.bf16 %v2462_v27, %v2462_v27 }
  0xf6   : > { %1146 = vst.msk [vmem:[#allocation3 + $0x34] sm:$0xf] %vm1132_vm5, %v1063_v23  ;;  %v1069_v30 = vpop.permute.xlu0 %1068 }
  0xf7   : > { %2123 = vrot.lane.b32.xlu1 %v4162_v33, %s3696_s9  ;;  %1149 = vst.msk [vmem:[#allocation3 + $0x40] sm:$0xf] %vm1132_vm5, %v1069_v30 }
  0xf8   : > { %2378 = vrot.lane.b32.xlu0 %v4167_v34, %s3697_s10 }
  0xf9   : > { %v1067_v31 = vpop.permute.xlu1 %1066 }
  0xfa   : > { %1148 = vst.msk [vmem:[#allocation3 + $0x3c] sm:$0xf] %vm1132_vm5, %v1067_v31  ;;  %v1073_v4 = vpop.permute.xlu0 %1072 }
  0xfb   : > { %2348 = vrot.lane.b32.xlu1 %v3572_v22, %s3697_s10  ;;  %1151 = vst.msk [vmem:[#allocation3 + $0x48] sm:$0xf] %vm1132_vm5, %v1073_v4  ;;  %v1430_v22 = vld [vmem:[#allocation2 + $0x79] sm:$0xff] }
  0xfc   : > { %2603 = vrot.lane.b32.xlu0 %v4099_v8, %s3698_s11 }
  0xfd   : > { %v1071_v32 = vpop.permute.xlu1 %1070 }
  0xfe   : > { %1150 = vst.msk [vmem:[#allocation3 + $0x44] sm:$0xf] %vm1132_vm5, %v1071_v32  ;;  %v1077_v33 = vpop.permute.xlu0 %1076  ;;  %v1446_v32 = vld [vmem:[#allocation2 + $0x139] sm:$0xff] }
  0xff   : > { %2380 = vrot.lane.b32.xlu1 %v4178_v44, %s3697_s10  ;;  %1153 = vst.msk [vmem:[#allocation3 + $0x50] sm:$0xf] %vm1132_vm5, %v1077_v33  ;;  %v4387_v33 = vpack.c.bf16 %v1446_v32, %v1446_v32 }
 0x100   : > { %2635 = vrot.lane.b32.xlu0 %v4183_v45, %s3698_s11  ;;  %v4305_v45 = vpack.c.bf16 %v1432_v24, %v1432_v24 }
 0x101   : > { %v1075_v34 = vpop.permute.xlu1 %1074 }
 0x102   : > { %1152 = vst.msk [vmem:[#allocation3 + $0x4c] sm:$0xf] %vm1132_vm5, %v1075_v34  ;;  %v1081_v35 = vpop.permute.xlu0 %1080 }
 0x103   : > { %2605 = vrot.lane.b32.xlu1 %v4111_v20, %s3698_s11  ;;  %1155 = vst.msk [vmem:[#allocation3 + $0x58] sm:$0xf] %vm1132_vm5, %v1081_v35  ;;  %v1687_v35 = vld [vmem:[#allocation2 + $0x7a] sm:$0xff] }
 0x104   : > { %1313 = vrot.lane.b32.xlu0 %v3977_v16, %s3693_s6 }
 0x105   : > { %v1079_v8 = vpop.permute.xlu1 %1078 }
 0x106   : > { %1154 = vst.msk [vmem:[#allocation3 + $0x54] sm:$0xf] %vm1132_vm5, %v1079_v8  ;;  %v1085_v44 = vpop.permute.xlu0 %1084 }
 0x107   : > { %2637 = vrot.lane.b32.xlu1 %v4194_v57, %s3698_s11  ;;  %1157 = vst.msk [vmem:[#allocation3 + $0x60] sm:$0xf] %vm1132_vm5, %v1085_v44  ;;  %v1433_v57 = vld [vmem:[#allocation2 + $0x99] sm:$0xff]  ;;  %v4397_v44 = vpack.c.bf16 %v1687_v35, %v1687_v35 }
 0x108   : > { %1345 = vrot.lane.b32.xlu0 %v4047_v60, %s3693_s6  ;;  %v4318_v42 = vpack.c.bf16 %v1433_v57, %v1433_v57 }
 0x109   : > { %v1083_v20 = vpop.permute.xlu1 %1082 }
 0x10a   : > { %1156 = vst.msk [vmem:[#allocation3 + $0x5c] sm:$0xf] %vm1132_vm5, %v1083_v20  ;;  %v1089_v40 = vpop.permute.xlu0 %1088 }
 0x10b   : > { %1315 = vrot.lane.b32.xlu1 %v3979_v17, %s3693_s6  ;;  %1159 = vst.msk [vmem:[#allocation3 + $0x68] sm:$0xf] %vm1132_vm5, %v1089_v40 }
 0x10c   : > { %1570 = vrot.lane.b32.xlu0 %v4305_v45, %s3694_s7 }
 0x10d   : > { %v1087_v41 = vpop.permute.xlu1 %1086 }
 0x10e   : > { %1158 = vst.msk [vmem:[#allocation3 + $0x64] sm:$0xf] %vm1132_vm5, %v1087_v41  ;;  %v1093_v43 = vpop.permute.xlu0 %1092  ;;  %v1688_v41 = vld [vmem:[#allocation2 + $0x82] sm:$0xff] }
 0x10f   : > { %1347 = vrot.lane.b32.xlu1 %v4049_v61, %s3693_s6  ;;  %1161 = vst.msk [vmem:[#allocation3 + $0x70] sm:$0xf] %vm1132_vm5, %v1093_v43  ;;  %v4407_v43 = vpack.c.bf16 %v1703_v39, %v1703_v39 }
 0x110   : > { %1602 = vrot.lane.b32.xlu0 %v4313_v59, %s3694_s7 }
 0x111   : > { %v1091_v36 = vpop.permute.xlu1 %1090 }
 0x112   : > { %1160 = vst.msk [vmem:[#allocation3 + $0x6c] sm:$0xf] %vm1132_vm5, %v1091_v36  ;;  %v1097_v50 = vpop.permute.xlu0 %1096 }
 0x113   : > { %1572 = vrot.lane.b32.xlu1 %v4318_v42, %s3694_s7  ;;  %1163 = vst.msk [vmem:[#allocation3 + $0x78] sm:$0xf] %vm1132_vm5, %v1097_v50  ;;  %v4412_v50 = vpack.c.bf16 %v1688_v41, %v1688_v41 }
 0x114   : > { %1827 = vrot.lane.b32.xlu0 %v4087_v54, %s3695_s8 }
 0x115   : > { %v1095_v58 = vpop.permute.xlu1 %1094 }
 0x116   : > { %1162 = vst.msk [vmem:[#allocation3 + $0x74] sm:$0xf] %vm1132_vm5, %v1095_v58  ;;  %v1322_v51 = vpop.permute.xlu0 %1321  ;;  %v1704_v58 = vld [vmem:[#allocation2 + $0x142] sm:$0xff] }
 0x117   : > { %1604 = vrot.lane.b32.xlu1 %v4326_v15, %s3694_s7  ;;  %1404 = vst.msk [vmem:[#allocation3 + $0x38] sm:$0xf] %vm1389_vm6, %v1322_v51 }
 0x118   : > { %1859 = vrot.lane.b32.xlu0 %v4129_v49, %s3695_s8 }
 0x119   : > { %v1099_v52 = vpop.permute.xlu1 %1098 }
 0x11a   : > { %1164 = vst.msk [vmem:[#allocation3 + $0x7c] sm:$0xf] %vm1132_vm5, %v1099_v52  ;;  %v1354_v2 = vpop.permute.xlu0 %1353 }
 0x11b   : > { %1829 = vrot.lane.b32.xlu1 %v4095_v0, %s3695_s8  ;;  %1420 = vst.msk [vmem:[#allocation3 + $0x78] sm:$0xf] %vm1389_vm6, %v1354_v2  ;;  %v3569_v0 = vpack.c.bf16 %v2204_v56, %v2204_v56  ;;  %v4420_v2 = vpack.c.bf16 %v1704_v58, %v1704_v58 }
 0x11c   : > { %2085 = vrot.lane.b32.xlu0 %v3981_v18, %s3696_s9 }
 0x11d   : > { %v1324_v54 = vpop.permute.xlu1 %1323 }
 0x11e   : > { %1405 = vst.msk [vmem:[#allocation3 + $0x3c] sm:$0xf] %vm1389_vm6, %v1324_v54  ;;  %v1579_v7 = vpop.permute.xlu0 %1578 }
 0x11f   : > { %1861 = vrot.lane.b32.xlu1 %v4138_v63, %s3695_s8  ;;  %1661 = vst.msk [vmem:[#allocation3 + $0x38] sm:$0xf] %vm1646_vm7, %v1579_v7  ;;  %v3585_v63 = vpack.c.bf16 %v2220_v9, %v2220_v9 }
 0x120   : > { %2117 = vrot.lane.b32.xlu0 %v4056_v5, %s3696_s9 }
 0x121   : > { %v1356_v49 = vpop.permute.xlu1 %1355 }
 0x122   : > { %1421 = vst.msk [vmem:[#allocation3 + $0x7c] sm:$0xf] %vm1389_vm6, %v1356_v49  ;;  %v1611_v18 = vpop.permute.xlu0 %1610 }
 0x123   : > { %2087 = vrot.lane.b32.xlu1 %v3983_v19, %s3696_s9  ;;  %1677 = vst.msk [vmem:[#allocation3 + $0x78] sm:$0xf] %vm1646_vm7, %v1611_v18  ;;  %v2221_v19 = vld [vmem:[#allocation2 + $0x171] sm:$0xff] }
 0x124   : > { %2342 = vrot.lane.b32.xlu0 %v3569_v0, %s3697_s10  ;;  %v3586_v25 = vpack.c.bf16 %v2221_v19, %v2221_v19 }
 0x125   : > { %v1581_v28 = vpop.permute.xlu1 %1580 }
 0x126   : > { %1662 = vst.msk [vmem:[#allocation3 + $0x3c] sm:$0xf] %vm1646_vm7, %v1581_v28  ;;  %v1836_v5 = vpop.permute.xlu0 %1835  ;;  %v2475_v28 = vld [vmem:[#allocation2 + $0x152] sm:$0xff] }
 0x127   : > { %2119 = vrot.lane.b32.xlu1 %v4058_v6, %s3696_s9  ;;  %1918 = vst.msk [vmem:[#allocation3 + $0x38] sm:$0xf] %vm1903_vm8, %v1836_v5 }
 0x128   : > { %2374 = vrot.lane.b32.xlu0 %v3585_v63, %s3697_s10 }
 0x129   : > { %v1613_v62 = vpop.permute.xlu1 %1612 }
 0x12a   : > { %1678 = vst.msk [vmem:[#allocation3 + $0x7c] sm:$0xf] %vm1646_vm7, %v1613_v62  ;;  %v1868_v26 = vpop.permute.xlu0 %1867 }
 0x12b   : > { %2344 = vrot.lane.b32.xlu1 %v3570_v14, %s3697_s10  ;;  %1934 = vst.msk [vmem:[#allocation3 + $0x78] sm:$0xf] %vm1903_vm8, %v1868_v26  ;;  %v1171_v14 = vld [vmem:[#allocation2 + $0x60] sm:$0xff] }
 0x12c   : > { %2599 = vrot.lane.b32.xlu0 %v3601_v53, %s3698_s11  ;;  %v4455_v53 = vpack.c.bf16 %v1171_v14, %v1171_v14 }
 0x12d   : > { %v1838_v6 = vpop.permute.xlu1 %1837 }
 0x12e   : > { %1919 = vst.msk [vmem:[#allocation3 + $0x3c] sm:$0xf] %vm1903_vm8, %v1838_v6  ;;  %v2094_v10 = vpop.permute.xlu0 %2093  ;;  %v1428_v6 = vld [vmem:[#allocation2 + $0x61] sm:$0xff] }
 0x12f   : > { %2376 = vrot.lane.b32.xlu1 %v3586_v25, %s3697_s10  ;;  %2176 = vst.msk [vmem:[#allocation3 + $0x38] sm:$0xf] %vm2161_vm9, %v2094_v10 }
 0x130   : > { %2631 = vrot.lane.b32.xlu0 %v4134_v55, %s3698_s11  ;;  %v4379_v55 = vpack.c.bf16 %v1430_v22, %v1430_v22 }
 0x131   : > { %v1870_v3 = vpop.permute.xlu1 %1869 }
 0x132   : > { %1935 = vst.msk [vmem:[#allocation3 + $0x7c] sm:$0xf] %vm1903_vm8, %v1870_v3  ;;  %v2126_v23 = vpop.permute.xlu0 %2125  ;;  %v4469_v3 = vpack.c.bf16 %v1428_v6, %v1428_v6 }
 0x133   : > { %2601 = vrot.lane.b32.xlu1 %v3602_v29, %s3698_s11  ;;  %2192 = vst.msk [vmem:[#allocation3 + $0x78] sm:$0xf] %vm2161_vm9, %v2126_v23 }
 0x134   : > { %1309 = vrot.lane.b32.xlu0 %v3971_v12, %s3693_s6 }
 0x135   : > { %v2096_v30 = vpop.permute.xlu1 %2095 }
 0x136   : > { %2177 = vst.msk [vmem:[#allocation3 + $0x3c] sm:$0xf] %vm2161_vm9, %v2096_v30  ;;  %v2351_v31 = vpop.permute.xlu0 %2350  ;;  %v1444_v30 = vld [vmem:[#allocation2 + $0x121] sm:$0xff] }
 0x137   : > { %2633 = vrot.lane.b32.xlu1 %v4146_v21, %s3698_s11  ;;  %2433 = vst.msk [vmem:[#allocation3 + $0x38] sm:$0xf] %vm2418_vm10, %v2351_v31  ;;  %v1431_v21 = vld [vmem:[#allocation2 + $0x81] sm:$0xff]  ;;  %v1429_v31 = vld [vmem:[#allocation2 + $0x69] sm:$0xff] }
 0x138   : > { %1341 = vrot.lane.b32.xlu0 %v4036_v46, %s3693_s6  ;;  %v4392_v24 = vpack.c.bf16 %v1431_v21, %v1431_v21  ;;  %v4482_v21 = vpack.c.bf16 %v1429_v31, %v1429_v31  ;;  %v1443_v31 = vld [vmem:[#allocation2 + $0x111] sm:$0xff] }
 0x139   : > { %v2128_v4 = vpop.permute.xlu1 %2127 }
 0x13a   : > { %2193 = vst.msk [vmem:[#allocation3 + $0x7c] sm:$0xf] %vm2161_vm9, %v2128_v4  ;;  %v2383_v12 = vpop.permute.xlu0 %2382  ;;  %v4477_v4 = vpack.c.bf16 %v1444_v30, %v1444_v30 }
 0x13b   : > { %1311 = vrot.lane.b32.xlu1 %v3973_v13, %s3693_s6  ;;  %2449 = vst.msk [vmem:[#allocation3 + $0x78] sm:$0xf] %vm2418_vm10, %v2383_v12  ;;  %v1447_v13 = vld [vmem:[#allocation2 + $0x141] sm:$0xff] }
 0x13c   : > { %1566 = vrot.lane.b32.xlu0 %v4379_v55, %s3694_s7  ;;  %v4402_v57 = vpack.c.bf16 %v1447_v13, %v1447_v13  ;;  %v1701_v13 = vld [vmem:[#allocation2 + $0x122] sm:$0xff] }
 0x13d   : > { %v2353_v34 = vpop.permute.xlu1 %2352 }
 0x13e   : > { %2434 = vst.msk [vmem:[#allocation3 + $0x3c] sm:$0xf] %vm2418_vm10, %v2353_v34  ;;  %v2608_v8 = vpop.permute.xlu0 %2607  ;;  %v1445_v34 = vld [vmem:[#allocation2 + $0x129] sm:$0xff] }
 0x13f   : > { %1343 = vrot.lane.b32.xlu1 %v4038_v47, %s3693_s6  ;;  %2690 = vst.msk [vmem:[#allocation3 + $0x38] sm:$0xf] %vm2675_vm11, %v2608_v8  ;;  %v4492_v39 = vpack.c.bf16 %v1445_v34, %v1445_v34 }
 0x140   : > { %1598 = vrot.lane.b32.xlu0 %v4387_v33, %s3694_s7 }
 0x141   : > { %v2385_v20 = vpop.permute.xlu1 %2384 }
 0x142   : > { %2450 = vst.msk [vmem:[#allocation3 + $0x7c] sm:$0xf] %vm2418_vm10, %v2385_v20  ;;  %v2640_v40 = vpop.permute.xlu0 %2639 }
 0x143   : > { %1568 = vrot.lane.b32.xlu1 %v4392_v24, %s3694_s7  ;;  %2706 = vst.msk [vmem:[#allocation3 + $0x78] sm:$0xf] %vm2675_vm11, %v2640_v40  ;;  %v4497_v40 = vpack.c.bf16 %v1701_v13, %v1701_v13  ;;  %v1684_v13 = vld [vmem:[#allocation2 + $0x52] sm:$0xff] }
 0x144   : > { %1823 = vrot.lane.b32.xlu0 %v4397_v44, %s3695_s8 }
 0x145   : > { %v2610_v48 = vpop.permute.xlu1 %2609 }
 0x146   : > { %2691 = vst.msk [vmem:[#allocation3 + $0x3c] sm:$0xf] %vm2675_vm11, %v2610_v48  ;;  %v1318_v36 = vpop.permute.xlu0 %1317  ;;  %v1943_v48 = vld [vmem:[#allocation2 + $0x78] sm:$0xff] }
 0x147   : > { %1600 = vrot.lane.b32.xlu1 %v4402_v57, %s3694_s7  ;;  %1402 = vst.msk [vmem:[#allocation3 + $0x30] sm:$0xf] %vm1389_vm6, %v1318_v36 }
 0x148   : > { %1855 = vrot.lane.b32.xlu0 %v4407_v43, %s3695_s8 }
 0x149   : > { %v2642_v51 = vpop.permute.xlu1 %2641 }
 0x14a   : > { %2707 = vst.msk [vmem:[#allocation3 + $0x7c] sm:$0xf] %vm2675_vm11, %v2642_v51  ;;  %v1350_v52 = vpop.permute.xlu0 %1349  ;;  %v1702_v51 = vld [vmem:[#allocation2 + $0x12a] sm:$0xff] }
 0x14b   : > { %1825 = vrot.lane.b32.xlu1 %v4412_v50, %s3695_s8  ;;  %1418 = vst.msk [vmem:[#allocation3 + $0x70] sm:$0xf] %vm1389_vm6, %v1350_v52  ;;  %v3533_v52 = vpack.c.bf16 %v1943_v48, %v1943_v48  ;;  %v4598_v48 = vpack.c.bf16 %v1684_v13, %v1684_v13  ;;  %v1682_v13 = vld [vmem:[#allocation2 + $0x3a] sm:$0xff] }
 0x14c   : > { %2081 = vrot.lane.b32.xlu0 %v3977_v16, %s3696_s9 }
 0x14d   : > { %v1320_v54 = vpop.permute.xlu1 %1319  ;;  %v3667_v7 = vld [vmem:[#allocation3 + $0x38] sm:$0xff]  }
 0x14e   : > { %1403 = vst.msk [vmem:[#allocation3 + $0x34] sm:$0xf] %vm1389_vm6, %v1320_v54  ;;  %v1575_v56 = vpop.permute.xlu0 %1574  ;;  %v2847_v16 = vsel %vm2821_vm12, %v3667_v7, 0  ;;  %v4510_v7 = vpack.c.bf16 %v1702_v51, %v1702_v51 }
 0x14f   : > { %1857 = vrot.lane.b32.xlu1 %v4420_v2, %s3695_s8  ;;  %1659 = vst.msk [vmem:[#allocation3 + $0x30] sm:$0xf] %vm1646_vm7, %v1575_v56 }
 0x150   : > { %2113 = vrot.lane.b32.xlu0 %v4047_v60, %s3696_s9  ;;  %v2459_v60 = vld [vmem:[#allocation2 + $0x92] sm:$0xff] }
 0x151   : > { %v1352_v0 = vpop.permute.xlu1 %1351  ;;  %v3666_v49 = vld [vmem:[#allocation3 + $0x78] sm:$0xff]  }
 0x152   : > { %1419 = vst.msk [vmem:[#allocation3 + $0x74] sm:$0xf] %vm1389_vm6, %v1352_v0  ;;  %v1607_v9 = vpop.permute.xlu0 %1606  ;;  %3641 = vmatprep.subr.msk.bf16.mxu0 %vm2821_vm12, %v3666_v49  ;;  %v1944_v0 = vld [vmem:[#allocation2 + $0x80] sm:$0xff] }
 0x153   : > { %2083 = vrot.lane.b32.xlu1 %v3979_v17, %s3696_s9  ;;  %1675 = vst.msk [vmem:[#allocation3 + $0x70] sm:$0xf] %vm1646_vm7, %v1607_v9  ;;  %3624 = vmatpush3.bf16.xpose.msra.mxu0 %v2847_v16  ;;  %v3599_v17 = vpack.c.bf16 %v2459_v60, %v2459_v60  ;;  %v3534_v16 = vpack.c.bf16 %v1944_v0, %v1944_v0 }
 0x154   : > { %2338 = vrot.lane.b32.xlu0 %v4305_v45, %s3697_s10  ;;  %v2460_v45 = vld [vmem:[#allocation2 + $0x9a] sm:$0xff] }
 0x155   : > { %v1577_v18 = vpop.permute.xlu1 %1576  ;;  %v3600_v19 = vpack.c.bf16 %v2460_v45, %v2460_v45 }
 0x156   : > { %1660 = vst.msk [vmem:[#allocation3 + $0x34] sm:$0xf] %vm1646_vm7, %v1577_v18  ;;  %v1832_v11 = vpop.permute.xlu0 %1831 }
 0x157   : > { %2115 = vrot.lane.b32.xlu1 %v4049_v61, %s3696_s9  ;;  %1916 = vst.msk [vmem:[#allocation3 + $0x30] sm:$0xf] %vm1903_vm8, %v1832_v11  ;;  %v3615_v61 = vpack.c.bf16 %v2475_v28, %v2475_v28 }
 0x158   : > { %2370 = vrot.lane.b32.xlu0 %v4313_v59, %s3697_s10 }
 0x159   : > { %v1609_v63 = vpop.permute.xlu1 %1608 }
 0x15a   : > { %1676 = vst.msk [vmem:[#allocation3 + $0x74] sm:$0xf] %vm1646_vm7, %v1609_v63  ;;  %v1864_v1 = vpop.permute.xlu0 %1863 }
 0x15b   : > { %2340 = vrot.lane.b32.xlu1 %v4318_v42, %s3697_s10  ;;  %1932 = vst.msk [vmem:[#allocation3 + $0x70] sm:$0xf] %vm1903_vm8, %v1864_v1  ;;  %v2476_v42 = vld [vmem:[#allocation2 + $0x15a] sm:$0xff] }
 0x15c   : > { %2595 = vrot.lane.b32.xlu0 %v3599_v17, %s3698_s11  ;;  %v3616_v25 = vpack.c.bf16 %v2476_v42, %v2476_v42 }
 0x15d   : > { %v1834_v5 = vpop.permute.xlu1 %1833 }
 0x15e   : > { %1917 = vst.msk [vmem:[#allocation3 + $0x34] sm:$0xf] %vm1903_vm8, %v1834_v5  ;;  %v2090_v59 = vpop.permute.xlu0 %2089  ;;  %v1185_v5 = vld [vmem:[#allocation2 + $0x108] sm:$0xff] }
 0x15f   : > { %2372 = vrot.lane.b32.xlu1 %v4326_v15, %s3697_s10  ;;  %2174 = vst.msk [vmem:[#allocation3 + $0x30] sm:$0xf] %vm2161_vm9, %v2090_v59  ;;  %v1172_v15 = vld [vmem:[#allocation2 + $0x68] sm:$0xff]  ;;  %v4553_v14 = vpack.c.bf16 %v1185_v5, %v1185_v5 }
 0x160   : > { %2627 = vrot.lane.b32.xlu0 %v3615_v61, %s3698_s11  ;;  %v4464_v29 = vpack.c.bf16 %v1172_v15, %v1172_v15  ;;  %v1169_v61 = vld [vmem:[#allocation2 + $0x48] sm:$0xff] }
 0x161   : > { %v1866_v62 = vpop.permute.xlu1 %1865 }
 0x162   : > { %1933 = vst.msk [vmem:[#allocation3 + $0x74] sm:$0xf] %vm1903_vm8, %v1866_v62  ;;  %v2122_v26 = vpop.permute.xlu0 %2121 }
 0x163   : > { %2597 = vrot.lane.b32.xlu1 %v3600_v19, %s3698_s11  ;;  %2190 = vst.msk [vmem:[#allocation3 + $0x70] sm:$0xf] %vm2161_vm9, %v2122_v26 }
 0x164   : > { %1305 = vrot.lane.b32.xlu0 %v4455_v53, %s3693_s6 }
 0x165   : > { %v2092_v27 = vpop.permute.xlu1 %2091 }
 0x166   : > { %2175 = vst.msk [vmem:[#allocation3 + $0x34] sm:$0xf] %vm2161_vm9, %v2092_v27  ;;  %v2347_v10 = vpop.permute.xlu0 %2346 }
 0x167   : > { %2629 = vrot.lane.b32.xlu1 %v3616_v25, %s3698_s11  ;;  %2431 = vst.msk [vmem:[#allocation3 + $0x30] sm:$0xf] %vm2418_vm10, %v2347_v10  ;;  %v1442_v25 = vld [vmem:[#allocation2 + $0x109] sm:$0xff] }
 0x168   : > { %1337 = vrot.lane.b32.xlu0 %v4025_v37, %s3693_s6  ;;  %v1685_v37 = vld [vmem:[#allocation2 + $0x62] sm:$0xff]  ;;  %v4573_v6 = vpack.c.bf16 %v1442_v25, %v1442_v25 }
 0x169   : > { %v2124_v23 = vpop.permute.xlu1 %2123  ;;  %v4487_v35 = vpack.c.bf16 %v1685_v37, %v1685_v37 }
 0x16a   : > { %2191 = vst.msk [vmem:[#allocation3 + $0x74] sm:$0xf] %vm2161_vm9, %v2124_v23  ;;  %v2379_v22 = vpop.permute.xlu0 %2378  ;;  %v1683_v23 = vld [vmem:[#allocation2 + $0x4a] sm:$0xff] }
 0x16b   : > { %1307 = vrot.lane.b32.xlu1 %v4464_v29, %s3693_s6  ;;  %2447 = vst.msk [vmem:[#allocation3 + $0x70] sm:$0xf] %vm2418_vm10, %v2379_v22 }
 0x16c   : > { %1562 = vrot.lane.b32.xlu0 %v4469_v3, %s3694_s7 }
 0x16d   : > { %v2349_v32 = vpop.permute.xlu1 %2348 }
 0x16e   : > { %2432 = vst.msk [vmem:[#allocation3 + $0x34] sm:$0xf] %vm2418_vm10, %v2349_v32  ;;  %v2604_v12 = vpop.permute.xlu0 %2603  ;;  %v4583_v32 = vpack.c.bf16 %v1683_v23, %v1683_v23  ;;  %v1441_v23 = vld [vmem:[#allocation2 + $0xf9] sm:$0xff] }
 0x16f   : > { %1339 = vrot.lane.b32.xlu1 %v4027_v38, %s3693_s6  ;;  %2688 = vst.msk [vmem:[#allocation3 + $0x30] sm:$0xf] %vm2675_vm11, %v2604_v12  ;;  %v1686_v38 = vld [vmem:[#allocation2 + $0x6a] sm:$0xff] }
 0x170   : > { %1594 = vrot.lane.b32.xlu0 %v4477_v4, %s3694_s7  ;;  %v4502_v58 = vpack.c.bf16 %v1686_v38, %v1686_v38  ;;  %v1699_v12 = vld [vmem:[#allocation2 + $0x10a] sm:$0xff] }
 0x171   : > { %v2381_v8 = vpop.permute.xlu1 %2380 }
 0x172   : > { %2448 = vst.msk [vmem:[#allocation3 + $0x74] sm:$0xf] %vm2418_vm10, %v2381_v8  ;;  %v2636_v20 = vpop.permute.xlu0 %2635  ;;  %v4588_v8 = vpack.c.bf16 %v1443_v31, %v1443_v31 }
 0x173   : > { %1564 = vrot.lane.b32.xlu1 %v4482_v21, %s3694_s7  ;;  %2704 = vst.msk [vmem:[#allocation3 + $0x70] sm:$0xf] %vm2675_vm11, %v2636_v20  ;;  %v4593_v20 = vpack.c.bf16 %v1699_v12, %v1699_v12 }
 0x174   : > { %1819 = vrot.lane.b32.xlu0 %v4487_v35, %s3695_s8 }
 0x175   : > { %v2606_v41 = vpop.permute.xlu1 %2605 }
 0x176   : > { %2689 = vst.msk [vmem:[#allocation3 + $0x34] sm:$0xf] %vm2675_vm11, %v2606_v41  ;;  %v1314_v36 = vpop.permute.xlu0 %1313 }
 0x177   : > { %1596 = vrot.lane.b32.xlu1 %v4492_v39, %s3694_s7  ;;  %1400 = vst.msk [vmem:[#allocation3 + $0x28] sm:$0xf] %vm1389_vm6, %v1314_v36  ;;  %v1700_v36 = vld [vmem:[#allocation2 + $0x112] sm:$0xff] }
 0x178   : > { %1851 = vrot.lane.b32.xlu0 %v4497_v40, %s3695_s8 }
 0x179   : > { %v2638_v54 = vpop.permute.xlu1 %2637 }
 0x17a   : > { %2705 = vst.msk [vmem:[#allocation3 + $0x74] sm:$0xf] %vm2675_vm11, %v2638_v54  ;;  %v1346_v56 = vpop.permute.xlu0 %1345 }
 0x17b   : > { %1821 = vrot.lane.b32.xlu1 %v4502_v58, %s3695_s8  ;;  %1416 = vst.msk [vmem:[#allocation3 + $0x68] sm:$0xf] %vm1389_vm6, %v1346_v56  ;;  %v4606_v56 = vpack.c.bf16 %v1700_v36, %v1700_v36 }
 0x17c   : > { %2077 = vrot.lane.b32.xlu0 %v3533_v52, %s3696_s9  ;;  %v1957_v52 = vld [vmem:[#allocation2 + $0x120] sm:$0xff] }
 0x17d   : > { %v1316_v49 = vpop.permute.xlu1 %1315  ;;  %v3669_v18 = vld [vmem:[#allocation3 + $0x30] sm:$0xff]   ;;  %v3547_v0 = vpack.c.bf16 %v1957_v52, %v1957_v52 }
 0x17e   : > { %1401 = vst.msk [vmem:[#allocation3 + $0x2c] sm:$0xf] %vm1389_vm6, %v1316_v49  ;;  %v1571_v9 = vpop.permute.xlu0 %1570  ;;  %v2844_v63 = vsel %vm2821_vm12, %v3669_v18, 0  ;;  %v1958_v18 = vld [vmem:[#allocation2 + $0x128] sm:$0xff]  ;;  %v1698_v52 = vld [vmem:[#allocation2 + $0xfa] sm:$0xff] }
 0x17f   : > { %1853 = vrot.lane.b32.xlu1 %v4510_v7, %s3695_s8  ;;  %1657 = vst.msk [vmem:[#allocation3 + $0x28] sm:$0xf] %vm1646_vm7, %v1571_v9 }
 0x180   : > { %2109 = vrot.lane.b32.xlu0 %v4036_v46, %s3696_s9 }
 0x181   : > { %v1348_v60 = vpop.permute.xlu1 %1347  ;;  %v3668_v11 = vld [vmem:[#allocation3 + $0x70] sm:$0xff]  }
 0x182   : > { %1417 = vst.msk [vmem:[#allocation3 + $0x6c] sm:$0xf] %vm1389_vm6, %v1348_v60  ;;  %v1603_v17 = vpop.permute.xlu0 %1602  ;;  %3642 = vmatprep.subr.msk.bf16.mxu0 %vm2821_vm12, %v3668_v11 }
 0x183   : > { %2079 = vrot.lane.b32.xlu1 %v3534_v16, %s3696_s9  ;;  %1673 = vst.msk [vmem:[#allocation3 + $0x68] sm:$0xf] %vm1646_vm7, %v1603_v17  ;;  %3626 = vmatpush3.bf16.xpose.msra.mxu0 %v2844_v63  ;;  %v3548_v63 = vpack.c.bf16 %v1958_v18, %v1958_v18 }
 0x184   : > { %2334 = vrot.lane.b32.xlu0 %v4379_v55, %s3697_s10 }
 0x185   : > { %v1573_v28 = vpop.permute.xlu1 %1572 }
 0x186   : > { %1658 = vst.msk [vmem:[#allocation3 + $0x2c] sm:$0xf] %vm1646_vm7, %v1573_v28  ;;  %v1828_v46 = vpop.permute.xlu0 %1827 }
 0x187   : > { %2111 = vrot.lane.b32.xlu1 %v4038_v47, %s3696_s9  ;;  %1914 = vst.msk [vmem:[#allocation3 + $0x28] sm:$0xf] %vm1903_vm8, %v1828_v46 }
 0x188   : > { %2366 = vrot.lane.b32.xlu0 %v4387_v33, %s3697_s10  ;;  %v4545_v33 = vpack.c.bf16 %v1169_v61, %v1169_v61  ;;  %v1183_v61 = vld [vmem:[#allocation2 + $0xf0] sm:$0xff] }
 0x189   : > { %v1605_v1 = vpop.permute.xlu1 %1604 }
 0x18a   : > { %1674 = vst.msk [vmem:[#allocation3 + $0x6c] sm:$0xf] %vm1646_vm7, %v1605_v1  ;;  %v1860_v45 = vpop.permute.xlu0 %1859 }
 0x18b   : > { %2336 = vrot.lane.b32.xlu1 %v4392_v24, %s3697_s10  ;;  %1930 = vst.msk [vmem:[#allocation3 + $0x68] sm:$0xf] %vm1903_vm8, %v1860_v45  ;;  %v1167_v45 = vld [vmem:[#allocation2 + $0x30] sm:$0xff] }
 0x18c   : > { %2591 = vrot.lane.b32.xlu0 %v4397_v44, %s3698_s11 }
 0x18d   : > { %v1830_v55 = vpop.permute.xlu1 %1829 }
 0x18e   : > { %1915 = vst.msk [vmem:[#allocation3 + $0x2c] sm:$0xf] %vm1903_vm8, %v1830_v55  ;;  %v2086_v47 = vpop.permute.xlu0 %2085 }
 0x18f   : > { %2368 = vrot.lane.b32.xlu1 %v4402_v57, %s3697_s10  ;;  %2172 = vst.msk [vmem:[#allocation3 + $0x28] sm:$0xf] %vm2161_vm9, %v2086_v47  ;;  %v1170_v57 = vld [vmem:[#allocation2 + $0x50] sm:$0xff]  ;;  %v4649_v47 = vpack.c.bf16 %v1183_v61, %v1183_v61  ;;  %v1438_v61 = vld [vmem:[#allocation2 + $0xd9] sm:$0xff] }
 0x190   : > { %2623 = vrot.lane.b32.xlu0 %v4407_v43, %s3698_s11  ;;  %v1426_v43 = vld [vmem:[#allocation2 + $0x49] sm:$0xff]  ;;  %v4558_v42 = vpack.c.bf16 %v1170_v57, %v1170_v57 }
 0x191   : > { %v1862_v24 = vpop.permute.xlu1 %1861  ;;  %v4563_v62 = vpack.c.bf16 %v1426_v43, %v1426_v43  ;;  %v1440_v43 = vld [vmem:[#allocation2 + $0xf1] sm:$0xff] }
 0x192   : > { %1931 = vst.msk [vmem:[#allocation3 + $0x6c] sm:$0xf] %vm1903_vm8, %v1862_v24  ;;  %v2118_v44 = vpop.permute.xlu0 %2117 }
 0x193   : > { %2593 = vrot.lane.b32.xlu1 %v4412_v50, %s3698_s11  ;;  %2188 = vst.msk [vmem:[#allocation3 + $0x68] sm:$0xf] %vm2161_vm9, %v2118_v44  ;;  %v1186_v50 = vld [vmem:[#allocation2 + $0x110] sm:$0xff] }
 0x194   : > { %1301 = vrot.lane.b32.xlu0 %v4545_v33, %s3693_s6  ;;  %v4568_v27 = vpack.c.bf16 %v1186_v50, %v1186_v50 }
 0x195   : > { %v2088_v59 = vpop.permute.xlu1 %2087 }
 0x196   : > { %2173 = vst.msk [vmem:[#allocation3 + $0x2c] sm:$0xf] %vm2161_vm9, %v2088_v59  ;;  %v2343_v19 = vpop.permute.xlu0 %2342 }
 0x197   : > { %2625 = vrot.lane.b32.xlu1 %v4420_v2, %s3698_s11  ;;  %2429 = vst.msk [vmem:[#allocation3 + $0x28] sm:$0xf] %vm2418_vm10, %v2343_v19  ;;  %v1427_v2 = vld [vmem:[#allocation2 + $0x51] sm:$0xff] }
 0x198   : > { %1333 = vrot.lane.b32.xlu0 %v4553_v14, %s3693_s6  ;;  %v4578_v22 = vpack.c.bf16 %v1427_v2, %v1427_v2 }
 0x199   : > { %v2120_v26 = vpop.permute.xlu1 %2119 }
 0x19a   : > { %2189 = vst.msk [vmem:[#allocation3 + $0x6c] sm:$0xf] %vm2161_vm9, %v2120_v26  ;;  %v2375_v15 = vpop.permute.xlu0 %2374  ;;  %v4669_v26 = vpack.c.bf16 %v1440_v43, %v1440_v43  ;;  %v1439_v43 = vld [vmem:[#allocation2 + $0xe1] sm:$0xff] }
 0x19b   : > { %1303 = vrot.lane.b32.xlu1 %v4558_v42, %s3693_s6  ;;  %2445 = vst.msk [vmem:[#allocation3 + $0x68] sm:$0xf] %vm2418_vm10, %v2375_v15  ;;  %v1681_v15 = vld [vmem:[#allocation2 + $0x32] sm:$0xff] }
 0x19c   : > { %1558 = vrot.lane.b32.xlu0 %v4563_v62, %s3694_s7 }
 0x19d   : > { %v2345_v10 = vpop.permute.xlu1 %2344 }
 0x19e   : > { %2430 = vst.msk [vmem:[#allocation3 + $0x2c] sm:$0xf] %vm2418_vm10, %v2345_v10  ;;  %v2600_v30 = vpop.permute.xlu0 %2599 }
 0x19f   : > { %1335 = vrot.lane.b32.xlu1 %v4568_v27, %s3693_s6  ;;  %2686 = vst.msk [vmem:[#allocation3 + $0x28] sm:$0xf] %vm2675_vm11, %v2600_v30  ;;  %v4679_v30 = vpack.c.bf16 %v1681_v15, %v1681_v15 }
 0x1a0   : > { %1590 = vrot.lane.b32.xlu0 %v4573_v6, %s3694_s7 }
 0x1a1   : > { %v2377_v37 = vpop.permute.xlu1 %2376 }
 0x1a2   : > { %2446 = vst.msk [vmem:[#allocation3 + $0x6c] sm:$0xf] %vm2418_vm10, %v2377_v37  ;;  %v2632_v34 = vpop.permute.xlu0 %2631  ;;  %v1697_v37 = vld [vmem:[#allocation2 + $0xf2] sm:$0xff] }
 0x1a3   : > { %1560 = vrot.lane.b32.xlu1 %v4578_v22, %s3694_s7  ;;  %2702 = vst.msk [vmem:[#allocation3 + $0x68] sm:$0xf] %vm2675_vm11, %v2632_v34  ;;  %v4684_v34 = vpack.c.bf16 %v1441_v23, %v1441_v23  ;;  %v1680_v23 = vld [vmem:[#allocation2 + $0x22] sm:$0xff] }
 0x1a4   : > { %1815 = vrot.lane.b32.xlu0 %v4583_v32, %s3695_s8 }
 0x1a5   : > { %v2602_v38 = vpop.permute.xlu1 %2601 }
 0x1a6   : > { %2687 = vst.msk [vmem:[#allocation3 + $0x2c] sm:$0xf] %vm2675_vm11, %v2602_v38  ;;  %v1310_v41 = vpop.permute.xlu0 %1309  ;;  %v4689_v38 = vpack.c.bf16 %v1697_v37, %v1697_v37 }
 0x1a7   : > { %1592 = vrot.lane.b32.xlu1 %v4588_v8, %s3694_s7  ;;  %1398 = vst.msk [vmem:[#allocation3 + $0x20] sm:$0xf] %vm1389_vm6, %v1310_v41 }
 0x1a8   : > { %1847 = vrot.lane.b32.xlu0 %v4593_v20, %s3695_s8 }
 0x1a9   : > { %v2634_v51 = vpop.permute.xlu1 %2633 }
 0x1aa   : > { %2703 = vst.msk [vmem:[#allocation3 + $0x6c] sm:$0xf] %vm2675_vm11, %v2634_v51  ;;  %v1342_v54 = vpop.permute.xlu0 %1341  ;;  %v4694_v51 = vpack.c.bf16 %v1682_v13, %v1682_v13  ;;  %v3496_v13 = vpack.c.bf16 %v1680_v23, %v1680_v23 }
 0x1ab   : > { %1817 = vrot.lane.b32.xlu1 %v4598_v48, %s3695_s8  ;;  %1414 = vst.msk [vmem:[#allocation3 + $0x60] sm:$0xf] %vm1389_vm6, %v1342_v54 }
 0x1ac   : > { %2073 = vrot.lane.b32.xlu0 %v4455_v53, %s3696_s9 }
 0x1ad   : > { %v1312_v49 = vpop.permute.xlu1 %1311  ;;  %v3671_v16 = vld [vmem:[#allocation3 + $0x28] sm:$0xff]  }
 0x1ae   : > { %1399 = vst.msk [vmem:[#allocation3 + $0x24] sm:$0xf] %vm1389_vm6, %v1312_v49  ;;  %v1567_v9 = vpop.permute.xlu0 %1566  ;;  %v2841_v53 = vsel %vm2821_vm12, %v3671_v16, 0  ;;  %v4702_v49 = vpack.c.bf16 %v1698_v52, %v1698_v52 }
 0x1af   : > { %1849 = vrot.lane.b32.xlu1 %v4606_v56, %s3695_s8  ;;  %1655 = vst.msk [vmem:[#allocation3 + $0x20] sm:$0xf] %vm1646_vm7, %v1567_v9 }
 0x1b0   : > { %2105 = vrot.lane.b32.xlu0 %v3547_v0, %s3696_s9 }
 0x1b1   : > { %v1344_v60 = vpop.permute.xlu1 %1343  ;;  %v3670_v11 = vld [vmem:[#allocation3 + $0x68] sm:$0xff]  }
 0x1b2   : > { %1415 = vst.msk [vmem:[#allocation3 + $0x64] sm:$0xf] %vm1389_vm6, %v1344_v60  ;;  %v1599_v17 = vpop.permute.xlu0 %1598  ;;  %3643 = vmatprep.subr.msk.bf16.mxu0 %vm2821_vm12, %v3670_v11 }
 0x1b3   : > { %2075 = vrot.lane.b32.xlu1 %v4464_v29, %s3696_s9  ;;  %1671 = vst.msk [vmem:[#allocation3 + $0x60] sm:$0xf] %vm1646_vm7, %v1599_v17  ;;  %3628 = vmatpush3.bf16.xpose.msra.mxu0 %v2841_v53 }
 0x1b4   : > { %2330 = vrot.lane.b32.xlu0 %v4469_v3, %s3697_s10 }
 0x1b5   : > { %v1569_v28 = vpop.permute.xlu1 %1568 }
 0x1b6   : > { %1656 = vst.msk [vmem:[#allocation3 + $0x24] sm:$0xf] %vm1646_vm7, %v1569_v28  ;;  %v1824_v46 = vpop.permute.xlu0 %1823  ;;  %v1165_v28 = vld [vmem:[#allocation2 + $0x18] sm:$0xff] }
 0x1b7   : > { %2107 = vrot.lane.b32.xlu1 %v3548_v63, %s3696_s9  ;;  %1912 = vst.msk [vmem:[#allocation3 + $0x20] sm:$0xf] %vm1903_vm8, %v1824_v46  ;;  %v1181_v46 = vld [vmem:[#allocation2 + $0xd8] sm:$0xff] }
 0x1b8   : > { %2362 = vrot.lane.b32.xlu0 %v4477_v4, %s3697_s10  ;;  %v4641_v4 = vpack.c.bf16 %v1167_v45, %v1167_v45 }
 0x1b9   : > { %v1601_v29 = vpop.permute.xlu1 %1600 }
 0x1ba   : > { %1672 = vst.msk [vmem:[#allocation3 + $0x64] sm:$0xf] %vm1646_vm7, %v1601_v29  ;;  %v1856_v1 = vpop.permute.xlu0 %1855 }
 0x1bb   : > { %2332 = vrot.lane.b32.xlu1 %v4482_v21, %s3697_s10  ;;  %1928 = vst.msk [vmem:[#allocation3 + $0x60] sm:$0xf] %vm1903_vm8, %v1856_v1 }
 0x1bc   : > { %2587 = vrot.lane.b32.xlu0 %v4487_v35, %s3698_s11 }
 0x1bd   : > { %v1826_v3 = vpop.permute.xlu1 %1825 }
 0x1be   : > { %1913 = vst.msk [vmem:[#allocation3 + $0x24] sm:$0xf] %vm1903_vm8, %v1826_v3  ;;  %v2082_v55 = vpop.permute.xlu0 %2081  ;;  %v1422_v3 = vld [vmem:[#allocation2 + $0x19] sm:$0xff] }
 0x1bf   : > { %2364 = vrot.lane.b32.xlu1 %v4492_v39, %s3697_s10  ;;  %2170 = vst.msk [vmem:[#allocation3 + $0x20] sm:$0xf] %vm2161_vm9, %v2082_v55  ;;  %v1168_v39 = vld [vmem:[#allocation2 + $0x38] sm:$0xff]  ;;  %v3463_v55 = vpack.c.bf16 %v1422_v3, %v1422_v3 }
 0x1c0   : > { %2619 = vrot.lane.b32.xlu0 %v4497_v40, %s3698_s11  ;;  %v1424_v40 = vld [vmem:[#allocation2 + $0x31] sm:$0xff]  ;;  %v4654_v44 = vpack.c.bf16 %v1168_v39, %v1168_v39 }
 0x1c1   : > { %v1858_v21 = vpop.permute.xlu1 %1857  ;;  %v4659_v57 = vpack.c.bf16 %v1424_v40, %v1424_v40 }
 0x1c2   : > { %1929 = vst.msk [vmem:[#allocation3 + $0x64] sm:$0xf] %vm1903_vm8, %v1858_v21  ;;  %v2114_v35 = vpop.permute.xlu0 %2113 }
 0x1c3   : > { %2589 = vrot.lane.b32.xlu1 %v4502_v58, %s3698_s11  ;;  %2186 = vst.msk [vmem:[#allocation3 + $0x60] sm:$0xf] %vm2161_vm9, %v2114_v35  ;;  %v1184_v58 = vld [vmem:[#allocation2 + $0xf8] sm:$0xff] }
 0x1c4   : > { %1297 = vrot.lane.b32.xlu0 %v4641_v4, %s3693_s6  ;;  %v4664_v50 = vpack.c.bf16 %v1184_v58, %v1184_v58 }
 0x1c5   : > { %v2084_v24 = vpop.permute.xlu1 %2083 }
 0x1c6   : > { %2171 = vst.msk [vmem:[#allocation3 + $0x24] sm:$0xf] %vm2161_vm9, %v2084_v24  ;;  %v2339_v5 = vpop.permute.xlu0 %2338  ;;  %v3479_v24 = vpack.c.bf16 %v1438_v61, %v1438_v61 }
 0x1c7   : > { %2621 = vrot.lane.b32.xlu1 %v4510_v7, %s3698_s11  ;;  %2427 = vst.msk [vmem:[#allocation3 + $0x20] sm:$0xf] %vm2418_vm10, %v2339_v5  ;;  %v1425_v7 = vld [vmem:[#allocation2 + $0x39] sm:$0xff] }
 0x1c8   : > { %1329 = vrot.lane.b32.xlu0 %v4649_v47, %s3693_s6  ;;  %v4674_v10 = vpack.c.bf16 %v1425_v7, %v1425_v7  ;;  %v1679_v5 = vld [vmem:[#allocation2 + $0x1a] sm:$0xff] }
 0x1c9   : > { %v2116_v59 = vpop.permute.xlu1 %2115 }
 0x1ca   : > { %2187 = vst.msk [vmem:[#allocation3 + $0x64] sm:$0xf] %vm2161_vm9, %v2116_v59  ;;  %v2371_v19 = vpop.permute.xlu0 %2370 }
 0x1cb   : > { %1299 = vrot.lane.b32.xlu1 %v4654_v44, %s3693_s6  ;;  %2443 = vst.msk [vmem:[#allocation3 + $0x60] sm:$0xf] %vm2418_vm10, %v2371_v19  ;;  %v3495_v19 = vpack.c.bf16 %v1679_v5, %v1679_v5 }
 0x1cc   : > { %1554 = vrot.lane.b32.xlu0 %v4659_v57, %s3694_s7 }
 0x1cd   : > { %v2341_v25 = vpop.permute.xlu1 %2340 }
 0x1ce   : > { %2428 = vst.msk [vmem:[#allocation3 + $0x24] sm:$0xf] %vm2418_vm10, %v2341_v25  ;;  %v2596_v2 = vpop.permute.xlu0 %2595  ;;  %v1695_v25 = vld [vmem:[#allocation2 + $0xda] sm:$0xff] }
 0x1cf   : > { %1331 = vrot.lane.b32.xlu1 %v4664_v50, %s3693_s6  ;;  %2684 = vst.msk [vmem:[#allocation3 + $0x20] sm:$0xf] %vm2675_vm11, %v2596_v2  ;;  %v3480_v2 = vpack.c.bf16 %v1439_v43, %v1439_v43 }
 0x1d0   : > { %1586 = vrot.lane.b32.xlu0 %v4669_v26, %s3694_s7 }
 0x1d1   : > { %v2373_v31 = vpop.permute.xlu1 %2372 }
 0x1d2   : > { %2444 = vst.msk [vmem:[#allocation3 + $0x64] sm:$0xf] %vm2418_vm10, %v2373_v31  ;;  %v2628_v12 = vpop.permute.xlu0 %2627  ;;  %v3511_v31 = vpack.c.bf16 %v1695_v25, %v1695_v25 }
 0x1d3   : > { %1556 = vrot.lane.b32.xlu1 %v4674_v10, %s3694_s7  ;;  %2700 = vst.msk [vmem:[#allocation3 + $0x60] sm:$0xf] %vm2675_vm11, %v2628_v12 }
 0x1d4   : > { %1811 = vrot.lane.b32.xlu0 %v4679_v30, %s3695_s8 }
 0x1d5   : > { %v2598_v41 = vpop.permute.xlu1 %2597 }
 0x1d6   : > { %2685 = vst.msk [vmem:[#allocation3 + $0x24] sm:$0xf] %vm2675_vm11, %v2598_v41  ;;  %v1306_v36 = vpop.permute.xlu0 %1305  ;;  %v1696_v41 = vld [vmem:[#allocation2 + $0xe2] sm:$0xff] }
 0x1d7   : > { %1588 = vrot.lane.b32.xlu1 %v4684_v34, %s3694_s7  ;;  %1396 = vst.msk [vmem:[#allocation3 + $0x18] sm:$0xf] %vm1389_vm6, %v1306_v36 }
 0x1d8   : > { %1843 = vrot.lane.b32.xlu0 %v4689_v38, %s3695_s8 }
 0x1d9   : > { %v2630_v54 = vpop.permute.xlu1 %2629 }
 0x1da   : > { %2701 = vst.msk [vmem:[#allocation3 + $0x64] sm:$0xf] %vm2675_vm11, %v2630_v54  ;;  %v1338_v0 = vpop.permute.xlu0 %1337  ;;  %v3512_v54 = vpack.c.bf16 %v1696_v41, %v1696_v41 }
 0x1db   : > { %1813 = vrot.lane.b32.xlu1 %v4694_v51, %s3695_s8  ;;  %1412 = vst.msk [vmem:[#allocation3 + $0x58] sm:$0xf] %vm1389_vm6, %v1338_v0 }
 0x1dc   : > { %2069 = vrot.lane.b32.xlu0 %v4545_v33, %s3696_s9 }
 0x1dd   : > { %v1308_v9 = vpop.permute.xlu1 %1307  ;;  %v3673_v18 = vld [vmem:[#allocation3 + $0x20] sm:$0xff]  }
 0x1de   : > { %1397 = vst.msk [vmem:[#allocation3 + $0x1c] sm:$0xf] %vm1389_vm6, %v1308_v9  ;;  %v1563_v16 = vpop.permute.xlu0 %1562  ;;  %v2838_v33 = vsel %vm2821_vm12, %v3673_v18, 0 }
 0x1df   : > { %1845 = vrot.lane.b32.xlu1 %v4702_v49, %s3695_s8  ;;  %1653 = vst.msk [vmem:[#allocation3 + $0x18] sm:$0xf] %vm1646_vm7, %v1563_v16 }
 0x1e0   : > { %2101 = vrot.lane.b32.xlu0 %v4553_v14, %s3696_s9 }
 0x1e1   : > { %v1340_v60 = vpop.permute.xlu1 %1339  ;;  %v3672_v11 = vld [vmem:[#allocation3 + $0x60] sm:$0xff]  }
 0x1e2   : > { %1413 = vst.msk [vmem:[#allocation3 + $0x5c] sm:$0xf] %vm1389_vm6, %v1340_v60  ;;  %v1595_v17 = vpop.permute.xlu0 %1594  ;;  %3644 = vmatprep.subr.msk.bf16.mxu0 %vm2821_vm12, %v3672_v11 }
 0x1e3   : > { %2071 = vrot.lane.b32.xlu1 %v4558_v42, %s3696_s9  ;;  %1669 = vst.msk [vmem:[#allocation3 + $0x58] sm:$0xf] %vm1646_vm7, %v1595_v17  ;;  %3630 = vmatpush3.bf16.xpose.msra.mxu0 %v2838_v33 }
 0x1e4   : > { %2326 = vrot.lane.b32.xlu0 %v4563_v62, %s3697_s10 }
 0x1e5   : > { %v1565_v53 = vpop.permute.xlu1 %1564 }
 0x1e6   : > { %1654 = vst.msk [vmem:[#allocation3 + $0x1c] sm:$0xf] %vm1646_vm7, %v1565_v53  ;;  %v1820_v14 = vpop.permute.xlu0 %1819 }
 0x1e7   : > { %2103 = vrot.lane.b32.xlu1 %v4568_v27, %s3696_s9  ;;  %1910 = vst.msk [vmem:[#allocation3 + $0x18] sm:$0xf] %vm1903_vm8, %v1820_v14 }
 0x1e8   : > { %2358 = vrot.lane.b32.xlu0 %v4573_v6, %s3697_s10  ;;  %v3431_v6 = vpack.c.bf16 %v1165_v28, %v1165_v28 }
 0x1e9   : > { %v1597_v42 = vpop.permute.xlu1 %1596 }
 0x1ea   : > { %1670 = vst.msk [vmem:[#allocation3 + $0x5c] sm:$0xf] %vm1646_vm7, %v1597_v42  ;;  %v1852_v63 = vpop.permute.xlu0 %1851 }
 0x1eb   : > { %2328 = vrot.lane.b32.xlu1 %v4578_v22, %s3697_s10  ;;  %1926 = vst.msk [vmem:[#allocation3 + $0x58] sm:$0xf] %vm1903_vm8, %v1852_v63 }
 0x1ec   : > { %2583 = vrot.lane.b32.xlu0 %v4583_v32, %s3698_s11  ;;  %v1166_v32 = vld [vmem:[#allocation2 + $0x20] sm:$0xff] }
 0x1ed   : > { %v1822_v62 = vpop.permute.xlu1 %1821  ;;  %v3432_v45 = vpack.c.bf16 %v1166_v32, %v1166_v32 }
 0x1ee   : > { %1911 = vst.msk [vmem:[#allocation3 + $0x1c] sm:$0xf] %vm1903_vm8, %v1822_v62  ;;  %v2078_v27 = vpop.permute.xlu0 %2077 }
 0x1ef   : > { %2360 = vrot.lane.b32.xlu1 %v4588_v8, %s3697_s10  ;;  %2168 = vst.msk [vmem:[#allocation3 + $0x18] sm:$0xf] %vm2161_vm9, %v2078_v27  ;;  %v3447_v8 = vpack.c.bf16 %v1181_v46, %v1181_v46 }
 0x1f0   : > { %2615 = vrot.lane.b32.xlu0 %v4593_v20, %s3698_s11 }
 0x1f1   : > { %v1854_v22 = vpop.permute.xlu1 %1853 }
 0x1f2   : > { %1927 = vst.msk [vmem:[#allocation3 + $0x5c] sm:$0xf] %vm1903_vm8, %v1854_v22  ;;  %v2110_v29 = vpop.permute.xlu0 %2109 }
 0x1f3   : > { %2585 = vrot.lane.b32.xlu1 %v4598_v48, %s3698_s11  ;;  %2184 = vst.msk [vmem:[#allocation3 + $0x58] sm:$0xf] %vm2161_vm9, %v2110_v29  ;;  %v1182_v48 = vld [vmem:[#allocation2 + $0xe0] sm:$0xff] }
 0x1f4   : > { %1293 = vrot.lane.b32.xlu0 %v3431_v6, %s3693_s6  ;;  %v3448_v39 = vpack.c.bf16 %v1182_v48, %v1182_v48 }
 0x1f5   : > { %v2080_v1 = vpop.permute.xlu1 %2079 }
 0x1f6   : > { %2169 = vst.msk [vmem:[#allocation3 + $0x1c] sm:$0xf] %vm2161_vm9, %v2080_v1  ;;  %v2335_v20 = vpop.permute.xlu0 %2334 }
 0x1f7   : > { %2617 = vrot.lane.b32.xlu1 %v4606_v56, %s3698_s11  ;;  %2425 = vst.msk [vmem:[#allocation3 + $0x18] sm:$0xf] %vm2418_vm10, %v2335_v20  ;;  %v1423_v56 = vld [vmem:[#allocation2 + $0x21] sm:$0xff] }
 0x1f8   : > { %1325 = vrot.lane.b32.xlu0 %v3447_v8, %s3693_s6  ;;  %v3464_v59 = vpack.c.bf16 %v1423_v56, %v1423_v56 }
 0x1f9   : > { %v2112_v21 = vpop.permute.xlu1 %2111 }
 0x1fa   : > { %2185 = vst.msk [vmem:[#allocation3 + $0x5c] sm:$0xf] %vm2161_vm9, %v2112_v21  ;;  %v2367_v35 = vpop.permute.xlu0 %2366 }
 0x1fb   : > { %1295 = vrot.lane.b32.xlu1 %v3432_v45, %s3693_s6  ;;  %2441 = vst.msk [vmem:[#allocation3 + $0x58] sm:$0xf] %vm2418_vm10, %v2367_v35 }
 0x1fc   : > { %1550 = vrot.lane.b32.xlu0 %v3463_v55, %s3694_s7 }
 0x1fd   : > { %v2337_v40 = vpop.permute.xlu1 %2336 }
 0x1fe   : > { %2426 = vst.msk [vmem:[#allocation3 + $0x1c] sm:$0xf] %vm2418_vm10, %v2337_v40  ;;  %v2592_v58 = vpop.permute.xlu0 %2591 }
 0x1ff   : > { %1327 = vrot.lane.b32.xlu1 %v3448_v39, %s3693_s6  ;;  %2682 = vst.msk [vmem:[#allocation3 + $0x18] sm:$0xf] %vm2675_vm11, %v2592_v58 }
 0x200   : > { %1582 = vrot.lane.b32.xlu0 %v3479_v24, %s3694_s7 }
 0x201   : > { %v2369_v7 = vpop.permute.xlu1 %2368 }
 0x202   : > { %2442 = vst.msk [vmem:[#allocation3 + $0x5c] sm:$0xf] %vm2418_vm10, %v2369_v7  ;;  %v2624_v15 = vpop.permute.xlu0 %2623 }
 0x203   : > { %1552 = vrot.lane.b32.xlu1 %v3464_v59, %s3694_s7  ;;  %2698 = vst.msk [vmem:[#allocation3 + $0x58] sm:$0xf] %vm2675_vm11, %v2624_v15 }
 0x204   : > { %1807 = vrot.lane.b32.xlu0 %v3495_v19, %s3695_s8 }
 0x205   : > { %v2594_v37 = vpop.permute.xlu1 %2593 }
 0x206   : > { %2683 = vst.msk [vmem:[#allocation3 + $0x1c] sm:$0xf] %vm2675_vm11, %v2594_v37  ;;  %v1302_v12 = vpop.permute.xlu0 %1301 }
 0x207   : > { %1584 = vrot.lane.b32.xlu1 %v3480_v2, %s3694_s7  ;;  %1394 = vst.msk [vmem:[#allocation3 + $0x10] sm:$0xf] %vm1389_vm6, %v1302_v12 }
 0x208   : > { %1839 = vrot.lane.b32.xlu0 %v3511_v31, %s3695_s8 }
 0x209   : > { %v2626_v36 = vpop.permute.xlu1 %2625 }
 0x20a   : > { %2699 = vst.msk [vmem:[#allocation3 + $0x5c] sm:$0xf] %vm2675_vm11, %v2626_v36  ;;  %v1334_v52 = vpop.permute.xlu0 %1333 }
 0x20b   : > { %1809 = vrot.lane.b32.xlu1 %v3496_v13, %s3695_s8  ;;  %1410 = vst.msk [vmem:[#allocation3 + $0x50] sm:$0xf] %vm1389_vm6, %v1334_v52 }
 0x20c   : > { %2065 = vrot.lane.b32.xlu0 %v4641_v4, %s3696_s9 }
 0x20d   : > { %v1304_v0 = vpop.permute.xlu1 %1303  ;;  %v3675_v16 = vld [vmem:[#allocation3 + $0x18] sm:$0xff]  }
 0x20e   : > { %1395 = vst.msk [vmem:[#allocation3 + $0x14] sm:$0xf] %vm1389_vm6, %v1304_v0  ;;  %v1559_v9 = vpop.permute.xlu0 %1558  ;;  %v2835_v4 = vsel %vm2821_vm12, %v3675_v16, 0 }
 0x20f   : > { %1841 = vrot.lane.b32.xlu1 %v3512_v54, %s3695_s8  ;;  %1651 = vst.msk [vmem:[#allocation3 + $0x10] sm:$0xf] %vm1646_vm7, %v1559_v9 }
 0x210   : > { %2097 = vrot.lane.b32.xlu0 %v4649_v47, %s3696_s9 }
 0x211   : > { %v1336_v18 = vpop.permute.xlu1 %1335  ;;  %v3674_v60 = vld [vmem:[#allocation3 + $0x58] sm:$0xff]  }
 0x212   : > { %1411 = vst.msk [vmem:[#allocation3 + $0x54] sm:$0xf] %vm1389_vm6, %v1336_v18  ;;  %v1591_v11 = vpop.permute.xlu0 %1590  ;;  %3645 = vmatprep.subr.msk.bf16.mxu0 %vm2821_vm12, %v3674_v60 }
 0x213   : > { %2067 = vrot.lane.b32.xlu1 %v4654_v44, %s3696_s9  ;;  %1667 = vst.msk [vmem:[#allocation3 + $0x50] sm:$0xf] %vm1646_vm7, %v1591_v11  ;;  %3632 = vmatpush3.bf16.xpose.msra.mxu0 %v2835_v4 }
 0x214   : > { %2322 = vrot.lane.b32.xlu0 %v4659_v57, %s3697_s10 }
 0x215   : > { %v1561_v17 = vpop.permute.xlu1 %1560 }
 0x216   : > { %1652 = vst.msk [vmem:[#allocation3 + $0x14] sm:$0xf] %vm1646_vm7, %v1561_v17  ;;  %v1816_v47 = vpop.permute.xlu0 %1815 }
 0x217   : > { %2099 = vrot.lane.b32.xlu1 %v4664_v50, %s3696_s9  ;;  %1908 = vst.msk [vmem:[#allocation3 + $0x10] sm:$0xf] %vm1903_vm8, %v1816_v47 }
 0x218   : > { %2354 = vrot.lane.b32.xlu0 %v4669_v26, %s3697_s10 }
 0x219   : > { %v1593_v44 = vpop.permute.xlu1 %1592 }
 0x21a   : > { %1668 = vst.msk [vmem:[#allocation3 + $0x54] sm:$0xf] %vm1646_vm7, %v1593_v44  ;;  %v1848_v33 = vpop.permute.xlu0 %1847 }
 0x21b   : > { %2324 = vrot.lane.b32.xlu1 %v4674_v10, %s3697_s10  ;;  %1924 = vst.msk [vmem:[#allocation3 + $0x50] sm:$0xf] %vm1903_vm8, %v1848_v33 }
 0x21c   : > { %2579 = vrot.lane.b32.xlu0 %v4679_v30, %s3698_s11  ;;  %v4808_v30 = vld [vmem:[%s4894_s3] sm:$0xf] }
 0x21d   : > { %v1818_v57 = vpop.permute.xlu1 %1817  ;;  %3639 = vmatprep.mubr.msk.bf16.mxu0 %vm2821_vm12, %v4808_v30 }
 0x21e   : > { %1909 = vst.msk [vmem:[#allocation3 + $0x14] sm:$0xf] %vm1903_vm8, %v1818_v57  ;;  %v2074_v50 = vpop.permute.xlu0 %2073 }
 0x21f   : > { %2356 = vrot.lane.b32.xlu1 %v4684_v34, %s3697_s10  ;;  %2166 = vst.msk [vmem:[#allocation3 + $0x10] sm:$0xf] %vm2161_vm9, %v2074_v50 }
 0x220   : > { %2611 = vrot.lane.b32.xlu0 %v4689_v38, %s3698_s11 }
 0x221   : > { %v1850_v26 = vpop.permute.xlu1 %1849 }
 0x222   : > { %1925 = vst.msk [vmem:[#allocation3 + $0x54] sm:$0xf] %vm1903_vm8, %v1850_v26  ;;  %v2106_v10 = vpop.permute.xlu0 %2105 }
 0x223   : > { %2581 = vrot.lane.b32.xlu1 %v4694_v51, %s3698_s11  ;;  %2182 = vst.msk [vmem:[#allocation3 + $0x50] sm:$0xf] %vm2161_vm9, %v2106_v10 }
 0x225   : > { %v2076_v34 = vpop.permute.xlu1 %2075 }
 0x226   : > { %2167 = vst.msk [vmem:[#allocation3 + $0x14] sm:$0xf] %vm2161_vm9, %v2076_v34  ;;  %v2331_v38 = vpop.permute.xlu0 %2330 }
 0x227   : > { %2613 = vrot.lane.b32.xlu1 %v4702_v49, %s3698_s11  ;;  %2423 = vst.msk [vmem:[#allocation3 + $0x10] sm:$0xf] %vm2418_vm10, %v2331_v38 }
 0x229   : > { %v2108_v51 = vpop.permute.xlu1 %2107 }
 0x22a   : > { %2183 = vst.msk [vmem:[#allocation3 + $0x54] sm:$0xf] %vm2161_vm9, %v2108_v51  ;;  %v2363_v53 = vpop.permute.xlu0 %2362 }
 0x22b   : > { %2439 = vst.msk [vmem:[#allocation3 + $0x50] sm:$0xf] %vm2418_vm10, %v2363_v53 }
 0x22d   : > { %v2333_v14 = vpop.permute.xlu1 %2332 }
 0x22e   : > { %2424 = vst.msk [vmem:[#allocation3 + $0x14] sm:$0xf] %vm2418_vm10, %v2333_v14  ;;  %v2588_v42 = vpop.permute.xlu0 %2587 }
 0x22f   : > { %2680 = vst.msk [vmem:[#allocation3 + $0x10] sm:$0xf] %vm2675_vm11, %v2588_v42 }
 0x231   : > { %v2365_v63 = vpop.permute.xlu1 %2364 }
 0x232   : > { %2440 = vst.msk [vmem:[#allocation3 + $0x54] sm:$0xf] %vm2418_vm10, %v2365_v63  ;;  %v2620_v62 = vpop.permute.xlu0 %2619 }
 0x233   : > { %2696 = vst.msk [vmem:[#allocation3 + $0x50] sm:$0xf] %vm2675_vm11, %v2620_v62 }
 0x235   : > { %v2590_v49 = vpop.permute.xlu1 %2589 }
 0x236   : > { %2681 = vst.msk [vmem:[#allocation3 + $0x14] sm:$0xf] %vm2675_vm11, %v2590_v49  ;;  %v1298_v28 = vpop.permute.xlu0 %1297 }
 0x237   : > { %1392 = vst.msk [vmem:[#allocation3 + $0x8] sm:$0xf] %vm1389_vm6, %v1298_v28 }
 0x239   : > { %v2622_v27 = vpop.permute.xlu1 %2621 }
 0x23a   : > { %2697 = vst.msk [vmem:[#allocation3 + $0x54] sm:$0xf] %vm2675_vm11, %v2622_v27  ;;  %v1330_v6 = vpop.permute.xlu0 %1329 }
 0x23b   : > { %1408 = vst.msk [vmem:[#allocation3 + $0x48] sm:$0xf] %vm1389_vm6, %v1330_v6 }
 0x23d   : > { %v1300_v22 = vpop.permute.xlu1 %1299  ;;  %v3677_v29 = vld [vmem:[#allocation3 + $0x10] sm:$0xff]  }
 0x23e   : > { %1393 = vst.msk [vmem:[#allocation3 + $0xc] sm:$0xf] %vm1389_vm6, %v1300_v22  ;;  %v1555_v46 = vpop.permute.xlu0 %1554  ;;  %v2832_v3 = vsel %vm2821_vm12, %v3677_v29, 0 }
 0x23f   : > { %1649 = vst.msk [vmem:[#allocation3 + $0x8] sm:$0xf] %vm1646_vm7, %v1555_v46 }
 0x241   : > { %v1332_v32 = vpop.permute.xlu1 %1331  ;;  %v3676_v8 = vld [vmem:[#allocation3 + $0x50] sm:$0xff]  }
 0x242   : > { %1409 = vst.msk [vmem:[#allocation3 + $0x4c] sm:$0xf] %vm1389_vm6, %v1332_v32  ;;  %v1587_v1 = vpop.permute.xlu0 %1586  ;;  %3646 = vmatprep.subr.msk.bf16.mxu0 %vm2821_vm12, %v3676_v8 }
 0x243   : > { %1665 = vst.msk [vmem:[#allocation3 + $0x48] sm:$0xf] %vm1646_vm7, %v1587_v1  ;;  %3634 = vmatpush3.bf16.xpose.msra.mxu0 %v2832_v3 }
 0x245   : > { %v1557_v20 = vpop.permute.xlu1 %1556 }
 0x246   : > { %1650 = vst.msk [vmem:[#allocation3 + $0xc] sm:$0xf] %vm1646_vm7, %v1557_v20  ;;  %v1812_v45 = vpop.permute.xlu0 %1811 }
 0x247   : > { %1906 = vst.msk [vmem:[#allocation3 + $0x8] sm:$0xf] %vm1903_vm8, %v1812_v45 }
 0x249   : > { %v1589_v48 = vpop.permute.xlu1 %1588 }
 0x24a   : > { %1666 = vst.msk [vmem:[#allocation3 + $0x4c] sm:$0xf] %vm1646_vm7, %v1589_v48  ;;  %v1844_v55 = vpop.permute.xlu0 %1843 }
 0x24b   : > { %1922 = vst.msk [vmem:[#allocation3 + $0x48] sm:$0xf] %vm1903_vm8, %v1844_v55 }
 0x24d   : > { %v1814_v21 = vpop.permute.xlu1 %1813 }
 0x24e   : > { %1907 = vst.msk [vmem:[#allocation3 + $0xc] sm:$0xf] %vm1903_vm8, %v1814_v21  ;;  %v2070_v61 = vpop.permute.xlu0 %2069 }
 0x24f   : > { %2164 = vst.msk [vmem:[#allocation3 + $0x8] sm:$0xf] %vm2161_vm9, %v2070_v61 }
 0x251   : > { %v1846_v35 = vpop.permute.xlu1 %1845 }
 0x252   : > { %1923 = vst.msk [vmem:[#allocation3 + $0x4c] sm:$0xf] %vm1903_vm8, %v1846_v35  ;;  %v2102_v39 = vpop.permute.xlu0 %2101 }
 0x253   : > { %2180 = vst.msk [vmem:[#allocation3 + $0x48] sm:$0xf] %vm2161_vm9, %v2102_v39 }
 0x255   : > { %v2072_v56 = vpop.permute.xlu1 %2071 }
 0x256   : > { %2165 = vst.msk [vmem:[#allocation3 + $0xc] sm:$0xf] %vm2161_vm9, %v2072_v56  ;;  %v2327_v24 = vpop.permute.xlu0 %2326 }
 0x257   : > { %2421 = vst.msk [vmem:[#allocation3 + $0x8] sm:$0xf] %vm2418_vm10, %v2327_v24 }
 0x259   : > { %v2104_v40 = vpop.permute.xlu1 %2103 }
 0x25a   : > { %2181 = vst.msk [vmem:[#allocation3 + $0x4c] sm:$0xf] %vm2161_vm9, %v2104_v40  ;;  %v2359_v5 = vpop.permute.xlu0 %2358 }
 0x25b   : > { %2437 = vst.msk [vmem:[#allocation3 + $0x48] sm:$0xf] %vm2418_vm10, %v2359_v5 }
 0x25d   : > { %v2329_v58 = vpop.permute.xlu1 %2328 }
 0x25e   : > { %2422 = vst.msk [vmem:[#allocation3 + $0xc] sm:$0xf] %vm2418_vm10, %v2329_v58  ;;  %v2584_v59 = vpop.permute.xlu0 %2583 }
 0x25f   : > { %2678 = vst.msk [vmem:[#allocation3 + $0x8] sm:$0xf] %vm2675_vm11, %v2584_v59 }
 0x261   : > { %v2361_v43 = vpop.permute.xlu1 %2360 }
 0x262   : > { %2438 = vst.msk [vmem:[#allocation3 + $0x4c] sm:$0xf] %vm2418_vm10, %v2361_v43  ;;  %v2616_v19 = vpop.permute.xlu0 %2615 }
 0x263   : > { %2694 = vst.msk [vmem:[#allocation3 + $0x48] sm:$0xf] %vm2675_vm11, %v2616_v19 }
 0x265   : > { %v2586_v7 = vpop.permute.xlu1 %2585 }
 0x266   : > { %2679 = vst.msk [vmem:[#allocation3 + $0xc] sm:$0xf] %vm2675_vm11, %v2586_v7  ;;  %v1294_v25 = vpop.permute.xlu0 %1293 }
 0x267   : > { %1390 = vst.msk [vmem:[#allocation3] sm:$0xf] %vm1389_vm6, %v1294_v25 }
 0x269   : > { %v2618_v15 = vpop.permute.xlu1 %2617 }
 0x26a   : > { %2695 = vst.msk [vmem:[#allocation3 + $0x4c] sm:$0xf] %vm2675_vm11, %v2618_v15  ;;  %v1326_v2 = vpop.permute.xlu0 %1325 }
 0x26b   : > { %1406 = vst.msk [vmem:[#allocation3 + $0x40] sm:$0xf] %vm1389_vm6, %v1326_v2 }
 0x26d   : > { %v1296_v23 = vpop.permute.xlu1 %1295  ;;  %v3679_v37 = vld [vmem:[#allocation3 + $0x8] sm:$0xff]  }
 0x26e   : > { %1391 = vst.msk [vmem:[#allocation3 + $0x4] sm:$0xf] %vm1389_vm6, %v1296_v23  ;;  %v1551_v31 = vpop.permute.xlu0 %1550  ;;  %v2829_v36 = vsel %vm2821_vm12, %v3679_v37, 0 }
 0x26f   : > { %1647 = vst.msk [vmem:[#allocation3] sm:$0xf] %vm1646_vm7, %v1551_v31 }
 0x271   : > { %v1328_v12 = vpop.permute.xlu1 %1327  ;;  %v3678_v13 = vld [vmem:[#allocation3 + $0x48] sm:$0xff]  }
 0x272   : > { %1407 = vst.msk [vmem:[#allocation3 + $0x44] sm:$0xf] %vm1389_vm6, %v1328_v12  ;;  %v1583_v41 = vpop.permute.xlu0 %1582  ;;  %3647 = vmatprep.subr.msk.bf16.mxu0 %vm2821_vm12, %v3678_v13 }
 0x273   : > { %1663 = vst.msk [vmem:[#allocation3 + $0x40] sm:$0xf] %vm1646_vm7, %v1583_v41  ;;  %3636 = vmatpush3.bf16.xpose.msra.mxu0 %v2829_v36 }
 0x275   : > { %v1553_v52 = vpop.permute.xlu1 %1552 }
 0x276   : > { %1648 = vst.msk [vmem:[#allocation3 + $0x4] sm:$0xf] %vm1646_vm7, %v1553_v52  ;;  %v1808_v54 = vpop.permute.xlu0 %1807 }
 0x277   : > { %1904 = vst.msk [vmem:[#allocation3] sm:$0xf] %vm1903_vm8, %v1808_v54 }
 0x279   : > { %v1585_v0 = vpop.permute.xlu1 %1584 }
 0x27a   : > { %1664 = vst.msk [vmem:[#allocation3 + $0x44] sm:$0xf] %vm1646_vm7, %v1585_v0  ;;  %v1840_v9 = vpop.permute.xlu0 %1839 }
 0x27b   : > { %1920 = vst.msk [vmem:[#allocation3 + $0x40] sm:$0xf] %vm1903_vm8, %v1840_v9 }
 0x27d   : > { %v1810_v16 = vpop.permute.xlu1 %1809 }
 0x27e   : > { %1905 = vst.msk [vmem:[#allocation3 + $0x4] sm:$0xf] %vm1903_vm8, %v1810_v16  ;;  %v2066_v18 = vpop.permute.xlu0 %2065 }
 0x27f   : > { %2162 = vst.msk [vmem:[#allocation3] sm:$0xf] %vm2161_vm9, %v2066_v18 }
 0x281   : > { %v1842_v60 = vpop.permute.xlu1 %1841 }
 0x282   : > { %1921 = vst.msk [vmem:[#allocation3 + $0x44] sm:$0xf] %vm1903_vm8, %v1842_v60  ;;  %v2098_v11 = vpop.permute.xlu0 %2097 }
 0x283   : > { %2178 = vst.msk [vmem:[#allocation3 + $0x40] sm:$0xf] %vm2161_vm9, %v2098_v11 }
 0x285   : > { %v2068_v4 = vpop.permute.xlu1 %2067 }
 0x286   : > { %2163 = vst.msk [vmem:[#allocation3 + $0x4] sm:$0xf] %vm2161_vm9, %v2068_v4  ;;  %v2323_v17 = vpop.permute.xlu0 %2322 }
 0x287   : > { %2419 = vst.msk [vmem:[#allocation3] sm:$0xf] %vm2418_vm10, %v2323_v17 }
 0x289   : > { %v2100_v47 = vpop.permute.xlu1 %2099 }
 0x28a   : > { %2179 = vst.msk [vmem:[#allocation3 + $0x44] sm:$0xf] %vm2161_vm9, %v2100_v47  ;;  %v2355_v44 = vpop.permute.xlu0 %2354 }
 0x28b   : > { %2435 = vst.msk [vmem:[#allocation3 + $0x40] sm:$0xf] %vm2418_vm10, %v2355_v44 }
 0x28d   : > { %v2325_v33 = vpop.permute.xlu1 %2324 }
 0x28e   : > { %2420 = vst.msk [vmem:[#allocation3 + $0x4] sm:$0xf] %vm2418_vm10, %v2325_v33  ;;  %v2580_v57 = vpop.permute.xlu0 %2579 }
 0x28f   : > { %2676 = vst.msk [vmem:[#allocation3] sm:$0xf] %vm2675_vm11, %v2580_v57 }
 0x291   : > { %v2357_v50 = vpop.permute.xlu1 %2356 }
 0x292   : > { %2436 = vst.msk [vmem:[#allocation3 + $0x44] sm:$0xf] %vm2418_vm10, %v2357_v50  ;;  %v2612_v26 = vpop.permute.xlu0 %2611 }
 0x293   : > { %2692 = vst.msk [vmem:[#allocation3 + $0x40] sm:$0xf] %vm2675_vm11, %v2612_v26 }
 0x295   : > { %v2582_v10 = vpop.permute.xlu1 %2581 }
 0x296   : > { %2677 = vst.msk [vmem:[#allocation3 + $0x4] sm:$0xf] %vm2675_vm11, %v2582_v10 }
 0x299   : > { %v2614_v34 = vpop.permute.xlu1 %2613 }
 0x29a   : > { %2693 = vst.msk [vmem:[#allocation3 + $0x44] sm:$0xf] %vm2675_vm11, %v2614_v34 }
 0x29d   : > { %v3681_v38 = vld [vmem:[#allocation3] sm:$0xff]  }
 0x29e   : > { %v2826_v53 = vsel %vm2821_vm12, %v3681_v38, 0 }
 0x2a1   : > { %v3680_v51 = vld [vmem:[#allocation3 + $0x40] sm:$0xff]  }
 0x2a2   : > { %3648 = vmatprep.subr.msk.bf16.mxu0 %vm2821_vm12, %v3680_v51 }
 0x2a3   : > { %3638 = vmatpush3.bf16.xpose.msra.mxu0 %v2826_v53 }
 0x2aa   : > { %3640 = vmatmul.mubr.msk.bf16.vlgmr.msra.gmra.mxu0 %vm2821_vm12, %v4808_v30 }
 0x36a   : > { %v2907_v14 = vpop.f32.mrf.mxu0 }
 0x36b   : > { %2914 = vst [vmem:[%s231_s17] sm:$0xff] %v2907_v14  ;;  %v2921_v63 = vmul.f32 %v2907_v14, %v2907_v14 }
 0x36c   : > { %v2909_v42 = vpop.f32.mrf.mxu0 }
 0x36d   : > { %2915 = vst [vmem:[%s231_s17 + $0x8] sm:$0xff] %v2909_v42  ;;  %v2916_v62 = vadd.f32 %v2909_v42, %v2907_v14  ;;  %v2922_v49 = vmul.f32 %v2909_v42, %v2909_v42 }
 0x36e   : > { %v2911_v28 = vpop.f32.mrf.mxu0 }
 0x36f   : > { %2917 = vadd.xlane.f32.xlu0 %v2916_v62  ;;  %v2923_v27 = vadd.f32 %v2922_v49, %v2921_v63 }
 0x370   : > { %v2912_v6 = vpop.f32.mrf.mxu0 }
 0x371   : > { %2924 = vadd.xlane.f32.xlu1 %v2923_v27 }
 0x3f8   : > { %v2918_v30 = vpop.xlane.xlu0 %2917 }
 0x3f9   : > { %2920 = vst.msk [vmem:[%s235_s23] sm:$0xff] %vm2919_vm13, %v2918_v30 }
 0x3fa   : > { %v2925_v22 = vpop.xlane.xlu1 %2924 }
 0x3fb   : > { %2927 = vst.msk [vmem:[%s235_s23] sm:$0xff] %vm2926_vm14, %v2925_v22 }
 0x3fc PF: > { %s16_s18 = sadd.s32 1, %s3688_s18  }
 0x3fd   : > { %p13_p4 = scmp.ge.s32.totalorder %s16_s18, 4  }
 0x3ff   :  { %15 = sbr.rel (!%p13_p4) target bundleno = 1 (0x1), region = 81 }

// kernel: spectral_basic_block.3
= control target key start
LH: loop header
LB: loop body
LE: loop exit
PB: predicated region body
PF: predicated region fallthrough
CT: control target
= control target key end

     0   :  { %s4242_s21 = smov 0   ;;  %s5437_s0 = inlined_call_operand.vmem [shape: f32[2,16,16,4], index: 0, kind: input, shape index: {}]   ;;  %s5438_s1 = inlined_call_operand.vmem [shape: bf16[8,36], index: 1, kind: input, shape index: {}]   ;;  %s5439_s2 = inlined_call_operand.vmem [shape: bf16[8,4], index: 2, kind: input, shape index: {}]   ;;  %s5440_s3 = inlined_call_operand.vmem [shape: f32[2,256,8], index: 3, kind: output, shape index: {0}]   ;;  %s5441_s4 = inlined_call_operand.vmem [shape: f32[2,2,8], index: 4, kind: output, shape index: {1}]   ;;  %s5442_s5 = inlined_call_operand.vmem [shape: f32[2,8,256], index: 5, kind: output, shape index: {2}]   ;;  %s5443_s6 = inlined_call_operand.vmem [shape: f32[2,8,2], index: 6, kind: output, shape index: {3}]  }
   0x1 LB: > { %s3452_s22 = sadd.s32 4294967295, %s4196_s21   ;;  %p3456_p0 = scmp.ge.s32.totalorder %s4196_s21, 1  ;;  %s4196_s21 = sphi %s4242_s21, %s17_s21  }
   0x2   : > { %p219_p1 = scmp.lt.s32.totalorder %s4196_s21, 3 }
   0x4   : > { %p220_p2 = pnand %p3456_p0, %p219_p1 }
   0x6   : > { %223 = sbr.rel (%p220_p2) target bundleno = 896 (0x380), region = 32 }
   0xb   : > { %vm318_vm0 = vcmask 31744   ;;  %vm327_vm1 = vcmask 24576   ;;  %vm321_vm2 = vcmask 25600   ;;  %p4252_p3 = scmp.lt.s32.totalorder %s3452_s22, 1  ;;  %v4198_v0 = vmov 0.0   ;;  %s4199_s28 = smov 4  }
   0xc   : > { %319 = vst.msk [vmem:[#allocation2] sm:$0xff] %vm318_vm0, %v4198_v0  ;;  %320 = vst.msk [vmem:[#allocation2 + $0x8] sm:$0xff] %vm318_vm0, %v4198_v0  ;;  %vm557_vm3 = vcmask 27648   ;;  %s4200_s29 = smov 8   ;;  %vm814_vm4 = vcmask 60448   ;;  %s4201_s30 = smov 12  }
   0xd   : > { %324 = vst.msk [vmem:[#allocation2 + $0x198] sm:$0xff] %vm318_vm0, %v4198_v0  ;;  %325 = vst.msk [vmem:[#allocation2 + $0x1a0] sm:$0xff] %vm318_vm0, %v4198_v0  ;;  %s5506_s22 = smov (!%p4252_p3, %s3452_s22), 1  ;;  %vm1071_vm5 = vcmask 93248   ;;  %s4202_s7 = smov 16   ;;  %vm2760_vm6 = vcmask 293888  }
   0xe   : > { %329 = vst.msk [vmem:[#allocation2 + $0x18] sm:$0x1] %vm327_vm1, %v4198_v0  ;;  %330 = vst.msk [vmem:[#allocation2 + $0x30] sm:$0x1] %vm327_vm1, %v4198_v0  ;;  %s3788_s24 = sshll.u32 %s5506_s22, 8  ;;  %s4203_s8 = smov 20  }
   0xf   : > { %331 = vst.msk [vmem:[#allocation2 + $0x48] sm:$0x1] %vm327_vm1, %v4198_v0  ;;  %332 = vst.msk [vmem:[#allocation2 + $0x60] sm:$0x1] %vm327_vm1, %v4198_v0  ;;  %s4310_s27 = scalar_lea.vmem %s5437_s0, %s3788_s24  ;;  %s4204_s9 = smov 24   ;;  %vm1328_vm7 = vcmask 126048  }
  0x10   : > { %333 = vst.msk [vmem:[#allocation2 + $0x78] sm:$0x1] %vm327_vm1, %v4198_v0  ;;  %334 = vst.msk [vmem:[#allocation2 + $0x90] sm:$0x1] %vm327_vm1, %v4198_v0  ;;  %v4313_v1 = vld [vmem:[%s4310_s27] sm:$0xff]  ;;  %v4316_v2 = vld [vmem:[%s4310_s27 + $0x10] sm:$0xff]  ;;  %s5240_s18 = scalar_lea.vmem %s5440_s3, %s3788_s24 }
  0x11   : > { %335 = vst.msk [vmem:[#allocation2 + $0xa8] sm:$0x1] %vm327_vm1, %v4198_v0  ;;  %336 = vst.msk [vmem:[#allocation2 + $0xc0] sm:$0x1] %vm327_vm1, %v4198_v0  ;;  %v4319_v3 = vld [vmem:[%s4310_s27 + $0x8] sm:$0xff]  ;;  %v4328_v4 = vld [vmem:[%s4310_s27 + $0x20] sm:$0xff] }
  0x12   : > { %337 = vst.msk [vmem:[#allocation2 + $0xd8] sm:$0x1] %vm327_vm1, %v4198_v0  ;;  %338 = vst.msk [vmem:[#allocation2 + $0xf0] sm:$0x1] %vm327_vm1, %v4198_v0  ;;  %v4331_v5 = vld [vmem:[%s4310_s27 + $0x18] sm:$0xff]  ;;  %v4334_v6 = vld [vmem:[%s4310_s27 + $0x30] sm:$0xff] }
  0x13   : > { %339 = vst.msk [vmem:[#allocation2 + $0x108] sm:$0x1] %vm327_vm1, %v4198_v0  ;;  %340 = vst.msk [vmem:[#allocation2 + $0x120] sm:$0x1] %vm327_vm1, %v4198_v0  ;;  %v590_v7 = vld [vmem:[#allocation2 + $0x1] sm:$0xff]  ;;  %v4351_v12 = vld [vmem:[%s4310_s27 + $0x38] sm:$0xff] }
  0x14   : > { %341 = vst.msk [vmem:[#allocation2 + $0x138] sm:$0x1] %vm327_vm1, %v4198_v0  ;;  %342 = vst.msk [vmem:[#allocation2 + $0x150] sm:$0x1] %vm327_vm1, %v4198_v0  ;;  %v4343_v9 = vld [vmem:[%s4310_s27 + $0x28] sm:$0xff]  ;;  %v3823_v10 = vpack.c.bf16 %v590_v7, %v590_v7  ;;  %v4348_v11 = vld [vmem:[%s4310_s27 + $0x40] sm:$0xff] }
  0x15   : > { %343 = vst.msk [vmem:[#allocation2 + $0x168] sm:$0x1] %vm327_vm1, %v4198_v0  ;;  %344 = vst.msk [vmem:[#allocation2 + $0x180] sm:$0x1] %vm327_vm1, %v4198_v0  ;;  %v4354_v13 = vld [vmem:[%s4310_s27 + $0x50] sm:$0xff]  ;;  %v4363_v14 = vld [vmem:[%s4310_s27 + $0x48] sm:$0xff] }
  0x16   : > { %347 = vst.msk [vmem:[#allocation2 + $0x29] sm:$0x1] %vm327_vm1, %v4198_v0  ;;  %348 = vst.msk [vmem:[#allocation2 + $0x41] sm:$0x1] %vm327_vm1, %v4198_v0  ;;  %v4366_v15 = vld [vmem:[%s4310_s27 + $0x60] sm:$0xff]  ;;  %v4369_v16 = vld [vmem:[%s4310_s27 + $0x58] sm:$0xff]  ;;  %718 = vrot.lane.b32.xlu0 %v3823_v10, %s4199_s28 }
  0x17   : > { %349 = vst.msk [vmem:[#allocation2 + $0x59] sm:$0x1] %vm327_vm1, %v4198_v0  ;;  %350 = vst.msk [vmem:[#allocation2 + $0x71] sm:$0x1] %vm327_vm1, %v4198_v0  ;;  %v4379_v18 = vld [vmem:[%s4310_s27 + $0x70] sm:$0xff]  ;;  %v4382_v19 = vld [vmem:[%s4310_s27 + $0x68] sm:$0xff] }
  0x18   : > { %351 = vst.msk [vmem:[#allocation2 + $0x89] sm:$0x1] %vm327_vm1, %v4198_v0  ;;  %352 = vst.msk [vmem:[#allocation2 + $0xa1] sm:$0x1] %vm327_vm1, %v4198_v0  ;;  %v4385_v20 = vld [vmem:[%s4310_s27 + $0x80] sm:$0xff]  ;;  %v4394_v21 = vld [vmem:[%s4310_s27 + $0x78] sm:$0xff] }
  0x19   : > { %353 = vst.msk [vmem:[#allocation2 + $0xb9] sm:$0x1] %vm327_vm1, %v4198_v0  ;;  %354 = vst.msk [vmem:[#allocation2 + $0xd1] sm:$0x1] %vm327_vm1, %v4198_v0  ;;  %v4397_v22 = vld [vmem:[%s4310_s27 + $0x90] sm:$0xff]  ;;  %v4400_v23 = vld [vmem:[%s4310_s27 + $0x88] sm:$0xff] }
  0x1a   : > { %355 = vst.msk [vmem:[#allocation2 + $0xe9] sm:$0x1] %vm327_vm1, %v4198_v0  ;;  %356 = vst.msk [vmem:[#allocation2 + $0x101] sm:$0x1] %vm327_vm1, %v4198_v0  ;;  %v4409_v24 = vld [vmem:[%s4310_s27 + $0xa0] sm:$0xff]  ;;  %v4412_v25 = vld [vmem:[%s4310_s27 + $0x98] sm:$0xff] }
  0x1b   : > { %357 = vst.msk [vmem:[#allocation2 + $0x119] sm:$0x1] %vm327_vm1, %v4198_v0  ;;  %358 = vst.msk [vmem:[#allocation2 + $0x131] sm:$0x1] %vm327_vm1, %v4198_v0  ;;  %v4415_v26 = vld [vmem:[%s4310_s27 + $0xb0] sm:$0xff]  ;;  %v4429_v33 = vld [vmem:[%s4310_s27 + $0xa8] sm:$0xff] }
  0x1c   : > { %359 = vst.msk [vmem:[#allocation2 + $0x149] sm:$0x1] %vm327_vm1, %v4198_v0  ;;  %360 = vst.msk [vmem:[#allocation2 + $0x161] sm:$0x1] %vm327_vm1, %v4198_v0  ;;  %v4432_v34 = vld [vmem:[%s4310_s27 + $0xc0] sm:$0xff]  ;;  %v4449_v41 = vld [vmem:[%s4310_s27 + $0xb8] sm:$0xff] }
  0x1d   : > { %361 = vst.msk [vmem:[#allocation2 + $0x179] sm:$0x1] %vm327_vm1, %v4198_v0  ;;  %362 = vst.msk [vmem:[#allocation2 + $0x191] sm:$0x1] %vm327_vm1, %v4198_v0  ;;  %v4452_v42 = vld [vmem:[%s4310_s27 + $0xd0] sm:$0xff]  ;;  %v4455_v43 = vld [vmem:[%s4310_s27 + $0xc8] sm:$0xff] }
  0x1e   : > { %322 = vst.msk [vmem:[#allocation2 + $0x10] sm:$0x3] %vm321_vm2, %v4198_v0  ;;  %326 = vst.msk [vmem:[#allocation2 + $0x1a8] sm:$0x3] %vm321_vm2, %v4198_v0  ;;  %v4465_v45 = vld [vmem:[%s4310_s27 + $0xe0] sm:$0xff]  ;;  %v4468_v46 = vld [vmem:[%s4310_s27 + $0xd8] sm:$0xff] }
  0x1f   : > { %328 = vst.msk [vmem:[#allocation2] sm:$0x1] %vm327_vm1, %v4198_v0  ;;  %345 = vst.msk [vmem:[#allocation2 + $0x198] sm:$0x1] %vm327_vm1, %v4198_v0  ;;  %v4475_v48 = vld [vmem:[%s4310_s27 + $0xe8] sm:$0xff]  ;;  %s4205_s10 = smov 28  }
  0x20   : > { %346 = vst.msk [vmem:[#allocation2 + $0x11] sm:$0x1] %vm327_vm1, %v4198_v0  ;;  %363 = vst.msk [vmem:[#allocation2 + $0x1a9] sm:$0x1] %vm327_vm1, %v4198_v0  ;;  %v398_v63 = vld [vmem:[#allocation2 + $0x8] sm:$0xff]  ;;  %s4206_s13 = smov 32  }
  0x21   : > { %5465 = vst [vmem:[#allocation4_spill] sm:$0xff] %v4313_v1  ;;  %5466 = vst [vmem:[#allocation5_spill] sm:$0xff] %v4316_v2  ;;  %vm1585_vm8 = vcmask 158848   ;;  %vm1842_vm9 = vcmask 191648   ;;  %vm2100_vm10 = vcmask 224448   ;;  %vm2357_vm11 = vcmask 257248  }
  0x22   : > { %5467 = vst [vmem:[#allocation6_spill] sm:$0xff] %v4319_v3  ;;  %365 = vst.msk [vmem:[#allocation2 + $0x19] sm:$0xff] %vm318_vm0, %v4313_v1  ;;  %vm2614_vm12 = vcmask 290048   ;;  %vm2973_vm13 = vcmask 64512   ;;  %s3790_s19 = sshll.u32 %s5506_s22, 4  ;;  %s3464_s25 = sshll.u32 %s5506_s22, 3 }
  0x23   : > { %367 = vst.msk [vmem:[#allocation2 + $0x31] sm:$0xff] %vm318_vm0, %v4316_v2  ;;  %366 = vst.msk [vmem:[#allocation2 + $0x21] sm:$0xff] %vm318_vm0, %v4319_v3  ;;  %s280_s24 = scalar_lea.vmem %s5442_s5, %s3790_s19  ;;  %vm3293_vm14 = vcmask 7168   ;;  %vm3300_vm15 = vcmask 15368  }
  0x24   : > { %5468 = vst [vmem:[#allocation7_spill] sm:$0xff] %v4328_v4  ;;  %5469 = vst [vmem:[#allocation8_spill] sm:$0xff] %v4331_v5 }
  0x25   : > { %5470 = vst [vmem:[#allocation9_spill] sm:$0xff] %v4334_v6  ;;  %v591_v8 = vld [vmem:[#allocation2 + $0x9] sm:$0xff]  ;;  %369 = vst.msk [vmem:[#allocation2 + $0x49] sm:$0xff] %vm318_vm0, %v4328_v4 }
  0x26   : > { %368 = vst.msk [vmem:[#allocation2 + $0x39] sm:$0xff] %vm318_vm0, %v4331_v5  ;;  %371 = vst.msk [vmem:[#allocation2 + $0x61] sm:$0xff] %vm318_vm0, %v4334_v6  ;;  %v3824_v17 = vpack.c.bf16 %v591_v8, %v591_v8  ;;  %v397_v60 = vld [vmem:[#allocation2] sm:$0xff]  ;;  %v3792_v8 = vpack.c.bf16 %v398_v63, %v398_v63 }
  0x27   : > { %5471 = vst [vmem:[#allocation10_spill] sm:$0xff] %v4343_v9  ;;  %370 = vst.msk [vmem:[#allocation2 + $0x51] sm:$0xff] %vm318_vm0, %v4343_v9  ;;  %v3791_v62 = vpack.c.bf16 %v397_v60, %v397_v60 }
  0x28   : > { %5472 = vst [vmem:[#allocation11_spill] sm:$0xff] %v4348_v11  ;;  %5473 = vst [vmem:[#allocation12_spill] sm:$0xff] %v4351_v12  ;;  %720 = vrot.lane.b32.xlu0 %v3824_v17, %s4199_s28 }
  0x29   : > { %373 = vst.msk [vmem:[#allocation2 + $0x79] sm:$0xff] %vm318_vm0, %v4348_v11  ;;  %372 = vst.msk [vmem:[#allocation2 + $0x69] sm:$0xff] %vm318_vm0, %v4351_v12  ;;  %v592_v27 = vld [vmem:[#allocation2 + $0x19] sm:$0xff] }
  0x2a   : > { %375 = vst.msk [vmem:[#allocation2 + $0x91] sm:$0xff] %vm318_vm0, %v4354_v13  ;;  %5474 = vst [vmem:[#allocation13_spill] sm:$0xff] %v4363_v14  ;;  %v594_v28 = vld [vmem:[#allocation2 + $0x31] sm:$0xff]  ;;  %v593_v29 = vld [vmem:[#allocation2 + $0x21] sm:$0xff]  ;;  %v4424_v30 = vpack.c.bf16 %v592_v27, %v592_v27 }
  0x2b   : > { %374 = vst.msk [vmem:[#allocation2 + $0x81] sm:$0xff] %vm318_vm0, %v4363_v14  ;;  %377 = vst.msk [vmem:[#allocation2 + $0xa9] sm:$0xff] %vm318_vm0, %v4366_v15  ;;  %v4426_v31 = vpack.c.bf16 %v594_v28, %v594_v28  ;;  %v4436_v35 = vpack.c.bf16 %v593_v29, %v593_v29  ;;  %v399_v0 = vld [vmem:[#allocation2 + $0x18] sm:$0xff]  ;;  %v401_v17 = vld [vmem:[#allocation2 + $0x30] sm:$0xff] }
  0x2c   : > { %376 = vst.msk [vmem:[#allocation2 + $0x99] sm:$0xff] %vm318_vm0, %v4369_v16  ;;  %5475 = vst [vmem:[#allocation14_spill] sm:$0xff] %v4385_v20  ;;  %v596_v32 = vld [vmem:[#allocation2 + $0x49] sm:$0xff]  ;;  %722 = vrot.lane.b32.xlu1 %v4424_v30, %s4199_s28  ;;  %v4487_v10 = vpack.c.bf16 %v399_v0, %v399_v0  ;;  %v400_v27 = vld [vmem:[#allocation2 + $0x20] sm:$0xff]  ;;  %v4490_v29 = vpack.c.bf16 %v401_v17, %v401_v17 }
  0x2d   : > { %379 = vst.msk [vmem:[#allocation2 + $0xc1] sm:$0xff] %vm318_vm0, %v4379_v18  ;;  %378 = vst.msk [vmem:[#allocation2 + $0xb1] sm:$0xff] %vm318_vm0, %v4382_v19  ;;  %v595_v36 = vld [vmem:[#allocation2 + $0x39] sm:$0xff]  ;;  %726 = vrot.lane.b32.xlu0 %v4426_v31, %s4199_s28  ;;  %v3829_v37 = vpack.c.bf16 %v596_v32, %v596_v32  ;;  %v598_v38 = vld [vmem:[#allocation2 + $0x61] sm:$0xff]  ;;  %v4492_v32 = vpack.c.bf16 %v400_v27, %v400_v27 }
  0x2e   : > { %381 = vst.msk [vmem:[#allocation2 + $0xd9] sm:$0xff] %vm318_vm0, %v4385_v20  ;;  %5476 = vst [vmem:[#allocation15_spill] sm:$0xff] %v4397_v22  ;;  %v4446_v39 = vpack.c.bf16 %v595_v36, %v595_v36  ;;  %v597_v40 = vld [vmem:[#allocation2 + $0x51] sm:$0xff]  ;;  %v3831_v44 = vpack.c.bf16 %v598_v38, %v598_v38  ;;  %v403_v36 = vld [vmem:[#allocation2 + $0x48] sm:$0xff] }
  0x2f   : > { %5477 = vst [vmem:[#allocation16_spill] sm:$0xff] %v4400_v23  ;;  %380 = vst.msk [vmem:[#allocation2 + $0xc9] sm:$0xff] %vm318_vm0, %v4394_v21  ;;  %v3830_v49 = vpack.c.bf16 %v597_v40, %v597_v40  ;;  %v4500_v40 = vpack.c.bf16 %v403_v36, %v403_v36 }
  0x30   : > { %383 = vst.msk [vmem:[#allocation2 + $0xf1] sm:$0xff] %vm318_vm0, %v4397_v22  ;;  %382 = vst.msk [vmem:[#allocation2 + $0xe1] sm:$0xff] %vm318_vm0, %v4400_v23  ;;  %724 = vrot.lane.b32.xlu1 %v4436_v35, %s4199_s28  ;;  %v600_v47 = vld [vmem:[#allocation2 + $0x79] sm:$0xff]  ;;  %v599_v50 = vld [vmem:[#allocation2 + $0x69] sm:$0xff] }
  0x31   : > { %5478 = vst [vmem:[#allocation17_spill] sm:$0xff] %v4409_v24  ;;  %5479 = vst [vmem:[#allocation18_spill] sm:$0xff] %v4412_v25  ;;  %730 = vrot.lane.b32.xlu0 %v3829_v37, %s4199_s28  ;;  %v3833_v51 = vpack.c.bf16 %v600_v47, %v600_v47  ;;  %v602_v52 = vld [vmem:[#allocation2 + $0x91] sm:$0xff]  ;;  %v3832_v53 = vpack.c.bf16 %v599_v50, %v599_v50  ;;  %v405_v47 = vld [vmem:[#allocation2 + $0x60] sm:$0xff] }
  0x32   : > { %5480 = vst [vmem:[#allocation19_spill] sm:$0xff] %v4415_v26  ;;  %385 = vst.msk [vmem:[#allocation2 + $0x109] sm:$0xff] %vm318_vm0, %v4409_v24  ;;  %v601_v54 = vld [vmem:[#allocation2 + $0x81] sm:$0xff]  ;;  %v3835_v55 = vpack.c.bf16 %v602_v52, %v602_v52  ;;  %v604_v56 = vld [vmem:[#allocation2 + $0xa9] sm:$0xff] }
  0x33   : > { %384 = vst.msk [vmem:[#allocation2 + $0xf9] sm:$0xff] %vm318_vm0, %v4412_v25  ;;  %387 = vst.msk [vmem:[#allocation2 + $0x121] sm:$0xff] %vm318_vm0, %v4415_v26  ;;  %v3834_v57 = vpack.c.bf16 %v601_v54, %v601_v54  ;;  %v603_v58 = vld [vmem:[#allocation2 + $0x99] sm:$0xff]  ;;  %v3837_v59 = vpack.c.bf16 %v604_v56, %v604_v56  ;;  %v404_v52 = vld [vmem:[#allocation2 + $0x50] sm:$0xff] }
  0x34   : > { %5481 = vst [vmem:[#allocation20_spill] sm:$0xff] %v4429_v33  ;;  %5482 = vst [vmem:[#allocation21_spill] sm:$0xff] %v4432_v34  ;;  %728 = vrot.lane.b32.xlu1 %v4446_v39, %s4199_s28  ;;  %v606_v61 = vld [vmem:[#allocation2 + $0xc1] sm:$0xff]  ;;  %v3836_v7 = vpack.c.bf16 %v603_v58, %v603_v58  ;;  %v605_v28 = vld [vmem:[#allocation2 + $0xb1] sm:$0xff]  ;;  %v4515_v56 = vpack.c.bf16 %v404_v52, %v404_v52 }
  0x35   : > { %386 = vst.msk [vmem:[#allocation2 + $0x111] sm:$0xff] %vm318_vm0, %v4429_v33  ;;  %389 = vst.msk [vmem:[#allocation2 + $0x139] sm:$0xff] %vm318_vm0, %v4432_v34  ;;  %734 = vrot.lane.b32.xlu0 %v3831_v44, %s4199_s28  ;;  %v3839_v37 = vpack.c.bf16 %v606_v61, %v606_v61  ;;  %v4495_v38 = vld [vmem:[#allocation2 + $0xd9] sm:$0xff]  ;;  %v406_v54 = vld [vmem:[#allocation2 + $0x68] sm:$0xff] }
  0x36   : > { %5483 = vst [vmem:[#allocation22_spill] sm:$0xff] %v4449_v41  ;;  %5484 = vst [vmem:[#allocation23_spill] sm:$0xff] %v4455_v43  ;;  %v402_v44 = vld [vmem:[#allocation2 + $0x38] sm:$0xff]  ;;  %v4519_v58 = vpack.c.bf16 %v406_v54, %v406_v54  ;;  %v408_v60 = vld [vmem:[#allocation2 + $0x80] sm:$0xff] }
  0x37   : > { %388 = vst.msk [vmem:[#allocation2 + $0x129] sm:$0xff] %vm318_vm0, %v4449_v41  ;;  %391 = vst.msk [vmem:[#allocation2 + $0x151] sm:$0xff] %vm318_vm0, %v4452_v42  ;;  %v4508_v50 = vpack.c.bf16 %v402_v44, %v402_v44  ;;  %v411_v61 = vld [vmem:[#allocation2 + $0xa8] sm:$0xff]  ;;  %v4527_v0 = vpack.c.bf16 %v408_v60, %v408_v60  ;;  %v413_v17 = vld [vmem:[#allocation2 + $0xc0] sm:$0xff] }
  0x38   : > { %390 = vst.msk [vmem:[#allocation2 + $0x141] sm:$0xff] %vm318_vm0, %v4455_v43  ;;  %393 = vst.msk [vmem:[#allocation2 + $0x169] sm:$0xff] %vm318_vm0, %v4465_v45  ;;  %732 = vrot.lane.b32.xlu1 %v3830_v49, %s4199_s28  ;;  %v4502_v49 = vld [vmem:[#allocation2 + $0xc9] sm:$0xff]  ;;  %v4542_v44 = vpack.c.bf16 %v413_v17, %v413_v17  ;;  %v415_v52 = vld [vmem:[#allocation2 + $0xd8] sm:$0xff] }
  0x39   : > { %392 = vst.msk [vmem:[#allocation2 + $0x159] sm:$0xff] %vm318_vm0, %v4468_v46  ;;  %394 = vst.msk [vmem:[#allocation2 + $0x171] sm:$0xff] %vm318_vm0, %v4475_v48  ;;  %738 = vrot.lane.b32.xlu0 %v3833_v51, %s4199_s28  ;;  %v4510_v51 = vpack.c.bf16 %v405_v47, %v405_v47  ;;  %v412_v27 = vld [vmem:[#allocation2 + $0xb0] sm:$0xff]  ;;  %v416_v60 = vld [vmem:[#allocation2 + $0xe0] sm:$0xff]  ;;  %v3840_v17 = vpack.c.bf16 %v4502_v49, %v4502_v49 }
  0x3a   : > { %558 = vst.msk [vmem:[#allocation3] sm:$0xf] %vm557_vm3, %v3791_v62  ;;  %559 = vst.msk [vmem:[#allocation3 + $0x4] sm:$0xf] %vm557_vm3, %v3792_v8  ;;  %v610_v62 = vld [vmem:[#allocation2 + $0xf1] sm:$0xff]  ;;  %v4544_v47 = vpack.c.bf16 %v412_v27, %v412_v27  ;;  %v4567_v27 = vpack.c.bf16 %v416_v60, %v416_v60  ;;  %v609_v3 = vld [vmem:[#allocation2 + $0xe1] sm:$0xff] }
  0x3b   : > { %560 = vst.msk [vmem:[#allocation3 + $0x8] sm:$0xf] %vm557_vm3, %v4487_v10  ;;  %562 = vst.msk [vmem:[#allocation3 + $0x10] sm:$0xf] %vm557_vm3, %v4490_v29  ;;  %v410_v8 = vld [vmem:[#allocation2 + $0x98] sm:$0xff]  ;;  %v614_v5 = vld [vmem:[#allocation2 + $0x121] sm:$0xff] }
  0x3c   : > { %736 = vrot.lane.b32.xlu1 %v3832_v53, %s4199_s28  ;;  %561 = vst.msk [vmem:[#allocation3 + $0xc] sm:$0xf] %vm557_vm3, %v4492_v32  ;;  %v407_v53 = vld [vmem:[#allocation2 + $0x78] sm:$0xff]  ;;  %564 = vst.msk [vmem:[#allocation3 + $0x18] sm:$0xf] %vm557_vm3, %v4500_v40  ;;  %v4540_v36 = vpack.c.bf16 %v410_v8, %v410_v8  ;;  %v863_v41 = vld [vmem:[#allocation2 + $0xc2] sm:$0xff] }
  0x3d   : > { %742 = vrot.lane.b32.xlu0 %v3835_v55, %s4199_s28  ;;  %v3838_v55 = vpack.c.bf16 %v605_v28, %v605_v28  ;;  %563 = vst.msk [vmem:[#allocation3 + $0x14] sm:$0xf] %vm557_vm3, %v4508_v50  ;;  %566 = vst.msk [vmem:[#allocation3 + $0x20] sm:$0xf] %vm557_vm3, %v4510_v51  ;;  %v3841_v28 = vpack.c.bf16 %v4495_v38, %v4495_v38  ;;  %v4552_v38 = vpack.c.bf16 %v415_v52, %v415_v52  ;;  %v418_v8 = vld [vmem:[#allocation2 + $0xf8] sm:$0xff]  ;;  %v864_v11 = vld [vmem:[#allocation2 + $0xca] sm:$0xff] }
  0x3e   : > { %565 = vst.msk [vmem:[#allocation3 + $0x1c] sm:$0xf] %vm557_vm3, %v4515_v56  ;;  %567 = vst.msk [vmem:[#allocation3 + $0x24] sm:$0xf] %vm557_vm3, %v4519_v58  ;;  %v611_v1 = vld [vmem:[#allocation2 + $0xf9] sm:$0xff]  ;;  %v613_v25 = vld [vmem:[#allocation2 + $0x111] sm:$0xff] }
  0x3f   : > { %569 = vst.msk [vmem:[#allocation3 + $0x2c] sm:$0xf] %vm557_vm3, %v4527_v0  ;;  %571 = vst.msk [vmem:[#allocation3 + $0x34] sm:$0xf] %vm557_vm3, %v4540_v36  ;;  %v424_v2 = vld [vmem:[#allocation2 + $0x140] sm:$0xff]  ;;  %v615_v9 = vld [vmem:[#allocation2 + $0x129] sm:$0xff] }
  0x40   : > { %740 = vrot.lane.b32.xlu1 %v3834_v57, %s4199_s28  ;;  %v4517_v57 = vpack.c.bf16 %v407_v53, %v407_v53  ;;  %v417_v53 = vld [vmem:[#allocation2 + $0xf0] sm:$0xff]  ;;  %574 = vst.msk [vmem:[#allocation3 + $0x40] sm:$0xf] %vm557_vm3, %v4542_v44  ;;  %573 = vst.msk [vmem:[#allocation3 + $0x3c] sm:$0xf] %vm557_vm3, %v4544_v47  ;;  %v426_v22 = vld [vmem:[#allocation2 + $0x158] sm:$0xff]  ;;  %v3848_v33 = vpack.c.bf16 %v615_v9, %v615_v9 }
  0x41   : > { %746 = vrot.lane.b32.xlu0 %v3837_v59, %s4199_s28  ;;  %v409_v59 = vld [vmem:[#allocation2 + $0x90] sm:$0xff]  ;;  %576 = vst.msk [vmem:[#allocation3 + $0x48] sm:$0xf] %vm557_vm3, %v4552_v38  ;;  %577 = vst.msk [vmem:[#allocation3 + $0x4c] sm:$0xf] %vm557_vm3, %v4567_v27  ;;  %v617_v12 = vld [vmem:[#allocation2 + $0x141] sm:$0xff] }
  0x42   : > { %v4525_v63 = vpack.c.bf16 %v409_v59, %v409_v59  ;;  %568 = vst.msk [vmem:[#allocation3 + $0x28] sm:$0xf] %vm557_vm3, %v4517_v57  ;;  %v4556_v59 = vpack.c.bf16 %v417_v53, %v417_v53  ;;  %v421_v53 = vld [vmem:[#allocation2 + $0x120] sm:$0xff]  ;;  %v621_v9 = vld [vmem:[#allocation2 + $0x171] sm:$0xff] }
  0x43   : > { %v4579_v49 = vpack.c.bf16 %v421_v53, %v421_v53  ;;  %v422_v53 = vld [vmem:[#allocation2 + $0x128] sm:$0xff]  ;;  %v860_v6 = vld [vmem:[#allocation2 + $0x9a] sm:$0xff]  ;;  %v862_v26 = vld [vmem:[#allocation2 + $0xb2] sm:$0xff] }
  0x44   : > { %744 = vrot.lane.b32.xlu1 %v3836_v7, %s4199_s28  ;;  %v4529_v7 = vpack.c.bf16 %v411_v61, %v411_v61  ;;  %570 = vst.msk [vmem:[#allocation3 + $0x30] sm:$0xf] %vm557_vm3, %v4525_v63  ;;  %v419_v61 = vld [vmem:[#allocation2 + $0x108] sm:$0xff]  ;;  %578 = vst.msk [vmem:[#allocation3 + $0x50] sm:$0xf] %vm557_vm3, %v4556_v59  ;;  %v3870_v14 = vpack.c.bf16 %v862_v26, %v862_v26  ;;  %v867_v43 = vld [vmem:[#allocation2 + $0xf2] sm:$0xff] }
  0x45   : > { %750 = vrot.lane.b32.xlu0 %v3839_v37, %s4199_s28  ;;  %v414_v37 = vld [vmem:[#allocation2 + $0xc8] sm:$0xff]  ;;  %v4569_v52 = vpack.c.bf16 %v419_v61, %v419_v61  ;;  %v3843_v61 = vpack.c.bf16 %v610_v62, %v610_v62  ;;  %582 = vst.msk [vmem:[#allocation3 + $0x60] sm:$0xf] %vm557_vm3, %v4579_v49  ;;  %v3842_v62 = vpack.c.bf16 %v609_v3, %v609_v3 }
  0x46   : > { %572 = vst.msk [vmem:[#allocation3 + $0x38] sm:$0xf] %vm557_vm3, %v4529_v7  ;;  %v4554_v54 = vpack.c.bf16 %v414_v37, %v414_v37  ;;  %v4571_v37 = vpack.c.bf16 %v418_v8, %v418_v8  ;;  %v612_v8 = vld [vmem:[#allocation2 + $0x109] sm:$0xff]  ;;  %v3844_v3 = vpack.c.bf16 %v611_v1, %v611_v1  ;;  %v3846_v1 = vpack.c.bf16 %v613_v25, %v613_v25 }
  0x47   : > { %580 = vst.msk [vmem:[#allocation3 + $0x58] sm:$0xf] %vm557_vm3, %v4569_v52  ;;  %v3845_v20 = vpack.c.bf16 %v612_v8, %v612_v8  ;;  %v616_v8 = vld [vmem:[#allocation2 + $0x139] sm:$0xff]  ;;  %v869_v34 = vld [vmem:[#allocation2 + $0x10a] sm:$0xff] }
  0x48   : > { %748 = vrot.lane.b32.xlu1 %v3838_v55, %s4199_s28  ;;  %v420_v55 = vld [vmem:[#allocation2 + $0x110] sm:$0xff]  ;;  %575 = vst.msk [vmem:[#allocation3 + $0x44] sm:$0xf] %vm557_vm3, %v4554_v54  ;;  %579 = vst.msk [vmem:[#allocation3 + $0x54] sm:$0xf] %vm557_vm3, %v4571_v37  ;;  %v3877_v26 = vpack.c.bf16 %v869_v34, %v869_v34 }
  0x49   : > { %v4581_v60 = vpack.c.bf16 %v420_v55, %v420_v55  ;;  %754 = vrot.lane.b32.xlu0 %v3841_v28, %s4199_s28  ;;  %v423_v28 = vld [vmem:[#allocation2 + $0x138] sm:$0xff]  ;;  %v4595_v55 = vpack.c.bf16 %v422_v53, %v422_v53  ;;  %v4605_v53 = vpack.c.bf16 %v424_v2, %v424_v2  ;;  %v3820_v2 = vpack.c.bf16 %v426_v22, %v426_v22  ;;  %v620_v22 = vld [vmem:[#allocation2 + $0x169] sm:$0xff] }
  0x4a   : > { %v4597_v23 = vpack.c.bf16 %v423_v28, %v423_v28 }
  0x4b   : > { %581 = vst.msk [vmem:[#allocation3 + $0x5c] sm:$0xf] %vm557_vm3, %v4581_v60  ;;  %583 = vst.msk [vmem:[#allocation3 + $0x64] sm:$0xf] %vm557_vm3, %v4595_v55 }
  0x4c   : > { %752 = vrot.lane.b32.xlu1 %v3840_v17, %s4199_s28  ;;  %584 = vst.msk [vmem:[#allocation3 + $0x68] sm:$0xf] %vm557_vm3, %v4597_v23  ;;  %v425_v17 = vld [vmem:[#allocation2 + $0x150] sm:$0xff]  ;;  %585 = vst.msk [vmem:[#allocation3 + $0x6c] sm:$0xf] %vm557_vm3, %v4605_v53 }
  0x4d   : > { %758 = vrot.lane.b32.xlu0 %v3843_v61, %s4199_s28  ;;  %v4607_v28 = vpack.c.bf16 %v425_v17, %v425_v17  ;;  %v3847_v61 = vpack.c.bf16 %v614_v5, %v614_v5  ;;  %v3849_v17 = vpack.c.bf16 %v616_v8, %v616_v8  ;;  %587 = vst.msk [vmem:[#allocation3 + $0x74] sm:$0xf] %vm557_vm3, %v3820_v2  ;;  %v618_v5 = vld [vmem:[#allocation2 + $0x151] sm:$0xff]  ;;  %v849_v2 = vld [vmem:[#allocation2 + $0x1a] sm:$0xff] }
  0x4e   : > { %v3851_v25 = vpack.c.bf16 %v618_v5, %v618_v5  ;;  %v3853_v8 = vpack.c.bf16 %v620_v22, %v620_v22  ;;  %v853_v22 = vld [vmem:[#allocation2 + $0x4a] sm:$0xff] }
  0x4f   : > { %586 = vst.msk [vmem:[#allocation3 + $0x70] sm:$0xf] %vm557_vm3, %v4607_v28 }
  0x50   : > { %756 = vrot.lane.b32.xlu1 %v3842_v62, %s4199_s28  ;;  %v427_v62 = vld [vmem:[#allocation2 + $0x168] sm:$0xff] }
  0x51   : > { %762 = vrot.lane.b32.xlu0 %v3845_v20, %s4199_s28  ;;  %v3821_v4 = vpack.c.bf16 %v427_v62, %v427_v62  ;;  %v428_v20 = vld [vmem:[#allocation2 + $0x170] sm:$0xff] }
  0x52   : > { %v3822_v24 = vpack.c.bf16 %v428_v20, %v428_v20  ;;  %v850_v20 = vld [vmem:[#allocation2 + $0x22] sm:$0xff] }
  0x53   : > { %588 = vst.msk [vmem:[#allocation3 + $0x78] sm:$0xf] %vm557_vm3, %v3821_v4  ;;  %v847_v4 = vld [vmem:[#allocation2 + $0x2] sm:$0xff] }
  0x54   : > { %760 = vrot.lane.b32.xlu1 %v3844_v3, %s4199_s28  ;;  %589 = vst.msk [vmem:[#allocation3 + $0x7c] sm:$0xf] %vm557_vm3, %v3822_v24  ;;  %v3850_v3 = vpack.c.bf16 %v617_v12, %v617_v12  ;;  %v3855_v62 = vpack.c.bf16 %v847_v4, %v847_v4  ;;  %v3854_v24 = vpack.c.bf16 %v621_v9, %v621_v9  ;;  %v855_v4 = vld [vmem:[#allocation2 + $0x62] sm:$0xff]  ;;  %v854_v9 = vld [vmem:[#allocation2 + $0x52] sm:$0xff] }
  0x55   : > { %766 = vrot.lane.b32.xlu0 %v3847_v61, %s4199_s28  ;;  %v619_v61 = vld [vmem:[#allocation2 + $0x159] sm:$0xff]  ;;  %v4627_v12 = vpack.c.bf16 %v849_v2, %v849_v2 }
  0x56   : > { %v857_v2 = vld [vmem:[#allocation2 + $0x7a] sm:$0xff] }
  0x58   : > { %764 = vrot.lane.b32.xlu1 %v3846_v1, %s4199_s28  ;;  %v3852_v1 = vpack.c.bf16 %v619_v61, %v619_v61  ;;  %v852_v61 = vld [vmem:[#allocation2 + $0x3a] sm:$0xff] }
  0x59   : > { %770 = vrot.lane.b32.xlu0 %v3849_v17, %s4199_s28  ;;  %v848_v17 = vld [vmem:[#allocation2 + $0xa] sm:$0xff] }
  0x5a   : > { %v3856_v5 = vpack.c.bf16 %v848_v17, %v848_v17  ;;  %v856_v17 = vld [vmem:[#allocation2 + $0x6a] sm:$0xff] }
  0x5c   : > { %768 = vrot.lane.b32.xlu1 %v3848_v33, %s4199_s28  ;;  %v851_v33 = vld [vmem:[#allocation2 + $0x32] sm:$0xff] }
  0x5d   : > { %774 = vrot.lane.b32.xlu0 %v3851_v25, %s4199_s28  ;;  %v4632_v25 = vpack.c.bf16 %v851_v33, %v851_v33  ;;  %v3865_v33 = vpack.c.bf16 %v857_v2, %v857_v2 }
  0x60   : > { %772 = vrot.lane.b32.xlu1 %v3850_v3, %s4199_s28  ;;  %v4635_v3 = vpack.c.bf16 %v850_v20, %v850_v20  ;;  %v4657_v20 = vpack.c.bf16 %v856_v17, %v856_v17  ;;  %v3868_v17 = vpack.c.bf16 %v860_v6, %v860_v6  ;;  %v3875_v6 = vpack.c.bf16 %v867_v43, %v867_v43 }
  0x61   : > { %778 = vrot.lane.b32.xlu0 %v3853_v8, %s4199_s28  ;;  %v4639_v8 = vpack.c.bf16 %v853_v22, %v853_v22  ;;  %v858_v22 = vld [vmem:[#allocation2 + $0x82] sm:$0xff] }
  0x64   : > { %776 = vrot.lane.b32.xlu1 %v3852_v1, %s4199_s28  ;;  %v4643_v1 = vpack.c.bf16 %v852_v61, %v852_v61 }
  0x65   : > { %975 = vrot.lane.b32.xlu0 %v3855_v62, %s4200_s29  ;;  %v4647_v62 = vpack.c.bf16 %v855_v4, %v855_v4  ;;  %v861_v4 = vld [vmem:[#allocation2 + $0xaa] sm:$0xff] }
  0x66   : > { %v3869_v2 = vpack.c.bf16 %v861_v4, %v861_v4  ;;  %v866_v4 = vld [vmem:[#allocation2 + $0xe2] sm:$0xff] }
  0x68   : > { %780 = vrot.lane.b32.xlu1 %v3854_v24, %s4199_s28  ;;  %v4651_v24 = vpack.c.bf16 %v854_v9, %v854_v9  ;;  %v4662_v9 = vpack.c.bf16 %v858_v22, %v858_v22  ;;  %s284_s28 = scalar_lea.vmem %s5443_s6, %s3464_s25 }
  0x69   : > { %979 = vrot.lane.b32.xlu0 %v4627_v12, %s4200_s29 }
  0x6c   : > { %977 = vrot.lane.b32.xlu1 %v3856_v5, %s4200_s29  ;;  %v859_v5 = vld [vmem:[#allocation2 + $0x92] sm:$0xff] }
  0x6d   : > { %983 = vrot.lane.b32.xlu0 %v4632_v25, %s4200_s29  ;;  %v3867_v61 = vpack.c.bf16 %v859_v5, %v859_v5  ;;  %v865_v5 = vld [vmem:[#allocation2 + $0xda] sm:$0xff] }
  0x6e   : > { %v3873_v22 = vpack.c.bf16 %v865_v5, %v865_v5  ;;  %v870_v5 = vld [vmem:[#allocation2 + $0x112] sm:$0xff] }
  0x6f   : > { %v3878_v43 = vpack.c.bf16 %v870_v5, %v870_v5  ;;  %v876_v5 = vld [vmem:[#allocation2 + $0x15a] sm:$0xff] }
  0x70   : > { %981 = vrot.lane.b32.xlu1 %v4635_v3, %s4200_s29 }
  0x71   : > { %987 = vrot.lane.b32.xlu0 %v4639_v8, %s4200_s29 }
  0x74   : > { %985 = vrot.lane.b32.xlu1 %v4643_v1, %s4200_s29 }
  0x75   : > { %991 = vrot.lane.b32.xlu0 %v4647_v62, %s4200_s29 }
  0x78   : > { %989 = vrot.lane.b32.xlu1 %v4651_v24, %s4200_s29 }
  0x79   : > { %995 = vrot.lane.b32.xlu0 %v3865_v33, %s4200_s29  ;;  %v3871_v33 = vpack.c.bf16 %v863_v41, %v863_v41  ;;  %v3874_v41 = vpack.c.bf16 %v866_v4, %v866_v4  ;;  %v875_v4 = vld [vmem:[#allocation2 + $0x152] sm:$0xff] }
  0x7c   : > { %993 = vrot.lane.b32.xlu1 %v4657_v20, %s4200_s29 }
  0x7d   : > { %999 = vrot.lane.b32.xlu0 %v3867_v61, %s4200_s29  ;;  %v3872_v61 = vpack.c.bf16 %v864_v11, %v864_v11 }
  0x80   : > { %997 = vrot.lane.b32.xlu1 %v4662_v9, %s4200_s29 }
  0x81   : > { %1003 = vrot.lane.b32.xlu0 %v3869_v2, %s4200_s29  ;;  %v868_v2 = vld [vmem:[#allocation2 + $0xfa] sm:$0xff] }
  0x84   : > { %1001 = vrot.lane.b32.xlu1 %v3868_v17, %s4200_s29  ;;  %v871_v17 = vld [vmem:[#allocation2 + $0x122] sm:$0xff] }
  0x85   : > { %1007 = vrot.lane.b32.xlu0 %v3871_v33, %s4200_s29  ;;  %v3876_v33 = vpack.c.bf16 %v868_v2, %v868_v2  ;;  %v3879_v11 = vpack.c.bf16 %v871_v17, %v871_v17  ;;  %v3883_v2 = vpack.c.bf16 %v875_v4, %v875_v4 }
  0x88   : > { %1005 = vrot.lane.b32.xlu1 %v3870_v14, %s4200_s29  ;;  %v873_v14 = vld [vmem:[#allocation2 + $0x13a] sm:$0xff]  ;;  %v719_v34 = vpop.permute.xlu0 %718 }
  0x89   : > { %1011 = vrot.lane.b32.xlu0 %v3873_v22, %s4200_s29  ;;  %v872_v22 = vld [vmem:[#allocation2 + $0x12a] sm:$0xff]  ;;  %815 = vst.msk [vmem:[#allocation3] sm:$0xf] %vm814_vm4, %v719_v34 }
  0x8c   : > { %1009 = vrot.lane.b32.xlu1 %v3872_v61, %s4200_s29  ;;  %v3881_v61 = vpack.c.bf16 %v873_v14, %v873_v14 }
  0x8d   : > { %1015 = vrot.lane.b32.xlu0 %v3875_v6, %s4200_s29  ;;  %v3880_v6 = vpack.c.bf16 %v872_v22, %v872_v22  ;;  %v3884_v22 = vpack.c.bf16 %v876_v5, %v876_v5 }
  0x90   : > { %1013 = vrot.lane.b32.xlu1 %v3874_v41, %s4200_s29  ;;  %v874_v41 = vld [vmem:[#allocation2 + $0x142] sm:$0xff] }
  0x91   : > { %1019 = vrot.lane.b32.xlu0 %v3877_v26, %s4200_s29  ;;  %v877_v26 = vld [vmem:[#allocation2 + $0x16a] sm:$0xff] }
  0x92   : > { %v3885_v14 = vpack.c.bf16 %v877_v26, %v877_v26 }
  0x94   : > { %1017 = vrot.lane.b32.xlu1 %v3876_v33, %s4200_s29  ;;  %v3882_v33 = vpack.c.bf16 %v874_v41, %v874_v41 }
  0x95   : > { %1023 = vrot.lane.b32.xlu0 %v3879_v11, %s4200_s29 }
  0x98   : > { %1021 = vrot.lane.b32.xlu1 %v3878_v43, %s4200_s29 }
  0x99   : > { %1027 = vrot.lane.b32.xlu0 %v3881_v61, %s4200_s29  ;;  %v878_v61 = vld [vmem:[#allocation2 + $0x172] sm:$0xff] }
  0x9a   : > { %v721_v17 = vpop.permute.xlu0 %720 }
  0x9b   : > { %816 = vst.msk [vmem:[#allocation3 + $0x4] sm:$0xf] %vm814_vm4, %v721_v17 }
  0x9c   : > { %1025 = vrot.lane.b32.xlu1 %v3880_v6, %s4200_s29  ;;  %v3886_v6 = vpack.c.bf16 %v878_v61, %v878_v61 }
  0x9d   : > { %1031 = vrot.lane.b32.xlu0 %v3883_v2, %s4200_s29 }
  0x9e   : > { %v723_v11 = vpop.permute.xlu1 %722 }
  0x9f   : > { %817 = vst.msk [vmem:[#allocation3 + $0x8] sm:$0xf] %vm814_vm4, %v723_v11  ;;  %v727_v43 = vpop.permute.xlu0 %726 }
  0xa0   : > { %1029 = vrot.lane.b32.xlu1 %v3882_v33, %s4200_s29  ;;  %819 = vst.msk [vmem:[#allocation3 + $0x10] sm:$0xf] %vm814_vm4, %v727_v43 }
  0xa1   : > { %1035 = vrot.lane.b32.xlu0 %v3885_v14, %s4200_s29 }
  0xa2   : > { %v725_v4 = vpop.permute.xlu1 %724 }
  0xa3   : > { %818 = vst.msk [vmem:[#allocation3 + $0xc] sm:$0xf] %vm814_vm4, %v725_v4  ;;  %v731_v34 = vpop.permute.xlu0 %730 }
  0xa4   : > { %1033 = vrot.lane.b32.xlu1 %v3884_v22, %s4200_s29  ;;  %821 = vst.msk [vmem:[#allocation3 + $0x18] sm:$0xf] %vm814_vm4, %v731_v34 }
  0xa5   : > { %1232 = vrot.lane.b32.xlu0 %v4487_v10, %s4201_s30 }
  0xa6   : > { %v729_v41 = vpop.permute.xlu1 %728 }
  0xa7   : > { %820 = vst.msk [vmem:[#allocation3 + $0x14] sm:$0xf] %vm814_vm4, %v729_v41  ;;  %v735_v2 = vpop.permute.xlu0 %734 }
  0xa8   : > { %1037 = vrot.lane.b32.xlu1 %v3886_v6, %s4200_s29  ;;  %823 = vst.msk [vmem:[#allocation3 + $0x20] sm:$0xf] %vm814_vm4, %v735_v2  ;;  %s3461_s29 = sshll.u32 %s5506_s22, 1 }
  0xa9   : > { %1236 = vrot.lane.b32.xlu0 %v4490_v29, %s4201_s30 }
  0xaa   : > { %v733_v26 = vpop.permute.xlu1 %732 }
  0xab   : > { %822 = vst.msk [vmem:[#allocation3 + $0x1c] sm:$0xf] %vm814_vm4, %v733_v26  ;;  %v739_v17 = vpop.permute.xlu0 %738 }
  0xac   : > { %1234 = vrot.lane.b32.xlu1 %v4492_v32, %s4201_s30  ;;  %825 = vst.msk [vmem:[#allocation3 + $0x28] sm:$0xf] %vm814_vm4, %v739_v17 }
  0xad   : > { %1240 = vrot.lane.b32.xlu0 %v4500_v40, %s4201_s30 }
  0xae   : > { %v737_v10 = vpop.permute.xlu1 %736 }
  0xaf   : > { %824 = vst.msk [vmem:[#allocation3 + $0x24] sm:$0xf] %vm814_vm4, %v737_v10  ;;  %v743_v33 = vpop.permute.xlu0 %742 }
  0xb0   : > { %1238 = vrot.lane.b32.xlu1 %v4508_v50, %s4201_s30  ;;  %827 = vst.msk [vmem:[#allocation3 + $0x30] sm:$0xf] %vm814_vm4, %v743_v33 }
  0xb1   : > { %1244 = vrot.lane.b32.xlu0 %v4510_v51, %s4201_s30 }
  0xb2   : > { %v741_v5 = vpop.permute.xlu1 %740 }
  0xb3   : > { %826 = vst.msk [vmem:[#allocation3 + $0x2c] sm:$0xf] %vm814_vm4, %v741_v5  ;;  %v747_v32 = vpop.permute.xlu0 %746 }
  0xb4   : > { %1242 = vrot.lane.b32.xlu1 %v4515_v56, %s4201_s30  ;;  %829 = vst.msk [vmem:[#allocation3 + $0x38] sm:$0xf] %vm814_vm4, %v747_v32 }
  0xb5   : > { %1248 = vrot.lane.b32.xlu0 %v4517_v57, %s4201_s30 }
  0xb6   : > { %v745_v11 = vpop.permute.xlu1 %744 }
  0xb7   : > { %828 = vst.msk [vmem:[#allocation3 + $0x34] sm:$0xf] %vm814_vm4, %v745_v11  ;;  %v751_v14 = vpop.permute.xlu0 %750  ;;  %v2133_v11 = vld [vmem:[#allocation2 + $0x31] sm:$0xff] }
  0xb8   : > { %1246 = vrot.lane.b32.xlu1 %v4519_v58, %s4201_s30  ;;  %831 = vst.msk [vmem:[#allocation3 + $0x40] sm:$0xf] %vm814_vm4, %v751_v14 }
  0xb9   : > { %1252 = vrot.lane.b32.xlu0 %v4525_v63, %s4201_s30 }
  0xba   : > { %v749_v43 = vpop.permute.xlu1 %748 }
  0xbb   : > { %830 = vst.msk [vmem:[#allocation3 + $0x3c] sm:$0xf] %vm814_vm4, %v749_v43  ;;  %v755_v22 = vpop.permute.xlu0 %754 }
  0xbc   : > { %1250 = vrot.lane.b32.xlu1 %v4527_v0, %s4201_s30  ;;  %833 = vst.msk [vmem:[#allocation3 + $0x48] sm:$0xf] %vm814_vm4, %v755_v22  ;;  %v2136_v22 = vld [vmem:[#allocation2 + $0x51] sm:$0xff] }
  0xbd   : > { %1256 = vrot.lane.b32.xlu0 %v4529_v7, %s4201_s30 }
  0xbe   : > { %v753_v61 = vpop.permute.xlu1 %752 }
  0xbf   : > { %832 = vst.msk [vmem:[#allocation3 + $0x44] sm:$0xf] %vm814_vm4, %v753_v61  ;;  %v759_v4 = vpop.permute.xlu0 %758  ;;  %v4015_v61 = vpack.c.bf16 %v2133_v11, %v2133_v11 }
  0xc0   : > { %1254 = vrot.lane.b32.xlu1 %v4540_v36, %s4201_s30  ;;  %835 = vst.msk [vmem:[#allocation3 + $0x50] sm:$0xf] %vm814_vm4, %v759_v4 }
  0xc1   : > { %1260 = vrot.lane.b32.xlu0 %v4542_v44, %s4201_s30 }
  0xc2   : > { %v757_v34 = vpop.permute.xlu1 %756 }
  0xc3   : > { %834 = vst.msk [vmem:[#allocation3 + $0x4c] sm:$0xf] %vm814_vm4, %v757_v34  ;;  %v763_v6 = vpop.permute.xlu0 %762  ;;  %v4018_v34 = vpack.c.bf16 %v2136_v22, %v2136_v22 }
  0xc4   : > { %1258 = vrot.lane.b32.xlu1 %v4544_v47, %s4201_s30  ;;  %837 = vst.msk [vmem:[#allocation3 + $0x58] sm:$0xf] %vm814_vm4, %v763_v6 }
  0xc5   : > { %1264 = vrot.lane.b32.xlu0 %v4552_v38, %s4201_s30 }
  0xc6   : > { %v761_v41 = vpop.permute.xlu1 %760 }
  0xc7   : > { %836 = vst.msk [vmem:[#allocation3 + $0x54] sm:$0xf] %vm814_vm4, %v761_v41  ;;  %v767_v2 = vpop.permute.xlu0 %766 }
  0xc8   : > { %1262 = vrot.lane.b32.xlu1 %v4554_v54, %s4201_s30  ;;  %839 = vst.msk [vmem:[#allocation3 + $0x60] sm:$0xf] %vm814_vm4, %v767_v2 }
  0xc9   : > { %1268 = vrot.lane.b32.xlu0 %v4556_v59, %s4201_s30 }
  0xca   : > { %v765_v26 = vpop.permute.xlu1 %764 }
  0xcb   : > { %838 = vst.msk [vmem:[#allocation3 + $0x5c] sm:$0xf] %vm814_vm4, %v765_v26  ;;  %v771_v17 = vpop.permute.xlu0 %770 }
  0xcc   : > { %1266 = vrot.lane.b32.xlu1 %v4567_v27, %s4201_s30  ;;  %841 = vst.msk [vmem:[#allocation3 + $0x68] sm:$0xf] %vm814_vm4, %v771_v17 }
  0xcd   : > { %1272 = vrot.lane.b32.xlu0 %v4569_v52, %s4201_s30 }
  0xce   : > { %v769_v10 = vpop.permute.xlu1 %768 }
  0xcf   : > { %840 = vst.msk [vmem:[#allocation3 + $0x64] sm:$0xf] %vm814_vm4, %v769_v10  ;;  %v775_v33 = vpop.permute.xlu0 %774 }
  0xd0   : > { %1270 = vrot.lane.b32.xlu1 %v4571_v37, %s4201_s30  ;;  %843 = vst.msk [vmem:[#allocation3 + $0x70] sm:$0xf] %vm814_vm4, %v775_v33 }
  0xd1   : > { %1276 = vrot.lane.b32.xlu0 %v4579_v49, %s4201_s30 }
  0xd2   : > { %v773_v59 = vpop.permute.xlu1 %772 }
  0xd3   : > { %842 = vst.msk [vmem:[#allocation3 + $0x6c] sm:$0xf] %vm814_vm4, %v773_v59  ;;  %v779_v5 = vpop.permute.xlu0 %778  ;;  %v1368_v59 = vld [vmem:[#allocation2 + $0x69] sm:$0xff] }
  0xd4   : > { %1274 = vrot.lane.b32.xlu1 %v4581_v60, %s4201_s30  ;;  %845 = vst.msk [vmem:[#allocation3 + $0x78] sm:$0xf] %vm814_vm4, %v779_v5 }
  0xd5   : > { %1280 = vrot.lane.b32.xlu0 %v4597_v23, %s4201_s30 }
  0xd6   : > { %v777_v52 = vpop.permute.xlu1 %776 }
  0xd7   : > { %844 = vst.msk [vmem:[#allocation3 + $0x74] sm:$0xf] %vm814_vm4, %v777_v52  ;;  %v976_v37 = vpop.permute.xlu0 %975 }
  0xd8   : > { %1278 = vrot.lane.b32.xlu1 %v4595_v55, %s4201_s30  ;;  %1072 = vst.msk [vmem:[#allocation3] sm:$0xf] %vm1071_vm5, %v976_v37 }
  0xd9   : > { %1284 = vrot.lane.b32.xlu0 %v4607_v28, %s4201_s30 }
  0xda   : > { %v781_v49 = vpop.permute.xlu1 %780 }
  0xdb   : > { %846 = vst.msk [vmem:[#allocation3 + $0x7c] sm:$0xf] %vm814_vm4, %v781_v49  ;;  %v980_v60 = vpop.permute.xlu0 %979 }
  0xdc   : > { %1282 = vrot.lane.b32.xlu1 %v4605_v53, %s4201_s30  ;;  %1074 = vst.msk [vmem:[#allocation3 + $0x8] sm:$0xf] %vm1071_vm5, %v980_v60 }
  0xdd   : > { %1491 = vrot.lane.b32.xlu0 %v4436_v35, %s4202_s7 }
  0xde   : > { %v978_v23 = vpop.permute.xlu1 %977 }
  0xdf   : > { %1073 = vst.msk [vmem:[#allocation3 + $0x4] sm:$0xf] %vm1071_vm5, %v978_v23  ;;  %v984_v55 = vpop.permute.xlu0 %983 }
  0xe0   : > { %1489 = vrot.lane.b32.xlu1 %v4424_v30, %s4202_s7  ;;  %1076 = vst.msk [vmem:[#allocation3 + $0x10] sm:$0xf] %vm1071_vm5, %v984_v55 }
  0xe1   : > { %1495 = vrot.lane.b32.xlu0 %v4446_v39, %s4202_s7 }
  0xe2   : > { %v982_v28 = vpop.permute.xlu1 %981 }
  0xe3   : > { %1075 = vst.msk [vmem:[#allocation3 + $0xc] sm:$0xf] %vm1071_vm5, %v982_v28  ;;  %v988_v53 = vpop.permute.xlu0 %987 }
  0xe4   : > { %1493 = vrot.lane.b32.xlu1 %v4426_v31, %s4202_s7  ;;  %1078 = vst.msk [vmem:[#allocation3 + $0x18] sm:$0xf] %vm1071_vm5, %v988_v53 }
  0xe5   : > { %1748 = vrot.lane.b32.xlu0 %v4635_v3, %s4203_s8 }
  0xe6   : > { %v986_v35 = vpop.permute.xlu1 %985 }
  0xe7   : > { %1077 = vst.msk [vmem:[#allocation3 + $0x14] sm:$0xf] %vm1071_vm5, %v986_v35  ;;  %v992_v30 = vpop.permute.xlu0 %991 }
  0xe8   : > { %1746 = vrot.lane.b32.xlu1 %v4627_v12, %s4203_s8  ;;  %1080 = vst.msk [vmem:[#allocation3 + $0x20] sm:$0xf] %vm1071_vm5, %v992_v30  ;;  %v2134_v12 = vld [vmem:[#allocation2 + $0x39] sm:$0xff] }
  0xe9   : > { %1752 = vrot.lane.b32.xlu0 %v4643_v1, %s4203_s8  ;;  %v4016_v43 = vpack.c.bf16 %v2134_v12, %v2134_v12  ;;  %v2394_v12 = vld [vmem:[#allocation2 + $0x62] sm:$0xff] }
  0xea   : > { %v990_v39 = vpop.permute.xlu1 %989  ;;  %v4051_v11 = vpack.c.bf16 %v2394_v12, %v2394_v12 }
  0xeb   : > { %1079 = vst.msk [vmem:[#allocation3 + $0x1c] sm:$0xf] %vm1071_vm5, %v990_v39  ;;  %v996_v31 = vpop.permute.xlu0 %995  ;;  %v2139_v39 = vld [vmem:[#allocation2 + $0x79] sm:$0xff] }
  0xec   : > { %1750 = vrot.lane.b32.xlu1 %v4632_v25, %s4203_s8  ;;  %1082 = vst.msk [vmem:[#allocation3 + $0x28] sm:$0xf] %vm1071_vm5, %v996_v31 }
  0xed   : > { %2006 = vrot.lane.b32.xlu0 %v4508_v50, %s4204_s9 }
  0xee   : > { %v994_v3 = vpop.permute.xlu1 %993 }
  0xef   : > { %1081 = vst.msk [vmem:[#allocation3 + $0x24] sm:$0xf] %vm1071_vm5, %v994_v3  ;;  %v1000_v32 = vpop.permute.xlu0 %999 }
  0xf0   : > { %2004 = vrot.lane.b32.xlu1 %v4490_v29, %s4204_s9  ;;  %1084 = vst.msk [vmem:[#allocation3 + $0x30] sm:$0xf] %vm1071_vm5, %v1000_v32  ;;  %v2135_v29 = vld [vmem:[#allocation2 + $0x49] sm:$0xff] }
  0xf1   : > { %2010 = vrot.lane.b32.xlu0 %v4515_v56, %s4204_s9  ;;  %v2679_v56 = vld [vmem:[%s5438_s1] sm:$0xf]  ;;  %v4017_v6 = vpack.c.bf16 %v2135_v29, %v2135_v29 }
  0xf2   : > { %v998_v14 = vpop.permute.xlu1 %997  ;;  %4148 = vmatprep.subr.msk.bf16.mxu0 %vm2760_vm6, %v2679_v56  ;;  %v2810_v41 = vsel %vm2760_vm6, %v2679_v56, 0  ;;  %v1372_v29 = vld [vmem:[#allocation2 + $0x99] sm:$0xff] }
  0xf3   : > { %1083 = vst.msk [vmem:[#allocation3 + $0x2c] sm:$0xf] %vm1071_vm5, %v998_v14  ;;  %v1004_v50 = vpop.permute.xlu0 %1003  ;;  %4115 = vmatpush3.bf16.xpose.msra.mxu0 %v2810_v41  ;;  %v2396_v14 = vld [vmem:[#allocation2 + $0x7a] sm:$0xff]  ;;  %v3930_v56 = vpack.c.bf16 %v1372_v29, %v1372_v29 }
  0xf4   : > { %2008 = vrot.lane.b32.xlu1 %v4500_v40, %s4204_s9  ;;  %1086 = vst.msk [vmem:[#allocation3 + $0x38] sm:$0xf] %vm1071_vm5, %v1004_v50  ;;  %v4053_v50 = vpack.c.bf16 %v2396_v14, %v2396_v14 }
  0xf5   : > { %2263 = vrot.lane.b32.xlu0 %v4016_v43, %s4205_s10 }
  0xf6   : > { %v1002_v4 = vpop.permute.xlu1 %1001 }
  0xf7   : > { %1085 = vst.msk [vmem:[#allocation3 + $0x34] sm:$0xf] %vm1071_vm5, %v1002_v4  ;;  %v1008_v40 = vpop.permute.xlu0 %1007 }
  0xf8   : > { %2261 = vrot.lane.b32.xlu1 %v4015_v61, %s4205_s10  ;;  %1088 = vst.msk [vmem:[#allocation3 + $0x40] sm:$0xf] %vm1071_vm5, %v1008_v40  ;;  %v1627_v40 = vld [vmem:[#allocation2 + $0x82] sm:$0xff] }
  0xf9   : > { %2267 = vrot.lane.b32.xlu0 %v4018_v34, %s4205_s10 }
  0xfa   : > { %v1006_v2 = vpop.permute.xlu1 %1005 }
  0xfb   : > { %1087 = vst.msk [vmem:[#allocation3 + $0x3c] sm:$0xf] %vm1071_vm5, %v1006_v2  ;;  %v1012_v26 = vpop.permute.xlu0 %1011  ;;  %v3960_v2 = vpack.c.bf16 %v1627_v40, %v1627_v40 }
  0xfc   : > { %2265 = vrot.lane.b32.xlu1 %v4017_v6, %s4205_s10  ;;  %1090 = vst.msk [vmem:[#allocation3 + $0x48] sm:$0xf] %vm1071_vm5, %v1012_v26  ;;  %v1629_v26 = vld [vmem:[#allocation2 + $0x9a] sm:$0xff] }
  0xfd   : > { %2520 = vrot.lane.b32.xlu0 %v4643_v1, %s4206_s13  ;;  %v1367_v1 = vld [vmem:[#allocation2 + $0x61] sm:$0xff] }
  0xfe   : > { %v1010_v17 = vpop.permute.xlu1 %1009  ;;  %v3925_v49 = vpack.c.bf16 %v1367_v1, %v1367_v1 }
  0xff   : > { %1089 = vst.msk [vmem:[#allocation3 + $0x44] sm:$0xf] %vm1071_vm5, %v1010_v17  ;;  %v1016_v10 = vpop.permute.xlu0 %1015 }
 0x100   : > { %2518 = vrot.lane.b32.xlu1 %v4632_v25, %s4206_s13  ;;  %1092 = vst.msk [vmem:[#allocation3 + $0x50] sm:$0xf] %vm1071_vm5, %v1016_v10  ;;  %v3926_v25 = vpack.c.bf16 %v1368_v59, %v1368_v59  ;;  %v1628_v10 = vld [vmem:[#allocation2 + $0x92] sm:$0xff]  ;;  %v3962_v59 = vpack.c.bf16 %v1629_v26, %v1629_v26 }
 0x101   : > { %2524 = vrot.lane.b32.xlu0 %v4651_v24, %s4206_s13  ;;  %v3961_v1 = vpack.c.bf16 %v1628_v10, %v1628_v10  ;;  %v2148_v10 = vld [vmem:[#allocation2 + $0xe1] sm:$0xff] }
 0x102   : > { %v1014_v33 = vpop.permute.xlu1 %1013 }
 0x103   : > { %1091 = vst.msk [vmem:[#allocation3 + $0x4c] sm:$0xf] %vm1071_vm5, %v1014_v33  ;;  %v1020_v5 = vpop.permute.xlu0 %1019 }
 0x104   : > { %2522 = vrot.lane.b32.xlu1 %v4639_v8, %s4206_s13  ;;  %1094 = vst.msk [vmem:[#allocation3 + $0x58] sm:$0xf] %vm1071_vm5, %v1020_v5 }
 0x105   : > { %1499 = vrot.lane.b32.xlu0 %v4018_v34, %s4202_s7 }
 0x106   : > { %v1018_v52 = vpop.permute.xlu1 %1017 }
 0x107   : > { %1093 = vst.msk [vmem:[#allocation3 + $0x54] sm:$0xf] %vm1071_vm5, %v1018_v52  ;;  %v1024_v37 = vpop.permute.xlu0 %1023 }
 0x108   : > { %1497 = vrot.lane.b32.xlu1 %v4017_v6, %s4202_s7  ;;  %1096 = vst.msk [vmem:[#allocation3 + $0x60] sm:$0xf] %vm1071_vm5, %v1024_v37 }
 0x109   : > { %1503 = vrot.lane.b32.xlu0 %v3926_v25, %s4202_s7 }
 0x10a   : > { %v1022_v60 = vpop.permute.xlu1 %1021 }
 0x10b   : > { %1095 = vst.msk [vmem:[#allocation3 + $0x5c] sm:$0xf] %vm1071_vm5, %v1022_v60  ;;  %v1028_v23 = vpop.permute.xlu0 %1027 }
 0x10c   : > { %1501 = vrot.lane.b32.xlu1 %v3925_v49, %s4202_s7  ;;  %1098 = vst.msk [vmem:[#allocation3 + $0x68] sm:$0xf] %vm1071_vm5, %v1028_v23  ;;  %v2144_v23 = vld [vmem:[#allocation2 + $0xb1] sm:$0xff] }
 0x10d   : > { %1756 = vrot.lane.b32.xlu0 %v4651_v24, %s4203_s8 }
 0x10e   : > { %v1026_v55 = vpop.permute.xlu1 %1025 }
 0x10f   : > { %1097 = vst.msk [vmem:[#allocation3 + $0x64] sm:$0xf] %vm1071_vm5, %v1026_v55  ;;  %v1032_v28 = vpop.permute.xlu0 %1031 }
 0x110   : > { %1754 = vrot.lane.b32.xlu1 %v4639_v8, %s4203_s8  ;;  %1100 = vst.msk [vmem:[#allocation3 + $0x70] sm:$0xf] %vm1071_vm5, %v1032_v28 }
 0x111   : > { %1760 = vrot.lane.b32.xlu0 %v4657_v20, %s4203_s8 }
 0x112   : > { %v1030_v53 = vpop.permute.xlu1 %1029 }
 0x113   : > { %1099 = vst.msk [vmem:[#allocation3 + $0x6c] sm:$0xf] %vm1071_vm5, %v1030_v53  ;;  %v1036_v35 = vpop.permute.xlu0 %1035 }
 0x114   : > { %1758 = vrot.lane.b32.xlu1 %v4647_v62, %s4203_s8  ;;  %1102 = vst.msk [vmem:[#allocation3 + $0x78] sm:$0xf] %vm1071_vm5, %v1036_v35  ;;  %v2140_v62 = vld [vmem:[#allocation2 + $0x81] sm:$0xff] }
 0x115   : > { %2014 = vrot.lane.b32.xlu0 %v4519_v58, %s4204_s9 }
 0x116   : > { %v1034_v24 = vpop.permute.xlu1 %1033 }
 0x117   : > { %1101 = vst.msk [vmem:[#allocation3 + $0x74] sm:$0xf] %vm1071_vm5, %v1034_v24  ;;  %v1233_v8 = vpop.permute.xlu0 %1232 }
 0x118   : > { %2012 = vrot.lane.b32.xlu1 %v4510_v51, %s4204_s9  ;;  %1329 = vst.msk [vmem:[#allocation3] sm:$0xf] %vm1328_vm7, %v1233_v8  ;;  %v4022_v51 = vpack.c.bf16 %v2140_v62, %v2140_v62  ;;  %v2400_v8 = vld [vmem:[#allocation2 + $0xaa] sm:$0xff] }
 0x119   : > { %2018 = vrot.lane.b32.xlu0 %v4527_v0, %s4204_s9  ;;  %v4021_v0 = vpack.c.bf16 %v2139_v39, %v2139_v39  ;;  %v4057_v39 = vpack.c.bf16 %v2400_v8, %v2400_v8  ;;  %v5488_v8 = vld [vmem:[#allocation13_spill] sm:$0xff] }
 0x11a   : > { %v1038_v30 = vpop.permute.xlu1 %1037 }
 0x11b   : > { %1103 = vst.msk [vmem:[#allocation3 + $0x7c] sm:$0xf] %vm1071_vm5, %v1038_v30  ;;  %v1237_v58 = vpop.permute.xlu0 %1236 }
 0x11c   : > { %2016 = vrot.lane.b32.xlu1 %v4517_v57, %s4204_s9  ;;  %1331 = vst.msk [vmem:[#allocation3 + $0x8] sm:$0xf] %vm1328_vm7, %v1237_v58 }
 0x11d   : > { %2271 = vrot.lane.b32.xlu0 %v3926_v25, %s4205_s10 }
 0x11e   : > { %v1235_v31 = vpop.permute.xlu1 %1234 }
 0x11f   : > { %1330 = vst.msk [vmem:[#allocation3 + $0x4] sm:$0xf] %vm1328_vm7, %v1235_v31  ;;  %v1241_v3 = vpop.permute.xlu0 %1240 }
 0x120   : > { %2269 = vrot.lane.b32.xlu1 %v3925_v49, %s4205_s10  ;;  %1333 = vst.msk [vmem:[#allocation3 + $0x10] sm:$0xf] %vm1328_vm7, %v1241_v3 }
 0x121   : > { %2275 = vrot.lane.b32.xlu0 %v4022_v51, %s4205_s10 }
 0x122   : > { %v1239_v32 = vpop.permute.xlu1 %1238 }
 0x123   : > { %1332 = vst.msk [vmem:[#allocation3 + $0xc] sm:$0xf] %vm1328_vm7, %v1239_v32  ;;  %v1245_v57 = vpop.permute.xlu0 %1244 }
 0x124   : > { %2273 = vrot.lane.b32.xlu1 %v4021_v0, %s4205_s10  ;;  %1335 = vst.msk [vmem:[#allocation3 + $0x18] sm:$0xf] %vm1328_vm7, %v1245_v57 }
 0x125   : > { %2528 = vrot.lane.b32.xlu0 %v4657_v20, %s4206_s13  ;;  %v1371_v20 = vld [vmem:[#allocation2 + $0x91] sm:$0xff] }
 0x126   : > { %v1243_v43 = vpop.permute.xlu1 %1242 }
 0x127   : > { %1334 = vst.msk [vmem:[#allocation3 + $0x14] sm:$0xf] %vm1328_vm7, %v1243_v43  ;;  %v1249_v22 = vpop.permute.xlu0 %1248  ;;  %v1633_v43 = vld [vmem:[#allocation2 + $0xca] sm:$0xff] }
 0x128   : > { %2526 = vrot.lane.b32.xlu1 %v4051_v11, %s4206_s13  ;;  %1337 = vst.msk [vmem:[#allocation3 + $0x20] sm:$0xf] %vm1328_vm7, %v1249_v22  ;;  %v3966_v29 = vpack.c.bf16 %v1633_v43, %v1633_v43 }
 0x129   : > { %2532 = vrot.lane.b32.xlu0 %v4662_v9, %s4206_s13  ;;  %v3929_v9 = vpack.c.bf16 %v1371_v20, %v1371_v20 }
 0x12a   : > { %v1247_v61 = vpop.permute.xlu1 %1246 }
 0x12b   : > { %1336 = vst.msk [vmem:[#allocation3 + $0x1c] sm:$0xf] %vm1328_vm7, %v1247_v61  ;;  %v1253_v4 = vpop.permute.xlu0 %1252 }
 0x12c   : > { %2530 = vrot.lane.b32.xlu1 %v4053_v50, %s4206_s13  ;;  %1339 = vst.msk [vmem:[#allocation3 + $0x28] sm:$0xf] %vm1328_vm7, %v1253_v4 }
 0x12d   : > { %1507 = vrot.lane.b32.xlu0 %v4022_v51, %s4202_s7  ;;  %v1376_v51 = vld [vmem:[#allocation2 + $0xc9] sm:$0xff] }
 0x12e   : > { %v1251_v34 = vpop.permute.xlu1 %1250  ;;  %v3934_v32 = vpack.c.bf16 %v1376_v51, %v1376_v51  ;;  %v1637_v51 = vld [vmem:[#allocation2 + $0xfa] sm:$0xff] }
 0x12f   : > { %1338 = vst.msk [vmem:[#allocation3 + $0x24] sm:$0xf] %vm1328_vm7, %v1251_v34  ;;  %v1257_v6 = vpop.permute.xlu0 %1256 }
 0x130   : > { %1505 = vrot.lane.b32.xlu1 %v4021_v0, %s4202_s7  ;;  %1341 = vst.msk [vmem:[#allocation3 + $0x30] sm:$0xf] %vm1328_vm7, %v1257_v6  ;;  %v1375_v0 = vld [vmem:[#allocation2 + $0xc1] sm:$0xff]  ;;  %v316_v6 = vld [vmem:[%s4310_s27 + $0xf0] sm:$0xff] }
 0x131   : > { %1511 = vrot.lane.b32.xlu0 %v3930_v56, %s4202_s7  ;;  %v3933_v11 = vpack.c.bf16 %v1375_v0, %v1375_v0  ;;  %395 = vst.msk [vmem:[#allocation2 + $0x181] sm:$0xff] %vm318_vm0, %v316_v6  ;;  %v1636_v0 = vld [vmem:[#allocation2 + $0xf2] sm:$0xff] }
 0x132   : > { %v1255_v41 = vpop.permute.xlu1 %1254 }
 0x133   : > { %1340 = vst.msk [vmem:[#allocation3 + $0x2c] sm:$0xf] %vm1328_vm7, %v1255_v41  ;;  %v1261_v17 = vpop.permute.xlu0 %1260 }
 0x134   : > { %1509 = vrot.lane.b32.xlu1 %v3929_v9, %s4202_s7  ;;  %1343 = vst.msk [vmem:[#allocation3 + $0x38] sm:$0xf] %vm1328_vm7, %v1261_v17 }
 0x135   : > { %1764 = vrot.lane.b32.xlu0 %v3960_v2, %s4203_s8  ;;  %v3186_v2 = vpack.c.bf16 %v4394_v21, %v4379_v18  ;;  %v2147_v21 = vld [vmem:[#allocation2 + $0xd9] sm:$0xff] }
 0x136   : > { %v1259_v33 = vpop.permute.xlu1 %1258 }
 0x137   : > { %1342 = vst.msk [vmem:[#allocation3 + $0x34] sm:$0xf] %vm1328_vm7, %v1259_v33  ;;  %v1265_v5 = vpop.permute.xlu0 %1264  ;;  %v4030_v33 = vpack.c.bf16 %v2148_v10, %v2148_v10  ;;  %v5494_v10 = vld [vmem:[#allocation20_spill] sm:$0xff] }
 0x138   : > { %1762 = vrot.lane.b32.xlu1 %v4053_v50, %s4203_s8  ;;  %1345 = vst.msk [vmem:[#allocation3 + $0x40] sm:$0xf] %vm1328_vm7, %v1265_v5  ;;  %v1632_v50 = vld [vmem:[#allocation2 + $0xc2] sm:$0xff]  ;;  %v4029_v5 = vpack.c.bf16 %v2147_v21, %v2147_v21 }
 0x139   : > { %1768 = vrot.lane.b32.xlu0 %v3962_v59, %s4203_s8  ;;  %v3965_v20 = vpack.c.bf16 %v1632_v50, %v1632_v50  ;;  %v5492_v50 = vld [vmem:[#allocation12_spill] sm:$0xff]  ;;  %v5495_v21 = vld [vmem:[#allocation7_spill] sm:$0xff] }
 0x13a   : > { %v1263_v52 = vpop.permute.xlu1 %1262 }
 0x13b   : > { %1344 = vst.msk [vmem:[#allocation3 + $0x3c] sm:$0xf] %vm1328_vm7, %v1263_v52  ;;  %v1269_v25 = vpop.permute.xlu0 %1268 }
 0x13c   : > { %1766 = vrot.lane.b32.xlu1 %v3961_v1, %s4203_s8  ;;  %1347 = vst.msk [vmem:[#allocation3 + $0x48] sm:$0xf] %vm1328_vm7, %v1269_v25 }
 0x13d   : > { %2022 = vrot.lane.b32.xlu0 %v4540_v36, %s4204_s9  ;;  %v2143_v36 = vld [vmem:[#allocation2 + $0xa9] sm:$0xff] }
 0x13e   : > { %v1267_v37 = vpop.permute.xlu1 %1266 }
 0x13f   : > { %1346 = vst.msk [vmem:[#allocation3 + $0x44] sm:$0xf] %vm1328_vm7, %v1267_v37  ;;  %v1273_v49 = vpop.permute.xlu0 %1272  ;;  %v3192_v37 = vpack.c.bf16 %v4468_v46, %v4452_v42  ;;  %v1380_v42 = vld [vmem:[#allocation2 + $0xf9] sm:$0xff] }
 0x140   : > { %2020 = vrot.lane.b32.xlu1 %v4525_v63, %s4204_s9  ;;  %1349 = vst.msk [vmem:[#allocation3 + $0x50] sm:$0xf] %vm1328_vm7, %v1273_v49  ;;  %v4026_v63 = vpack.c.bf16 %v2144_v23, %v2144_v23  ;;  %v3184_v49 = vpack.c.bf16 %v4369_v16, %v4354_v13  ;;  %v1379_v16 = vld [vmem:[#allocation2 + $0xf1] sm:$0xff] }
 0x141   : > { %2026 = vrot.lane.b32.xlu0 %v4544_v47, %s4204_s9  ;;  %v4025_v47 = vpack.c.bf16 %v2143_v36, %v2143_v36 }
 0x142   : > { %v1271_v60 = vpop.permute.xlu1 %1270 }
 0x143   : > { %1348 = vst.msk [vmem:[#allocation3 + $0x4c] sm:$0xf] %vm1328_vm7, %v1271_v60  ;;  %v1277_v55 = vpop.permute.xlu0 %1276 }
 0x144   : > { %2024 = vrot.lane.b32.xlu1 %v4529_v7, %s4204_s9  ;;  %1351 = vst.msk [vmem:[#allocation3 + $0x58] sm:$0xf] %vm1328_vm7, %v1277_v55  ;;  %v2401_v7 = vld [vmem:[#allocation2 + $0xb2] sm:$0xff]  ;;  %v3215_v55 = vsel %vm318_vm0, %v3184_v49, 0 }
 0x145   : > { %2279 = vrot.lane.b32.xlu0 %v3930_v56, %s4205_s10  ;;  %v4058_v62 = vpack.c.bf16 %v2401_v7, %v2401_v7  ;;  %v5499_v49 = vld [vmem:[#allocation5_spill] sm:$0xff] }
 0x146   : > { %v1275_v28 = vpop.permute.xlu1 %1274 }
 0x147   : > { %1350 = vst.msk [vmem:[#allocation3 + $0x54] sm:$0xf] %vm1328_vm7, %v1275_v28  ;;  %v1281_v53 = vpop.permute.xlu0 %1280 }
 0x148   : > { %2277 = vrot.lane.b32.xlu1 %v3929_v9, %s4205_s10  ;;  %1353 = vst.msk [vmem:[#allocation3 + $0x60] sm:$0xf] %vm1328_vm7, %v1281_v53  ;;  %v317_v9 = vld [vmem:[%s4310_s27 + $0xf8] sm:$0xff]  ;;  %v4995_v53 = vpack.c.bf16 %v1380_v42, %v1380_v42 }
 0x149   : > { %2283 = vrot.lane.b32.xlu0 %v4026_v63, %s4205_s10  ;;  %396 = vst.msk [vmem:[#allocation2 + $0x189] sm:$0xff] %vm318_vm0, %v317_v9  ;;  %v3194_v41 = vpack.c.bf16 %v317_v9, %v316_v6  ;;  %v1895_v6 = vld [vmem:[#allocation2 + $0x110] sm:$0xff] }
 0x14a   : > { %v1279_v35 = vpop.permute.xlu1 %1278 }
 0x14b   : > { %1352 = vst.msk [vmem:[#allocation3 + $0x5c] sm:$0xf] %vm1328_vm7, %v1279_v35  ;;  %v1285_v24 = vpop.permute.xlu0 %1284  ;;  %4149 = vmatprep.subr.msk.bf16.mxu1 %vm318_vm0, %v3194_v41  ;;  %v5486_v35 = vld [vmem:[#allocation23_spill] sm:$0xff] }
 0x14c   : > { %2281 = vrot.lane.b32.xlu1 %v4025_v47, %s4205_s10  ;;  %1355 = vst.msk [vmem:[#allocation3 + $0x68] sm:$0xf] %vm1328_vm7, %v1285_v24  ;;  %v5487_v24 = vld [vmem:[#allocation11_spill] sm:$0xff] }
 0x14d   : > { %2536 = vrot.lane.b32.xlu0 %v3962_v59, %s4206_s13  ;;  %v3185_v59 = vpack.c.bf16 %v4382_v19, %v4366_v15  ;;  %v2404_v19 = vld [vmem:[#allocation2 + $0xda] sm:$0xff] }
 0x14e   : > { %v1283_v30 = vpop.permute.xlu1 %1282  ;;  %v4061_v23 = vpack.c.bf16 %v2404_v19, %v2404_v19 }
 0x14f   : > { %1354 = vst.msk [vmem:[#allocation3 + $0x64] sm:$0xf] %vm1328_vm7, %v1283_v30  ;;  %v1492_v58 = vpop.permute.xlu0 %1491  ;;  %v3183_v30 = vpack.c.bf16 %v5488_v8, %v5487_v24  ;;  %v5503_v24 = vld [vmem:[#allocation4_spill] sm:$0xff]  ;;  %v5504_v8 = vld [vmem:[#allocation6_spill] sm:$0xff] }
 0x150   : > { %2534 = vrot.lane.b32.xlu1 %v3961_v1, %s4206_s13  ;;  %1587 = vst.msk [vmem:[#allocation3 + $0x4] sm:$0xf] %vm1585_vm8, %v1492_v58  ;;  %v3218_v1 = vsel %vm318_vm0, %v3185_v59, 0  ;;  %v5004_v58 = vpack.c.bf16 %v1379_v16, %v1379_v16 }
 0x151   : > { %2540 = vrot.lane.b32.xlu0 %v4058_v62, %s4206_s13 }
 0x152   : > { %v1490_v31 = vpop.permute.xlu1 %1489 }
 0x153   : > { %1586 = vst.msk [vmem:[#allocation3] sm:$0xf] %vm1585_vm8, %v1490_v31  ;;  %v1496_v3 = vpop.permute.xlu0 %1495 }
 0x154   : > { %2538 = vrot.lane.b32.xlu1 %v4057_v39, %s4206_s13  ;;  %1589 = vst.msk [vmem:[#allocation3 + $0xc] sm:$0xf] %vm1585_vm8, %v1496_v3 }
 0x155   : > { %1515 = vrot.lane.b32.xlu0 %v4026_v63, %s4202_s7 }
 0x156   : > { %v1494_v12 = vpop.permute.xlu1 %1493 }
 0x157   : > { %1588 = vst.msk [vmem:[#allocation3 + $0x8] sm:$0xf] %vm1585_vm8, %v1494_v12  ;;  %v1749_v57 = vpop.permute.xlu0 %1748 }
 0x158   : > { %1513 = vrot.lane.b32.xlu1 %v4025_v47, %s4202_s7  ;;  %1844 = vst.msk [vmem:[#allocation3 + $0x4] sm:$0xf] %vm1842_vm9, %v1749_v57  ;;  %v5485_v47 = vld [vmem:[#allocation21_spill] sm:$0xff] }
 0x159   : > { %1519 = vrot.lane.b32.xlu0 %v3934_v32, %s4202_s7  ;;  %v3191_v7 = vpack.c.bf16 %v5486_v35, %v5485_v47  ;;  %v1893_v57 = vld [vmem:[#allocation2 + $0xf8] sm:$0xff]  ;;  %v5501_v47 = vld [vmem:[#allocation14_spill] sm:$0xff]  ;;  %v5502_v35 = vld [vmem:[#allocation16_spill] sm:$0xff] }
 0x15a   : > { %v1747_v14 = vpop.permute.xlu1 %1746 }
 0x15b   : > { %1843 = vst.msk [vmem:[#allocation3] sm:$0xf] %vm1842_vm9, %v1747_v14  ;;  %v1753_v22 = vpop.permute.xlu0 %1752  ;;  %v5490_v14 = vld [vmem:[#allocation22_spill] sm:$0xff] }
 0x15c   : > { %1517 = vrot.lane.b32.xlu1 %v3933_v11, %s4202_s7  ;;  %1846 = vst.msk [vmem:[#allocation3 + $0xc] sm:$0xf] %vm1842_vm9, %v1753_v22  ;;  %v5491_v22 = vld [vmem:[#allocation9_spill] sm:$0xff] }
 0x15d   : > { %1772 = vrot.lane.b32.xlu0 %v4058_v62, %s4203_s8 }
 0x15e   : > { %v1751_v61 = vpop.permute.xlu1 %1750 }
 0x15f   : > { %1845 = vst.msk [vmem:[#allocation3 + $0x8] sm:$0xf] %vm1842_vm9, %v1751_v61  ;;  %v2007_v4 = vpop.permute.xlu0 %2006  ;;  %v3182_v61 = vpack.c.bf16 %v5492_v50, %v5491_v22 }
 0x160   : > { %1770 = vrot.lane.b32.xlu1 %v4057_v39, %s4203_s8  ;;  %2102 = vst.msk [vmem:[#allocation3 + $0x4] sm:$0xf] %vm2100_vm10, %v2007_v4  ;;  %v3212_v39 = vsel %vm318_vm0, %v3183_v30, 0  ;;  %v5024_v4 = vpack.c.bf16 %v1636_v0, %v1636_v0  ;;  %v3179_v30 = vpack.c.bf16 %v5504_v8, %v5503_v24  ;;  %v1644_v8 = vld [vmem:[#allocation2 + $0x152] sm:$0xff] }
 0x161   : > { %1776 = vrot.lane.b32.xlu0 %v3966_v29, %s4203_s8 }
 0x162   : > { %v2005_v34 = vpop.permute.xlu1 %2004 }
 0x163   : > { %2101 = vst.msk [vmem:[#allocation3] sm:$0xf] %vm2100_vm10, %v2005_v34  ;;  %v2011_v56 = vpop.permute.xlu0 %2010  ;;  %v3209_v34 = vsel %vm318_vm0, %v3182_v61, 0  ;;  %v1641_v61 = vld [vmem:[#allocation2 + $0x12a] sm:$0xff] }
 0x164   : > { %1774 = vrot.lane.b32.xlu1 %v3965_v20, %s4203_s8  ;;  %2104 = vst.msk [vmem:[#allocation3 + $0xc] sm:$0xf] %vm2100_vm10, %v2011_v56 }
 0x165   : > { %2030 = vrot.lane.b32.xlu0 %v4554_v54, %s4204_s9  ;;  %v3221_v54 = vsel %vm318_vm0, %v3186_v2, 0  ;;  %v1894_v2 = vld [vmem:[#allocation2 + $0x108] sm:$0xff] }
 0x166   : > { %v2009_v40 = vpop.permute.xlu1 %2008  ;;  %4097 = vmatpush3.bf16.xpose.msra.mxu1 %v3221_v54  ;;  %v4002_v54 = vpack.c.bf16 %v1895_v6, %v1895_v6  ;;  %v4001_v59 = vpack.c.bf16 %v1894_v2, %v1894_v2 }
 0x167   : > { %2103 = vst.msk [vmem:[#allocation3 + $0x8] sm:$0xf] %vm2100_vm10, %v2009_v40  ;;  %v2264_v26 = vpop.permute.xlu0 %2263  ;;  %v4000_v40 = vpack.c.bf16 %v1893_v57, %v1893_v57 }
 0x168   : > { %2028 = vrot.lane.b32.xlu1 %v4542_v44, %s4204_s9  ;;  %2359 = vst.msk [vmem:[#allocation3 + $0x4] sm:$0xf] %vm2357_vm11, %v2264_v26 }
 0x169   : > { %2034 = vrot.lane.b32.xlu0 %v4567_v27, %s4204_s9  ;;  %v3193_v27 = vpack.c.bf16 %v4475_v48, %v4465_v45  ;;  %v2405_v45 = vld [vmem:[#allocation2 + $0xe2] sm:$0xff] }
 0x16a   : > { %v2262_v17 = vpop.permute.xlu1 %2261  ;;  %v4062_v25 = vpack.c.bf16 %v2405_v45, %v2405_v45  ;;  %v2151_v45 = vld [vmem:[#allocation2 + $0x109] sm:$0xff] }
 0x16b   : > { %2358 = vst.msk [vmem:[#allocation3] sm:$0xf] %vm2357_vm11, %v2262_v17  ;;  %v2268_v18 = vpop.permute.xlu0 %2267  ;;  %4150 = vmatprep.subr.msk.bf16.mxu1 %vm318_vm0, %v3193_v27  ;;  %v5493_v17 = vld [vmem:[#allocation17_spill] sm:$0xff] }
 0x16c   : > { %2032 = vrot.lane.b32.xlu1 %v4552_v38, %s4204_s9  ;;  %2361 = vst.msk [vmem:[#allocation3 + $0xc] sm:$0xf] %vm2357_vm11, %v2268_v18  ;;  %v3189_v18 = vpack.c.bf16 %v5494_v10, %v5493_v17  ;;  %v1898_v10 = vld [vmem:[#allocation2 + $0x138] sm:$0xff] }
 0x16d   : > { %2287 = vrot.lane.b32.xlu0 %v3934_v32, %s4205_s10  ;;  %v5016_v32 = vpack.c.bf16 %v1637_v51, %v1637_v51 }
 0x16e   : > { %v2266_v44 = vpop.permute.xlu1 %2265  ;;  %4099 = vmatpush3.bf16.xpose.msra.mxu1 %v3218_v1  ;;  %v2152_v1 = vld [vmem:[#allocation2 + $0x111] sm:$0xff] }
 0x16f   : > { %2360 = vst.msk [vmem:[#allocation3 + $0x8] sm:$0xf] %vm2357_vm11, %v2266_v44  ;;  %v2521_v38 = vpop.permute.xlu0 %2520  ;;  %4151 = vmatprep.subr.msk.bf16.mxu1 %vm318_vm0, %v3192_v37  ;;  %v5496_v44 = vld [vmem:[#allocation10_spill] sm:$0xff]  ;;  %v4034_v19 = vpack.c.bf16 %v2152_v1, %v2152_v1 }
 0x170   : > { %2285 = vrot.lane.b32.xlu1 %v3933_v11, %s4205_s10  ;;  %2616 = vst.msk [vmem:[#allocation3 + $0x4] sm:$0xf] %vm2614_vm12, %v2521_v38  ;;  %v5489_v11 = vld [vmem:[#allocation19_spill] sm:$0xff] }
 0x171   : > { %2291 = vrot.lane.b32.xlu0 %v4030_v33, %s4205_s10  ;;  %v3190_v43 = vpack.c.bf16 %v5490_v14, %v5489_v11  ;;  %v3195_v14 = vld [vmem:[%s5439_s2] sm:$0xf] }
 0x172   : > { %v2519_v52 = vpop.permute.xlu1 %2518  ;;  %4112 = vmatprep.mubr.msk.bf16.mxu1 %vm318_vm0, %v3195_v14 }
 0x173   : > { %2615 = vst.msk [vmem:[#allocation3] sm:$0xf] %vm2614_vm12, %v2519_v52  ;;  %v2525_v15 = vpop.permute.xlu0 %2524 }
 0x174   : > { %2289 = vrot.lane.b32.xlu1 %v4029_v5, %s4205_s10  ;;  %2618 = vst.msk [vmem:[#allocation3 + $0xc] sm:$0xf] %vm2614_vm12, %v2525_v15 }
 0x175   : > { %2544 = vrot.lane.b32.xlu0 %v3966_v29, %s4206_s13 }
 0x176   : > { %v2523_v48 = vpop.permute.xlu1 %2522  ;;  %4101 = vmatpush3.bf16.xpose.msra.mxu1 %v3215_v55 }
 0x177   : > { %2617 = vst.msk [vmem:[#allocation3 + $0x8] sm:$0xf] %vm2614_vm12, %v2523_v48  ;;  %v1500_v60 = vpop.permute.xlu0 %1499  ;;  %4152 = vmatprep.subr.msk.bf16.mxu1 %vm318_vm0, %v3191_v7  ;;  %v5497_v48 = vld [vmem:[#allocation15_spill] sm:$0xff]  ;;  %v3187_v7 = vpack.c.bf16 %v5502_v35, %v5501_v47 }
 0x178   : > { %2542 = vrot.lane.b32.xlu1 %v3965_v20, %s4206_s13  ;;  %1591 = vst.msk [vmem:[#allocation3 + $0x14] sm:$0xf] %vm1585_vm8, %v1500_v60  ;;  %v1892_v20 = vld [vmem:[#allocation2 + $0xf0] sm:$0xff] }
 0x179   : > { %2548 = vrot.lane.b32.xlu0 %v4062_v25, %s4206_s13  ;;  %v3999_v41 = vpack.c.bf16 %v1892_v20, %v1892_v20  ;;  %v5500_v60 = vld [vmem:[#allocation8_spill] sm:$0xff] }
 0x17a   : > { %v1498_v36 = vpop.permute.xlu1 %1497  ;;  %v4174_v28 = vld [vmem:[#allocation3] sm:$0xff]  }
 0x17b   : > { %1590 = vst.msk [vmem:[#allocation3 + $0x10] sm:$0xf] %vm1585_vm8, %v1498_v36  ;;  %4116 = vmatprep.mubr.msk.bf16.mxu0 %vm2760_vm6, %v4174_v28  ;;  %v1504_v13 = vpop.permute.xlu0 %1503  ;;  %v4033_v36 = vpack.c.bf16 %v2151_v45, %v2151_v45 }
 0x17c   : > { %2546 = vrot.lane.b32.xlu1 %v4061_v23, %s4206_s13  ;;  %1593 = vst.msk [vmem:[#allocation3 + $0x1c] sm:$0xf] %vm1585_vm8, %v1504_v13  ;;  %v2409_v13 = vld [vmem:[#allocation2 + $0x112] sm:$0xff] }
 0x17d   : > { %1523 = vrot.lane.b32.xlu0 %v4030_v33, %s4202_s7  ;;  %v3181_v33 = vpack.c.bf16 %v5496_v44, %v5495_v21 }
 0x17e   : > { %v1502_v46 = vpop.permute.xlu1 %1501  ;;  %v4175_v63 = vld [vmem:[#allocation3 + $0x8] sm:$0xff]   ;;  %4103 = vmatpush3.bf16.xpose.msra.mxu1 %v3212_v39  ;;  %v3200_v39 = vsel %vm318_vm0, %v3179_v30, 0 }
 0x17f   : > { %1592 = vst.msk [vmem:[#allocation3 + $0x18] sm:$0xf] %vm1585_vm8, %v1502_v46  ;;  %4117 = vmatmul.mubr.msk.bf16.vlgmr.msra.gmra.mxu0 %vm2760_vm6, %v4175_v63  ;;  %v1757_v62 = vpop.permute.xlu0 %1756  ;;  %4153 = vmatprep.subr.msk.bf16.mxu1 %vm318_vm0, %v3190_v43  ;;  %v3206_v38 = vsel %vm318_vm0, %v3181_v33, 0  ;;  %v2408_v46 = vld [vmem:[#allocation2 + $0x10a] sm:$0xff]  ;;  %v4005_v33 = vpack.c.bf16 %v1898_v10, %v1898_v10 }
 0x180   : > { %1521 = vrot.lane.b32.xlu1 %v4029_v5, %s4202_s7  ;;  %1848 = vst.msk [vmem:[#allocation3 + $0x14] sm:$0xf] %vm1842_vm9, %v1757_v62 }
 0x181   : > { %1527 = vrot.lane.b32.xlu0 %v4995_v53, %s4202_s7 }
 0x182   : > { %v1755_v31 = vpop.permute.xlu1 %1754 }
 0x183   : > { %1847 = vst.msk [vmem:[#allocation3 + $0x10] sm:$0xf] %vm1842_vm9, %v1755_v31  ;;  %v1761_v3 = vpop.permute.xlu0 %1760 }
 0x184   : > { %1525 = vrot.lane.b32.xlu1 %v5004_v58, %s4202_s7  ;;  %1850 = vst.msk [vmem:[#allocation3 + $0x1c] sm:$0xf] %vm1842_vm9, %v1761_v3  ;;  %v1384_v3 = vld [vmem:[#allocation2 + $0x129] sm:$0xff] }
 0x185   : > { %1780 = vrot.lane.b32.xlu0 %v4062_v25, %s4203_s8  ;;  %v5498_v25 = vld [vmem:[#allocation18_spill] sm:$0xff]  ;;  %v3942_v11 = vpack.c.bf16 %v1384_v3, %v1384_v3 }
 0x186   : > { %v1759_v12 = vpop.permute.xlu1 %1758  ;;  %4105 = vmatpush3.bf16.xpose.msra.mxu1 %v3209_v34  ;;  %v3188_v37 = vpack.c.bf16 %v5498_v25, %v5497_v48  ;;  %v3974_v34 = vpack.c.bf16 %v1641_v61, %v1641_v61  ;;  %v2413_v48 = vld [vmem:[#allocation2 + $0x142] sm:$0xff]  ;;  %v1645_v3 = vld [vmem:[#allocation2 + $0x15a] sm:$0xff] }
 0x187   : > { %1849 = vst.msk [vmem:[#allocation3 + $0x18] sm:$0xf] %vm1842_vm9, %v1759_v12  ;;  %v2015_v29 = vpop.permute.xlu0 %2014  ;;  %4154 = vmatprep.subr.msk.bf16.mxu1 %vm318_vm0, %v3189_v18  ;;  %v1383_v12 = vld [vmem:[#allocation2 + $0x121] sm:$0xff] }
 0x188   : > { %1778 = vrot.lane.b32.xlu1 %v4061_v23, %s4203_s8  ;;  %2106 = vst.msk [vmem:[#allocation3 + $0x14] sm:$0xf] %vm2100_vm10, %v2015_v29  ;;  %v3180_v23 = vpack.c.bf16 %v5500_v60, %v5499_v49  ;;  %v3941_v22 = vpack.c.bf16 %v1383_v12, %v1383_v12  ;;  %v4070_v60 = vpack.c.bf16 %v2413_v48, %v2413_v48 }
 0x189   : > { %1784 = vrot.lane.b32.xlu0 %v5016_v32, %s4203_s8 }
 0x18a   : > { %v2013_v56 = vpop.permute.xlu1 %2012  ;;  %v3203_v28 = vsel %vm318_vm0, %v3180_v23, 0 }
 0x18b   : > { %2105 = vst.msk [vmem:[#allocation3 + $0x10] sm:$0xf] %vm2100_vm10, %v2013_v56  ;;  %v2019_v9 = vpop.permute.xlu0 %2018  ;;  %v1897_v56 = vld [vmem:[#allocation2 + $0x128] sm:$0xff] }
 0x18c   : > { %1782 = vrot.lane.b32.xlu1 %v5024_v4, %s4203_s8  ;;  %2108 = vst.msk [vmem:[#allocation3 + $0x1c] sm:$0xf] %vm2100_vm10, %v2019_v9  ;;  %v1896_v9 = vld [vmem:[#allocation2 + $0x120] sm:$0xff]  ;;  %v4004_v2 = vpack.c.bf16 %v1897_v56, %v1897_v56 }
 0x18d   : > { %2038 = vrot.lane.b32.xlu0 %v4000_v40, %s4204_s9  ;;  %v4003_v17 = vpack.c.bf16 %v1896_v9, %v1896_v9 }
 0x18e   : > { %v2017_v26 = vpop.permute.xlu1 %2016  ;;  %4107 = vmatpush3.bf16.xpose.msra.mxu1 %v3206_v38 }
 0x18f   : > { %2107 = vst.msk [vmem:[#allocation3 + $0x18] sm:$0xf] %vm2100_vm10, %v2017_v26  ;;  %v2272_v27 = vpop.permute.xlu0 %2271  ;;  %4155 = vmatprep.subr.msk.bf16.mxu1 %vm318_vm0, %v3188_v37  ;;  %v1899_v26 = vld [vmem:[#allocation2 + $0x140] sm:$0xff] }
 0x190   : > { %2036 = vrot.lane.b32.xlu1 %v3999_v41, %s4204_s9  ;;  %2363 = vst.msk [vmem:[#allocation3 + $0x14] sm:$0xf] %vm2357_vm11, %v2272_v27  ;;  %v4006_v21 = vpack.c.bf16 %v1899_v26, %v1899_v26  ;;  %v2412_v37 = vld [vmem:[#allocation2 + $0x13a] sm:$0xff] }
 0x191   : > { %2042 = vrot.lane.b32.xlu0 %v4002_v54, %s4204_s9 }
 0x192   : > { %v2270_v5 = vpop.permute.xlu1 %2269 }
 0x193   : > { %2362 = vst.msk [vmem:[#allocation3 + $0x10] sm:$0xf] %vm2357_vm11, %v2270_v5  ;;  %v2276_v52 = vpop.permute.xlu0 %2275  ;;  %v2155_v5 = vld [vmem:[#allocation2 + $0x139] sm:$0xff] }
 0x194   : > { %2040 = vrot.lane.b32.xlu1 %v4001_v59, %s4204_s9  ;;  %2365 = vst.msk [vmem:[#allocation3 + $0x1c] sm:$0xf] %vm2357_vm11, %v2276_v52  ;;  %v2156_v59 = vld [vmem:[#allocation2 + $0x141] sm:$0xff] }
 0x195   : > { %2295 = vrot.lane.b32.xlu0 %v4995_v53, %s4205_s10  ;;  %v4066_v53 = vpack.c.bf16 %v2409_v13, %v2409_v13  ;;  %v4038_v52 = vpack.c.bf16 %v2156_v59, %v2156_v59  ;;  %v1387_v13 = vld [vmem:[#allocation2 + $0x151] sm:$0xff] }
 0x196   : > { %v2274_v15 = vpop.permute.xlu1 %2273  ;;  %4109 = vmatpush3.bf16.xpose.msra.mxu1 %v3203_v28  ;;  %v3945_v47 = vpack.c.bf16 %v1387_v13, %v1387_v13 }
 0x197   : > { %2364 = vst.msk [vmem:[#allocation3 + $0x18] sm:$0xf] %vm2357_vm11, %v2274_v15  ;;  %v2529_v55 = vpop.permute.xlu0 %2528  ;;  %4156 = vmatprep.subr.msk.bf16.mxu1 %vm318_vm0, %v3187_v7  ;;  %v4037_v15 = vpack.c.bf16 %v2155_v5, %v2155_v5  ;;  %v1388_v7 = vld [vmem:[#allocation2 + $0x159] sm:$0xff] }
 0x198   : > { %2293 = vrot.lane.b32.xlu1 %v5004_v58, %s4205_s10  ;;  %2620 = vst.msk [vmem:[#allocation3 + $0x14] sm:$0xf] %vm2614_vm12, %v2529_v55  ;;  %v4065_v58 = vpack.c.bf16 %v2408_v46, %v2408_v46  ;;  %v4069_v55 = vpack.c.bf16 %v2412_v37, %v2412_v37 }
 0x199   : > { %2299 = vrot.lane.b32.xlu0 %v4034_v19, %s4205_s10 }
 0x19a   : > { %v2527_v42 = vpop.permute.xlu1 %2526 }
 0x19b   : > { %2619 = vst.msk [vmem:[#allocation3 + $0x10] sm:$0xf] %vm2614_vm12, %v2527_v42  ;;  %v2533_v16 = vpop.permute.xlu0 %2532 }
 0x19c   : > { %2297 = vrot.lane.b32.xlu1 %v4033_v36, %s4205_s10  ;;  %2622 = vst.msk [vmem:[#allocation3 + $0x1c] sm:$0xf] %vm2614_vm12, %v2533_v16 }
 0x19d   : > { %2552 = vrot.lane.b32.xlu0 %v5016_v32, %s4206_s13 }
 0x19e   : > { %v2531_v63 = vpop.permute.xlu1 %2530  ;;  %4111 = vmatpush3.bf16.xpose.msra.mxu1 %v3200_v39  ;;  %v3977_v39 = vpack.c.bf16 %v1644_v8, %v1644_v8 }
 0x19f   : > { %2621 = vst.msk [vmem:[#allocation3 + $0x18] sm:$0xf] %vm2614_vm12, %v2531_v63  ;;  %v1508_v62 = vpop.permute.xlu0 %1507 }
 0x1a0   : > { %2550 = vrot.lane.b32.xlu1 %v5024_v4, %s4206_s13  ;;  %1595 = vst.msk [vmem:[#allocation3 + $0x24] sm:$0xf] %vm1585_vm8, %v1508_v62  ;;  %v1640_v4 = vld [vmem:[#allocation2 + $0x122] sm:$0xff]  ;;  %v3946_v62 = vpack.c.bf16 %v1388_v7, %v1388_v7 }
 0x1a1   : > { %2556 = vrot.lane.b32.xlu0 %v4066_v53, %s4206_s13  ;;  %v3973_v6 = vpack.c.bf16 %v1640_v4, %v1640_v4 }
 0x1a2   : > { %v1506_v31 = vpop.permute.xlu1 %1505  ;;  %v4176_v51 = vld [vmem:[#allocation3 + $0x10] sm:$0xff]  }
 0x1a3   : > { %1594 = vst.msk [vmem:[#allocation3 + $0x20] sm:$0xf] %vm1585_vm8, %v1506_v31  ;;  %4120 = vmatprep.mubr.msk.bf16.mxu0 %vm2760_vm6, %v4176_v51  ;;  %v1512_v0 = vpop.permute.xlu0 %1511  ;;  %v1900_v31 = vld [vmem:[#allocation2 + $0x150] sm:$0xff] }
 0x1a4   : > { %2554 = vrot.lane.b32.xlu1 %v4065_v58, %s4206_s13  ;;  %1597 = vst.msk [vmem:[#allocation3 + $0x2c] sm:$0xf] %vm1585_vm8, %v1512_v0  ;;  %v4007_v12 = vpack.c.bf16 %v1900_v31, %v1900_v31 }
 0x1a5   : > { %1531 = vrot.lane.b32.xlu0 %v4034_v19, %s4202_s7  ;;  %4113 = vmatmul.mubr.msk.bf16.vlgmr.msra.gmra.mxu1 %vm318_vm0, %v3195_v14  ;;  %vm3075_vm0 = vcmask 57344  }
 0x1a6   : > { %v1510_v32 = vpop.permute.xlu1 %1509  ;;  %v4177_v57 = vld [vmem:[#allocation3 + $0x18] sm:$0xff]  }
 0x1a7   : > { %1596 = vst.msk [vmem:[#allocation3 + $0x28] sm:$0xf] %vm1585_vm8, %v1510_v32  ;;  %4121 = vmatmul.mubr.msk.bf16.gmra.mxu0 %vm2760_vm6, %v4177_v57  ;;  %v1765_v43 = vpop.permute.xlu0 %1764  ;;  %v1902_v32 = vld [vmem:[#allocation2 + $0x168] sm:$0xff] }
 0x1a8   : > { %1529 = vrot.lane.b32.xlu1 %v4033_v36, %s4202_s7  ;;  %1852 = vst.msk [vmem:[#allocation3 + $0x24] sm:$0xf] %vm1842_vm9, %v1765_v43  ;;  %v1131_v36 = vld [vmem:[#allocation2 + $0x158] sm:$0xff]  ;;  %v4009_v43 = vpack.c.bf16 %v1902_v32, %v1902_v32  ;;  %v2164_v32 = vld [vmem:[#allocation2 + $0x1a1] sm:$0xff] }
 0x1a9   : > { %1535 = vrot.lane.b32.xlu0 %v3942_v11, %s4202_s7  ;;  %v3914_v46 = vpack.c.bf16 %v1131_v36, %v1131_v36  ;;  %v1648_v36 = vld [vmem:[#allocation2 + $0x182] sm:$0xff] }
 0x1aa   : > { %v1763_v50 = vpop.permute.xlu1 %1762 }
 0x1ab   : > { %1851 = vst.msk [vmem:[#allocation3 + $0x20] sm:$0xf] %vm1842_vm9, %v1763_v50  ;;  %v1769_v29 = vpop.permute.xlu0 %1768  ;;  %v1903_v50 = vld [vmem:[#allocation2 + $0x170] sm:$0xff] }
 0x1ac   : > { %1533 = vrot.lane.b32.xlu1 %v3941_v22, %s4202_s7  ;;  %1854 = vst.msk [vmem:[#allocation3 + $0x2c] sm:$0xf] %vm1842_vm9, %v1769_v29  ;;  %v2159_v29 = vld [vmem:[#allocation2 + $0x169] sm:$0xff] }
 0x1ad   : > { %1788 = vrot.lane.b32.xlu0 %v4066_v53, %s4203_s8  ;;  %v4041_v56 = vpack.c.bf16 %v2159_v29, %v2159_v29 }
 0x1ae   : > { %v1767_v20 = vpop.permute.xlu1 %1766 }
 0x1af   : > { %1853 = vst.msk [vmem:[#allocation3 + $0x28] sm:$0xf] %vm1842_vm9, %v1767_v20  ;;  %v2023_v40 = vpop.permute.xlu0 %2022  ;;  %v4010_v20 = vpack.c.bf16 %v1903_v50, %v1903_v50 }
 0x1b0   : > { %1786 = vrot.lane.b32.xlu1 %v4065_v58, %s4203_s8  ;;  %2110 = vst.msk [vmem:[#allocation3 + $0x24] sm:$0xf] %vm2100_vm10, %v2023_v40 }
 0x1b1   : > { %1792 = vrot.lane.b32.xlu0 %v3974_v34, %s4203_s8 }
 0x1b2   : > { %v2021_v41 = vpop.permute.xlu1 %2020 }
 0x1b3   : > { %2109 = vst.msk [vmem:[#allocation3 + $0x20] sm:$0xf] %vm2100_vm10, %v2021_v41  ;;  %v2027_v54 = vpop.permute.xlu0 %2026  ;;  %v2416_v41 = vld [vmem:[#allocation2 + $0x16a] sm:$0xff] }
 0x1b4   : > { %1790 = vrot.lane.b32.xlu1 %v3973_v6, %s4203_s8  ;;  %2112 = vst.msk [vmem:[#allocation3 + $0x2c] sm:$0xf] %vm2100_vm10, %v2027_v54 }
 0x1b5   : > { %2046 = vrot.lane.b32.xlu0 %v4004_v2, %s4204_s9 }
 0x1b6   : > { %v2025_v18 = vpop.permute.xlu1 %2024 }
 0x1b7   : > { %2111 = vst.msk [vmem:[#allocation3 + $0x28] sm:$0xf] %vm2100_vm10, %v2025_v18  ;;  %v2280_v44 = vpop.permute.xlu0 %2279  ;;  %v2417_v18 = vld [vmem:[#allocation2 + $0x172] sm:$0xff] }
 0x1b8   : > { %2044 = vrot.lane.b32.xlu1 %v4003_v17, %s4204_s9  ;;  %2367 = vst.msk [vmem:[#allocation3 + $0x24] sm:$0xf] %vm2357_vm11, %v2280_v44  ;;  %v4073_v17 = vpack.c.bf16 %v2416_v41, %v2416_v41  ;;  %v4074_v59 = vpack.c.bf16 %v2417_v18, %v2417_v18 }
 0x1b9   : > { %2050 = vrot.lane.b32.xlu0 %v4006_v21, %s4204_s9 }
 0x1ba   : > { %v2278_v27 = vpop.permute.xlu1 %2277 }
 0x1bb   : > { %2366 = vst.msk [vmem:[#allocation3 + $0x20] sm:$0xf] %vm2357_vm11, %v2278_v27  ;;  %v2284_v38 = vpop.permute.xlu0 %2283 }
 0x1bc   : > { %2048 = vrot.lane.b32.xlu1 %v4005_v33, %s4204_s9  ;;  %2369 = vst.msk [vmem:[#allocation3 + $0x2c] sm:$0xf] %vm2357_vm11, %v2284_v38  ;;  %v1134_v33 = vld [vmem:[#allocation2 + $0x180] sm:$0xff] }
 0x1bd   : > { %2303 = vrot.lane.b32.xlu0 %v3942_v11, %s4205_s10  ;;  %v3978_v11 = vpack.c.bf16 %v1645_v3, %v1645_v3 }
 0x1be   : > { %v2282_v1 = vpop.permute.xlu1 %2281 }
 0x1bf   : > { %2368 = vst.msk [vmem:[#allocation3 + $0x28] sm:$0xf] %vm2357_vm11, %v2282_v1  ;;  %v2537_v45 = vpop.permute.xlu0 %2536  ;;  %v3917_v1 = vpack.c.bf16 %v1134_v33, %v1134_v33 }
 0x1c0   : > { %2301 = vrot.lane.b32.xlu1 %v3941_v22, %s4205_s10  ;;  %2624 = vst.msk [vmem:[#allocation3 + $0x24] sm:$0xf] %vm2614_vm12, %v2537_v45  ;;  %v1135_v45 = vld [vmem:[#allocation2 + $0x188] sm:$0xff] }
 0x1c1   : > { %2307 = vrot.lane.b32.xlu0 %v4038_v52, %s4205_s10 }
 0x1c2   : > { %v2535_v19 = vpop.permute.xlu1 %2534 }
 0x1c3   : > { %2623 = vst.msk [vmem:[#allocation3 + $0x20] sm:$0xf] %vm2614_vm12, %v2535_v19  ;;  %v2541_v25 = vpop.permute.xlu0 %2540  ;;  %v1391_v19 = vld [vmem:[#allocation2 + $0x181] sm:$0xff] }
 0x1c4   : > { %2305 = vrot.lane.b32.xlu1 %v4037_v15, %s4205_s10  ;;  %2626 = vst.msk [vmem:[#allocation3 + $0x2c] sm:$0xf] %vm2614_vm12, %v2541_v25  ;;  %v3918_v25 = vpack.c.bf16 %v1135_v45, %v1135_v45 }
 0x1c5   : > { %2560 = vrot.lane.b32.xlu0 %v3974_v34, %s4206_s13 }
 0x1c6   : > { %v2539_v49 = vpop.permute.xlu1 %2538 }
 0x1c7   : > { %2625 = vst.msk [vmem:[#allocation3 + $0x28] sm:$0xf] %vm2614_vm12, %v2539_v49  ;;  %v1516_v23 = vpop.permute.xlu0 %1515  ;;  %v3949_v49 = vpack.c.bf16 %v1391_v19, %v1391_v19 }
 0x1c8   : > { %2558 = vrot.lane.b32.xlu1 %v3973_v6, %s4206_s13  ;;  %1599 = vst.msk [vmem:[#allocation3 + $0x34] sm:$0xf] %vm1585_vm8, %v1516_v23  ;;  %v2160_v6 = vld [vmem:[#allocation2 + $0x171] sm:$0xff]  ;;  %v1392_v23 = vld [vmem:[#allocation2 + $0x189] sm:$0xff] }
 0x1c9   : > { %2564 = vrot.lane.b32.xlu0 %v4070_v60, %s4206_s13  ;;  %v4042_v26 = vpack.c.bf16 %v2160_v6, %v2160_v6 }
 0x1ca   : > { %v1514_v28 = vpop.permute.xlu1 %1513  ;;  %v4178_v42 = vld [vmem:[#allocation3 + $0x20] sm:$0xff]  }
 0x1cb   : > { %1598 = vst.msk [vmem:[#allocation3 + $0x30] sm:$0xf] %vm1585_vm8, %v1514_v28  ;;  %4124 = vmatprep.mubr.msk.bf16.mxu0 %vm2760_vm6, %v4178_v42  ;;  %v1520_v16 = vpop.permute.xlu0 %1519  ;;  %v3950_v42 = vpack.c.bf16 %v1392_v23, %v1392_v23 }
 0x1cc   : > { %2562 = vrot.lane.b32.xlu1 %v4069_v55, %s4206_s13  ;;  %1601 = vst.msk [vmem:[#allocation3 + $0x3c] sm:$0xf] %vm1585_vm8, %v1520_v16  ;;  %v3981_v16 = vpack.c.bf16 %v1648_v36, %v1648_v36 }
 0x1cd   : > { %1537 = vrot.lane.b32.xlu0 %v4037_v15, %s4202_s7 }
 0x1ce   : > { %v1518_v63 = vpop.permute.xlu1 %1517  ;;  %v4179_v53 = vld [vmem:[#allocation3 + $0x28] sm:$0xff]  }
 0x1cf   : > { %1600 = vst.msk [vmem:[#allocation3 + $0x38] sm:$0xf] %vm1585_vm8, %v1518_v63  ;;  %4125 = vmatmul.mubr.msk.bf16.gmra.mxu0 %vm2760_vm6, %v4179_v53  ;;  %v1773_v35 = vpop.permute.xlu0 %1772  ;;  %v1649_v63 = vld [vmem:[#allocation2 + $0x18a] sm:$0xff] }
 0x1d0   : > { %1286 = vrot.lane.b32.xlu1 %v3914_v46, %s4201_s30  ;;  %1856 = vst.msk [vmem:[#allocation3 + $0x34] sm:$0xf] %vm1842_vm9, %v1773_v35  ;;  %v3982_v7 = vpack.c.bf16 %v1649_v63, %v1649_v63 }
 0x1d1   : > { %1541 = vrot.lane.b32.xlu0 %v3945_v47, %s4202_s7 }
 0x1d2   : > { %v1771_v24 = vpop.permute.xlu1 %1770 }
 0x1d3   : > { %1855 = vst.msk [vmem:[#allocation3 + $0x30] sm:$0xf] %vm1842_vm9, %v1771_v24  ;;  %v1777_v30 = vpop.permute.xlu0 %1776 }
 0x1d4   : > { %1539 = vrot.lane.b32.xlu1 %v4038_v52, %s4202_s7  ;;  %1858 = vst.msk [vmem:[#allocation3 + $0x3c] sm:$0xf] %vm1842_vm9, %v1777_v30 }
 0x1d5   : > { %1794 = vrot.lane.b32.xlu0 %v4069_v55, %s4203_s8 }
 0x1d6   : > { %v1775_v58 = vpop.permute.xlu1 %1774 }
 0x1d7   : > { %1857 = vst.msk [vmem:[#allocation3 + $0x38] sm:$0xf] %vm1842_vm9, %v1775_v58  ;;  %v2031_v51 = vpop.permute.xlu0 %2030 }
 0x1d8   : > { %1543 = vrot.lane.b32.xlu1 %v3946_v62, %s4202_s7  ;;  %2114 = vst.msk [vmem:[#allocation3 + $0x34] sm:$0xf] %vm2100_vm10, %v2031_v51 }
 0x1d9   : > { %1798 = vrot.lane.b32.xlu0 %v3977_v39, %s4203_s8 }
 0x1da   : > { %v2029_v0 = vpop.permute.xlu1 %2028 }
 0x1db   : > { %2113 = vst.msk [vmem:[#allocation3 + $0x30] sm:$0xf] %vm2100_vm10, %v2029_v0  ;;  %v2035_v57 = vpop.permute.xlu0 %2034 }
 0x1dc   : > { %1796 = vrot.lane.b32.xlu1 %v4070_v60, %s4203_s8  ;;  %2116 = vst.msk [vmem:[#allocation3 + $0x3c] sm:$0xf] %vm2100_vm10, %v2035_v57 }
 0x1dd   : > { %2052 = vrot.lane.b32.xlu0 %v4007_v12, %s4204_s9 }
 0x1de   : > { %v2033_v14 = vpop.permute.xlu1 %2032 }
 0x1df   : > { %2115 = vst.msk [vmem:[#allocation3 + $0x38] sm:$0xf] %vm2100_vm10, %v2033_v14  ;;  %v2288_v22 = vpop.permute.xlu0 %2287  ;;  %v2420_v14 = vld [vmem:[#allocation2 + $0x19a] sm:$0xff] }
 0x1e0   : > { %1800 = vrot.lane.b32.xlu1 %v3978_v11, %s4203_s8  ;;  %2371 = vst.msk [vmem:[#allocation3 + $0x34] sm:$0xf] %vm2357_vm11, %v2288_v22  ;;  %v4046_v22 = vpack.c.bf16 %v2164_v32, %v2164_v32  ;;  %v4077_v29 = vpack.c.bf16 %v2420_v14, %v2420_v14 }
 0x1e1   : > { %2056 = vrot.lane.b32.xlu0 %v4009_v43, %s4204_s9 }
 0x1e2   : > { %v2286_v61 = vpop.permute.xlu1 %2285 }
 0x1e3   : > { %2370 = vst.msk [vmem:[#allocation3 + $0x30] sm:$0xf] %vm2357_vm11, %v2286_v61  ;;  %v2292_v4 = vpop.permute.xlu0 %2291 }
 0x1e4   : > { %2054 = vrot.lane.b32.xlu1 %v3914_v46, %s4204_s9  ;;  %2373 = vst.msk [vmem:[#allocation3 + $0x3c] sm:$0xf] %vm2357_vm11, %v2292_v4 }
 0x1e5   : > { %2309 = vrot.lane.b32.xlu0 %v3945_v47, %s4205_s10  ;;  %v1906_v47 = vld [vmem:[#allocation2 + $0x198] sm:$0xff] }
 0x1e6   : > { %v2290_v34 = vpop.permute.xlu1 %2289  ;;  %v4013_v8 = vpack.c.bf16 %v1906_v47, %v1906_v47 }
 0x1e7   : > { %2372 = vst.msk [vmem:[#allocation3 + $0x38] sm:$0xf] %vm2357_vm11, %v2290_v34  ;;  %v2545_v40 = vpop.permute.xlu0 %2544 }
 0x1e8   : > { %2058 = vrot.lane.b32.xlu1 %v4010_v20, %s4204_s9  ;;  %2628 = vst.msk [vmem:[#allocation3 + $0x34] sm:$0xf] %vm2614_vm12, %v2545_v40 }
 0x1e9   : > { %2313 = vrot.lane.b32.xlu0 %v4041_v56, %s4205_s10 }
 0x1ea   : > { %v2543_v9 = vpop.permute.xlu1 %2542 }
 0x1eb   : > { %2627 = vst.msk [vmem:[#allocation3 + $0x30] sm:$0xf] %vm2614_vm12, %v2543_v9  ;;  %v2549_v2 = vpop.permute.xlu0 %2548 }
 0x1ec   : > { %2311 = vrot.lane.b32.xlu1 %v3946_v62, %s4205_s10  ;;  %2630 = vst.msk [vmem:[#allocation3 + $0x3c] sm:$0xf] %vm2614_vm12, %v2549_v2  ;;  %v1907_v62 = vld [vmem:[#allocation2 + $0x1a0] sm:$0xff] }
 0x1ed   : > { %2566 = vrot.lane.b32.xlu0 %v3977_v39, %s4206_s13  ;;  %v2163_v39 = vld [vmem:[#allocation2 + $0x199] sm:$0xff]  ;;  %v4014_v51 = vpack.c.bf16 %v1907_v62, %v1907_v62 }
 0x1ee   : > { %v2547_v54 = vpop.permute.xlu1 %2546  ;;  %v4045_v0 = vpack.c.bf16 %v2163_v39, %v2163_v39 }
 0x1ef   : > { %2629 = vst.msk [vmem:[#allocation3 + $0x38] sm:$0xf] %vm2614_vm12, %v2547_v54  ;;  %v1524_v10 = vpop.permute.xlu0 %1523 }
 0x1f0   : > { %2315 = vrot.lane.b32.xlu1 %v4042_v26, %s4205_s10  ;;  %1603 = vst.msk [vmem:[#allocation3 + $0x44] sm:$0xf] %vm1585_vm8, %v1524_v10 }
 0x1f1   : > { %2570 = vrot.lane.b32.xlu0 %v4073_v17, %s4206_s13 }
 0x1f2   : > { %v1522_v21 = vpop.permute.xlu1 %1521  ;;  %v4180_v44 = vld [vmem:[#allocation3 + $0x30] sm:$0xff]  }
 0x1f3   : > { %1602 = vst.msk [vmem:[#allocation3 + $0x40] sm:$0xf] %vm1585_vm8, %v1522_v21  ;;  %4128 = vmatprep.mubr.msk.bf16.mxu0 %vm2760_vm6, %v4180_v44  ;;  %v1528_v27 = vpop.permute.xlu0 %1527 }
 0x1f4   : > { %2568 = vrot.lane.b32.xlu1 %v3978_v11, %s4206_s13  ;;  %1605 = vst.msk [vmem:[#allocation3 + $0x4c] sm:$0xf] %vm1585_vm8, %v1528_v27 }
 0x1f5   : > { %1288 = vrot.lane.b32.xlu0 %v4009_v43, %s4201_s30 }
 0x1f6   : > { %v1526_v38 = vpop.permute.xlu1 %1525  ;;  %v4181_v5 = vld [vmem:[#allocation3 + $0x38] sm:$0xff]  }
 0x1f7   : > { %1604 = vst.msk [vmem:[#allocation3 + $0x48] sm:$0xf] %vm1585_vm8, %v1526_v38  ;;  %4129 = vmatmul.mubr.msk.bf16.gmra.mxu0 %vm2760_vm6, %v4181_v5  ;;  %v1781_v52 = vpop.permute.xlu0 %1780 }
 0x1f8   : > { %2572 = vrot.lane.b32.xlu1 %v4074_v59, %s4206_s13  ;;  %1860 = vst.msk [vmem:[#allocation3 + $0x44] sm:$0xf] %vm1842_vm9, %v1781_v52 }
 0x1f9   : > { %1292 = vrot.lane.b32.xlu0 %v3917_v1, %s4201_s30 }
 0x1fa   : > { %v1779_v15 = vpop.permute.xlu1 %1778 }
 0x1fb   : > { %1859 = vst.msk [vmem:[#allocation3 + $0x40] sm:$0xf] %vm1842_vm9, %v1779_v15  ;;  %v1785_v48 = vpop.permute.xlu0 %1784 }
 0x1fc   : > { %1290 = vrot.lane.b32.xlu1 %v4010_v20, %s4201_s30  ;;  %1862 = vst.msk [vmem:[#allocation3 + $0x4c] sm:$0xf] %vm1842_vm9, %v1785_v48  ;;  %v2421_v20 = vld [vmem:[#allocation2 + $0x1a2] sm:$0xff] }
 0x1fd   : > { %1545 = vrot.lane.b32.xlu0 %v4041_v56, %s4202_s7  ;;  %v4078_v40 = vpack.c.bf16 %v2421_v20, %v2421_v20 }
 0x1fe   : > { %v1783_v37 = vpop.permute.xlu1 %1782 }
 0x1ff   : > { %1861 = vst.msk [vmem:[#allocation3 + $0x48] sm:$0xf] %vm1842_vm9, %v1783_v37  ;;  %v2039_v60 = vpop.permute.xlu0 %2038 }
 0x200   : > { %1294 = vrot.lane.b32.xlu1 %v3918_v25, %s4201_s30  ;;  %2118 = vst.msk [vmem:[#allocation3 + $0x44] sm:$0xf] %vm2100_vm10, %v2039_v60 }
 0x201   : > { %1549 = vrot.lane.b32.xlu0 %v3949_v49, %s4202_s7 }
 0x202   : > { %v2037_v55 = vpop.permute.xlu1 %2036 }
 0x203   : > { %2117 = vst.msk [vmem:[#allocation3 + $0x40] sm:$0xf] %vm2100_vm10, %v2037_v55  ;;  %v2043_v28 = vpop.permute.xlu0 %2042 }
 0x204   : > { %1547 = vrot.lane.b32.xlu1 %v4042_v26, %s4202_s7  ;;  %2120 = vst.msk [vmem:[#allocation3 + $0x4c] sm:$0xf] %vm2100_vm10, %v2043_v28 }
 0x205   : > { %1802 = vrot.lane.b32.xlu0 %v4073_v17, %s4203_s8 }
 0x206   : > { %v2041_v13 = vpop.permute.xlu1 %2040 }
 0x207   : > { %2119 = vst.msk [vmem:[#allocation3 + $0x48] sm:$0xf] %vm2100_vm10, %v2041_v13  ;;  %v2296_v46 = vpop.permute.xlu0 %2295 }
 0x208   : > { %1551 = vrot.lane.b32.xlu1 %v3950_v42, %s4202_s7  ;;  %2375 = vst.msk [vmem:[#allocation3 + $0x44] sm:$0xf] %vm2357_vm11, %v2296_v46 }
 0x209   : > { %1806 = vrot.lane.b32.xlu0 %v3981_v16, %s4203_s8 }
 0x20a   : > { %v2294_v53 = vpop.permute.xlu1 %2293 }
 0x20b   : > { %2374 = vst.msk [vmem:[#allocation3 + $0x40] sm:$0xf] %vm2357_vm11, %v2294_v53  ;;  %v2300_v35 = vpop.permute.xlu0 %2299 }
 0x20c   : > { %1804 = vrot.lane.b32.xlu1 %v4074_v59, %s4203_s8  ;;  %2377 = vst.msk [vmem:[#allocation3 + $0x4c] sm:$0xf] %vm2357_vm11, %v2300_v35 }
 0x20d   : > { %2060 = vrot.lane.b32.xlu0 %v3917_v1, %s4204_s9 }
 0x20e   : > { %v2298_v24 = vpop.permute.xlu1 %2297 }
 0x20f   : > { %2376 = vst.msk [vmem:[#allocation3 + $0x48] sm:$0xf] %vm2357_vm11, %v2298_v24  ;;  %v2553_v30 = vpop.permute.xlu0 %2552 }
 0x210   : > { %1808 = vrot.lane.b32.xlu1 %v3982_v7, %s4203_s8  ;;  %2632 = vst.msk [vmem:[#allocation3 + $0x44] sm:$0xf] %vm2614_vm12, %v2553_v30  ;;  %s275_s8 = scalar_lea.vmem %s5441_s4, %s3461_s29 }
 0x211   : > { %2064 = vrot.lane.b32.xlu0 %v4013_v8, %s4204_s9 }
 0x212   : > { %v2551_v58 = vpop.permute.xlu1 %2550 }
 0x213   : > { %2631 = vst.msk [vmem:[#allocation3 + $0x40] sm:$0xf] %vm2614_vm12, %v2551_v58  ;;  %v2557_v31 = vpop.permute.xlu0 %2556 }
 0x214   : > { %2062 = vrot.lane.b32.xlu1 %v3918_v25, %s4204_s9  ;;  %2634 = vst.msk [vmem:[#allocation3 + $0x4c] sm:$0xf] %vm2614_vm12, %v2557_v31 }
 0x215   : > { %2317 = vrot.lane.b32.xlu0 %v3949_v49, %s4205_s10 }
 0x216   : > { %v2555_v3 = vpop.permute.xlu1 %2554 }
 0x217   : > { %2633 = vst.msk [vmem:[#allocation3 + $0x48] sm:$0xf] %vm2614_vm12, %v2555_v3  ;;  %v1532_v12 = vpop.permute.xlu0 %1531 }
 0x218   : > { %2066 = vrot.lane.b32.xlu1 %v4014_v51, %s4204_s9  ;;  %1607 = vst.msk [vmem:[#allocation3 + $0x54] sm:$0xf] %vm1585_vm8, %v1532_v12 }
 0x219   : > { %2321 = vrot.lane.b32.xlu0 %v4045_v0, %s4205_s10 }
 0x21a   : > { %v1530_v57 = vpop.permute.xlu1 %1529  ;;  %v4182_v11 = vld [vmem:[#allocation3 + $0x40] sm:$0xff]  }
 0x21b   : > { %1606 = vst.msk [vmem:[#allocation3 + $0x50] sm:$0xf] %vm1585_vm8, %v1530_v57  ;;  %4132 = vmatprep.mubr.msk.bf16.mxu0 %vm2760_vm6, %v4182_v11  ;;  %v1536_v43 = vpop.permute.xlu0 %1535 }
 0x21c   : > { %2319 = vrot.lane.b32.xlu1 %v3950_v42, %s4205_s10  ;;  %1609 = vst.msk [vmem:[#allocation3 + $0x5c] sm:$0xf] %vm1585_vm8, %v1536_v43 }
 0x21d   : > { %2574 = vrot.lane.b32.xlu0 %v3981_v16, %s4206_s13 }
 0x21e   : > { %v1534_v50 = vpop.permute.xlu1 %1533  ;;  %v4183_v61 = vld [vmem:[#allocation3 + $0x48] sm:$0xff]  }
 0x21f   : > { %1608 = vst.msk [vmem:[#allocation3 + $0x58] sm:$0xf] %vm1585_vm8, %v1534_v50  ;;  %4133 = vmatmul.mubr.msk.bf16.gmra.mxu0 %vm2760_vm6, %v4183_v61  ;;  %v1789_v4 = vpop.permute.xlu0 %1788 }
 0x220   : > { %2323 = vrot.lane.b32.xlu1 %v4046_v22, %s4205_s10  ;;  %1864 = vst.msk [vmem:[#allocation3 + $0x54] sm:$0xf] %vm1842_vm9, %v1789_v4 }
 0x221   : > { %2578 = vrot.lane.b32.xlu0 %v4077_v29, %s4206_s13 }
 0x222   : > { %v1787_v34 = vpop.permute.xlu1 %1786 }
 0x223   : > { %1863 = vst.msk [vmem:[#allocation3 + $0x50] sm:$0xf] %vm1842_vm9, %v1787_v34  ;;  %v1793_v56 = vpop.permute.xlu0 %1792 }
 0x224   : > { %2576 = vrot.lane.b32.xlu1 %v3982_v7, %s4206_s13  ;;  %1866 = vst.msk [vmem:[#allocation3 + $0x5c] sm:$0xf] %vm1842_vm9, %v1793_v56 }
 0x226   : > { %v1791_v6 = vpop.permute.xlu1 %1790 }
 0x227   : > { %1865 = vst.msk [vmem:[#allocation3 + $0x58] sm:$0xf] %vm1842_vm9, %v1791_v6  ;;  %v2047_v9 = vpop.permute.xlu0 %2046 }
 0x228   : > { %2580 = vrot.lane.b32.xlu1 %v4078_v40, %s4206_s13  ;;  %2122 = vst.msk [vmem:[#allocation3 + $0x54] sm:$0xf] %vm2100_vm10, %v2047_v9 }
 0x22a   : > { %v2045_v41 = vpop.permute.xlu1 %2044 }
 0x22b   : > { %2121 = vst.msk [vmem:[#allocation3 + $0x50] sm:$0xf] %vm2100_vm10, %v2045_v41  ;;  %v2051_v2 = vpop.permute.xlu0 %2050 }
 0x22c   : > { %2124 = vst.msk [vmem:[#allocation3 + $0x5c] sm:$0xf] %vm2100_vm10, %v2051_v2 }
 0x22e   : > { %v2049_v26 = vpop.permute.xlu1 %2048 }
 0x22f   : > { %2123 = vst.msk [vmem:[#allocation3 + $0x58] sm:$0xf] %vm2100_vm10, %v2049_v26  ;;  %v2304_v54 = vpop.permute.xlu0 %2303 }
 0x230   : > { %2379 = vst.msk [vmem:[#allocation3 + $0x54] sm:$0xf] %vm2357_vm11, %v2304_v54 }
 0x232   : > { %v2302_v17 = vpop.permute.xlu1 %2301 }
 0x233   : > { %2378 = vst.msk [vmem:[#allocation3 + $0x50] sm:$0xf] %vm2357_vm11, %v2302_v17  ;;  %v2308_v10 = vpop.permute.xlu0 %2307 }
 0x234   : > { %2381 = vst.msk [vmem:[#allocation3 + $0x5c] sm:$0xf] %vm2357_vm11, %v2308_v10 }
 0x236   : > { %v2306_v18 = vpop.permute.xlu1 %2305 }
 0x237   : > { %2380 = vst.msk [vmem:[#allocation3 + $0x58] sm:$0xf] %vm2357_vm11, %v2306_v18  ;;  %v2561_v21 = vpop.permute.xlu0 %2560 }
 0x238   : > { %2636 = vst.msk [vmem:[#allocation3 + $0x54] sm:$0xf] %vm2614_vm12, %v2561_v21 }
 0x23a   : > { %v2559_v44 = vpop.permute.xlu1 %2558 }
 0x23b   : > { %2635 = vst.msk [vmem:[#allocation3 + $0x50] sm:$0xf] %vm2614_vm12, %v2559_v44  ;;  %v2565_v33 = vpop.permute.xlu0 %2564 }
 0x23c   : > { %2638 = vst.msk [vmem:[#allocation3 + $0x5c] sm:$0xf] %vm2614_vm12, %v2565_v33 }
 0x23e   : > { %v2563_v27 = vpop.permute.xlu1 %2562 }
 0x23f   : > { %2637 = vst.msk [vmem:[#allocation3 + $0x58] sm:$0xf] %vm2614_vm12, %v2563_v27  ;;  %v4118_v59 = vpop.f32.mrf.mxu0  ;;  %v1538_v38 = vpop.permute.xlu0 %1537 }
 0x240   : > { %2976 = vst.msk [vmem:[%s5240_s18 + $0x10] sm:$0xff] %vm2973_vm13, %v4118_v59  ;;  %v3079_v49 = vmul.f32 %v4118_v59, %v4118_v59  ;;  %v3009_v42 = vsel %vm2973_vm13, %v4118_v59, 0.0 }
 0x241   : > { %1610 = vst.msk [vmem:[#allocation3 + $0x60] sm:$0xf] %vm1585_vm8, %v1538_v38  ;;  %v2846_v1 = vpop.f32.mrf.mxu0 }
 0x242   : > { %v1287_v5 = vpop.permute.xlu1 %1286  ;;  %v4184_v52 = vld [vmem:[#allocation3 + $0x50] sm:$0xff]   ;;  %2974 = vst.msk [vmem:[%s5240_s18] sm:$0xff] %vm2973_vm13, %v2846_v1  ;;  %v3077_v19 = vmul.f32 %v2846_v1, %v2846_v1  ;;  %v3006_v60 = vsel %vm2973_vm13, %v2846_v1, 0.0  ;;  %v3112_v35 = vsel %vm2973_vm13, %v3079_v49, 0.0 }
 0x243   : > { %1356 = vst.msk [vmem:[#allocation3 + $0x6c] sm:$0xf] %vm1328_vm7, %v1287_v5  ;;  %v4119_v45 = vpop.f32.mrf.mxu0  ;;  %4136 = vmatprep.mubr.msk.bf16.mxu0 %vm2760_vm6, %v4184_v52  ;;  %v1542_v15 = vpop.permute.xlu0 %1541 }
 0x244   : > { %2977 = vst.msk [vmem:[%s5240_s18 + $0x18] sm:$0xff] %vm2973_vm13, %v4119_v45  ;;  %v3109_v13 = vsel %vm2973_vm13, %v3077_v19, 0.0  ;;  %v3080_v16 = vmul.f32 %v4119_v45, %v4119_v45  ;;  %v3011_v7 = vsel %vm2973_vm13, %v4119_v45, 0.0 }
 0x245   : > { %1612 = vst.msk [vmem:[#allocation3 + $0x68] sm:$0xf] %vm1585_vm8, %v1542_v15  ;;  %v2849_v25 = vpop.f32.mrf.mxu0 }
 0x246   : > { %v1540_v48 = vpop.permute.xlu1 %1539  ;;  %v4185_v37 = vld [vmem:[#allocation3 + $0x58] sm:$0xff]   ;;  %2975 = vst.msk [vmem:[%s5240_s18 + $0x8] sm:$0xff] %vm2973_vm13, %v2849_v25  ;;  %v3007_v23 = vsel %vm2973_vm13, %v2849_v25, 0.0  ;;  %v3078_v55 = vmul.f32 %v2849_v25, %v2849_v25  ;;  %v3114_v62 = vsel %vm2973_vm13, %v3080_v16, 0.0 }
 0x247   : > { %1611 = vst.msk [vmem:[#allocation3 + $0x64] sm:$0xf] %vm1585_vm8, %v1540_v48  ;;  %v3008_v36 = vadd.f32 %v3007_v23, %v3006_v60  ;;  %4137 = vmatmul.mubr.msk.bf16.gmra.mxu0 %vm2760_vm6, %v4185_v37  ;;  %v1795_v28 = vpop.permute.xlu0 %1794 }
 0x248   : > { %v3110_v46 = vsel %vm2973_vm13, %v3078_v55, 0.0  ;;  %1867 = vst.msk [vmem:[#allocation3 + $0x60] sm:$0xf] %vm1842_vm9, %v1795_v28 }
 0x249   : > { %v3010_v63 = vadd.f32 %v3009_v42, %v3008_v36  ;;  %v3111_v53 = vadd.f32 %v3110_v46, %v3109_v13 }
 0x24a   : > { %v1544_v47 = vpop.permute.xlu1 %1543 }
 0x24b   : > { %1613 = vst.msk [vmem:[#allocation3 + $0x6c] sm:$0xf] %vm1585_vm8, %v1544_v47  ;;  %v3113_v24 = vadd.f32 %v3112_v35, %v3111_v53  ;;  %v1799_v8 = vpop.permute.xlu0 %1798  ;;  %v3012_v30 = vadd.f32 %v3011_v7, %v3010_v63 }
 0x24c   : > { %1869 = vst.msk [vmem:[#allocation3 + $0x68] sm:$0xf] %vm1842_vm9, %v1799_v8 }
 0x24d   : > { %v3115_v39 = vadd.f32 %v3114_v62, %v3113_v24 }
 0x24e   : > { %v1797_v58 = vpop.permute.xlu1 %1796 }
 0x24f   : > { %1868 = vst.msk [vmem:[#allocation3 + $0x64] sm:$0xf] %vm1842_vm9, %v1797_v58  ;;  %v2053_v31 = vpop.permute.xlu0 %2052 }
 0x250   : > { %2125 = vst.msk [vmem:[#allocation3 + $0x60] sm:$0xf] %vm2100_vm10, %v2053_v31 }
 0x252   : > { %v1801_v51 = vpop.permute.xlu1 %1800 }
 0x253   : > { %1870 = vst.msk [vmem:[#allocation3 + $0x6c] sm:$0xf] %vm1842_vm9, %v1801_v51  ;;  %v2057_v3 = vpop.permute.xlu0 %2056 }
 0x254   : > { %2127 = vst.msk [vmem:[#allocation3 + $0x68] sm:$0xf] %vm2100_vm10, %v2057_v3 }
 0x256   : > { %v2055_v0 = vpop.permute.xlu1 %2054 }
 0x257   : > { %2126 = vst.msk [vmem:[#allocation3 + $0x64] sm:$0xf] %vm2100_vm10, %v2055_v0  ;;  %v2310_v12 = vpop.permute.xlu0 %2309 }
 0x258   : > { %2382 = vst.msk [vmem:[#allocation3 + $0x60] sm:$0xf] %vm2357_vm11, %v2310_v12 }
 0x25a   : > { %v2059_v32 = vpop.permute.xlu1 %2058 }
 0x25b   : > { %2128 = vst.msk [vmem:[#allocation3 + $0x6c] sm:$0xf] %vm2100_vm10, %v2059_v32  ;;  %v2314_v57 = vpop.permute.xlu0 %2313 }
 0x25c   : > { %2384 = vst.msk [vmem:[#allocation3 + $0x68] sm:$0xf] %vm2357_vm11, %v2314_v57 }
 0x25e   : > { %v2312_v11 = vpop.permute.xlu1 %2311 }
 0x25f   : > { %2383 = vst.msk [vmem:[#allocation3 + $0x64] sm:$0xf] %vm2357_vm11, %v2312_v11  ;;  %v2567_v14 = vpop.permute.xlu0 %2566 }
 0x260   : > { %2639 = vst.msk [vmem:[#allocation3 + $0x60] sm:$0xf] %vm2614_vm12, %v2567_v14 }
 0x262   : > { %v2316_v43 = vpop.permute.xlu1 %2315 }
 0x263   : > { %2385 = vst.msk [vmem:[#allocation3 + $0x6c] sm:$0xf] %vm2357_vm11, %v2316_v43  ;;  %v2571_v22 = vpop.permute.xlu0 %2570 }
 0x264   : > { %2641 = vst.msk [vmem:[#allocation3 + $0x68] sm:$0xf] %vm2614_vm12, %v2571_v22 }
 0x265   : > { %v3281_v40 = vpop.f32.mrf.mxu1 }
 0x266   : > { %v2569_v50 = vpop.permute.xlu1 %2568  ;;  %v3295_v2 = vmul.f32 %v3281_v40, %v3281_v40  ;;  %3288 = vst [vmem:[%s280_s24] sm:$0xff] %v3281_v40 }
 0x267   : > { %2640 = vst.msk [vmem:[#allocation3 + $0x64] sm:$0xf] %vm2614_vm12, %v2569_v50  ;;  %v4122_v61 = vpop.f32.mrf.mxu0  ;;  %v1289_v29 = vpop.permute.xlu0 %1288 }
 0x268   : > { %2980 = vst.msk [vmem:[%s5240_s18 + $0x30] sm:$0xff] %vm2973_vm13, %v4122_v61  ;;  %v3283_v54 = vpop.f32.mrf.mxu1  ;;  %v3083_v27 = vmul.f32 %v4122_v61, %v4122_v61  ;;  %v3017_v15 = vsel %vm2973_vm13, %v4122_v61, 0.0 }
 0x269   : > { %1357 = vst.msk [vmem:[#allocation3 + $0x70] sm:$0xf] %vm1328_vm7, %v1289_v29  ;;  %v2862_v20 = vpop.f32.mrf.mxu0  ;;  %3289 = vst [vmem:[%s280_s24 + $0x8] sm:$0xff] %v3283_v54  ;;  %v3290_v44 = vadd.f32 %v3283_v54, %v3281_v40  ;;  %v3296_v33 = vmul.f32 %v3283_v54, %v3283_v54 }
 0x26a   : > { %v2573_v4 = vpop.permute.xlu1 %2572  ;;  %2978 = vst.msk [vmem:[%s5240_s18 + $0x20] sm:$0xff] %vm2973_vm13, %v2862_v20  ;;  %v3013_v34 = vsel %vm2973_vm13, %v2862_v20, 0.0  ;;  %v3081_v56 = vmul.f32 %v2862_v20, %v2862_v20  ;;  %v3285_v5 = vpop.f32.mrf.mxu1  ;;  %v3120_v55 = vsel %vm2973_vm13, %v3083_v27, 0.0 }
 0x26b   : > { %2642 = vst.msk [vmem:[#allocation3 + $0x6c] sm:$0xf] %vm2614_vm12, %v2573_v4  ;;  %v3014_v6 = vadd.f32 %v3013_v34, %v3012_v30  ;;  %v4123_v9 = vpop.f32.mrf.mxu0  ;;  %v1293_v41 = vpop.permute.xlu0 %1292  ;;  %3291 = vadd.xlane.f32.xlu0 %v3290_v44  ;;  %v3297_v45 = vadd.f32 %v3296_v33, %v3295_v2 }
 0x26c   : > { %v3116_v26 = vsel %vm2973_vm13, %v3081_v56, 0.0  ;;  %2981 = vst.msk [vmem:[%s5240_s18 + $0x38] sm:$0xff] %vm2973_vm13, %v4123_v9  ;;  %v3084_v19 = vmul.f32 %v4123_v9, %v4123_v9  ;;  %v3286_v25 = vpop.f32.mrf.mxu1  ;;  %v3019_v36 = vsel %vm2973_vm13, %v4123_v9, 0.0 }
 0x26d   : > { %1359 = vst.msk [vmem:[#allocation3 + $0x78] sm:$0xf] %vm1328_vm7, %v1293_v41  ;;  %v3117_v17 = vadd.f32 %v3116_v26, %v3115_v39  ;;  %v2865_v18 = vpop.f32.mrf.mxu0  ;;  %3298 = vadd.xlane.f32.xlu1 %v3297_v45 }
 0x26e   : > { %v1291_v10 = vpop.permute.xlu1 %1290  ;;  %v4186_v21 = vld [vmem:[#allocation3 + $0x60] sm:$0xff]   ;;  %2979 = vst.msk [vmem:[%s5240_s18 + $0x28] sm:$0xff] %vm2973_vm13, %v2865_v18  ;;  %v3015_v59 = vsel %vm2973_vm13, %v2865_v18, 0.0  ;;  %v3082_v38 = vmul.f32 %v2865_v18, %v2865_v18  ;;  %v3122_v16 = vsel %vm2973_vm13, %v3084_v19, 0.0 }
 0x26f   : > { %1358 = vst.msk [vmem:[#allocation3 + $0x74] sm:$0xf] %vm1328_vm7, %v1291_v10  ;;  %v3016_v1 = vadd.f32 %v3015_v59, %v3014_v6  ;;  %4140 = vmatprep.mubr.msk.bf16.mxu0 %vm2760_vm6, %v4186_v21  ;;  %v1546_v52 = vpop.permute.xlu0 %1545 }
 0x270   : > { %v3118_v48 = vsel %vm2973_vm13, %v3082_v38, 0.0  ;;  %1614 = vst.msk [vmem:[#allocation3 + $0x70] sm:$0xf] %vm1585_vm8, %v1546_v52 }
 0x271   : > { %v3018_v37 = vadd.f32 %v3017_v15, %v3016_v1  ;;  %v3119_v49 = vadd.f32 %v3118_v48, %v3117_v17 }
 0x272   : > { %v1295_v60 = vpop.permute.xlu1 %1294  ;;  %v4187_v23 = vld [vmem:[#allocation3 + $0x68] sm:$0xff]  }
 0x273   : > { %1360 = vst.msk [vmem:[#allocation3 + $0x7c] sm:$0xf] %vm1328_vm7, %v1295_v60  ;;  %v3121_v28 = vadd.f32 %v3120_v55, %v3119_v49  ;;  %4141 = vmatmul.mubr.msk.bf16.gmra.mxu0 %vm2760_vm6, %v4187_v23  ;;  %v1550_v42 = vpop.permute.xlu0 %1549  ;;  %v3020_v13 = vadd.f32 %v3019_v36, %v3018_v37 }
 0x274   : > { %1616 = vst.msk [vmem:[#allocation3 + $0x78] sm:$0xf] %vm1585_vm8, %v1550_v42 }
 0x275   : > { %v3123_v63 = vadd.f32 %v3122_v16, %v3121_v28 }
 0x276   : > { %v1548_v46 = vpop.permute.xlu1 %1547 }
 0x277   : > { %1615 = vst.msk [vmem:[#allocation3 + $0x74] sm:$0xf] %vm1585_vm8, %v1548_v46  ;;  %v1803_v53 = vpop.permute.xlu0 %1802 }
 0x278   : > { %1871 = vst.msk [vmem:[#allocation3 + $0x70] sm:$0xf] %vm1842_vm9, %v1803_v53 }
 0x27a   : > { %v1552_v47 = vpop.permute.xlu1 %1551 }
 0x27b   : > { %1617 = vst.msk [vmem:[#allocation3 + $0x7c] sm:$0xf] %vm1585_vm8, %v1552_v47  ;;  %v1807_v35 = vpop.permute.xlu0 %1806 }
 0x27c   : > { %1873 = vst.msk [vmem:[#allocation3 + $0x78] sm:$0xf] %vm1842_vm9, %v1807_v35 }
 0x27e   : > { %v1805_v7 = vpop.permute.xlu1 %1804 }
 0x27f   : > { %1872 = vst.msk [vmem:[#allocation3 + $0x74] sm:$0xf] %vm1842_vm9, %v1805_v7  ;;  %v2061_v24 = vpop.permute.xlu0 %2060 }
 0x280   : > { %2129 = vst.msk [vmem:[#allocation3 + $0x70] sm:$0xf] %vm2100_vm10, %v2061_v24 }
 0x282   : > { %v1809_v8 = vpop.permute.xlu1 %1808 }
 0x283   : > { %1874 = vst.msk [vmem:[#allocation3 + $0x7c] sm:$0xf] %vm1842_vm9, %v1809_v8  ;;  %v2065_v30 = vpop.permute.xlu0 %2064 }
 0x284   : > { %2131 = vst.msk [vmem:[#allocation3 + $0x78] sm:$0xf] %vm2100_vm10, %v2065_v30 }
 0x286   : > { %v2063_v62 = vpop.permute.xlu1 %2062 }
 0x287   : > { %2130 = vst.msk [vmem:[#allocation3 + $0x74] sm:$0xf] %vm2100_vm10, %v2063_v62  ;;  %v2318_v58 = vpop.permute.xlu0 %2317 }
 0x288   : > { %2386 = vst.msk [vmem:[#allocation3 + $0x70] sm:$0xf] %vm2357_vm11, %v2318_v58 }
 0x28a   : > { %v2067_v39 = vpop.permute.xlu1 %2066 }
 0x28b   : > { %2132 = vst.msk [vmem:[#allocation3 + $0x7c] sm:$0xf] %vm2100_vm10, %v2067_v39  ;;  %v2322_v31 = vpop.permute.xlu0 %2321 }
 0x28c   : > { %2388 = vst.msk [vmem:[#allocation3 + $0x78] sm:$0xf] %vm2357_vm11, %v2322_v31 }
 0x28e   : > { %v2320_v51 = vpop.permute.xlu1 %2319 }
 0x28f   : > { %2387 = vst.msk [vmem:[#allocation3 + $0x74] sm:$0xf] %vm2357_vm11, %v2320_v51  ;;  %v4126_v3 = vpop.f32.mrf.mxu0  ;;  %v2575_v0 = vpop.permute.xlu0 %2574 }
 0x290   : > { %2984 = vst.msk [vmem:[%s5240_s18 + $0x50] sm:$0xff] %vm2973_vm13, %v4126_v3  ;;  %v3087_v20 = vmul.f32 %v4126_v3, %v4126_v3  ;;  %v3025_v6 = vsel %vm2973_vm13, %v4126_v3, 0.0 }
 0x291   : > { %2643 = vst.msk [vmem:[#allocation3 + $0x70] sm:$0xf] %vm2614_vm12, %v2575_v0  ;;  %v2878_v32 = vpop.f32.mrf.mxu0 }
 0x292   : > { %v2324_v12 = vpop.permute.xlu1 %2323  ;;  %2982 = vst.msk [vmem:[%s5240_s18 + $0x40] sm:$0xff] %vm2973_vm13, %v2878_v32  ;;  %v3021_v57 = vsel %vm2973_vm13, %v2878_v32, 0.0  ;;  %v3085_v11 = vmul.f32 %v2878_v32, %v2878_v32  ;;  %v3128_v17 = vsel %vm2973_vm13, %v3087_v20, 0.0 }
 0x293   : > { %2389 = vst.msk [vmem:[#allocation3 + $0x7c] sm:$0xf] %vm2357_vm11, %v2324_v12  ;;  %v3022_v14 = vadd.f32 %v3021_v57, %v3020_v13  ;;  %v4127_v43 = vpop.f32.mrf.mxu0  ;;  %v2579_v22 = vpop.permute.xlu0 %2578 }
 0x294   : > { %v3124_v50 = vsel %vm2973_vm13, %v3085_v11, 0.0  ;;  %2985 = vst.msk [vmem:[%s5240_s18 + $0x58] sm:$0xff] %vm2973_vm13, %v4127_v43  ;;  %v3088_v9 = vmul.f32 %v4127_v43, %v4127_v43  ;;  %v3027_v10 = vsel %vm2973_vm13, %v4127_v43, 0.0 }
 0x295   : > { %2645 = vst.msk [vmem:[#allocation3 + $0x78] sm:$0xf] %vm2614_vm12, %v2579_v22  ;;  %v3125_v61 = vadd.f32 %v3124_v50, %v3123_v63  ;;  %v2881_v4 = vpop.f32.mrf.mxu0 }
 0x296   : > { %v2577_v29 = vpop.permute.xlu1 %2576  ;;  %2983 = vst.msk [vmem:[%s5240_s18 + $0x48] sm:$0xff] %vm2973_vm13, %v2881_v4  ;;  %v3023_v34 = vsel %vm2973_vm13, %v2881_v4, 0.0  ;;  %v3086_v56 = vmul.f32 %v2881_v4, %v2881_v4  ;;  %v3130_v44 = vsel %vm2973_vm13, %v3088_v9, 0.0 }
 0x297   : > { %2644 = vst.msk [vmem:[#allocation3 + $0x74] sm:$0xf] %vm2614_vm12, %v2577_v29  ;;  %v3024_v40 = vadd.f32 %v3023_v34, %v3022_v14 }
 0x298   : > { %v3126_v41 = vsel %vm2973_vm13, %v3086_v56, 0.0 }
 0x299   : > { %v3026_v2 = vadd.f32 %v3025_v6, %v3024_v40  ;;  %v3127_v26 = vadd.f32 %v3126_v41, %v3125_v61 }
 0x29a   : > { %v2581_v54 = vpop.permute.xlu1 %2580 }
 0x29b   : > { %2646 = vst.msk [vmem:[#allocation3 + $0x7c] sm:$0xf] %vm2614_vm12, %v2581_v54  ;;  %v3129_v18 = vadd.f32 %v3128_v17, %v3127_v26  ;;  %v3028_v21 = vadd.f32 %v3027_v10, %v3026_v2 }
 0x29d   : > { %v3131_v27 = vadd.f32 %v3130_v44, %v3129_v18 }
 0x29e   : > { %v4188_v33 = vld [vmem:[#allocation3 + $0x70] sm:$0xff]  }
 0x29f   : > { %4144 = vmatprep.mubr.msk.bf16.mxu0 %vm2760_vm6, %v4188_v33 }
 0x2a2   : > { %v4189_v59 = vld [vmem:[#allocation3 + $0x78] sm:$0xff]  }
 0x2a3   : > { %4145 = vmatmul.mubr.msk.bf16.gmra.mxu0 %vm2760_vm6, %v4189_v59 }
 0x2b7   : > { %v4130_v38 = vpop.f32.mrf.mxu0 }
 0x2b8   : > { %2988 = vst.msk [vmem:[%s5240_s18 + $0x70] sm:$0xff] %vm2973_vm13, %v4130_v38  ;;  %v3091_v37 = vmul.f32 %v4130_v38, %v4130_v38  ;;  %v3033_v55 = vsel %vm2973_vm13, %v4130_v38, 0.0 }
 0x2b9   : > { %v2894_v5 = vpop.f32.mrf.mxu0 }
 0x2ba   : > { %2986 = vst.msk [vmem:[%s5240_s18 + $0x60] sm:$0xff] %vm2973_vm13, %v2894_v5  ;;  %v3029_v1 = vsel %vm2973_vm13, %v2894_v5, 0.0  ;;  %v3089_v52 = vmul.f32 %v2894_v5, %v2894_v5  ;;  %v3136_v16 = vsel %vm2973_vm13, %v3091_v37, 0.0 }
 0x2bb   : > { %v3030_v45 = vadd.f32 %v3029_v1, %v3028_v21  ;;  %v4131_v15 = vpop.f32.mrf.mxu0 }
 0x2bc   : > { %v3132_v19 = vsel %vm2973_vm13, %v3089_v52, 0.0  ;;  %2989 = vst.msk [vmem:[%s5240_s18 + $0x78] sm:$0xff] %vm2973_vm13, %v4131_v15  ;;  %v3092_v36 = vmul.f32 %v4131_v15, %v4131_v15  ;;  %v3035_v46 = vsel %vm2973_vm13, %v4131_v15, 0.0 }
 0x2bd   : > { %v3133_v48 = vadd.f32 %v3132_v19, %v3131_v27  ;;  %v2897_v25 = vpop.f32.mrf.mxu0 }
 0x2be   : > { %2987 = vst.msk [vmem:[%s5240_s18 + $0x68] sm:$0xff] %vm2973_vm13, %v2897_v25  ;;  %v3031_v49 = vsel %vm2973_vm13, %v2897_v25, 0.0  ;;  %v3090_v60 = vmul.f32 %v2897_v25, %v2897_v25  ;;  %v3138_v47 = vsel %vm2973_vm13, %v3092_v36, 0.0 }
 0x2bf   : > { %v3032_v23 = vadd.f32 %v3031_v49, %v3030_v45 }
 0x2c0   : > { %v3134_v28 = vsel %vm2973_vm13, %v3090_v60, 0.0 }
 0x2c1   : > { %v3034_v42 = vadd.f32 %v3033_v55, %v3032_v23  ;;  %v3135_v13 = vadd.f32 %v3134_v28, %v3133_v48 }
 0x2c3   : > { %v3137_v63 = vadd.f32 %v3136_v16, %v3135_v13  ;;  %v3036_v53 = vadd.f32 %v3035_v46, %v3034_v42 }
 0x2c5   : > { %v3139_v35 = vadd.f32 %v3138_v47, %v3137_v63 }
 0x2df   : > { %v4134_v7 = vpop.f32.mrf.mxu0 }
 0x2e0   : > { %2992 = vst.msk [vmem:[%s5240_s18 + $0x90] sm:$0xff] %vm2973_vm13, %v4134_v7  ;;  %v3095_v3 = vmul.f32 %v4134_v7, %v4134_v7  ;;  %v3041_v57 = vsel %vm2973_vm13, %v4134_v7, 0.0 }
 0x2e1   : > { %v2910_v24 = vpop.f32.mrf.mxu0 }
 0x2e2   : > { %2990 = vst.msk [vmem:[%s5240_s18 + $0x80] sm:$0xff] %vm2973_vm13, %v2910_v24  ;;  %v3037_v8 = vsel %vm2973_vm13, %v2910_v24, 0.0  ;;  %v3093_v30 = vmul.f32 %v2910_v24, %v2910_v24  ;;  %v3144_v50 = vsel %vm2973_vm13, %v3095_v3, 0.0 }
 0x2e3   : > { %v3038_v62 = vadd.f32 %v3037_v8, %v3036_v53  ;;  %v4135_v58 = vpop.f32.mrf.mxu0 }
 0x2e4   : > { %v3140_v39 = vsel %vm2973_vm13, %v3093_v30, 0.0  ;;  %2993 = vst.msk [vmem:[%s5240_s18 + $0x98] sm:$0xff] %vm2973_vm13, %v4135_v58  ;;  %v3096_v11 = vmul.f32 %v4135_v58, %v4135_v58  ;;  %v3043_v61 = vsel %vm2973_vm13, %v4135_v58, 0.0 }
 0x2e5   : > { %v3141_v31 = vadd.f32 %v3140_v39, %v3139_v35  ;;  %v2913_v51 = vpop.f32.mrf.mxu0 }
 0x2e6   : > { %2991 = vst.msk [vmem:[%s5240_s18 + $0x88] sm:$0xff] %vm2973_vm13, %v2913_v51  ;;  %v3039_v0 = vsel %vm2973_vm13, %v2913_v51, 0.0  ;;  %v3094_v12 = vmul.f32 %v2913_v51, %v2913_v51  ;;  %v3146_v20 = vsel %vm2973_vm13, %v3096_v11, 0.0 }
 0x2e7   : > { %v3040_v32 = vadd.f32 %v3039_v0, %v3038_v62 }
 0x2e8   : > { %v3142_v14 = vsel %vm2973_vm13, %v3094_v12, 0.0 }
 0x2e9   : > { %v3042_v43 = vadd.f32 %v3041_v57, %v3040_v32  ;;  %v3143_v22 = vadd.f32 %v3142_v14, %v3141_v31 }
 0x2eb   : > { %v3145_v29 = vadd.f32 %v3144_v50, %v3143_v22  ;;  %v3044_v4 = vadd.f32 %v3043_v61, %v3042_v43 }
 0x2ed   : > { %v3147_v34 = vadd.f32 %v3146_v20, %v3145_v29 }
 0x2f4   : > { %v3292_v56 = vpop.xlane.xlu0 %3291 }
 0x2f5   : > { %3294 = vst.msk [vmem:[%s284_s28] sm:$0xff] %vm3293_vm14, %v3292_v56 }
 0x2f6   : > { %v3299_v40 = vpop.xlane.xlu1 %3298 }
 0x2f7   : > { %3301 = vst.msk [vmem:[%s284_s28] sm:$0xff] %vm3300_vm15, %v3299_v40 }
 0x307   : > { %v4138_v6 = vpop.f32.mrf.mxu0 }
 0x308   : > { %2996 = vst.msk [vmem:[%s5240_s18 + $0xb0] sm:$0xff] %vm2973_vm13, %v4138_v6  ;;  %v3099_v21 = vmul.f32 %v4138_v6, %v4138_v6  ;;  %v3049_v59 = vsel %vm2973_vm13, %v4138_v6, 0.0 }
 0x309   : > { %v2926_v9 = vpop.f32.mrf.mxu0 }
 0x30a   : > { %2994 = vst.msk [vmem:[%s5240_s18 + $0xa0] sm:$0xff] %vm2973_vm13, %v2926_v9  ;;  %v3045_v41 = vsel %vm2973_vm13, %v2926_v9, 0.0  ;;  %v3097_v2 = vmul.f32 %v2926_v9, %v2926_v9  ;;  %v3152_v45 = vsel %vm2973_vm13, %v3099_v21, 0.0 }
 0x30b   : > { %v3046_v26 = vadd.f32 %v3045_v41, %v3044_v4  ;;  %v4139_v54 = vpop.f32.mrf.mxu0 }
 0x30c   : > { %v3148_v17 = vsel %vm2973_vm13, %v3097_v2, 0.0  ;;  %2997 = vst.msk [vmem:[%s5240_s18 + $0xb8] sm:$0xff] %vm2973_vm13, %v4139_v54  ;;  %v3100_v38 = vmul.f32 %v4139_v54, %v4139_v54  ;;  %v3051_v15 = vsel %vm2973_vm13, %v4139_v54, 0.0 }
 0x30d   : > { %v3149_v10 = vadd.f32 %v3148_v17, %v3147_v34  ;;  %v2929_v18 = vpop.f32.mrf.mxu0 }
 0x30e   : > { %2995 = vst.msk [vmem:[%s5240_s18 + $0xa8] sm:$0xff] %vm2973_vm13, %v2929_v18  ;;  %v3047_v44 = vsel %vm2973_vm13, %v2929_v18, 0.0  ;;  %v3098_v33 = vmul.f32 %v2929_v18, %v2929_v18  ;;  %v3154_v25 = vsel %vm2973_vm13, %v3100_v38, 0.0 }
 0x30f   : > { %v3048_v27 = vadd.f32 %v3047_v44, %v3046_v26 }
 0x310   : > { %v3150_v5 = vsel %vm2973_vm13, %v3098_v33, 0.0 }
 0x311   : > { %v3050_v1 = vadd.f32 %v3049_v59, %v3048_v27  ;;  %v3151_v52 = vadd.f32 %v3150_v5, %v3149_v10 }
 0x313   : > { %v3153_v19 = vadd.f32 %v3152_v45, %v3151_v52  ;;  %v3052_v48 = vadd.f32 %v3051_v15, %v3050_v1 }
 0x315   : > { %v3155_v37 = vadd.f32 %v3154_v25, %v3153_v19 }
 0x333   : > { %v4142_v49 = vpop.f32.mrf.mxu0 }
 0x334   : > { %3000 = vst.msk [vmem:[%s5240_s18 + $0xd0] sm:$0xff] %vm2973_vm13, %v4142_v49  ;;  %v3103_v35 = vmul.f32 %v4142_v49, %v4142_v49  ;;  %v3057_v24 = vsel %vm2973_vm13, %v4142_v49, 0.0 }
 0x335   : > { %v2942_v60 = vpop.f32.mrf.mxu0 }
 0x336   : > { %2998 = vst.msk [vmem:[%s5240_s18 + $0xc0] sm:$0xff] %vm2973_vm13, %v2942_v60  ;;  %v3101_v36 = vmul.f32 %v2942_v60, %v2942_v60  ;;  %v3053_v28 = vsel %vm2973_vm13, %v2942_v60, 0.0  ;;  %v3160_v62 = vsel %vm2973_vm13, %v3103_v35, 0.0 }
 0x337   : > { %v4143_v23 = vpop.f32.mrf.mxu0  ;;  %v3054_v46 = vadd.f32 %v3053_v28, %v3052_v48 }
 0x338   : > { %3001 = vst.msk [vmem:[%s5240_s18 + $0xd8] sm:$0xff] %vm2973_vm13, %v4143_v23  ;;  %v3156_v13 = vsel %vm2973_vm13, %v3101_v36, 0.0  ;;  %v3104_v58 = vmul.f32 %v4143_v23, %v4143_v23  ;;  %v3059_v51 = vsel %vm2973_vm13, %v4143_v23, 0.0 }
 0x339   : > { %v2945_v55 = vpop.f32.mrf.mxu0  ;;  %v3157_v53 = vadd.f32 %v3156_v13, %v3155_v37 }
 0x33a   : > { %2999 = vst.msk [vmem:[%s5240_s18 + $0xc8] sm:$0xff] %vm2973_vm13, %v2945_v55  ;;  %v3102_v42 = vmul.f32 %v2945_v55, %v2945_v55  ;;  %v3055_v16 = vsel %vm2973_vm13, %v2945_v55, 0.0  ;;  %v3162_v57 = vsel %vm2973_vm13, %v3104_v58, 0.0 }
 0x33b   : > { %v3056_v47 = vadd.f32 %v3055_v16, %v3054_v46 }
 0x33c   : > { %v3158_v63 = vsel %vm2973_vm13, %v3102_v42, 0.0 }
 0x33d   : > { %v3159_v7 = vadd.f32 %v3158_v63, %v3157_v53  ;;  %v3058_v8 = vadd.f32 %v3057_v24, %v3056_v47 }
 0x33f   : > { %v3161_v39 = vadd.f32 %v3160_v62, %v3159_v7  ;;  %v3060_v12 = vadd.f32 %v3059_v51, %v3058_v8 }
 0x341   : > { %v3163_v43 = vadd.f32 %v3162_v57, %v3161_v39 }
 0x363   : > { %v4146_v30 = vpop.f32.mrf.mxu0 }
 0x364   : > { %3004 = vst.msk [vmem:[%s5240_s18 + $0xf0] sm:$0xff] %vm2973_vm13, %v4146_v30  ;;  %v3107_v50 = vmul.f32 %v4146_v30, %v4146_v30  ;;  %v3065_v34 = vsel %vm2973_vm13, %v4146_v30, 0.0 }
 0x365   : > { %v2958_v31 = vpop.f32.mrf.mxu0 }
 0x366   : > { %3002 = vst.msk [vmem:[%s5240_s18 + $0xe0] sm:$0xff] %vm2973_vm13, %v2958_v31  ;;  %v3061_v3 = vsel %vm2973_vm13, %v2958_v31, 0.0  ;;  %v3105_v0 = vmul.f32 %v2958_v31, %v2958_v31  ;;  %v3168_v41 = vsel %vm2973_vm13, %v3107_v50, 0.0 }
 0x367   : > { %v4147_v32 = vpop.f32.mrf.mxu0  ;;  %v3062_v14 = vadd.f32 %v3061_v3, %v3060_v12 }
 0x368   : > { %v3164_v11 = vsel %vm2973_vm13, %v3105_v0, 0.0  ;;  %3005 = vst.msk [vmem:[%s5240_s18 + $0xf8] sm:$0xff] %vm2973_vm13, %v4147_v32  ;;  %v3108_v56 = vmul.f32 %v4147_v32, %v4147_v32  ;;  %v3067_v2 = vsel %vm2973_vm13, %v4147_v32, 0.0 }
 0x369   : > { %v2961_v22 = vpop.f32.mrf.mxu0  ;;  %v3165_v4 = vadd.f32 %v3164_v11, %v3163_v43 }
 0x36a   : > { %3003 = vst.msk [vmem:[%s5240_s18 + $0xe8] sm:$0xff] %vm2973_vm13, %v2961_v22  ;;  %v3063_v61 = vsel %vm2973_vm13, %v2961_v22, 0.0  ;;  %v3106_v29 = vmul.f32 %v2961_v22, %v2961_v22  ;;  %v3170_v17 = vsel %vm2973_vm13, %v3108_v56, 0.0 }
 0x36b   : > { %v3064_v20 = vadd.f32 %v3063_v61, %v3062_v14 }
 0x36c   : > { %v3166_v40 = vsel %vm2973_vm13, %v3106_v29, 0.0 }
 0x36d   : > { %v3066_v6 = vadd.f32 %v3065_v34, %v3064_v20  ;;  %v3167_v9 = vadd.f32 %v3166_v40, %v3165_v4 }
 0x36f   : > { %v3068_v26 = vadd.f32 %v3067_v2, %v3066_v6  ;;  %v3169_v54 = vadd.f32 %v3168_v41, %v3167_v9 }
 0x371   : > { %v3069_v10 = vrot.slane %v3068_v26, 4  ;;  %v3171_v18 = vadd.f32 %v3170_v17, %v3169_v54 }
 0x373   : > { %v3070_v21 = vadd.f32 %v3069_v10, %v3068_v26  ;;  %v3172_v44 = vrot.slane %v3171_v18, 4 }
 0x375   : > { %v3071_v33 = vrot.slane %v3070_v21, 2  ;;  %v3173_v27 = vadd.f32 %v3172_v44, %v3171_v18 }
 0x377   : > { %v3072_v59 = vadd.f32 %v3071_v33, %v3070_v21  ;;  %v3174_v38 = vrot.slane %v3173_v27, 2 }
 0x379   : > { %v3073_v5 = vrot.slane %v3072_v59, 1  ;;  %v3175_v1 = vadd.f32 %v3174_v38, %v3173_v27 }
 0x37b   : > { %v3074_v52 = vadd.f32 %v3073_v5, %v3072_v59  ;;  %v3176_v45 = vrot.slane %v3175_v1, 1 }
 0x37d   : > { %3076 = vst.msk [vmem:[%s275_s8] sm:$0x1] %vm3075_vm0, %v3074_v52  ;;  %v3177_v15 = vadd.f32 %v3176_v45, %v3175_v1 }
 0x37f   : > { %3178 = vst.msk [vmem:[%s275_s8 + $0x1] sm:$0x1] %vm3075_vm0, %v3177_v15 }
 0x380 PF: > { %s17_s21 = sadd.s32 1, %s4196_s21  }
 0x381   : > { %p14_p4 = scmp.ge.s32.totalorder %s17_s21, 4  }
 0x383   :  { %16 = sbr.rel (!%p14_p4) target bundleno = 1 (0x1), region = 101 }

</bundles_post_ra>
